<compile_context>
chip_gen: v7x
topology: tpu7x:2x2x1
jax: 0.10.0
libtpu: 0.0.40
codegen_flags: <defaults>
</compile_context>

<pallas_src>
import jax
import jax.numpy as jnp
import numpy as np
from jax.experimental import pallas as pl
from jax.experimental.pallas import tpu as pltpu

HIDDEN_SIZE = 128
INPUT_SIZE = 100
NUM_LAYERS = 2
OUTPUT_SIZE = 2


def pose_lstm_kernel(x_ref,
                     wih0_ref, whh0_ref, b0_ref,
                     w1_ref, b1_ref,
                     wfc_ref, bfc_ref,
                     out_ref):
    Bs, T, I = x_ref.shape
    H = HIDDEN_SIZE
    G = 4 * H

    # ---- Hoisted layer-0 input projection for ALL timesteps: one big MXU matmul. ----
    # b0 (= b_ih_l0 + b_hh_l0) is folded in here, once, instead of every step.
    x2d = x_ref[...].reshape(Bs * T, I)
    xproj = (jnp.dot(x2d, wih0_ref[...], preferred_element_type=jnp.float32)
             + b0_ref[...]).reshape(Bs, T, G)

    whh0 = whh0_ref[...]          # (H, 4H)   layer-0 recurrent weight
    w1 = w1_ref[...]              # (2H, 4H)  fused [W_ih_l1^T ; W_hh_l1^T]
    b1 = jnp.broadcast_to(b1_ref[...], (Bs, G))   # hoisted broadcast (JAX won't CSE it)

    def activations(gates):       # PyTorch gate order: i, f, g, o
        i = jax.nn.sigmoid(gates[:, 0 * H:1 * H])
        f = jax.nn.sigmoid(gates[:, 1 * H:2 * H])
        g = jnp.tanh(gates[:, 2 * H:3 * H])
        o = jax.nn.sigmoid(gates[:, 3 * H:4 * H])
        return i, f, g, o

    h1 = jnp.zeros((Bs, H), jnp.float32)
    c1 = jnp.zeros((Bs, H), jnp.float32)
    h2 = jnp.zeros((Bs, H), jnp.float32)
    c2 = jnp.zeros((Bs, H), jnp.float32)

    # T is a trace-time constant and short here: fully unroll the recurrence so the
    # scheduler sees across timesteps and the state stays in vregs.
    # TODO(synk): for long sequences switch to lax.fori_loop with xproj staged in a VMEM
    # scratch ref (dynamic first-axis indexing) instead of full unrolling.
    for t in range(T):
        # Layer 0: only the recurrent matmul remains on the serial path.
        gates0 = xproj[:, t, :] + jnp.dot(h1, whh0, preferred_element_type=jnp.float32)
        i0, f0, g0, o0 = activations(gates0)
        c1 = f0 * c1 + i0 * g0
        h1 = o0 * jnp.tanh(c1)

        # Layer 1: both matmuls fused -> (Bs, 2H) @ (2H, 4H), K = 256 (2 x 128 lanes).
        gates1 = jnp.dot(jnp.concatenate([h1, h2], axis=-1), w1,
                         preferred_element_type=jnp.float32) + b1
        i1, f1, g1, o1 = activations(gates1)
        c2 = f1 * c2 + i1 * g1
        h2 = o1 * jnp.tanh(c2)

    # Final Linear on the last timestep's top-layer hidden state (one-time cost).
    out_ref[...] = (jnp.dot(h2, wfc_ref[...], preferred_element_type=jnp.float32)
                    + bfc_ref[...])


def pose_lstm_forward(x, params, num_shards=None):
    """x: (B, T, INPUT_SIZE) float32, PyTorch batch_first layout. Returns (B, OUTPUT_SIZE)."""
    B, T, I = x.shape
    assert I == INPUT_SIZE
    H = HIDDEN_SIZE

    if num_shards is None:
        # v7x megacore: shard the batch across TensorCores only when every shard still
        # fills the f32 sublane tile (>= 8 rows and a multiple of 8).
        num_shards = 2 if (B % 16 == 0) else 1
    assert B % num_shards == 0
    Bs = B // num_shards

    (wih0_t, whh0_t, b0, w1, b1, wfc_t, bfc) = params

    in_specs = [
        pl.BlockSpec((Bs, T, I), lambda s: (s, 0, 0)),            # x, batch-sharded, batch-first
        pl.BlockSpec((I, 4 * H), lambda s: (0, 0)),               # W_ih_l0^T (VMEM-resident)
        pl.BlockSpec((H, 4 * H), lambda s: (0, 0)),               # W_hh_l0^T
        pl.BlockSpec((1, 4 * H), lambda s: (0, 0)),               # b_ih_l0 + b_hh_l0
        pl.BlockSpec((2 * H, 4 * H), lambda s: (0, 0)),           # [W_ih_l1^T ; W_hh_l1^T]
        pl.BlockSpec((1, 4 * H), lambda s: (0, 0)),               # b_ih_l1 + b_hh_l1
        pl.BlockSpec((H, OUTPUT_SIZE), lambda s: (0, 0)),         # fc.weight^T
        pl.BlockSpec((1, OUTPUT_SIZE), lambda s: (0, 0)),         # fc.bias
    ]
    out_specs = pl.BlockSpec((Bs, OUTPUT_SIZE), lambda s: (s, 0))

    return pl.pallas_call(
        pose_lstm_kernel,
        out_shape=jax.ShapeDtypeStruct((B, OUTPUT_SIZE), jnp.float32),
        grid=(num_shards,),
        in_specs=in_specs,
        out_specs=out_specs,
        compiler_params=pltpu.CompilerParams(
            dimension_semantics=("parallel",)),
    )(x, wih0_t, whh0_t, b0, w1, b1, wfc_t, bfc)


def init_params(key):
    """Deterministic init mirroring PyTorch default uniform(-1/sqrt(H), 1/sqrt(H)) shapes,
    then transposed / combined into the kernel's layout."""
    H, I, O = HIDDEN_SIZE, INPUT_SIZE, OUTPUT_SIZE
    k_lstm = 1.0 / np.sqrt(H)
    k_fc = 1.0 / np.sqrt(H)
    keys = jax.random.split(key, 11)

    def u(k, shape, bound):
        return jax.random.uniform(k, shape, jnp.float32, minval=-bound, maxval=bound)

    # PyTorch shapes.
    w_ih_l0 = u(keys[0], (4 * H, I), k_lstm)
    w_hh_l0 = u(keys[1], (4 * H, H), k_lstm)
    b_ih_l0 = u(keys[2], (4 * H,), k_lstm)
    b_hh_l0 = u(keys[3], (4 * H,), k_lstm)
    w_ih_l1 = u(keys[4], (4 * H, H), k_lstm)
    w_hh_l1 = u(keys[5], (4 * H, H), k_lstm)
    b_ih_l1 = u(keys[6], (4 * H,), k_lstm)
    b_hh_l1 = u(keys[7], (4 * H,), k_lstm)
    w_fc = u(keys[8], (O, H), k_fc)
    b_fc = u(keys[9], (O,), k_fc)

    params = (
        w_ih_l0.T,                                           # (I, 4H)
        w_hh_l0.T,                                           # (H, 4H)
        (b_ih_l0 + b_hh_l0).reshape(1, 4 * H),               # (1, 4H)
        jnp.concatenate([w_ih_l1.T, w_hh_l1.T], axis=0),     # (2H, 4H) fused layer-1 weight
        (b_ih_l1 + b_hh_l1).reshape(1, 4 * H),               # (1, 4H)
        w_fc.T,                                              # (H, O)
        b_fc.reshape(1, O),                                  # (1, O)
    )
    return params


def pose_lstm_reference(x, params):
    """Pure-JAX reference (lax.scan) with identical semantics, for verification."""
    (wih0_t, whh0_t, b0, w1, b1, wfc_t, bfc) = params
    B, T, I = x.shape
    H = HIDDEN_SIZE
    HI = jax.lax.Precision.HIGHEST

    def acts(gates):
        i = jax.nn.sigmoid(gates[:, 0 * H:1 * H])
        f = jax.nn.sigmoid(gates[:, 1 * H:2 * H])
        g = jnp.tanh(gates[:, 2 * H:3 * H])
        o = jax.nn.sigmoid(gates[:, 3 * H:4 * H])
        return i, f, g, o

    def step(carry, x_t):
        h1, c1, h2, c2 = carry
        g0 = (jnp.dot(x_t, wih0_t, precision=HI)
              + jnp.dot(h1, whh0_t, precision=HI) + b0)
        i0, f0, gg0, o0 = acts(g0)
        c1 = f0 * c1 + i0 * gg0
        h1 = o0 * jnp.tanh(c1)

        g1 = jnp.dot(jnp.concatenate([h1, h2], axis=-1), w1, precision=HI) + b1
        i1, f1, gg1, o1 = acts(g1)
        c2 = f1 * c2 + i1 * gg1
        h2 = o1 * jnp.tanh(c2)
        return (h1, c1, h2, c2), None

    init = tuple(jnp.zeros((B, H), jnp.float32) for _ in range(4))
    (h1, c1, h2, c2), _ = jax.lax.scan(step, init, jnp.transpose(x, (1, 0, 2)))
    return jnp.dot(h2, wfc_t, precision=HI) + bfc


if __name__ == "__main__":
    B, T = 8, 8   # batch padded to the f32 sublane tile (8) per perf review
    key = jax.random.PRNGKey(0)
    k_x, k_p = jax.random.split(key)
    x = jax.random.normal(k_x, (B, T, INPUT_SIZE), dtype=jnp.float32)
    params = init_params(k_p)

    out = jax.block_until_ready(pose_lstm_forward(x, params))
    ref = jax.block_until_ready(pose_lstm_reference(x, params))

    np.testing.assert_allclose(np.asarray(out), np.asarray(ref), rtol=2e-3, atol=2e-3)
    assert out.shape == (B, OUTPUT_SIZE)
    print("KERNEL_OK")
</pallas_src>

<mosaic_0001>
module attributes {stable_mosaic.version = 11 : i64} {
  func.func @pose_lstm_kernel(%arg0: i32, %arg1: memref<8x8x100xf32, #tpu.memory_space<vmem>>, %arg2: memref<100x512xf32, #tpu.memory_space<vmem>>, %arg3: memref<128x512xf32, #tpu.memory_space<vmem>>, %arg4: memref<1x512xf32, #tpu.memory_space<vmem>>, %arg5: memref<256x512xf32, #tpu.memory_space<vmem>>, %arg6: memref<1x512xf32, #tpu.memory_space<vmem>>, %arg7: memref<128x2xf32, #tpu.memory_space<vmem>>, %arg8: memref<1x2xf32, #tpu.memory_space<vmem>>, %arg9: memref<8x2xf32, #tpu.memory_space<vmem>>) attributes {dimension_semantics = [#tpu.dimension_semantics<parallel>], iteration_bounds = array<i64: 1>, scalar_prefetch = 0 : i64, scratch_operands = 0 : i64, tpu.core_type = #tpu.core_type<tc>, window_params = [{transform_indices = @transform_0, window_bounds = array<i64: 8, 8, 100>}, {pipeline_mode = #tpu.pipeline_mode<synchronous>, transform_indices = @transform_1, window_bounds = array<i64: 100, 512>}, {pipeline_mode = #tpu.pipeline_mode<synchronous>, transform_indices = @transform_2, window_bounds = array<i64: 128, 512>}, {pipeline_mode = #tpu.pipeline_mode<synchronous>, transform_indices = @transform_3, window_bounds = array<i64: 1, 512>}, {pipeline_mode = #tpu.pipeline_mode<synchronous>, transform_indices = @transform_4, window_bounds = array<i64: 256, 512>}, {pipeline_mode = #tpu.pipeline_mode<synchronous>, transform_indices = @transform_5, window_bounds = array<i64: 1, 512>}, {pipeline_mode = #tpu.pipeline_mode<synchronous>, transform_indices = @transform_6, window_bounds = array<i64: 128, 2>}, {pipeline_mode = #tpu.pipeline_mode<synchronous>, transform_indices = @transform_7, window_bounds = array<i64: 1, 2>}, {transform_indices = @transform_8, window_bounds = array<i64: 8, 2>}]} {
    %c0 = arith.constant 0 : index
    %c0_0 = arith.constant 0 : index
    %c0_1 = arith.constant 0 : index
    %0 = vector.load %arg1[%c0, %c0_0, %c0_1] : memref<8x8x100xf32, #tpu.memory_space<vmem>>, vector<8x8x100xf32>
    %1 = vector.shape_cast %0 : vector<8x8x100xf32> to vector<64x100xf32>
    %c0_2 = arith.constant 0 : index
    %c0_3 = arith.constant 0 : index
    %2 = vector.load %arg2[%c0_2, %c0_3] : memref<100x512xf32, #tpu.memory_space<vmem>>, vector<100x512xf32>
    %cst = arith.constant dense<0.000000e+00> : vector<64x512xf32>
    %3 = tpu.matmul %1, %2, %cst {dimension_numbers = #tpu.dot_dimension_numbers<[1], [0], [0], [1], [0, 0, 1, 1], [], []>} : vector<64x100xf32>, vector<100x512xf32>, vector<64x512xf32> -> vector<64x512xf32>
    %c0_4 = arith.constant 0 : index
    %c0_5 = arith.constant 0 : index
    %4 = vector.load %arg4[%c0_4, %c0_5] : memref<1x512xf32, #tpu.memory_space<vmem>>, vector<1x512xf32>
    %5 = vector.broadcast %4 : vector<1x512xf32> to vector<64x512xf32>
    %6 = arith.addf %3, %5 : vector<64x512xf32>
    %7 = vector.shape_cast %6 : vector<64x512xf32> to vector<8x8x512xf32>
    %c0_6 = arith.constant 0 : index
    %c0_7 = arith.constant 0 : index
    %8 = vector.load %arg3[%c0_6, %c0_7] : memref<128x512xf32, #tpu.memory_space<vmem>>, vector<128x512xf32>
    %c0_8 = arith.constant 0 : index
    %c0_9 = arith.constant 0 : index
    %9 = vector.load %arg5[%c0_8, %c0_9] : memref<256x512xf32, #tpu.memory_space<vmem>>, vector<256x512xf32>
    %c0_10 = arith.constant 0 : index
    %c0_11 = arith.constant 0 : index
    %10 = vector.load %arg6[%c0_10, %c0_11] : memref<1x512xf32, #tpu.memory_space<vmem>>, vector<1x512xf32>
    %11 = vector.shape_cast %10 : vector<1x512xf32> to vector<1x512xf32>
    %12 = vector.broadcast %11 : vector<1x512xf32> to vector<8x512xf32>
    %cst_12 = arith.constant 0.000000e+00 : f32
    %13 = vector.broadcast %cst_12 : f32 to vector<8x128xf32>
    %cst_13 = arith.constant 0.000000e+00 : f32
    %14 = vector.broadcast %cst_13 : f32 to vector<8x128xf32>
    %cst_14 = arith.constant 0.000000e+00 : f32
    %15 = vector.broadcast %cst_14 : f32 to vector<8x128xf32>
    %cst_15 = arith.constant 0.000000e+00 : f32
    %16 = vector.broadcast %cst_15 : f32 to vector<8x128xf32>
    %17 = vector.extract_strided_slice %7 {offsets = [0, 0, 0], sizes = [8, 1, 512], strides = [1, 1, 1]} : vector<8x8x512xf32> to vector<8x1x512xf32>
    %18 = vector.shape_cast %17 : vector<8x1x512xf32> to vector<8x512xf32>
    %cst_16 = arith.constant dense<0.000000e+00> : vector<8x512xf32>
    %19 = tpu.matmul %13, %8, %cst_16 {dimension_numbers = #tpu.dot_dimension_numbers<[1], [0], [0], [1], [0, 0, 1, 1], [], []>} : vector<8x128xf32>, vector<128x512xf32>, vector<8x512xf32> -> vector<8x512xf32>
    %20 = arith.addf %18, %19 : vector<8x512xf32>
    %21 = vector.extract_strided_slice %20 {offsets = [0, 0], sizes = [8, 128], strides = [1, 1]} : vector<8x512xf32> to vector<8x128xf32>
    %22 = arith.negf %21 : vector<8x128xf32>
    %23 = math.exp %22 : vector<8x128xf32>
    %cst_17 = arith.constant 1.000000e+00 : f32
    %24 = vector.broadcast %cst_17 : f32 to vector<8x128xf32>
    %25 = arith.addf %24, %23 : vector<8x128xf32>
    %26 = arith.divf %24, %25 : vector<8x128xf32>
    %27 = vector.extract_strided_slice %20 {offsets = [0, 128], sizes = [8, 128], strides = [1, 1]} : vector<8x512xf32> to vector<8x128xf32>
    %28 = arith.negf %27 : vector<8x128xf32>
    %29 = math.exp %28 : vector<8x128xf32>
    %cst_18 = arith.constant 1.000000e+00 : f32
    %30 = vector.broadcast %cst_18 : f32 to vector<8x128xf32>
    %31 = arith.addf %30, %29 : vector<8x128xf32>
    %32 = arith.divf %30, %31 : vector<8x128xf32>
    %33 = vector.extract_strided_slice %20 {offsets = [0, 256], sizes = [8, 128], strides = [1, 1]} : vector<8x512xf32> to vector<8x128xf32>
    %34 = math.tanh %33 : vector<8x128xf32>
    %35 = vector.extract_strided_slice %20 {offsets = [0, 384], sizes = [8, 128], strides = [1, 1]} : vector<8x512xf32> to vector<8x128xf32>
    %36 = arith.negf %35 : vector<8x128xf32>
    %37 = math.exp %36 : vector<8x128xf32>
    %cst_19 = arith.constant 1.000000e+00 : f32
    %38 = vector.broadcast %cst_19 : f32 to vector<8x128xf32>
    %39 = arith.addf %38, %37 : vector<8x128xf32>
    %40 = arith.divf %38, %39 : vector<8x128xf32>
    %41 = arith.mulf %32, %14 : vector<8x128xf32>
    %42 = arith.mulf %26, %34 : vector<8x128xf32>
    %43 = arith.addf %41, %42 : vector<8x128xf32>
    %44 = math.tanh %43 : vector<8x128xf32>
    %45 = arith.mulf %40, %44 : vector<8x128xf32>
    %46 = tpu.concatenate %45, %15 in 1 : vector<8x128xf32>, vector<8x128xf32> -> vector<8x256xf32>
    %cst_20 = arith.constant dense<0.000000e+00> : vector<8x512xf32>
    %47 = tpu.matmul %46, %9, %cst_20 {dimension_numbers = #tpu.dot_dimension_numbers<[1], [0], [0], [1], [0, 0, 1, 1], [], []>} : vector<8x256xf32>, vector<256x512xf32>, vector<8x512xf32> -> vector<8x512xf32>
    %48 = arith.addf %47, %12 : vector<8x512xf32>
    %49 = vector.extract_strided_slice %48 {offsets = [0, 0], sizes = [8, 128], strides = [1, 1]} : vector<8x512xf32> to vector<8x128xf32>
    %50 = arith.negf %49 : vector<8x128xf32>
    %51 = math.exp %50 : vector<8x128xf32>
    %cst_21 = arith.constant 1.000000e+00 : f32
    %52 = vector.broadcast %cst_21 : f32 to vector<8x128xf32>
    %53 = arith.addf %52, %51 : vector<8x128xf32>
    %54 = arith.divf %52, %53 : vector<8x128xf32>
    %55 = vector.extract_strided_slice %48 {offsets = [0, 128], sizes = [8, 128], strides = [1, 1]} : vector<8x512xf32> to vector<8x128xf32>
    %56 = arith.negf %55 : vector<8x128xf32>
    %57 = math.exp %56 : vector<8x128xf32>
    %cst_22 = arith.constant 1.000000e+00 : f32
    %58 = vector.broadcast %cst_22 : f32 to vector<8x128xf32>
    %59 = arith.addf %58, %57 : vector<8x128xf32>
    %60 = arith.divf %58, %59 : vector<8x128xf32>
    %61 = vector.extract_strided_slice %48 {offsets = [0, 256], sizes = [8, 128], strides = [1, 1]} : vector<8x512xf32> to vector<8x128xf32>
    %62 = math.tanh %61 : vector<8x128xf32>
    %63 = vector.extract_strided_slice %48 {offsets = [0, 384], sizes = [8, 128], strides = [1, 1]} : vector<8x512xf32> to vector<8x128xf32>
    %64 = arith.negf %63 : vector<8x128xf32>
    %65 = math.exp %64 : vector<8x128xf32>
    %cst_23 = arith.constant 1.000000e+00 : f32
    %66 = vector.broadcast %cst_23 : f32 to vector<8x128xf32>
    %67 = arith.addf %66, %65 : vector<8x128xf32>
    %68 = arith.divf %66, %67 : vector<8x128xf32>
    %69 = arith.mulf %60, %16 : vector<8x128xf32>
    %70 = arith.mulf %54, %62 : vector<8x128xf32>
    %71 = arith.addf %69, %70 : vector<8x128xf32>
    %72 = math.tanh %71 : vector<8x128xf32>
    %73 = arith.mulf %68, %72 : vector<8x128xf32>
    %74 = vector.extract_strided_slice %7 {offsets = [0, 1, 0], sizes = [8, 1, 512], strides = [1, 1, 1]} : vector<8x8x512xf32> to vector<8x1x512xf32>
    %75 = vector.shape_cast %74 : vector<8x1x512xf32> to vector<8x512xf32>
    %cst_24 = arith.constant dense<0.000000e+00> : vector<8x512xf32>
    %76 = tpu.matmul %45, %8, %cst_24 {dimension_numbers = #tpu.dot_dimension_numbers<[1], [0], [0], [1], [0, 0, 1, 1], [], []>} : vector<8x128xf32>, vector<128x512xf32>, vector<8x512xf32> -> vector<8x512xf32>
    %77 = arith.addf %75, %76 : vector<8x512xf32>
    %78 = vector.extract_strided_slice %77 {offsets = [0, 0], sizes = [8, 128], strides = [1, 1]} : vector<8x512xf32> to vector<8x128xf32>
    %79 = arith.negf %78 : vector<8x128xf32>
    %80 = math.exp %79 : vector<8x128xf32>
    %cst_25 = arith.constant 1.000000e+00 : f32
    %81 = vector.broadcast %cst_25 : f32 to vector<8x128xf32>
    %82 = arith.addf %81, %80 : vector<8x128xf32>
    %83 = arith.divf %81, %82 : vector<8x128xf32>
    %84 = vector.extract_strided_slice %77 {offsets = [0, 128], sizes = [8, 128], strides = [1, 1]} : vector<8x512xf32> to vector<8x128xf32>
    %85 = arith.negf %84 : vector<8x128xf32>
    %86 = math.exp %85 : vector<8x128xf32>
    %cst_26 = arith.constant 1.000000e+00 : f32
    %87 = vector.broadcast %cst_26 : f32 to vector<8x128xf32>
    %88 = arith.addf %87, %86 : vector<8x128xf32>
    %89 = arith.divf %87, %88 : vector<8x128xf32>
    %90 = vector.extract_strided_slice %77 {offsets = [0, 256], sizes = [8, 128], strides = [1, 1]} : vector<8x512xf32> to vector<8x128xf32>
    %91 = math.tanh %90 : vector<8x128xf32>
    %92 = vector.extract_strided_slice %77 {offsets = [0, 384], sizes = [8, 128], strides = [1, 1]} : vector<8x512xf32> to vector<8x128xf32>
    %93 = arith.negf %92 : vector<8x128xf32>
    %94 = math.exp %93 : vector<8x128xf32>
    %cst_27 = arith.constant 1.000000e+00 : f32
    %95 = vector.broadcast %cst_27 : f32 to vector<8x128xf32>
    %96 = arith.addf %95, %94 : vector<8x128xf32>
    %97 = arith.divf %95, %96 : vector<8x128xf32>
    %98 = arith.mulf %89, %43 : vector<8x128xf32>
    %99 = arith.mulf %83, %91 : vector<8x128xf32>
    %100 = arith.addf %98, %99 : vector<8x128xf32>
    %101 = math.tanh %100 : vector<8x128xf32>
    %102 = arith.mulf %97, %101 : vector<8x128xf32>
    %103 = tpu.concatenate %102, %73 in 1 : vector<8x128xf32>, vector<8x128xf32> -> vector<8x256xf32>
    %cst_28 = arith.constant dense<0.000000e+00> : vector<8x512xf32>
    %104 = tpu.matmul %103, %9, %cst_28 {dimension_numbers = #tpu.dot_dimension_numbers<[1], [0], [0], [1], [0, 0, 1, 1], [], []>} : vector<8x256xf32>, vector<256x512xf32>, vector<8x512xf32> -> vector<8x512xf32>
    %105 = arith.addf %104, %12 : vector<8x512xf32>
    %106 = vector.extract_strided_slice %105 {offsets = [0, 0], sizes = [8, 128], strides = [1, 1]} : vector<8x512xf32> to vector<8x128xf32>
    %107 = arith.negf %106 : vector<8x128xf32>
    %108 = math.exp %107 : vector<8x128xf32>
    %cst_29 = arith.constant 1.000000e+00 : f32
    %109 = vector.broadcast %cst_29 : f32 to vector<8x128xf32>
    %110 = arith.addf %109, %108 : vector<8x128xf32>
    %111 = arith.divf %109, %110 : vector<8x128xf32>
    %112 = vector.extract_strided_slice %105 {offsets = [0, 128], sizes = [8, 128], strides = [1, 1]} : vector<8x512xf32> to vector<8x128xf32>
    %113 = arith.negf %112 : vector<8x128xf32>
    %114 = math.exp %113 : vector<8x128xf32>
    %cst_30 = arith.constant 1.000000e+00 : f32
    %115 = vector.broadcast %cst_30 : f32 to vector<8x128xf32>
    %116 = arith.addf %115, %114 : vector<8x128xf32>
    %117 = arith.divf %115, %116 : vector<8x128xf32>
    %118 = vector.extract_strided_slice %105 {offsets = [0, 256], sizes = [8, 128], strides = [1, 1]} : vector<8x512xf32> to vector<8x128xf32>
    %119 = math.tanh %118 : vector<8x128xf32>
    %120 = vector.extract_strided_slice %105 {offsets = [0, 384], sizes = [8, 128], strides = [1, 1]} : vector<8x512xf32> to vector<8x128xf32>
    %121 = arith.negf %120 : vector<8x128xf32>
    %122 = math.exp %121 : vector<8x128xf32>
    %cst_31 = arith.constant 1.000000e+00 : f32
    %123 = vector.broadcast %cst_31 : f32 to vector<8x128xf32>
    %124 = arith.addf %123, %122 : vector<8x128xf32>
    %125 = arith.divf %123, %124 : vector<8x128xf32>
    %126 = arith.mulf %117, %71 : vector<8x128xf32>
    %127 = arith.mulf %111, %119 : vector<8x128xf32>
    %128 = arith.addf %126, %127 : vector<8x128xf32>
    %129 = math.tanh %128 : vector<8x128xf32>
    %130 = arith.mulf %125, %129 : vector<8x128xf32>
    %131 = vector.extract_strided_slice %7 {offsets = [0, 2, 0], sizes = [8, 1, 512], strides = [1, 1, 1]} : vector<8x8x512xf32> to vector<8x1x512xf32>
    %132 = vector.shape_cast %131 : vector<8x1x512xf32> to vector<8x512xf32>
    %cst_32 = arith.constant dense<0.000000e+00> : vector<8x512xf32>
    %133 = tpu.matmul %102, %8, %cst_32 {dimension_numbers = #tpu.dot_dimension_numbers<[1], [0], [0], [1], [0, 0, 1, 1], [], []>} : vector<8x128xf32>, vector<128x512xf32>, vector<8x512xf32> -> vector<8x512xf32>
    %134 = arith.addf %132, %133 : vector<8x512xf32>
    %135 = vector.extract_strided_slice %134 {offsets = [0, 0], sizes = [8, 128], strides = [1, 1]} : vector<8x512xf32> to vector<8x128xf32>
    %136 = arith.negf %135 : vector<8x128xf32>
    %137 = math.exp %136 : vector<8x128xf32>
    %cst_33 = arith.constant 1.000000e+00 : f32
    %138 = vector.broadcast %cst_33 : f32 to vector<8x128xf32>
    %139 = arith.addf %138, %137 : vector<8x128xf32>
    %140 = arith.divf %138, %139 : vector<8x128xf32>
    %141 = vector.extract_strided_slice %134 {offsets = [0, 128], sizes = [8, 128], strides = [1, 1]} : vector<8x512xf32> to vector<8x128xf32>
    %142 = arith.negf %141 : vector<8x128xf32>
    %143 = math.exp %142 : vector<8x128xf32>
    %cst_34 = arith.constant 1.000000e+00 : f32
    %144 = vector.broadcast %cst_34 : f32 to vector<8x128xf32>
    %145 = arith.addf %144, %143 : vector<8x128xf32>
    %146 = arith.divf %144, %145 : vector<8x128xf32>
    %147 = vector.extract_strided_slice %134 {offsets = [0, 256], sizes = [8, 128], strides = [1, 1]} : vector<8x512xf32> to vector<8x128xf32>
    %148 = math.tanh %147 : vector<8x128xf32>
    %149 = vector.extract_strided_slice %134 {offsets = [0, 384], sizes = [8, 128], strides = [1, 1]} : vector<8x512xf32> to vector<8x128xf32>
    %150 = arith.negf %149 : vector<8x128xf32>
    %151 = math.exp %150 : vector<8x128xf32>
    %cst_35 = arith.constant 1.000000e+00 : f32
    %152 = vector.broadcast %cst_35 : f32 to vector<8x128xf32>
    %153 = arith.addf %152, %151 : vector<8x128xf32>
    %154 = arith.divf %152, %153 : vector<8x128xf32>
    %155 = arith.mulf %146, %100 : vector<8x128xf32>
    %156 = arith.mulf %140, %148 : vector<8x128xf32>
    %157 = arith.addf %155, %156 : vector<8x128xf32>
    %158 = math.tanh %157 : vector<8x128xf32>
    %159 = arith.mulf %154, %158 : vector<8x128xf32>
    %160 = tpu.concatenate %159, %130 in 1 : vector<8x128xf32>, vector<8x128xf32> -> vector<8x256xf32>
    %cst_36 = arith.constant dense<0.000000e+00> : vector<8x512xf32>
    %161 = tpu.matmul %160, %9, %cst_36 {dimension_numbers = #tpu.dot_dimension_numbers<[1], [0], [0], [1], [0, 0, 1, 1], [], []>} : vector<8x256xf32>, vector<256x512xf32>, vector<8x512xf32> -> vector<8x512xf32>
    %162 = arith.addf %161, %12 : vector<8x512xf32>
    %163 = vector.extract_strided_slice %162 {offsets = [0, 0], sizes = [8, 128], strides = [1, 1]} : vector<8x512xf32> to vector<8x128xf32>
    %164 = arith.negf %163 : vector<8x128xf32>
    %165 = math.exp %164 : vector<8x128xf32>
    %cst_37 = arith.constant 1.000000e+00 : f32
    %166 = vector.broadcast %cst_37 : f32 to vector<8x128xf32>
    %167 = arith.addf %166, %165 : vector<8x128xf32>
    %168 = arith.divf %166, %167 : vector<8x128xf32>
    %169 = vector.extract_strided_slice %162 {offsets = [0, 128], sizes = [8, 128], strides = [1, 1]} : vector<8x512xf32> to vector<8x128xf32>
    %170 = arith.negf %169 : vector<8x128xf32>
    %171 = math.exp %170 : vector<8x128xf32>
    %cst_38 = arith.constant 1.000000e+00 : f32
    %172 = vector.broadcast %cst_38 : f32 to vector<8x128xf32>
    %173 = arith.addf %172, %171 : vector<8x128xf32>
    %174 = arith.divf %172, %173 : vector<8x128xf32>
    %175 = vector.extract_strided_slice %162 {offsets = [0, 256], sizes = [8, 128], strides = [1, 1]} : vector<8x512xf32> to vector<8x128xf32>
    %176 = math.tanh %175 : vector<8x128xf32>
    %177 = vector.extract_strided_slice %162 {offsets = [0, 384], sizes = [8, 128], strides = [1, 1]} : vector<8x512xf32> to vector<8x128xf32>
    %178 = arith.negf %177 : vector<8x128xf32>
    %179 = math.exp %178 : vector<8x128xf32>
    %cst_39 = arith.constant 1.000000e+00 : f32
    %180 = vector.broadcast %cst_39 : f32 to vector<8x128xf32>
    %181 = arith.addf %180, %179 : vector<8x128xf32>
    %182 = arith.divf %180, %181 : vector<8x128xf32>
    %183 = arith.mulf %174, %128 : vector<8x128xf32>
    %184 = arith.mulf %168, %176 : vector<8x128xf32>
    %185 = arith.addf %183, %184 : vector<8x128xf32>
    %186 = math.tanh %185 : vector<8x128xf32>
    %187 = arith.mulf %182, %186 : vector<8x128xf32>
    %188 = vector.extract_strided_slice %7 {offsets = [0, 3, 0], sizes = [8, 1, 512], strides = [1, 1, 1]} : vector<8x8x512xf32> to vector<8x1x512xf32>
    %189 = vector.shape_cast %188 : vector<8x1x512xf32> to vector<8x512xf32>
    %cst_40 = arith.constant dense<0.000000e+00> : vector<8x512xf32>
    %190 = tpu.matmul %159, %8, %cst_40 {dimension_numbers = #tpu.dot_dimension_numbers<[1], [0], [0], [1], [0, 0, 1, 1], [], []>} : vector<8x128xf32>, vector<128x512xf32>, vector<8x512xf32> -> vector<8x512xf32>
    %191 = arith.addf %189, %190 : vector<8x512xf32>
    %192 = vector.extract_strided_slice %191 {offsets = [0, 0], sizes = [8, 128], strides = [1, 1]} : vector<8x512xf32> to vector<8x128xf32>
    %193 = arith.negf %192 : vector<8x128xf32>
    %194 = math.exp %193 : vector<8x128xf32>
    %cst_41 = arith.constant 1.000000e+00 : f32
    %195 = vector.broadcast %cst_41 : f32 to vector<8x128xf32>
    %196 = arith.addf %195, %194 : vector<8x128xf32>
    %197 = arith.divf %195, %196 : vector<8x128xf32>
    %198 = vector.extract_strided_slice %191 {offsets = [0, 128], sizes = [8, 128], strides = [1, 1]} : vector<8x512xf32> to vector<8x128xf32>
    %199 = arith.negf %198 : vector<8x128xf32>
    %200 = math.exp %199 : vector<8x128xf32>
    %cst_42 = arith.constant 1.000000e+00 : f32
    %201 = vector.broadcast %cst_42 : f32 to vector<8x128xf32>
    %202 = arith.addf %201, %200 : vector<8x128xf32>
    %203 = arith.divf %201, %202 : vector<8x128xf32>
    %204 = vector.extract_strided_slice %191 {offsets = [0, 256], sizes = [8, 128], strides = [1, 1]} : vector<8x512xf32> to vector<8x128xf32>
    %205 = math.tanh %204 : vector<8x128xf32>
    %206 = vector.extract_strided_slice %191 {offsets = [0, 384], sizes = [8, 128], strides = [1, 1]} : vector<8x512xf32> to vector<8x128xf32>
    %207 = arith.negf %206 : vector<8x128xf32>
    %208 = math.exp %207 : vector<8x128xf32>
    %cst_43 = arith.constant 1.000000e+00 : f32
    %209 = vector.broadcast %cst_43 : f32 to vector<8x128xf32>
    %210 = arith.addf %209, %208 : vector<8x128xf32>
    %211 = arith.divf %209, %210 : vector<8x128xf32>
    %212 = arith.mulf %203, %157 : vector<8x128xf32>
    %213 = arith.mulf %197, %205 : vector<8x128xf32>
    %214 = arith.addf %212, %213 : vector<8x128xf32>
    %215 = math.tanh %214 : vector<8x128xf32>
    %216 = arith.mulf %211, %215 : vector<8x128xf32>
    %217 = tpu.concatenate %216, %187 in 1 : vector<8x128xf32>, vector<8x128xf32> -> vector<8x256xf32>
    %cst_44 = arith.constant dense<0.000000e+00> : vector<8x512xf32>
    %218 = tpu.matmul %217, %9, %cst_44 {dimension_numbers = #tpu.dot_dimension_numbers<[1], [0], [0], [1], [0, 0, 1, 1], [], []>} : vector<8x256xf32>, vector<256x512xf32>, vector<8x512xf32> -> vector<8x512xf32>
    %219 = arith.addf %218, %12 : vector<8x512xf32>
    %220 = vector.extract_strided_slice %219 {offsets = [0, 0], sizes = [8, 128], strides = [1, 1]} : vector<8x512xf32> to vector<8x128xf32>
    %221 = arith.negf %220 : vector<8x128xf32>
    %222 = math.exp %221 : vector<8x128xf32>
    %cst_45 = arith.constant 1.000000e+00 : f32
    %223 = vector.broadcast %cst_45 : f32 to vector<8x128xf32>
    %224 = arith.addf %223, %222 : vector<8x128xf32>
    %225 = arith.divf %223, %224 : vector<8x128xf32>
    %226 = vector.extract_strided_slice %219 {offsets = [0, 128], sizes = [8, 128], strides = [1, 1]} : vector<8x512xf32> to vector<8x128xf32>
    %227 = arith.negf %226 : vector<8x128xf32>
    %228 = math.exp %227 : vector<8x128xf32>
    %cst_46 = arith.constant 1.000000e+00 : f32
    %229 = vector.broadcast %cst_46 : f32 to vector<8x128xf32>
    %230 = arith.addf %229, %228 : vector<8x128xf32>
    %231 = arith.divf %229, %230 : vector<8x128xf32>
    %232 = vector.extract_strided_slice %219 {offsets = [0, 256], sizes = [8, 128], strides = [1, 1]} : vector<8x512xf32> to vector<8x128xf32>
    %233 = math.tanh %232 : vector<8x128xf32>
    %234 = vector.extract_strided_slice %219 {offsets = [0, 384], sizes = [8, 128], strides = [1, 1]} : vector<8x512xf32> to vector<8x128xf32>
    %235 = arith.negf %234 : vector<8x128xf32>
    %236 = math.exp %235 : vector<8x128xf32>
    %cst_47 = arith.constant 1.000000e+00 : f32
    %237 = vector.broadcast %cst_47 : f32 to vector<8x128xf32>
    %238 = arith.addf %237, %236 : vector<8x128xf32>
    %239 = arith.divf %237, %238 : vector<8x128xf32>
    %240 = arith.mulf %231, %185 : vector<8x128xf32>
    %241 = arith.mulf %225, %233 : vector<8x128xf32>
    %242 = arith.addf %240, %241 : vector<8x128xf32>
    %243 = math.tanh %242 : vector<8x128xf32>
    %244 = arith.mulf %239, %243 : vector<8x128xf32>
    %245 = vector.extract_strided_slice %7 {offsets = [0, 4, 0], sizes = [8, 1, 512], strides = [1, 1, 1]} : vector<8x8x512xf32> to vector<8x1x512xf32>
    %246 = vector.shape_cast %245 : vector<8x1x512xf32> to vector<8x512xf32>
    %cst_48 = arith.constant dense<0.000000e+00> : vector<8x512xf32>
    %247 = tpu.matmul %216, %8, %cst_48 {dimension_numbers = #tpu.dot_dimension_numbers<[1], [0], [0], [1], [0, 0, 1, 1], [], []>} : vector<8x128xf32>, vector<128x512xf32>, vector<8x512xf32> -> vector<8x512xf32>
    %248 = arith.addf %246, %247 : vector<8x512xf32>
    %249 = vector.extract_strided_slice %248 {offsets = [0, 0], sizes = [8, 128], strides = [1, 1]} : vector<8x512xf32> to vector<8x128xf32>
    %250 = arith.negf %249 : vector<8x128xf32>
    %251 = math.exp %250 : vector<8x128xf32>
    %cst_49 = arith.constant 1.000000e+00 : f32
    %252 = vector.broadcast %cst_49 : f32 to vector<8x128xf32>
    %253 = arith.addf %252, %251 : vector<8x128xf32>
    %254 = arith.divf %252, %253 : vector<8x128xf32>
    %255 = vector.extract_strided_slice %248 {offsets = [0, 128], sizes = [8, 128], strides = [1, 1]} : vector<8x512xf32> to vector<8x128xf32>
    %256 = arith.negf %255 : vector<8x128xf32>
    %257 = math.exp %256 : vector<8x128xf32>
    %cst_50 = arith.constant 1.000000e+00 : f32
    %258 = vector.broadcast %cst_50 : f32 to vector<8x128xf32>
    %259 = arith.addf %258, %257 : vector<8x128xf32>
    %260 = arith.divf %258, %259 : vector<8x128xf32>
    %261 = vector.extract_strided_slice %248 {offsets = [0, 256], sizes = [8, 128], strides = [1, 1]} : vector<8x512xf32> to vector<8x128xf32>
    %262 = math.tanh %261 : vector<8x128xf32>
    %263 = vector.extract_strided_slice %248 {offsets = [0, 384], sizes = [8, 128], strides = [1, 1]} : vector<8x512xf32> to vector<8x128xf32>
    %264 = arith.negf %263 : vector<8x128xf32>
    %265 = math.exp %264 : vector<8x128xf32>
    %cst_51 = arith.constant 1.000000e+00 : f32
    %266 = vector.broadcast %cst_51 : f32 to vector<8x128xf32>
    %267 = arith.addf %266, %265 : vector<8x128xf32>
    %268 = arith.divf %266, %267 : vector<8x128xf32>
    %269 = arith.mulf %260, %214 : vector<8x128xf32>
    %270 = arith.mulf %254, %262 : vector<8x128xf32>
    %271 = arith.addf %269, %270 : vector<8x128xf32>
    %272 = math.tanh %271 : vector<8x128xf32>
    %273 = arith.mulf %268, %272 : vector<8x128xf32>
    %274 = tpu.concatenate %273, %244 in 1 : vector<8x128xf32>, vector<8x128xf32> -> vector<8x256xf32>
    %cst_52 = arith.constant dense<0.000000e+00> : vector<8x512xf32>
    %275 = tpu.matmul %274, %9, %cst_52 {dimension_numbers = #tpu.dot_dimension_numbers<[1], [0], [0], [1], [0, 0, 1, 1], [], []>} : vector<8x256xf32>, vector<256x512xf32>, vector<8x512xf32> -> vector<8x512xf32>
    %276 = arith.addf %275, %12 : vector<8x512xf32>
    %277 = vector.extract_strided_slice %276 {offsets = [0, 0], sizes = [8, 128], strides = [1, 1]} : vector<8x512xf32> to vector<8x128xf32>
    %278 = arith.negf %277 : vector<8x128xf32>
    %279 = math.exp %278 : vector<8x128xf32>
    %cst_53 = arith.constant 1.000000e+00 : f32
    %280 = vector.broadcast %cst_53 : f32 to vector<8x128xf32>
    %281 = arith.addf %280, %279 : vector<8x128xf32>
    %282 = arith.divf %280, %281 : vector<8x128xf32>
    %283 = vector.extract_strided_slice %276 {offsets = [0, 128], sizes = [8, 128], strides = [1, 1]} : vector<8x512xf32> to vector<8x128xf32>
    %284 = arith.negf %283 : vector<8x128xf32>
    %285 = math.exp %284 : vector<8x128xf32>
    %cst_54 = arith.constant 1.000000e+00 : f32
    %286 = vector.broadcast %cst_54 : f32 to vector<8x128xf32>
    %287 = arith.addf %286, %285 : vector<8x128xf32>
    %288 = arith.divf %286, %287 : vector<8x128xf32>
    %289 = vector.extract_strided_slice %276 {offsets = [0, 256], sizes = [8, 128], strides = [1, 1]} : vector<8x512xf32> to vector<8x128xf32>
    %290 = math.tanh %289 : vector<8x128xf32>
    %291 = vector.extract_strided_slice %276 {offsets = [0, 384], sizes = [8, 128], strides = [1, 1]} : vector<8x512xf32> to vector<8x128xf32>
    %292 = arith.negf %291 : vector<8x128xf32>
    %293 = math.exp %292 : vector<8x128xf32>
    %cst_55 = arith.constant 1.000000e+00 : f32
    %294 = vector.broadcast %cst_55 : f32 to vector<8x128xf32>
    %295 = arith.addf %294, %293 : vector<8x128xf32>
    %296 = arith.divf %294, %295 : vector<8x128xf32>
    %297 = arith.mulf %288, %242 : vector<8x128xf32>
    %298 = arith.mulf %282, %290 : vector<8x128xf32>
    %299 = arith.addf %297, %298 : vector<8x128xf32>
    %300 = math.tanh %299 : vector<8x128xf32>
    %301 = arith.mulf %296, %300 : vector<8x128xf32>
    %302 = vector.extract_strided_slice %7 {offsets = [0, 5, 0], sizes = [8, 1, 512], strides = [1, 1, 1]} : vector<8x8x512xf32> to vector<8x1x512xf32>
    %303 = vector.shape_cast %302 : vector<8x1x512xf32> to vector<8x512xf32>
    %cst_56 = arith.constant dense<0.000000e+00> : vector<8x512xf32>
    %304 = tpu.matmul %273, %8, %cst_56 {dimension_numbers = #tpu.dot_dimension_numbers<[1], [0], [0], [1], [0, 0, 1, 1], [], []>} : vector<8x128xf32>, vector<128x512xf32>, vector<8x512xf32> -> vector<8x512xf32>
    %305 = arith.addf %303, %304 : vector<8x512xf32>
    %306 = vector.extract_strided_slice %305 {offsets = [0, 0], sizes = [8, 128], strides = [1, 1]} : vector<8x512xf32> to vector<8x128xf32>
    %307 = arith.negf %306 : vector<8x128xf32>
    %308 = math.exp %307 : vector<8x128xf32>
    %cst_57 = arith.constant 1.000000e+00 : f32
    %309 = vector.broadcast %cst_57 : f32 to vector<8x128xf32>
    %310 = arith.addf %309, %308 : vector<8x128xf32>
    %311 = arith.divf %309, %310 : vector<8x128xf32>
    %312 = vector.extract_strided_slice %305 {offsets = [0, 128], sizes = [8, 128], strides = [1, 1]} : vector<8x512xf32> to vector<8x128xf32>
    %313 = arith.negf %312 : vector<8x128xf32>
    %314 = math.exp %313 : vector<8x128xf32>
    %cst_58 = arith.constant 1.000000e+00 : f32
    %315 = vector.broadcast %cst_58 : f32 to vector<8x128xf32>
    %316 = arith.addf %315, %314 : vector<8x128xf32>
    %317 = arith.divf %315, %316 : vector<8x128xf32>
    %318 = vector.extract_strided_slice %305 {offsets = [0, 256], sizes = [8, 128], strides = [1, 1]} : vector<8x512xf32> to vector<8x128xf32>
    %319 = math.tanh %318 : vector<8x128xf32>
    %320 = vector.extract_strided_slice %305 {offsets = [0, 384], sizes = [8, 128], strides = [1, 1]} : vector<8x512xf32> to vector<8x128xf32>
    %321 = arith.negf %320 : vector<8x128xf32>
    %322 = math.exp %321 : vector<8x128xf32>
    %cst_59 = arith.constant 1.000000e+00 : f32
    %323 = vector.broadcast %cst_59 : f32 to vector<8x128xf32>
    %324 = arith.addf %323, %322 : vector<8x128xf32>
    %325 = arith.divf %323, %324 : vector<8x128xf32>
    %326 = arith.mulf %317, %271 : vector<8x128xf32>
    %327 = arith.mulf %311, %319 : vector<8x128xf32>
    %328 = arith.addf %326, %327 : vector<8x128xf32>
    %329 = math.tanh %328 : vector<8x128xf32>
    %330 = arith.mulf %325, %329 : vector<8x128xf32>
    %331 = tpu.concatenate %330, %301 in 1 : vector<8x128xf32>, vector<8x128xf32> -> vector<8x256xf32>
    %cst_60 = arith.constant dense<0.000000e+00> : vector<8x512xf32>
    %332 = tpu.matmul %331, %9, %cst_60 {dimension_numbers = #tpu.dot_dimension_numbers<[1], [0], [0], [1], [0, 0, 1, 1], [], []>} : vector<8x256xf32>, vector<256x512xf32>, vector<8x512xf32> -> vector<8x512xf32>
    %333 = arith.addf %332, %12 : vector<8x512xf32>
    %334 = vector.extract_strided_slice %333 {offsets = [0, 0], sizes = [8, 128], strides = [1, 1]} : vector<8x512xf32> to vector<8x128xf32>
    %335 = arith.negf %334 : vector<8x128xf32>
    %336 = math.exp %335 : vector<8x128xf32>
    %cst_61 = arith.constant 1.000000e+00 : f32
    %337 = vector.broadcast %cst_61 : f32 to vector<8x128xf32>
    %338 = arith.addf %337, %336 : vector<8x128xf32>
    %339 = arith.divf %337, %338 : vector<8x128xf32>
    %340 = vector.extract_strided_slice %333 {offsets = [0, 128], sizes = [8, 128], strides = [1, 1]} : vector<8x512xf32> to vector<8x128xf32>
    %341 = arith.negf %340 : vector<8x128xf32>
    %342 = math.exp %341 : vector<8x128xf32>
    %cst_62 = arith.constant 1.000000e+00 : f32
    %343 = vector.broadcast %cst_62 : f32 to vector<8x128xf32>
    %344 = arith.addf %343, %342 : vector<8x128xf32>
    %345 = arith.divf %343, %344 : vector<8x128xf32>
    %346 = vector.extract_strided_slice %333 {offsets = [0, 256], sizes = [8, 128], strides = [1, 1]} : vector<8x512xf32> to vector<8x128xf32>
    %347 = math.tanh %346 : vector<8x128xf32>
    %348 = vector.extract_strided_slice %333 {offsets = [0, 384], sizes = [8, 128], strides = [1, 1]} : vector<8x512xf32> to vector<8x128xf32>
    %349 = arith.negf %348 : vector<8x128xf32>
    %350 = math.exp %349 : vector<8x128xf32>
    %cst_63 = arith.constant 1.000000e+00 : f32
    %351 = vector.broadcast %cst_63 : f32 to vector<8x128xf32>
    %352 = arith.addf %351, %350 : vector<8x128xf32>
    %353 = arith.divf %351, %352 : vector<8x128xf32>
    %354 = arith.mulf %345, %299 : vector<8x128xf32>
    %355 = arith.mulf %339, %347 : vector<8x128xf32>
    %356 = arith.addf %354, %355 : vector<8x128xf32>
    %357 = math.tanh %356 : vector<8x128xf32>
    %358 = arith.mulf %353, %357 : vector<8x128xf32>
    %359 = vector.extract_strided_slice %7 {offsets = [0, 6, 0], sizes = [8, 1, 512], strides = [1, 1, 1]} : vector<8x8x512xf32> to vector<8x1x512xf32>
    %360 = vector.shape_cast %359 : vector<8x1x512xf32> to vector<8x512xf32>
    %cst_64 = arith.constant dense<0.000000e+00> : vector<8x512xf32>
    %361 = tpu.matmul %330, %8, %cst_64 {dimension_numbers = #tpu.dot_dimension_numbers<[1], [0], [0], [1], [0, 0, 1, 1], [], []>} : vector<8x128xf32>, vector<128x512xf32>, vector<8x512xf32> -> vector<8x512xf32>
    %362 = arith.addf %360, %361 : vector<8x512xf32>
    %363 = vector.extract_strided_slice %362 {offsets = [0, 0], sizes = [8, 128], strides = [1, 1]} : vector<8x512xf32> to vector<8x128xf32>
    %364 = arith.negf %363 : vector<8x128xf32>
    %365 = math.exp %364 : vector<8x128xf32>
    %cst_65 = arith.constant 1.000000e+00 : f32
    %366 = vector.broadcast %cst_65 : f32 to vector<8x128xf32>
    %367 = arith.addf %366, %365 : vector<8x128xf32>
    %368 = arith.divf %366, %367 : vector<8x128xf32>
    %369 = vector.extract_strided_slice %362 {offsets = [0, 128], sizes = [8, 128], strides = [1, 1]} : vector<8x512xf32> to vector<8x128xf32>
    %370 = arith.negf %369 : vector<8x128xf32>
    %371 = math.exp %370 : vector<8x128xf32>
    %cst_66 = arith.constant 1.000000e+00 : f32
    %372 = vector.broadcast %cst_66 : f32 to vector<8x128xf32>
    %373 = arith.addf %372, %371 : vector<8x128xf32>
    %374 = arith.divf %372, %373 : vector<8x128xf32>
    %375 = vector.extract_strided_slice %362 {offsets = [0, 256], sizes = [8, 128], strides = [1, 1]} : vector<8x512xf32> to vector<8x128xf32>
    %376 = math.tanh %375 : vector<8x128xf32>
    %377 = vector.extract_strided_slice %362 {offsets = [0, 384], sizes = [8, 128], strides = [1, 1]} : vector<8x512xf32> to vector<8x128xf32>
    %378 = arith.negf %377 : vector<8x128xf32>
    %379 = math.exp %378 : vector<8x128xf32>
    %cst_67 = arith.constant 1.000000e+00 : f32
    %380 = vector.broadcast %cst_67 : f32 to vector<8x128xf32>
    %381 = arith.addf %380, %379 : vector<8x128xf32>
    %382 = arith.divf %380, %381 : vector<8x128xf32>
    %383 = arith.mulf %374, %328 : vector<8x128xf32>
    %384 = arith.mulf %368, %376 : vector<8x128xf32>
    %385 = arith.addf %383, %384 : vector<8x128xf32>
    %386 = math.tanh %385 : vector<8x128xf32>
    %387 = arith.mulf %382, %386 : vector<8x128xf32>
    %388 = tpu.concatenate %387, %358 in 1 : vector<8x128xf32>, vector<8x128xf32> -> vector<8x256xf32>
    %cst_68 = arith.constant dense<0.000000e+00> : vector<8x512xf32>
    %389 = tpu.matmul %388, %9, %cst_68 {dimension_numbers = #tpu.dot_dimension_numbers<[1], [0], [0], [1], [0, 0, 1, 1], [], []>} : vector<8x256xf32>, vector<256x512xf32>, vector<8x512xf32> -> vector<8x512xf32>
    %390 = arith.addf %389, %12 : vector<8x512xf32>
    %391 = vector.extract_strided_slice %390 {offsets = [0, 0], sizes = [8, 128], strides = [1, 1]} : vector<8x512xf32> to vector<8x128xf32>
    %392 = arith.negf %391 : vector<8x128xf32>
    %393 = math.exp %392 : vector<8x128xf32>
    %cst_69 = arith.constant 1.000000e+00 : f32
    %394 = vector.broadcast %cst_69 : f32 to vector<8x128xf32>
    %395 = arith.addf %394, %393 : vector<8x128xf32>
    %396 = arith.divf %394, %395 : vector<8x128xf32>
    %397 = vector.extract_strided_slice %390 {offsets = [0, 128], sizes = [8, 128], strides = [1, 1]} : vector<8x512xf32> to vector<8x128xf32>
    %398 = arith.negf %397 : vector<8x128xf32>
    %399 = math.exp %398 : vector<8x128xf32>
    %cst_70 = arith.constant 1.000000e+00 : f32
    %400 = vector.broadcast %cst_70 : f32 to vector<8x128xf32>
    %401 = arith.addf %400, %399 : vector<8x128xf32>
    %402 = arith.divf %400, %401 : vector<8x128xf32>
    %403 = vector.extract_strided_slice %390 {offsets = [0, 256], sizes = [8, 128], strides = [1, 1]} : vector<8x512xf32> to vector<8x128xf32>
    %404 = math.tanh %403 : vector<8x128xf32>
    %405 = vector.extract_strided_slice %390 {offsets = [0, 384], sizes = [8, 128], strides = [1, 1]} : vector<8x512xf32> to vector<8x128xf32>
    %406 = arith.negf %405 : vector<8x128xf32>
    %407 = math.exp %406 : vector<8x128xf32>
    %cst_71 = arith.constant 1.000000e+00 : f32
    %408 = vector.broadcast %cst_71 : f32 to vector<8x128xf32>
    %409 = arith.addf %408, %407 : vector<8x128xf32>
    %410 = arith.divf %408, %409 : vector<8x128xf32>
    %411 = arith.mulf %402, %356 : vector<8x128xf32>
    %412 = arith.mulf %396, %404 : vector<8x128xf32>
    %413 = arith.addf %411, %412 : vector<8x128xf32>
    %414 = math.tanh %413 : vector<8x128xf32>
    %415 = arith.mulf %410, %414 : vector<8x128xf32>
    %416 = vector.extract_strided_slice %7 {offsets = [0, 7, 0], sizes = [8, 1, 512], strides = [1, 1, 1]} : vector<8x8x512xf32> to vector<8x1x512xf32>
    %417 = vector.shape_cast %416 : vector<8x1x512xf32> to vector<8x512xf32>
    %cst_72 = arith.constant dense<0.000000e+00> : vector<8x512xf32>
    %418 = tpu.matmul %387, %8, %cst_72 {dimension_numbers = #tpu.dot_dimension_numbers<[1], [0], [0], [1], [0, 0, 1, 1], [], []>} : vector<8x128xf32>, vector<128x512xf32>, vector<8x512xf32> -> vector<8x512xf32>
    %419 = arith.addf %417, %418 : vector<8x512xf32>
    %420 = vector.extract_strided_slice %419 {offsets = [0, 0], sizes = [8, 128], strides = [1, 1]} : vector<8x512xf32> to vector<8x128xf32>
    %421 = arith.negf %420 : vector<8x128xf32>
    %422 = math.exp %421 : vector<8x128xf32>
    %cst_73 = arith.constant 1.000000e+00 : f32
    %423 = vector.broadcast %cst_73 : f32 to vector<8x128xf32>
    %424 = arith.addf %423, %422 : vector<8x128xf32>
    %425 = arith.divf %423, %424 : vector<8x128xf32>
    %426 = vector.extract_strided_slice %419 {offsets = [0, 128], sizes = [8, 128], strides = [1, 1]} : vector<8x512xf32> to vector<8x128xf32>
    %427 = arith.negf %426 : vector<8x128xf32>
    %428 = math.exp %427 : vector<8x128xf32>
    %cst_74 = arith.constant 1.000000e+00 : f32
    %429 = vector.broadcast %cst_74 : f32 to vector<8x128xf32>
    %430 = arith.addf %429, %428 : vector<8x128xf32>
    %431 = arith.divf %429, %430 : vector<8x128xf32>
    %432 = vector.extract_strided_slice %419 {offsets = [0, 256], sizes = [8, 128], strides = [1, 1]} : vector<8x512xf32> to vector<8x128xf32>
    %433 = math.tanh %432 : vector<8x128xf32>
    %434 = vector.extract_strided_slice %419 {offsets = [0, 384], sizes = [8, 128], strides = [1, 1]} : vector<8x512xf32> to vector<8x128xf32>
    %435 = arith.negf %434 : vector<8x128xf32>
    %436 = math.exp %435 : vector<8x128xf32>
    %cst_75 = arith.constant 1.000000e+00 : f32
    %437 = vector.broadcast %cst_75 : f32 to vector<8x128xf32>
    %438 = arith.addf %437, %436 : vector<8x128xf32>
    %439 = arith.divf %437, %438 : vector<8x128xf32>
    %440 = arith.mulf %431, %385 : vector<8x128xf32>
    %441 = arith.mulf %425, %433 : vector<8x128xf32>
    %442 = arith.addf %440, %441 : vector<8x128xf32>
    %443 = math.tanh %442 : vector<8x128xf32>
    %444 = arith.mulf %439, %443 : vector<8x128xf32>
    %445 = tpu.concatenate %444, %415 in 1 : vector<8x128xf32>, vector<8x128xf32> -> vector<8x256xf32>
    %cst_76 = arith.constant dense<0.000000e+00> : vector<8x512xf32>
    %446 = tpu.matmul %445, %9, %cst_76 {dimension_numbers = #tpu.dot_dimension_numbers<[1], [0], [0], [1], [0, 0, 1, 1], [], []>} : vector<8x256xf32>, vector<256x512xf32>, vector<8x512xf32> -> vector<8x512xf32>
    %447 = arith.addf %446, %12 : vector<8x512xf32>
    %448 = vector.extract_strided_slice %447 {offsets = [0, 0], sizes = [8, 128], strides = [1, 1]} : vector<8x512xf32> to vector<8x128xf32>
    %449 = arith.negf %448 : vector<8x128xf32>
    %450 = math.exp %449 : vector<8x128xf32>
    %cst_77 = arith.constant 1.000000e+00 : f32
    %451 = vector.broadcast %cst_77 : f32 to vector<8x128xf32>
    %452 = arith.addf %451, %450 : vector<8x128xf32>
    %453 = arith.divf %451, %452 : vector<8x128xf32>
    %454 = vector.extract_strided_slice %447 {offsets = [0, 128], sizes = [8, 128], strides = [1, 1]} : vector<8x512xf32> to vector<8x128xf32>
    %455 = arith.negf %454 : vector<8x128xf32>
    %456 = math.exp %455 : vector<8x128xf32>
    %cst_78 = arith.constant 1.000000e+00 : f32
    %457 = vector.broadcast %cst_78 : f32 to vector<8x128xf32>
    %458 = arith.addf %457, %456 : vector<8x128xf32>
    %459 = arith.divf %457, %458 : vector<8x128xf32>
    %460 = vector.extract_strided_slice %447 {offsets = [0, 256], sizes = [8, 128], strides = [1, 1]} : vector<8x512xf32> to vector<8x128xf32>
    %461 = math.tanh %460 : vector<8x128xf32>
    %462 = vector.extract_strided_slice %447 {offsets = [0, 384], sizes = [8, 128], strides = [1, 1]} : vector<8x512xf32> to vector<8x128xf32>
    %463 = arith.negf %462 : vector<8x128xf32>
    %464 = math.exp %463 : vector<8x128xf32>
    %cst_79 = arith.constant 1.000000e+00 : f32
    %465 = vector.broadcast %cst_79 : f32 to vector<8x128xf32>
    %466 = arith.addf %465, %464 : vector<8x128xf32>
    %467 = arith.divf %465, %466 : vector<8x128xf32>
    %468 = arith.mulf %459, %413 : vector<8x128xf32>
    %469 = arith.mulf %453, %461 : vector<8x128xf32>
    %470 = arith.addf %468, %469 : vector<8x128xf32>
    %471 = math.tanh %470 : vector<8x128xf32>
    %472 = arith.mulf %467, %471 : vector<8x128xf32>
    %c0_80 = arith.constant 0 : index
    %c0_81 = arith.constant 0 : index
    %473 = vector.load %arg7[%c0_80, %c0_81] : memref<128x2xf32, #tpu.memory_space<vmem>>, vector<128x2xf32>
    %cst_82 = arith.constant dense<0.000000e+00> : vector<8x2xf32>
    %474 = tpu.matmul %472, %473, %cst_82 {dimension_numbers = #tpu.dot_dimension_numbers<[1], [0], [0], [1], [0, 0, 1, 1], [], []>} : vector<8x128xf32>, vector<128x2xf32>, vector<8x2xf32> -> vector<8x2xf32>
    %c0_83 = arith.constant 0 : index
    %c0_84 = arith.constant 0 : index
    %475 = vector.load %arg8[%c0_83, %c0_84] : memref<1x2xf32, #tpu.memory_space<vmem>>, vector<1x2xf32>
    %476 = vector.broadcast %475 : vector<1x2xf32> to vector<8x2xf32>
    %477 = arith.addf %474, %476 : vector<8x2xf32>
    %c0_85 = arith.constant 0 : index
    %c0_86 = arith.constant 0 : index
    %478 = vector.load %arg9[%c0_85, %c0_86] : memref<8x2xf32, #tpu.memory_space<vmem>>, vector<8x2xf32>
    tpu.vector_store %arg9[%c0_85, %c0_86], %477 {strides = array<i32>} : memref<8x2xf32, #tpu.memory_space<vmem>>, vector<8x2xf32>,
    return
  }
  func.func @transform_0(%arg0: i32) -> (i32, i32, i32) {
    %c0_i32 = arith.constant 0 : i32
    %c0_i32_0 = arith.constant 0 : i32
    %c0_i32_1 = arith.constant 0 : i32
    return %arg0, %c0_i32, %c0_i32_0 : i32, i32, i32
  }
  func.func @transform_1(%arg0: i32) -> (i32, i32) {
    %c0_i32 = arith.constant 0 : i32
    %c0_i32_0 = arith.constant 0 : i32
    %c0_i32_1 = arith.constant 0 : i32
    return %c0_i32, %c0_i32_0 : i32, i32
  }
  func.func @transform_2(%arg0: i32) -> (i32, i32) {
    %c0_i32 = arith.constant 0 : i32
    %c0_i32_0 = arith.constant 0 : i32
    %c0_i32_1 = arith.constant 0 : i32
    return %c0_i32, %c0_i32_0 : i32, i32
  }
  func.func @transform_3(%arg0: i32) -> (i32, i32) {
    %c0_i32 = arith.constant 0 : i32
    %c0_i32_0 = arith.constant 0 : i32
    %c0_i32_1 = arith.constant 0 : i32
    return %c0_i32, %c0_i32_0 : i32, i32
  }
  func.func @transform_4(%arg0: i32) -> (i32, i32) {
    %c0_i32 = arith.constant 0 : i32
    %c0_i32_0 = arith.constant 0 : i32
    %c0_i32_1 = arith.constant 0 : i32
    return %c0_i32, %c0_i32_0 : i32, i32
  }
  func.func @transform_5(%arg0: i32) -> (i32, i32) {
    %c0_i32 = arith.constant 0 : i32
    %c0_i32_0 = arith.constant 0 : i32
    %c0_i32_1 = arith.constant 0 : i32
    return %c0_i32, %c0_i32_0 : i32, i32
  }
  func.func @transform_6(%arg0: i32) -> (i32, i32) {
    %c0_i32 = arith.constant 0 : i32
    %c0_i32_0 = arith.constant 0 : i32
    %c0_i32_1 = arith.constant 0 : i32
    return %c0_i32, %c0_i32_0 : i32, i32
  }
  func.func @transform_7(%arg0: i32) -> (i32, i32) {
    %c0_i32 = arith.constant 0 : i32
    %c0_i32_0 = arith.constant 0 : i32
    %c0_i32_1 = arith.constant 0 : i32
    return %c0_i32, %c0_i32_0 : i32, i32
  }
  func.func @transform_8(%arg0: i32) -> (i32, i32) {
    %c0_i32 = arith.constant 0 : i32
    %c0_i32_0 = arith.constant 0 : i32
    return %arg0, %c0_i32 : i32, i32
  }
}

</mosaic_0001>

<bundles_post_ra>
// kernel: tpu_custom_call.1
= control target key start
LH: loop header
LB: loop body
LE: loop exit
PB: predicated region body
PF: predicated region fallthrough
CT: control target
= control target key end

     0   :  { %13 = vsyncpa [#allocation3], 0  ;;  %s11621_s0 = inlined_call_operand.vmem [shape: f32[8,8,100], index: 0, kind: input, shape index: {}]   ;;  %s11622_s1 = inlined_call_operand.hbm [shape: f32[100,512], index: 1, kind: input, shape index: {}]   ;;  %s11623_s2 = inlined_call_operand.hbm [shape: f32[128,512], index: 2, kind: input, shape index: {}]   ;;  %s11624_s3 = inlined_call_operand.vmem [shape: f32[1,512], index: 3, kind: input, shape index: {}]   ;;  %s11625_s4 = inlined_call_operand.hbm [shape: f32[256,512], index: 4, kind: input, shape index: {}]   ;;  %s11626_s5 = inlined_call_operand.vmem [shape: f32[1,512], index: 5, kind: input, shape index: {}]   ;;  %s11627_s6 = inlined_call_operand.vmem [shape: f32[128,2], index: 6, kind: input, shape index: {}]   ;;  %s11628_s7 = inlined_call_operand.vmem [shape: f32[1,2], index: 7, kind: input, shape index: {}]   ;;  %s11629_s8 = inlined_call_operand.vmem [shape: f32[8,2], index: 8, kind: output, shape index: {}]  }
   0x1   :  { %14 = vsyncpa [#allocation5], 0  ;;  %s9131_s27 = smov [#allocation4]   ;;  %s9132_s29 = smov [#allocation2]  }
   0x2   :  { %s34_s28 = sshll.u32 %s9131_s27, 4  ;;  %s22_s30 = sshll.u32 %s9132_s29, 4  ;;  %s35_s28 = int_to_ptr.vmem [resolvable:$true] %s34_s28  ;;  %s9184_s30 = int_to_ptr.vmem [resolvable:$true] %s22_s30 }
   0x3   :  { %s9061_s11 = scalar_lea.hbm %s11623_s2, 8192 }
   0x4   :  { %p9062_p0 = scmp.ne.s32.totalorder %s11623_s2, %s9061_s11  ;;  %p9065_p1 = scmp.lt.u32.totalorder %s9061_s11, %s11623_s2 }
   0x6   :  { %p9067_p2 = pnand %p9065_p1, %p9062_p0 }
   0x8   :  { %9070 = shalt.err (!%p9067_p2)
}
   0x9   :  { %s9071_s16 = scalar_lea.vmem %s35_s28, 8192  ;;  %p9076_p4 = scmp.lt.s32.totalorder %s35_s28, %s35_s28 }
   0xa   :  { %p9072_p3 = scmp.ne.s32.totalorder %s35_s28, %s9071_s16  ;;  %p9077_p5 = scmp.lt.s32.totalorder %s9071_s16, %s9071_s16 }
   0xc   :  { %p9078_p6 = por %p9077_p5, %p9076_p4 }
   0xe   :  { %p9079_p7 = pnand %p9078_p6, %p9072_p3 }
  0x10   :  { %9082 = shalt.err (!%p9079_p7)
}
  0x11   :  { %s9133_s17 = smov 512   ;;  %s9134_s18 = smov 32  }
  0x12   :  { %40 = dma.hbm_to_vmem [thread:$0]  %s11623_s2, 8192, %s35_s28, [#allocation5], %s9133_s17, %s9133_s17, %s9134_s18  }
  0x13   :  { %s9083_s23 = scalar_lea.hbm %s11622_s1, 6656 }
  0x14   :  { %p9084_p8 = scmp.ne.s32.totalorder %s11622_s1, %s9083_s23  ;;  %p9087_p9 = scmp.lt.u32.totalorder %s9083_s23, %s11622_s1 }
  0x16   :  { %p9089_p10 = pnand %p9087_p9, %p9084_p8 }
  0x18   :  { %9092 = shalt.err (!%p9089_p10)
}
  0x19   :  { %s9093_s29 = scalar_lea.vmem %s9184_s30, 6656  ;;  %p9098_p12 = scmp.lt.s32.totalorder %s9184_s30, %s9184_s30 }
  0x1a   :  { %p9094_p11 = scmp.ne.s32.totalorder %s9184_s30, %s9093_s29  ;;  %p9099_p13 = scmp.lt.s32.totalorder %s9093_s29, %s9093_s29 }
  0x1c   :  { %p9100_p0 = por %p9099_p13, %p9098_p12 }
  0x1e   :  { %p9101_p1 = pnand %p9100_p0, %p9094_p11 }
  0x20   :  { %9104 = shalt.err (!%p9101_p1)
}
  0x21   :  { %28 = dma.hbm_to_vmem [thread:$0]  %s11622_s1, 6656, %s9184_s30, [#allocation3], %s9133_s17, %s9133_s17, %s9134_s18  }
  0x22   :  { %s9135_s9 = smov [#allocation6]   ;;  %s9105_s13 = scalar_lea.hbm %s11625_s4, 16384 }
  0x23   :  { %s48_s10 = sshll.u32 %s9135_s9, 4  ;;  %p9106_p2 = scmp.ne.s32.totalorder %s11625_s4, %s9105_s13  ;;  %s49_s10 = int_to_ptr.vmem [resolvable:$true] %s48_s10 }
  0x24   :  { %p9109_p3 = scmp.lt.u32.totalorder %s9105_s13, %s11625_s4 }
  0x26   :  { %p9111_p4 = pnand %p9109_p3, %p9106_p2 }
  0x28   :  { %9114 = shalt.err (!%p9111_p4)
}
  0x29   :  { %s9115_s20 = scalar_lea.vmem %s49_s10, 16384  ;;  %p9120_p6 = scmp.lt.s32.totalorder %s49_s10, %s49_s10 }
  0x2a   :  { %p9116_p5 = scmp.ne.s32.totalorder %s49_s10, %s9115_s20  ;;  %p9121_p7 = scmp.lt.s32.totalorder %s9115_s20, %s9115_s20 }
  0x2c   :  { %p9122_p8 = por %p9121_p7, %p9120_p6 }
  0x2e   :  { %p9123_p9 = pnand %p9122_p8, %p9116_p5 }
  0x30   :  { %9126 = shalt.err (!%p9123_p9)
}
  0x31   :  { %54 = dma.hbm_to_vmem [thread:$0]  %s11625_s4, 16384, %s49_s10, [#allocation5], %s9133_s17, %s9133_s17, %s9134_s18  }
  0x32   :  { %9127 = dma.done.wait [#allocation3], 6656  }
  0x33   :  { %9128 = vsyncadd [#allocation3], 4294960640 }
  0x34   :  { %9129 = dma.done.wait [#allocation5], 24576  }
  0x35   :  { %9130 = vsyncadd [#allocation5], 4294942720  ;;  %v11630_v0 = vmov 0.0   ;;  %v79_v1 = vld [vmem:[#allocation2 + $0x8] sm:$0xff]  ;;  %v81_v3 = vld [vmem:[#allocation2 + $0x18] sm:$0xff]  ;;  %vm177_vm0 = vcmask 1043456  }
  0x36   :  { %254 = vmatprep.mubr.f32.mxu0 %v11630_v0  ;;  %367 = vmatprep.mubr.f32.mxu1 %v11630_v0  ;;  %v83_v2 = vld [vmem:[#allocation2 + $0x28] sm:$0xff]  ;;  %v85_v5 = vld [vmem:[#allocation2 + $0x38] sm:$0xff]  ;;  %v78_v6 = vld [vmem:[#allocation2] sm:$0xff]  ;;  %vm152_vm1 = vcmask 818176   ;;  %vm1069_vm2 = vcmask 1041409   ;;  %vm1072_vm3 = vcmask 1042434  }
  0x37   :  { %v6293_v4 = vpack.c.bf16 %v83_v2, %v79_v1  ;;  %v82_v7 = vld [vmem:[#allocation2 + $0x20] sm:$0xff]  ;;  %v6317_v8 = vpack.c.bf16 %v85_v5, %v81_v3  ;;  %v80_v10 = vld [vmem:[#allocation2 + $0x10] sm:$0xff]  ;;  %v87_v12 = vld [vmem:[#allocation2 + $0x48] sm:$0xff]  ;;  %vm1075_vm4 = vcmask 1043459   ;;  %vm1078_vm5 = vcmask 1044484  }
  0x38   :  { %v6295_v9 = vpack.c.bf16 %v82_v7, %v78_v6  ;;  %v84_v11 = vld [vmem:[#allocation2 + $0x30] sm:$0xff]  ;;  %v91_v14 = vld [vmem:[#allocation2 + $0x68] sm:$0xff]  ;;  %v89_v15 = vld [vmem:[#allocation2 + $0x58] sm:$0xff]  ;;  %vm1081_vm6 = vcmask 1045509   ;;  %vm1084_vm7 = vcmask 1046534   ;;  %vm1087_vm8 = vcmask 1047559  }
  0x39   :  { %6294 = vmatprep.subr.bf16.mxu0 %v6293_v4  ;;  %v6319_v13 = vpack.c.bf16 %v84_v11, %v80_v10  ;;  %v93_v16 = vld [vmem:[#allocation2 + $0x78] sm:$0xff]  ;;  %6318 = vmatprep.subr.bf16.mxu1 %v6317_v8  ;;  %v6297_v17 = vpack.c.bf16 %v91_v14, %v87_v12  ;;  %v86_v19 = vld [vmem:[#allocation2 + $0x40] sm:$0xff]  ;;  %v88_v21 = vld [vmem:[#allocation2 + $0x50] sm:$0xff]  ;;  %vm1733_vm9 = vcmask 1046528   ;;  %vm2399_vm10 = vcmask 1045504  }
  0x3a   :  { %6296 = vmatpush1.bf16.msra.mxu0 %v6295_v9  ;;  %v6321_v18 = vpack.c.bf16 %v93_v16, %v89_v15  ;;  %v90_v20 = vld [vmem:[#allocation2 + $0x60] sm:$0xff]  ;;  %v92_v23 = vld [vmem:[#allocation2 + $0x70] sm:$0xff]  ;;  %v95_v24 = vld [vmem:[#allocation2 + $0x88] sm:$0xff]  ;;  %vm3065_vm11 = vcmask 1044480   ;;  %vm4396_vm12 = vcmask 1042432   ;;  %vm5062_vm13 = vcmask 1041408  }
  0x3b   :  { %6320 = vmatpush1.bf16.msra.mxu1 %v6319_v13  ;;  %v6299_v22 = vpack.c.bf16 %v90_v20, %v86_v19  ;;  %v99_v25 = vld [vmem:[#allocation2 + $0xa8] sm:$0xff]  ;;  %6298 = vmatprep.subr.bf16.mxu0 %v6297_v17  ;;  %v6323_v26 = vpack.c.bf16 %v92_v23, %v88_v21  ;;  %v97_v28 = vld [vmem:[#allocation2 + $0x98] sm:$0xff]  ;;  %v94_v30 = vld [vmem:[#allocation2 + $0x80] sm:$0xff]  ;;  %vm5728_vm14 = vcmask 1040384   ;;  %vm9138_vm15 = vmmov 0  }
  0x3c   :  { %6322 = vmatprep.subr.bf16.mxu1 %v6321_v18  ;;  %v6301_v27 = vpack.c.bf16 %v99_v25, %v95_v24  ;;  %v101_v29 = vld [vmem:[#allocation2 + $0xb8] sm:$0xff]  ;;  %v98_v32 = vld [vmem:[#allocation2 + $0xa0] sm:$0xff]  ;;  %v96_v33 = vld [vmem:[#allocation2 + $0x90] sm:$0xff] }
  0x3d   :  { %v6325_v31 = vpack.c.bf16 %v101_v29, %v97_v28  ;;  %v100_v34 = vld [vmem:[#allocation2 + $0xb0] sm:$0xff]  ;;  %v6303_v35 = vpack.c.bf16 %v98_v32, %v94_v30  ;;  %v103_v36 = vld [vmem:[#allocation2 + $0xc8] sm:$0xff]  ;;  %v105_v38 = vld [vmem:[#allocation2 + $0xd8] sm:$0xff] }
  0x3e   :  { %6300 = vmatpush1.bf16.msra.mxu0 %v6299_v22  ;;  %v107_v37 = vld [vmem:[#allocation2 + $0xe8] sm:$0xff]  ;;  %v6327_v39 = vpack.c.bf16 %v100_v34, %v96_v33  ;;  %v109_v41 = vld [vmem:[#allocation2 + $0xf8] sm:$0xff]  ;;  %v102_v42 = vld [vmem:[#allocation2 + $0xc0] sm:$0xff] }
  0x3f   :  { %6324 = vmatpush1.bf16.msra.mxu1 %v6323_v26  ;;  %6302 = vmatprep.subr.bf16.mxu0 %v6301_v27  ;;  %v6305_v40 = vpack.c.bf16 %v107_v37, %v103_v36  ;;  %v106_v43 = vld [vmem:[#allocation2 + $0xe0] sm:$0xff]  ;;  %v6329_v44 = vpack.c.bf16 %v109_v41, %v105_v38  ;;  %v104_v45 = vld [vmem:[#allocation2 + $0xd0] sm:$0xff]  ;;  %v111_v47 = vld [vmem:[#allocation2 + $0x108] sm:$0xff] }
  0x40   :  { %6326 = vmatprep.subr.bf16.mxu1 %v6325_v31  ;;  %v108_v46 = vld [vmem:[#allocation2 + $0xf0] sm:$0xff]  ;;  %v115_v48 = vld [vmem:[#allocation2 + $0x128] sm:$0xff]  ;;  %v113_v49 = vld [vmem:[#allocation2 + $0x118] sm:$0xff]  ;;  %v6307_v51 = vpack.c.bf16 %v106_v43, %v102_v42 }
  0x41   :  { %v117_v50 = vld [vmem:[#allocation2 + $0x138] sm:$0xff]  ;;  %v6331_v52 = vpack.c.bf16 %v108_v46, %v104_v45  ;;  %v6309_v53 = vpack.c.bf16 %v115_v48, %v111_v47  ;;  %v110_v54 = vld [vmem:[#allocation2 + $0x100] sm:$0xff]  ;;  %v112_v56 = vld [vmem:[#allocation2 + $0x110] sm:$0xff] }
  0x42   :  { %6304 = vmatpush1.bf16.msra.mxu0 %v6303_v35  ;;  %v114_v55 = vld [vmem:[#allocation2 + $0x120] sm:$0xff]  ;;  %v6333_v57 = vpack.c.bf16 %v117_v50, %v113_v49  ;;  %v116_v58 = vld [vmem:[#allocation2 + $0x130] sm:$0xff]  ;;  %v119_v59 = vld [vmem:[#allocation2 + $0x148] sm:$0xff] }
  0x43   :  { %6328 = vmatpush1.bf16.msra.mxu1 %v6327_v39  ;;  %6306 = vmatprep.subr.bf16.mxu0 %v6305_v40  ;;  %v123_v60 = vld [vmem:[#allocation2 + $0x168] sm:$0xff]  ;;  %v121_v61 = vld [vmem:[#allocation2 + $0x158] sm:$0xff]  ;;  %v6311_v63 = vpack.c.bf16 %v114_v55, %v110_v54  ;;  %v6335_v1 = vpack.c.bf16 %v116_v58, %v112_v56  ;;  %v118_v3 = vld [vmem:[#allocation2 + $0x140] sm:$0xff] }
  0x44   :  { %6330 = vmatprep.subr.bf16.mxu1 %v6329_v44  ;;  %v125_v62 = vld [vmem:[#allocation2 + $0x178] sm:$0xff]  ;;  %v6313_v2 = vpack.c.bf16 %v123_v60, %v119_v59  ;;  %v122_v4 = vld [vmem:[#allocation2 + $0x160] sm:$0xff]  ;;  %v120_v6 = vld [vmem:[#allocation2 + $0x150] sm:$0xff] }
  0x45   :  { %v6337_v5 = vpack.c.bf16 %v125_v62, %v121_v61  ;;  %v124_v7 = vld [vmem:[#allocation2 + $0x170] sm:$0xff]  ;;  %v6315_v8 = vpack.c.bf16 %v122_v4, %v118_v3  ;;  %v127_v10 = vld [vmem:[#allocation2 + $0x188] sm:$0xf]  ;;  %v129_v11 = vld [vmem:[#allocation2 + $0x198] sm:$0xf] }
  0x46   :  { %6308 = vmatpush1.bf16.msra.mxu0 %v6307_v51  ;;  %v6339_v9 = vpack.c.bf16 %v124_v7, %v120_v6  ;;  %v417_v12 = vld [vmem:[#allocation4 + $0x8] sm:$0xff]  ;;  %v419_v14 = vld [vmem:[#allocation4 + $0x18] sm:$0xff]  ;;  %v416_v16 = vld [vmem:[#allocation4] sm:$0xff] }
  0x47   :  { %6332 = vmatpush1.bf16.msra.mxu1 %v6331_v52  ;;  %6310 = vmatprep.subr.bf16.mxu0 %v6309_v53  ;;  %v421_v13 = vld [vmem:[#allocation4 + $0x28] sm:$0xff]  ;;  %v423_v15 = vld [vmem:[#allocation4 + $0x38] sm:$0xff]  ;;  %v420_v17 = vld [vmem:[#allocation4 + $0x20] sm:$0xff] }
  0x48   :  { %6334 = vmatprep.subr.bf16.mxu1 %v6333_v57  ;;  %v126_v18 = vld [vmem:[#allocation2 + $0x180] sm:$0xf]  ;;  %v418_v19 = vld [vmem:[#allocation4 + $0x10] sm:$0xff]  ;;  %v9243_v23 = vpack.c.bf16 %v421_v13, %v417_v12  ;;  %v9245_v24 = vpack.c.bf16 %v423_v15, %v419_v14  ;;  %v9247_v25 = vpack.c.bf16 %v420_v17, %v416_v16  ;;  %v425_v26 = vld [vmem:[#allocation4 + $0x48] sm:$0xff] }
  0x49   :  { %v422_v20 = vld [vmem:[#allocation4 + $0x30] sm:$0xff]  ;;  %v70_v22 = vld [vmem:[%s11621_s0] sm:$0xff]  ;;  %v429_v27 = vld [vmem:[#allocation4 + $0x68] sm:$0xff] }
  0x4a   :  { %6312 = vmatpush1.bf16.msra.mxu0 %v6311_v63  ;;  %v128_v21 = vld [vmem:[#allocation2 + $0x190] sm:$0xf]  ;;  %11878 = vst [vmem:[#allocation9_spill] sm:$0xff] %v9243_v23  ;;  %11879 = vst [vmem:[#allocation10_spill] sm:$0xff] %v9245_v24  ;;  %v427_v28 = vld [vmem:[#allocation4 + $0x58] sm:$0xff]  ;;  %v9250_v29 = vpack.c.bf16 %v422_v20, %v418_v19  ;;  %v9259_v36 = vpack.c.bf16 %v429_v27, %v425_v26 }
  0x4b   :  { %6336 = vmatpush1.bf16.msra.mxu1 %v6335_v1  ;;  %6314 = vmatprep.subr.bf16.mxu0 %v6313_v2  ;;  %v431_v30 = vld [vmem:[#allocation4 + $0x78] sm:$0xff]  ;;  %v424_v31 = vld [vmem:[#allocation4 + $0x40] sm:$0xff]  ;;  %v426_v33 = vld [vmem:[#allocation4 + $0x50] sm:$0xff] }
  0x4c   :  { %6338 = vmatprep.subr.bf16.mxu1 %v6337_v5  ;;  %v428_v32 = vld [vmem:[#allocation4 + $0x60] sm:$0xff]  ;;  %v430_v34 = vld [vmem:[#allocation4 + $0x70] sm:$0xff]  ;;  %v71_v35 = vld [vmem:[%s11621_s0 + $0x8] sm:$0xff]  ;;  %v9263_v37 = vpack.c.bf16 %v431_v30, %v427_v28 }
  0x4d   :  { %v9265_v38 = vpack.c.bf16 %v428_v32, %v424_v31  ;;  %v433_v39 = vld [vmem:[#allocation4 + $0x88] sm:$0xff]  ;;  %v435_v41 = vld [vmem:[#allocation4 + $0x98] sm:$0xff]  ;;  %v9269_v42 = vpack.c.bf16 %v430_v34, %v426_v33  ;;  %v432_v44 = vld [vmem:[#allocation4 + $0x80] sm:$0xff] }
  0x4e   :  { %6316 = vmatpush1.bf16.msra.mxu0 %v6315_v8  ;;  %v437_v40 = vld [vmem:[#allocation4 + $0xa8] sm:$0xff]  ;;  %v439_v43 = vld [vmem:[#allocation4 + $0xb8] sm:$0xff]  ;;  %v436_v45 = vld [vmem:[#allocation4 + $0xa0] sm:$0xff] }
  0x4f   :  { %6340 = vmatpush1.bf16.msra.mxu1 %v6339_v9  ;;  %6003 = vmatprep.subr.msk.mxu0 %vm177_vm0, %v127_v10  ;;  %v434_v46 = vld [vmem:[#allocation4 + $0x90] sm:$0xff]  ;;  %v9278_v49 = vpack.c.bf16 %v437_v40, %v433_v39  ;;  %v9282_v50 = vpack.c.bf16 %v439_v43, %v435_v41  ;;  %v9284_v51 = vpack.c.bf16 %v436_v45, %v432_v44  ;;  %v441_v52 = vld [vmem:[#allocation4 + $0xc8] sm:$0xff]  ;;  %v443_v54 = vld [vmem:[#allocation4 + $0xd8] sm:$0xff] }
  0x50   :  { %6013 = vmatprep.subr.msk.mxu1 %vm177_vm0, %v129_v11  ;;  %v438_v47 = vld [vmem:[#allocation4 + $0xb0] sm:$0xff]  ;;  %v445_v53 = vld [vmem:[#allocation4 + $0xe8] sm:$0xff]  ;;  %v447_v56 = vld [vmem:[#allocation4 + $0xf8] sm:$0xff] }
  0x51   :  { %v72_v48 = vld [vmem:[%s11621_s0 + $0x10] sm:$0xff]  ;;  %11880 = vst [vmem:[#allocation11_spill] sm:$0xff] %v9278_v49  ;;  %11881 = vst [vmem:[#allocation12_spill] sm:$0xff] %v9282_v50  ;;  %v9288_v55 = vpack.c.bf16 %v438_v47, %v434_v46  ;;  %v440_v57 = vld [vmem:[#allocation4 + $0xc0] sm:$0xff]  ;;  %v9297_v62 = vpack.c.bf16 %v445_v53, %v441_v52  ;;  %v9301_v63 = vpack.c.bf16 %v447_v56, %v443_v54 }
  0x52   :  { %6004 = vmatpush1.msk.msra.mxu0 %vm177_vm0, %v126_v18  ;;  %11882 = vst [vmem:[#allocation13_spill] sm:$0xff] %v9284_v51  ;;  %v444_v58 = vld [vmem:[#allocation4 + $0xe0] sm:$0xff]  ;;  %v442_v59 = vld [vmem:[#allocation4 + $0xd0] sm:$0xff]  ;;  %v73_v61 = vld [vmem:[%s11621_s0 + $0x18] sm:$0xff] }
  0x53   :  { %6014 = vmatpush1.msk.msra.mxu1 %vm177_vm0, %v128_v21  ;;  %6005 = vmatmul.mubr.msk.f32.vlgmr.msra.gmra.mrb[0].mxu0 %vm152_vm1, %v70_v22  ;;  %11883 = vst [vmem:[#allocation14_spill] sm:$0xff] %v9288_v55  ;;  %v446_v60 = vld [vmem:[#allocation4 + $0xf0] sm:$0xff]  ;;  %11884 = vst [vmem:[#allocation15_spill] sm:$0xff] %v9297_v62  ;;  %v9303_v1 = vpack.c.bf16 %v444_v58, %v440_v57  ;;  %v449_v2 = vld [vmem:[#allocation4 + $0x108] sm:$0xff] }
  0x54   :  { %6015 = vmatmul.mubr.msk.f32.vlgmr.msra.gmra.mrb[0].mxu1 %vm152_vm1, %v70_v22  ;;  %6342 = vmatprep.subr.bf16.mxu0 %v9243_v23  ;;  %11885 = vst [vmem:[#allocation16_spill] sm:$0xff] %v9301_v63  ;;  %v453_v3 = vld [vmem:[#allocation4 + $0x128] sm:$0xff]  ;;  %v451_v4 = vld [vmem:[#allocation4 + $0x118] sm:$0xff]  ;;  %v9307_v5 = vpack.c.bf16 %v446_v60, %v442_v59  ;;  %v448_v7 = vld [vmem:[#allocation4 + $0x100] sm:$0xff] }
  0x55   :  { %6374 = vmatprep.subr.bf16.mxu1 %v9245_v24  ;;  %6344 = vmatpush1.bf16.msra.mxu0 %v9247_v25  ;;  %11886 = vst [vmem:[#allocation17_spill] sm:$0xff] %v9303_v1  ;;  %v455_v6 = vld [vmem:[#allocation4 + $0x138] sm:$0xff]  ;;  %v452_v8 = vld [vmem:[#allocation4 + $0x120] sm:$0xff]  ;;  %v450_v9 = vld [vmem:[#allocation4 + $0x110] sm:$0xff]  ;;  %v9316_v12 = vpack.c.bf16 %v453_v3, %v449_v2 }
  0x56   :  { %6376 = vmatpush1.bf16.msra.mxu1 %v9250_v29  ;;  %260 = vmatprep.mubr.f32.mxu0 %v11630_v0  ;;  %11887 = vst [vmem:[#allocation18_spill] sm:$0xff] %v9307_v5  ;;  %v454_v10 = vld [vmem:[#allocation4 + $0x130] sm:$0xff]  ;;  %v74_v11 = vld [vmem:[%s11621_s0 + $0x20] sm:$0xff]  ;;  %v9320_v13 = vpack.c.bf16 %v455_v6, %v451_v4  ;;  %v9322_v14 = vpack.c.bf16 %v452_v8, %v448_v7  ;;  %v457_v15 = vld [vmem:[#allocation4 + $0x148] sm:$0xff] }
  0x57   :  { %373 = vmatprep.mubr.f32.mxu1 %v11630_v0  ;;  %6006 = vmatmul.mubr.msk.f32.gmra.mrb[2].mxu0 %vm152_vm1, %v71_v35  ;;  %11888 = vst [vmem:[#allocation19_spill] sm:$0xff] %v9316_v12  ;;  %v461_v16 = vld [vmem:[#allocation4 + $0x168] sm:$0xff]  ;;  %v459_v17 = vld [vmem:[#allocation4 + $0x158] sm:$0xff]  ;;  %v9326_v18 = vpack.c.bf16 %v454_v10, %v450_v9  ;;  %v456_v20 = vld [vmem:[#allocation4 + $0x140] sm:$0xff] }
  0x58   :  { %6016 = vmatmul.mubr.msk.f32.gmra.mrb[2].mxu1 %vm152_vm1, %v71_v35  ;;  %6346 = vmatprep.subr.bf16.mxu0 %v9259_v36  ;;  %11889 = vst [vmem:[#allocation20_spill] sm:$0xff] %v9320_v13  ;;  %11890 = vst [vmem:[#allocation21_spill] sm:$0xff] %v9322_v14  ;;  %v463_v19 = vld [vmem:[#allocation4 + $0x178] sm:$0xff]  ;;  %v460_v21 = vld [vmem:[#allocation4 + $0x160] sm:$0xff]  ;;  %v9335_v28 = vpack.c.bf16 %v461_v16, %v457_v15 }
  0x59   :  { %6378 = vmatprep.subr.bf16.mxu1 %v9263_v37  ;;  %6348 = vmatpush1.bf16.msra.mxu0 %v9265_v38  ;;  %11891 = vst [vmem:[#allocation22_spill] sm:$0xff] %v9326_v18  ;;  %v458_v22 = vld [vmem:[#allocation4 + $0x150] sm:$0xff]  ;;  %v75_v27 = vld [vmem:[%s11621_s0 + $0x28] sm:$0xff]  ;;  %v9339_v30 = vpack.c.bf16 %v463_v19, %v459_v17  ;;  %v9341_v31 = vpack.c.bf16 %v460_v21, %v456_v20  ;;  %v467_v34 = vld [vmem:[#allocation4 + $0x198] sm:$0xff] }
  0x5a   :  { %6380 = vmatpush1.bf16.msra.mxu1 %v9269_v42  ;;  %266 = vmatprep.mubr.f32.mxu0 %v11630_v0  ;;  %v462_v26 = vld [vmem:[#allocation4 + $0x170] sm:$0xff]  ;;  %11892 = vst [vmem:[#allocation23_spill] sm:$0xff] %v9335_v28  ;;  %v465_v32 = vld [vmem:[#allocation4 + $0x188] sm:$0xff]  ;;  %v471_v39 = vld [vmem:[#allocation4 + $0x1b8] sm:$0xff] }
  0x5b   :  { %379 = vmatprep.mubr.f32.mxu1 %v11630_v0  ;;  %6007 = vmatmul.mubr.msk.f32.gmra.mrb[4].mxu0 %vm152_vm1, %v72_v48  ;;  %11893 = vst [vmem:[#allocation24_spill] sm:$0xff] %v9339_v30  ;;  %11894 = vst [vmem:[#allocation25_spill] sm:$0xff] %v9341_v31  ;;  %v469_v33 = vld [vmem:[#allocation4 + $0x1a8] sm:$0xff]  ;;  %v9345_v35 = vpack.c.bf16 %v462_v26, %v458_v22  ;;  %v464_v40 = vld [vmem:[#allocation4 + $0x180] sm:$0xff]  ;;  %v9358_v47 = vpack.c.bf16 %v471_v39, %v467_v34 }
  0x5c   :  { %6017 = vmatmul.mubr.msk.f32.gmra.mrb[4].mxu1 %vm152_vm1, %v72_v48  ;;  %6350 = vmatprep.subr.bf16.mxu0 %v9278_v49  ;;  %v468_v41 = vld [vmem:[#allocation4 + $0x1a0] sm:$0xff]  ;;  %v466_v43 = vld [vmem:[#allocation4 + $0x190] sm:$0xff]  ;;  %v9354_v46 = vpack.c.bf16 %v469_v33, %v465_v32  ;;  %v473_v52 = vld [vmem:[#allocation4 + $0x1c8] sm:$0xff] }
  0x5d   :  { %6382 = vmatprep.subr.bf16.mxu1 %v9282_v50  ;;  %6352 = vmatpush1.bf16.msra.mxu0 %v9284_v51  ;;  %11895 = vst [vmem:[#allocation26_spill] sm:$0xff] %v9345_v35  ;;  %v470_v44 = vld [vmem:[#allocation4 + $0x1b0] sm:$0xff]  ;;  %11897 = vst [vmem:[#allocation28_spill] sm:$0xff] %v9358_v47  ;;  %v9360_v48 = vpack.c.bf16 %v468_v41, %v464_v40  ;;  %v477_v53 = vld [vmem:[#allocation4 + $0x1e8] sm:$0xff] }
  0x5e   :  { %6384 = vmatpush1.bf16.msra.mxu1 %v9288_v55  ;;  %272 = vmatprep.mubr.f32.mxu0 %v11630_v0  ;;  %v76_v45 = vld [vmem:[%s11621_s0 + $0x30] sm:$0xff]  ;;  %11896 = vst [vmem:[#allocation27_spill] sm:$0xff] %v9354_v46  ;;  %v475_v54 = vld [vmem:[#allocation4 + $0x1d8] sm:$0xff]  ;;  %v9364_v56 = vpack.c.bf16 %v470_v44, %v466_v43  ;;  %v472_v58 = vld [vmem:[#allocation4 + $0x1c0] sm:$0xff]  ;;  %v9373_v3 = vpack.c.bf16 %v477_v53, %v473_v52 }
  0x5f   :  { %385 = vmatprep.mubr.f32.mxu1 %v11630_v0  ;;  %6008 = vmatmul.mubr.msk.f32.gmra.mrb[6].mxu0 %vm152_vm1, %v73_v61  ;;  %11898 = vst [vmem:[#allocation29_spill] sm:$0xff] %v9360_v48  ;;  %v479_v57 = vld [vmem:[#allocation4 + $0x1f8] sm:$0xff]  ;;  %v476_v59 = vld [vmem:[#allocation4 + $0x1e0] sm:$0xff]  ;;  %v474_v60 = vld [vmem:[#allocation4 + $0x1d0] sm:$0xff] }
  0x60   :  { %6018 = vmatmul.mubr.msk.f32.gmra.mrb[6].mxu1 %vm152_vm1, %v73_v61  ;;  %6354 = vmatprep.subr.bf16.mxu0 %v9297_v62  ;;  %11899 = vst [vmem:[#allocation30_spill] sm:$0xff] %v9364_v56  ;;  %v478_v61 = vld [vmem:[#allocation4 + $0x1f0] sm:$0xff]  ;;  %v77_v2 = vld [vmem:[%s11621_s0 + $0x38] sm:$0xff]  ;;  %11900 = vst [vmem:[#allocation31_spill] sm:$0xff] %v9373_v3  ;;  %v9377_v4 = vpack.c.bf16 %v479_v57, %v475_v54  ;;  %v9379_v6 = vpack.c.bf16 %v476_v59, %v472_v58 }
  0x61   :  { %6386 = vmatprep.subr.bf16.mxu1 %v9301_v63  ;;  %6356 = vmatpush1.bf16.msra.mxu0 %v9303_v1  ;;  %v9383_v7 = vpack.c.bf16 %v478_v61, %v474_v60  ;;  %v481_v8 = vld [vmem:[#allocation6 + $0x8] sm:$0xff]  ;;  %v483_v10 = vld [vmem:[#allocation6 + $0x18] sm:$0xff]  ;;  %v480_v16 = vld [vmem:[#allocation6] sm:$0xff] }
  0x62   :  { %6388 = vmatpush1.bf16.msra.mxu1 %v9307_v5  ;;  %278 = vmatprep.mubr.f32.mxu0 %v11630_v0  ;;  %11901 = vst [vmem:[#allocation32_spill] sm:$0xff] %v9377_v4  ;;  %11902 = vst [vmem:[#allocation33_spill] sm:$0xff] %v9379_v6  ;;  %v485_v9 = vld [vmem:[#allocation6 + $0x28] sm:$0xff]  ;;  %v487_v15 = vld [vmem:[#allocation6 + $0x38] sm:$0xff] }
  0x63   :  { %391 = vmatprep.mubr.f32.mxu1 %v11630_v0  ;;  %6009 = vmatmul.mubr.msk.f32.gmra.mrb[8].mxu0 %vm152_vm1, %v74_v11  ;;  %11903 = vst [vmem:[#allocation34_spill] sm:$0xff] %v9383_v7  ;;  %v484_v17 = vld [vmem:[#allocation6 + $0x20] sm:$0xff]  ;;  %v9400_v19 = vpack.c.bf16 %v487_v15, %v483_v10  ;;  %v482_v21 = vld [vmem:[#allocation6 + $0x10] sm:$0xff]  ;;  %v493_v32 = vld [vmem:[#allocation6 + $0x68] sm:$0xff] }
  0x64   :  { %6019 = vmatmul.mubr.msk.f32.gmra.mrb[8].mxu1 %vm152_vm1, %v74_v11  ;;  %6358 = vmatprep.subr.bf16.mxu0 %v9316_v12  ;;  %v9398_v11 = vpack.c.bf16 %v485_v9, %v481_v8  ;;  %v9402_v20 = vpack.c.bf16 %v484_v17, %v480_v16  ;;  %v486_v22 = vld [vmem:[#allocation6 + $0x30] sm:$0xff]  ;;  %v491_v33 = vld [vmem:[#allocation6 + $0x58] sm:$0xff]  ;;  %v488_v40 = vld [vmem:[#allocation6 + $0x40] sm:$0xff] }
  0x65   :  { %6390 = vmatprep.subr.bf16.mxu1 %v9320_v13  ;;  %6360 = vmatpush1.bf16.msra.mxu0 %v9322_v14  ;;  %11905 = vst [vmem:[#allocation36_spill] sm:$0xff] %v9400_v19  ;;  %v9405_v26 = vpack.c.bf16 %v486_v22, %v482_v21  ;;  %v495_v39 = vld [vmem:[#allocation6 + $0x78] sm:$0xff]  ;;  %v492_v41 = vld [vmem:[#allocation6 + $0x60] sm:$0xff]  ;;  %v494_v52 = vld [vmem:[#allocation6 + $0x70] sm:$0xff] }
  0x66   :  { %6392 = vmatpush1.bf16.msra.mxu1 %v9326_v18  ;;  %284 = vmatprep.mubr.f32.mxu0 %v11630_v0  ;;  %11904 = vst [vmem:[#allocation35_spill] sm:$0xff] %v9398_v11  ;;  %11906 = vst [vmem:[#allocation37_spill] sm:$0xff] %v9402_v20  ;;  %v9412_v43 = vpack.c.bf16 %v495_v39, %v491_v33  ;;  %v9414_v44 = vpack.c.bf16 %v492_v41, %v488_v40  ;;  %v497_v54 = vld [vmem:[#allocation6 + $0x88] sm:$0xff]  ;;  %v499_v58 = vld [vmem:[#allocation6 + $0x98] sm:$0xff] }
  0x67   :  { %397 = vmatprep.mubr.f32.mxu1 %v11630_v0  ;;  %6010 = vmatmul.mubr.msk.f32.gmra.mrb[10].mxu0 %vm152_vm1, %v75_v27  ;;  %11907 = vst [vmem:[#allocation38_spill] sm:$0xff] %v9405_v26  ;;  %v501_v57 = vld [vmem:[#allocation6 + $0xa8] sm:$0xff]  ;;  %v503_v60 = vld [vmem:[#allocation6 + $0xb8] sm:$0xff]  ;;  %v496_v61 = vld [vmem:[#allocation6 + $0x80] sm:$0xff] }
  0x68   :  { %6020 = vmatmul.mubr.msk.f32.gmra.mrb[10].mxu1 %vm152_vm1, %v75_v27  ;;  %6362 = vmatprep.subr.bf16.mxu0 %v9335_v28  ;;  %v489_v27 = vld [vmem:[#allocation6 + $0x48] sm:$0xff]  ;;  %11909 = vst [vmem:[#allocation40_spill] sm:$0xff] %v9412_v43  ;;  %11910 = vst [vmem:[#allocation41_spill] sm:$0xff] %v9414_v44  ;;  %v9422_v59 = vpack.c.bf16 %v501_v57, %v497_v54  ;;  %v9424_v8 = vpack.c.bf16 %v503_v60, %v499_v58  ;;  %v498_v10 = vld [vmem:[#allocation6 + $0x90] sm:$0xff] }
  0x69   :  { %6394 = vmatprep.subr.bf16.mxu1 %v9339_v30  ;;  %6364 = vmatpush1.bf16.msra.mxu0 %v9341_v31  ;;  %v9410_v34 = vpack.c.bf16 %v493_v32, %v489_v27  ;;  %v502_v15 = vld [vmem:[#allocation6 + $0xb0] sm:$0xff]  ;;  %v505_v17 = vld [vmem:[#allocation6 + $0xc8] sm:$0xff]  ;;  %v507_v22 = vld [vmem:[#allocation6 + $0xd8] sm:$0xff] }
  0x6a   :  { %6396 = vmatpush1.bf16.msra.mxu1 %v9345_v35  ;;  %290 = vmatprep.mubr.f32.mxu0 %v11630_v0  ;;  %11912 = vst [vmem:[#allocation43_spill] sm:$0xff] %v9422_v59  ;;  %11913 = vst [vmem:[#allocation44_spill] sm:$0xff] %v9424_v8  ;;  %v9429_v16 = vpack.c.bf16 %v502_v15, %v498_v10  ;;  %v509_v21 = vld [vmem:[#allocation6 + $0xe8] sm:$0xff]  ;;  %v511_v32 = vld [vmem:[#allocation6 + $0xf8] sm:$0xff] }
  0x6b   :  { %403 = vmatprep.mubr.f32.mxu1 %v11630_v0  ;;  %6011 = vmatmul.mubr.msk.f32.gmra.mrb[12].mxu0 %vm152_vm1, %v76_v45  ;;  %11908 = vst [vmem:[#allocation39_spill] sm:$0xff] %v9410_v34  ;;  %v9434_v27 = vpack.c.bf16 %v509_v21, %v505_v17  ;;  %v504_v33 = vld [vmem:[#allocation6 + $0xc0] sm:$0xff]  ;;  %v9436_v40 = vpack.c.bf16 %v511_v32, %v507_v22  ;;  %v513_v57 = vld [vmem:[#allocation6 + $0x108] sm:$0xff]  ;;  %v515_v60 = vld [vmem:[#allocation6 + $0x118] sm:$0xff] }
  0x6c   :  { %6021 = vmatmul.mubr.msk.f32.gmra.mrb[12].mxu1 %vm152_vm1, %v76_v45  ;;  %6366 = vmatprep.subr.bf16.mxu0 %v9354_v46  ;;  %v490_v45 = vld [vmem:[#allocation6 + $0x50] sm:$0xff]  ;;  %11915 = vst [vmem:[#allocation46_spill] sm:$0xff] %v9429_v16  ;;  %v508_v39 = vld [vmem:[#allocation6 + $0xe0] sm:$0xff]  ;;  %v517_v58 = vld [vmem:[#allocation6 + $0x128] sm:$0xff] }
  0x6d   :  { %6398 = vmatprep.subr.bf16.mxu1 %v9358_v47  ;;  %6368 = vmatpush1.bf16.msra.mxu0 %v9360_v48  ;;  %v9417_v53 = vpack.c.bf16 %v494_v52, %v490_v45  ;;  %11916 = vst [vmem:[#allocation47_spill] sm:$0xff] %v9434_v27  ;;  %11917 = vst [vmem:[#allocation48_spill] sm:$0xff] %v9436_v40  ;;  %v9438_v41 = vpack.c.bf16 %v508_v39, %v504_v33  ;;  %v506_v45 = vld [vmem:[#allocation6 + $0xd0] sm:$0xff]  ;;  %v512_v10 = vld [vmem:[#allocation6 + $0x100] sm:$0xff] }
  0x6e   :  { %6400 = vmatpush1.bf16.msra.mxu1 %v9364_v56  ;;  %296 = vmatprep.mubr.f32.mxu0 %v11630_v0  ;;  %v510_v52 = vld [vmem:[#allocation6 + $0xf0] sm:$0xff]  ;;  %v516_v15 = vld [vmem:[#allocation6 + $0x120] sm:$0xff]  ;;  %v521_v39 = vld [vmem:[#allocation6 + $0x148] sm:$0xff] }
  0x6f   :  { %409 = vmatprep.mubr.f32.mxu1 %v11630_v0  ;;  %6012 = vmatmul.mubr.msk.f32.gmra.mrb[14].mxu0 %vm152_vm1, %v77_v2  ;;  %11911 = vst [vmem:[#allocation42_spill] sm:$0xff] %v9417_v53  ;;  %11918 = vst [vmem:[#allocation49_spill] sm:$0xff] %v9438_v41  ;;  %v9441_v54 = vpack.c.bf16 %v510_v52, %v506_v45  ;;  %v9450_v21 = vpack.c.bf16 %v516_v15, %v512_v10  ;;  %v514_v22 = vld [vmem:[#allocation6 + $0x110] sm:$0xff]  ;;  %v525_v45 = vld [vmem:[#allocation6 + $0x168] sm:$0xff] }
  0x70   :  { %6022 = vmatmul.mubr.msk.f32.gmra.mrb[14].mxu1 %vm152_vm1, %v77_v2  ;;  %6370 = vmatprep.subr.bf16.mxu0 %v9373_v3  ;;  %v500_v2 = vld [vmem:[#allocation6 + $0xa0] sm:$0xff]  ;;  %v518_v32 = vld [vmem:[#allocation6 + $0x130] sm:$0xff]  ;;  %v523_v52 = vld [vmem:[#allocation6 + $0x158] sm:$0xff] }
  0x71   :  { %6402 = vmatprep.subr.bf16.mxu1 %v9377_v4  ;;  %6372 = vmatpush1.bf16.msra.mxu0 %v9379_v6  ;;  %v9426_v9 = vpack.c.bf16 %v500_v2, %v496_v61  ;;  %11919 = vst [vmem:[#allocation50_spill] sm:$0xff] %v9441_v54  ;;  %v9446_v61 = vpack.c.bf16 %v517_v58, %v513_v57  ;;  %v519_v2 = vld [vmem:[#allocation6 + $0x138] sm:$0xff]  ;;  %11922 = vst [vmem:[#allocation53_spill] sm:$0xff] %v9450_v21 }
  0x72   :  { %6404 = vmatpush1.bf16.msra.mxu1 %v9383_v7  ;;  %694 = vmatprep.mubr.f32.mxu0 %v11630_v0  ;;  %v9448_v17 = vpack.c.bf16 %v519_v2, %v515_v60  ;;  %v9453_v33 = vpack.c.bf16 %v518_v32, %v514_v22  ;;  %v9458_v57 = vpack.c.bf16 %v525_v45, %v521_v39  ;;  %v527_v58 = vld [vmem:[#allocation6 + $0x178] sm:$0xff]  ;;  %v520_v60 = vld [vmem:[#allocation6 + $0x140] sm:$0xff]  ;;  %v522_v22 = vld [vmem:[#allocation6 + $0x150] sm:$0xff] }
  0x73   :  { %765 = vmatprep.mubr.f32.mxu1 %v11630_v0  ;;  %6406 = vmatprep.subr.bf16.mxu0 %v9398_v11  ;;  %11914 = vst [vmem:[#allocation45_spill] sm:$0xff] %v9426_v9  ;;  %11920 = vst [vmem:[#allocation51_spill] sm:$0xff] %v9446_v61  ;;  %v524_v2 = vld [vmem:[#allocation6 + $0x160] sm:$0xff]  ;;  %v9460_v10 = vpack.c.bf16 %v527_v58, %v523_v52  ;;  %v526_v32 = vld [vmem:[#allocation6 + $0x170] sm:$0xff] }
  0x74   :  { %695 = vmatmul.mubr.f32.vlgmr.msra.gmra.mrb[16].mxu0 %v11630_v0  ;;  %6470 = vmatprep.subr.bf16.mxu1 %v9400_v19  ;;  %11921 = vst [vmem:[#allocation52_spill] sm:$0xff] %v9448_v17  ;;  %11923 = vst [vmem:[#allocation54_spill] sm:$0xff] %v9453_v33  ;;  %v9462_v15 = vpack.c.bf16 %v524_v2, %v520_v60  ;;  %v533_v39 = vld [vmem:[#allocation6 + $0x1a8] sm:$0xff]  ;;  %v531_v45 = vld [vmem:[#allocation6 + $0x198] sm:$0xff] }
  0x75   :  { %766 = vmatmul.mubr.f32.vlgmr.msra.gmra.mrb[16].mxu1 %v11630_v0  ;;  %1154 = vmatprep.mubr.f32.mxu0 %v11630_v0  ;;  %11924 = vst [vmem:[#allocation55_spill] sm:$0xff] %v9458_v57  ;;  %11925 = vst [vmem:[#allocation56_spill] sm:$0xff] %v9460_v10  ;;  %v535_v52 = vld [vmem:[#allocation6 + $0x1b8] sm:$0xff]  ;;  %v528_v58 = vld [vmem:[#allocation6 + $0x180] sm:$0xff] }
  0x76   :  { %1225 = vmatprep.mubr.f32.mxu1 %v11630_v0  ;;  %6408 = vmatpush1.bf16.msra.mxu0 %v9402_v20  ;;  %11926 = vst [vmem:[#allocation57_spill] sm:$0xff] %v9462_v15  ;;  %v9465_v0 = vpack.c.bf16 %v526_v32, %v522_v22  ;;  %v532_v60 = vld [vmem:[#allocation6 + $0x1a0] sm:$0xff]  ;;  %v9472_v2 = vpack.c.bf16 %v535_v52, %v531_v45  ;;  %v530_v22 = vld [vmem:[#allocation6 + $0x190] sm:$0xff]  ;;  %v543_v45 = vld [vmem:[#allocation6 + $0x1f8] sm:$0xff] }
  0x77   :  { %6472 = vmatpush1.bf16.msra.mxu1 %v9405_v26  ;;  %6410 = vmatprep.subr.bf16.mxu0 %v9410_v34  ;;  %v534_v32 = vld [vmem:[#allocation6 + $0x1b0] sm:$0xff]  ;;  %v536_v52 = vld [vmem:[#allocation6 + $0x1c0] sm:$0xff] }
  0x78   :  { %6474 = vmatprep.subr.bf16.mxu1 %v9412_v43  ;;  %11927 = vst [vmem:[#allocation58_spill] sm:$0xff] %v9465_v0  ;;  %11929 = vst [vmem:[#allocation60_spill] sm:$0xff] %v9472_v2  ;;  %v130_v43 = vld [vmem:[%s11624_s3] sm:$0xf] }
  0x7a   :  { %6412 = vmatpush1.bf16.msra.mxu0 %v9414_v44 }
  0x7b   :  { %6476 = vmatpush1.bf16.msra.mxu1 %v9417_v53  ;;  %6414 = vmatprep.subr.bf16.mxu0 %v9422_v59 }
  0x7c   :  { %6478 = vmatprep.subr.bf16.mxu1 %v9424_v8 }
  0x7e   :  { %6416 = vmatpush1.bf16.msra.mxu0 %v9426_v9 }
  0x7f   :  { %6480 = vmatpush1.bf16.msra.mxu1 %v9429_v16  ;;  %6418 = vmatprep.subr.bf16.mxu0 %v9434_v27  ;;  %v571_v27 = vld [vmem:[#allocation6 + $0x2d8] sm:$0xff] }
  0x80   :  { %6482 = vmatprep.subr.bf16.mxu1 %v9436_v40  ;;  %v563_v40 = vld [vmem:[#allocation6 + $0x298] sm:$0xff] }
  0x81   :  { %v575_v16 = vld [vmem:[#allocation6 + $0x2f8] sm:$0xff] }
  0x82   :  { %6420 = vmatpush1.bf16.msra.mxu0 %v9438_v41  ;;  %v561_v41 = vld [vmem:[#allocation6 + $0x288] sm:$0xff] }
  0x83   :  { %6484 = vmatpush1.bf16.msra.mxu1 %v9441_v54  ;;  %6422 = vmatprep.subr.bf16.mxu0 %v9446_v61  ;;  %v547_v61 = vld [vmem:[#allocation6 + $0x218] sm:$0xff] }
  0x84   :  { %6486 = vmatprep.subr.bf16.mxu1 %v9448_v17  ;;  %v9474_v17 = vpack.c.bf16 %v532_v60, %v528_v58  ;;  %v540_v58 = vld [vmem:[#allocation6 + $0x1e0] sm:$0xff]  ;;  %v551_v54 = vld [vmem:[#allocation6 + $0x238] sm:$0xff] }
  0x86   :  { %6424 = vmatpush1.bf16.msra.mxu0 %v9450_v21  ;;  %11930 = vst [vmem:[#allocation61_spill] sm:$0xff] %v9474_v17 }
  0x87   :  { %6488 = vmatpush1.bf16.msra.mxu1 %v9453_v33  ;;  %6426 = vmatprep.subr.bf16.mxu0 %v9458_v57  ;;  %v529_v33 = vld [vmem:[#allocation6 + $0x188] sm:$0xff]  ;;  %v9486_v57 = vpack.c.bf16 %v540_v58, %v536_v52  ;;  %v546_v52 = vld [vmem:[#allocation6 + $0x210] sm:$0xff] }
  0x88   :  { %6490 = vmatprep.subr.bf16.mxu1 %v9460_v10  ;;  %v9470_v21 = vpack.c.bf16 %v533_v39, %v529_v33  ;;  %v9477_v10 = vpack.c.bf16 %v534_v32, %v530_v22  ;;  %v541_v33 = vld [vmem:[#allocation6 + $0x1e8] sm:$0xff]  ;;  %v539_v39 = vld [vmem:[#allocation6 + $0x1d8] sm:$0xff]  ;;  %v538_v22 = vld [vmem:[#allocation6 + $0x1d0] sm:$0xff] }
  0x89   :  { %v9484_v60 = vpack.c.bf16 %v543_v45, %v539_v39  ;;  %11934 = vst [vmem:[#allocation65_spill] sm:$0xff] %v9486_v57  ;;  %v542_v32 = vld [vmem:[#allocation6 + $0x1f0] sm:$0xff]  ;;  %v544_v39 = vld [vmem:[#allocation6 + $0x200] sm:$0xff] }
  0x8a   :  { %6428 = vmatpush1.bf16.msra.mxu0 %v9462_v15  ;;  %11928 = vst [vmem:[#allocation59_spill] sm:$0xff] %v9470_v21  ;;  %11931 = vst [vmem:[#allocation62_spill] sm:$0xff] %v9477_v10  ;;  %v548_v45 = vld [vmem:[#allocation6 + $0x220] sm:$0xff] }
  0x8b   :  { %6492 = vmatpush1.bf16.msra.mxu1 %v9465_v0  ;;  %6430 = vmatprep.subr.bf16.mxu0 %v9470_v21  ;;  %v537_v0 = vld [vmem:[#allocation6 + $0x1c8] sm:$0xff]  ;;  %11933 = vst [vmem:[#allocation64_spill] sm:$0xff] %v9484_v60  ;;  %v9498_v58 = vpack.c.bf16 %v548_v45, %v544_v39  ;;  %v558_v39 = vld [vmem:[#allocation6 + $0x270] sm:$0xff] }
  0x8c   :  { %6494 = vmatprep.subr.bf16.mxu1 %v9472_v2  ;;  %v9482_v15 = vpack.c.bf16 %v541_v33, %v537_v0  ;;  %v545_v21 = vld [vmem:[#allocation6 + $0x208] sm:$0xff]  ;;  %v9495_v33 = vpack.c.bf16 %v551_v54, %v547_v61  ;;  %v555_v54 = vld [vmem:[#allocation6 + $0x258] sm:$0xff] }
  0x8d   :  { %v549_v2 = vld [vmem:[#allocation6 + $0x228] sm:$0xff]  ;;  %11938 = vst [vmem:[#allocation69_spill] sm:$0xff] %v9498_v58  ;;  %v559_v61 = vld [vmem:[#allocation6 + $0x278] sm:$0xff] }
  0x8e   :  { %6432 = vmatpush1.bf16.msra.mxu0 %v9474_v17  ;;  %11932 = vst [vmem:[#allocation63_spill] sm:$0xff] %v9482_v15  ;;  %v9489_v17 = vpack.c.bf16 %v542_v32, %v538_v22  ;;  %v9493_v0 = vpack.c.bf16 %v549_v2, %v545_v21  ;;  %11937 = vst [vmem:[#allocation68_spill] sm:$0xff] %v9495_v33  ;;  %v550_v22 = vld [vmem:[#allocation6 + $0x230] sm:$0xff]  ;;  %v553_v32 = vld [vmem:[#allocation6 + $0x248] sm:$0xff] }
  0x8f   :  { %6496 = vmatpush1.bf16.msra.mxu1 %v9477_v10  ;;  %6434 = vmatprep.subr.bf16.mxu0 %v9482_v15  ;;  %v557_v15 = vld [vmem:[#allocation6 + $0x268] sm:$0xff]  ;;  %v552_v2 = vld [vmem:[#allocation6 + $0x240] sm:$0xff] }
  0x90   :  { %11935 = vst [vmem:[#allocation66_spill] sm:$0xff] %v9489_v17  ;;  %6498 = vmatprep.subr.bf16.mxu1 %v9484_v60  ;;  %11936 = vst [vmem:[#allocation67_spill] sm:$0xff] %v9493_v0  ;;  %v9502_v60 = vpack.c.bf16 %v550_v22, %v546_v52  ;;  %v9504_v21 = vpack.c.bf16 %v557_v15, %v553_v32  ;;  %v556_v10 = vld [vmem:[#allocation6 + $0x260] sm:$0xff]  ;;  %v567_v22 = vld [vmem:[#allocation6 + $0x2b8] sm:$0xff] }
  0x91   :  { %v9509_v45 = vpack.c.bf16 %v556_v10, %v552_v2  ;;  %v560_v32 = vld [vmem:[#allocation6 + $0x280] sm:$0xff]  ;;  %v562_v10 = vld [vmem:[#allocation6 + $0x290] sm:$0xff] }
  0x92   :  { %6436 = vmatpush1.bf16.msra.mxu0 %v9486_v57  ;;  %11939 = vst [vmem:[#allocation70_spill] sm:$0xff] %v9502_v60  ;;  %11940 = vst [vmem:[#allocation71_spill] sm:$0xff] %v9504_v21  ;;  %v9506_v57 = vpack.c.bf16 %v559_v61, %v555_v54  ;;  %v564_v54 = vld [vmem:[#allocation6 + $0x2a0] sm:$0xff]  ;;  %v9518_v61 = vpack.c.bf16 %v567_v22, %v563_v40  ;;  %v566_v2 = vld [vmem:[#allocation6 + $0x2b0] sm:$0xff]  ;;  %v9530_v22 = vpack.c.bf16 %v575_v16, %v571_v27 }
  0x93   :  { %6500 = vmatpush1.bf16.msra.mxu1 %v9489_v17  ;;  %6438 = vmatprep.subr.bf16.mxu0 %v9493_v0  ;;  %v554_v17 = vld [vmem:[#allocation6 + $0x250] sm:$0xff]  ;;  %11942 = vst [vmem:[#allocation73_spill] sm:$0xff] %v9509_v45  ;;  %v565_v0 = vld [vmem:[#allocation6 + $0x2a8] sm:$0xff]  ;;  %v568_v40 = vld [vmem:[#allocation6 + $0x2c0] sm:$0xff] }
  0x94   :  { %6502 = vmatprep.subr.bf16.mxu1 %v9495_v33  ;;  %11941 = vst [vmem:[#allocation72_spill] sm:$0xff] %v9506_v57  ;;  %v9513_v15 = vpack.c.bf16 %v558_v39, %v554_v17  ;;  %v9515_v52 = vpack.c.bf16 %v565_v0, %v561_v41  ;;  %11945 = vst [vmem:[#allocation76_spill] sm:$0xff] %v9518_v61  ;;  %v573_v33 = vld [vmem:[#allocation6 + $0x2e8] sm:$0xff]  ;;  %v9525_v41 = vpack.c.bf16 %v566_v2, %v562_v10  ;;  %v572_v0 = vld [vmem:[#allocation6 + $0x2e0] sm:$0xff] }
  0x95   :  { %v570_v39 = vld [vmem:[#allocation6 + $0x2d0] sm:$0xff]  ;;  %11949 = vst [vmem:[#allocation80_spill] sm:$0xff] %v9530_v22  ;;  %v576_v10 = vld [vmem:[#allocation6 + $0x300] sm:$0xff] }
  0x96   :  { %6440 = vmatpush1.bf16.msra.mxu0 %v9498_v58  ;;  %11943 = vst [vmem:[#allocation74_spill] sm:$0xff] %v9513_v15  ;;  %11944 = vst [vmem:[#allocation75_spill] sm:$0xff] %v9515_v52  ;;  %v569_v58 = vld [vmem:[#allocation6 + $0x2c8] sm:$0xff]  ;;  %v580_v16 = vld [vmem:[#allocation6 + $0x320] sm:$0xff] }
  0x97   :  { %6504 = vmatpush1.bf16.msra.mxu1 %v9502_v60  ;;  %6442 = vmatprep.subr.bf16.mxu0 %v9504_v21  ;;  %v9521_v21 = vpack.c.bf16 %v564_v54, %v560_v32  ;;  %11947 = vst [vmem:[#allocation78_spill] sm:$0xff] %v9525_v41  ;;  %v9527_v17 = vpack.c.bf16 %v573_v33, %v569_v58  ;;  %v577_v60 = vld [vmem:[#allocation6 + $0x308] sm:$0xff]  ;;  %v579_v32 = vld [vmem:[#allocation6 + $0x318] sm:$0xff]  ;;  %v578_v27 = vld [vmem:[#allocation6 + $0x310] sm:$0xff] }
  0x98   :  { %6506 = vmatprep.subr.bf16.mxu1 %v9506_v57  ;;  %v574_v57 = vld [vmem:[#allocation6 + $0x2f0] sm:$0xff]  ;;  %v583_v54 = vld [vmem:[#allocation6 + $0x338] sm:$0xff] }
  0x99   :  { %11946 = vst [vmem:[#allocation77_spill] sm:$0xff] %v9521_v21  ;;  %11948 = vst [vmem:[#allocation79_spill] sm:$0xff] %v9527_v17  ;;  %v9537_v33 = vpack.c.bf16 %v574_v57, %v570_v39  ;;  %v9542_v2 = vpack.c.bf16 %v583_v54, %v579_v32  ;;  %v588_v39 = vld [vmem:[#allocation6 + $0x360] sm:$0xff]  ;;  %v586_v32 = vld [vmem:[#allocation6 + $0x350] sm:$0xff] }
  0x9a   :  { %6444 = vmatpush1.bf16.msra.mxu0 %v9509_v45  ;;  %v581_v45 = vld [vmem:[#allocation6 + $0x328] sm:$0xff] }
  0x9b   :  { %6508 = vmatpush1.bf16.msra.mxu1 %v9513_v15  ;;  %6446 = vmatprep.subr.bf16.mxu0 %v9515_v52  ;;  %v9533_v15 = vpack.c.bf16 %v572_v0, %v568_v40  ;;  %11951 = vst [vmem:[#allocation82_spill] sm:$0xff] %v9537_v33  ;;  %v9539_v58 = vpack.c.bf16 %v581_v45, %v577_v60  ;;  %11953 = vst [vmem:[#allocation84_spill] sm:$0xff] %v9542_v2  ;;  %v585_v52 = vld [vmem:[#allocation6 + $0x348] sm:$0xff]  ;;  %v587_v40 = vld [vmem:[#allocation6 + $0x358] sm:$0xff] }
  0x9c   :  { %6510 = vmatprep.subr.bf16.mxu1 %v9518_v61  ;;  %v582_v61 = vld [vmem:[#allocation6 + $0x330] sm:$0xff]  ;;  %v591_v0 = vld [vmem:[#allocation6 + $0x378] sm:$0xff]  ;;  %v584_v45 = vld [vmem:[#allocation6 + $0x340] sm:$0xff] }
  0x9d   :  { %11950 = vst [vmem:[#allocation81_spill] sm:$0xff] %v9533_v15  ;;  %11952 = vst [vmem:[#allocation83_spill] sm:$0xff] %v9539_v58  ;;  %v9549_v57 = vpack.c.bf16 %v582_v61, %v578_v27  ;;  %v9554_v54 = vpack.c.bf16 %v591_v0, %v587_v40  ;;  %v592_v61 = vld [vmem:[#allocation6 + $0x380] sm:$0xff]  ;;  %v594_v40 = vld [vmem:[#allocation6 + $0x390] sm:$0xff] }
  0x9e   :  { %6448 = vmatpush1.bf16.msra.mxu0 %v9521_v21  ;;  %v589_v21 = vld [vmem:[#allocation6 + $0x368] sm:$0xff]  ;;  %v596_v27 = vld [vmem:[#allocation6 + $0x3a0] sm:$0xff] }
  0x9f   :  { %6512 = vmatpush1.bf16.msra.mxu1 %v9525_v41  ;;  %6450 = vmatprep.subr.bf16.mxu0 %v9527_v17  ;;  %v9545_v41 = vpack.c.bf16 %v580_v16, %v576_v10  ;;  %11955 = vst [vmem:[#allocation86_spill] sm:$0xff] %v9549_v57  ;;  %v9551_v60 = vpack.c.bf16 %v589_v21, %v585_v52  ;;  %11957 = vst [vmem:[#allocation88_spill] sm:$0xff] %v9554_v54  ;;  %v593_v17 = vld [vmem:[#allocation6 + $0x388] sm:$0xff]  ;;  %v595_v10 = vld [vmem:[#allocation6 + $0x398] sm:$0xff] }
  0xa0   :  { %6514 = vmatprep.subr.bf16.mxu1 %v9530_v22  ;;  %v590_v22 = vld [vmem:[#allocation6 + $0x370] sm:$0xff]  ;;  %v599_v16 = vld [vmem:[#allocation6 + $0x3b8] sm:$0xff] }
  0xa1   :  { %11954 = vst [vmem:[#allocation85_spill] sm:$0xff] %v9545_v41  ;;  %11956 = vst [vmem:[#allocation87_spill] sm:$0xff] %v9551_v60  ;;  %v9561_v21 = vpack.c.bf16 %v590_v22, %v586_v32  ;;  %v9566_v0 = vpack.c.bf16 %v599_v16, %v595_v10  ;;  %v600_v22 = vld [vmem:[#allocation6 + $0x3c0] sm:$0xff]  ;;  %v602_v16 = vld [vmem:[#allocation6 + $0x3d0] sm:$0xff] }
  0xa2   :  { %6452 = vmatpush1.bf16.msra.mxu0 %v9533_v15  ;;  %v597_v15 = vld [vmem:[#allocation6 + $0x3a8] sm:$0xff]  ;;  %v604_v32 = vld [vmem:[#allocation6 + $0x3e0] sm:$0xff] }
  0xa3   :  { %6516 = vmatpush1.bf16.msra.mxu1 %v9537_v33  ;;  %6454 = vmatprep.subr.bf16.mxu0 %v9539_v58  ;;  %v9557_v33 = vpack.c.bf16 %v588_v39, %v584_v45  ;;  %11959 = vst [vmem:[#allocation90_spill] sm:$0xff] %v9561_v21  ;;  %v9563_v52 = vpack.c.bf16 %v597_v15, %v593_v17  ;;  %11961 = vst [vmem:[#allocation92_spill] sm:$0xff] %v9566_v0  ;;  %v601_v58 = vld [vmem:[#allocation6 + $0x3c8] sm:$0xff]  ;;  %v603_v45 = vld [vmem:[#allocation6 + $0x3d8] sm:$0xff] }
  0xa4   :  { %6518 = vmatprep.subr.bf16.mxu1 %v9542_v2  ;;  %v598_v2 = vld [vmem:[#allocation6 + $0x3b0] sm:$0xff]  ;;  %v607_v39 = vld [vmem:[#allocation6 + $0x3f8] sm:$0xff] }
  0xa5   :  { %11958 = vst [vmem:[#allocation89_spill] sm:$0xff] %v9557_v33  ;;  %11960 = vst [vmem:[#allocation91_spill] sm:$0xff] %v9563_v52  ;;  %v9573_v15 = vpack.c.bf16 %v598_v2, %v594_v40  ;;  %v9578_v10 = vpack.c.bf16 %v607_v39, %v603_v45 }
  0xa6   :  { %6456 = vmatpush1.bf16.msra.mxu0 %v9545_v41  ;;  %v605_v41 = vld [vmem:[#allocation6 + $0x3e8] sm:$0xff] }
  0xa7   :  { %6520 = vmatpush1.bf16.msra.mxu1 %v9549_v57  ;;  %6458 = vmatprep.subr.bf16.mxu0 %v9551_v60  ;;  %v9569_v57 = vpack.c.bf16 %v596_v27, %v592_v61  ;;  %11963 = vst [vmem:[#allocation94_spill] sm:$0xff] %v9573_v15  ;;  %v9575_v17 = vpack.c.bf16 %v605_v41, %v601_v58  ;;  %11965 = vst [vmem:[#allocation96_spill] sm:$0xff] %v9578_v10 }
  0xa8   :  { %6522 = vmatprep.subr.bf16.mxu1 %v9554_v54  ;;  %v606_v54 = vld [vmem:[#allocation6 + $0x3f0] sm:$0xff]  ;;  %v9581_v61 = vpack.c.bf16 %v604_v32, %v600_v22 }
  0xa9   :  { %11962 = vst [vmem:[#allocation93_spill] sm:$0xff] %v9569_v57  ;;  %11964 = vst [vmem:[#allocation95_spill] sm:$0xff] %v9575_v17  ;;  %v9585_v2 = vpack.c.bf16 %v606_v54, %v602_v16 }
  0xaa   :  { %6460 = vmatpush1.bf16.msra.mxu0 %v9557_v33  ;;  %11966 = vst [vmem:[#allocation97_spill] sm:$0xff] %v9581_v61 }
  0xab   :  { %6524 = vmatpush1.bf16.msra.mxu1 %v9561_v21  ;;  %6462 = vmatprep.subr.bf16.mxu0 %v9563_v52  ;;  %11967 = vst [vmem:[#allocation98_spill] sm:$0xff] %v9585_v2 }
  0xac   :  { %6526 = vmatprep.subr.bf16.mxu1 %v9566_v0 }
  0xae   :  { %6464 = vmatpush1.bf16.msra.mxu0 %v9569_v57 }
  0xaf   :  { %6528 = vmatpush1.bf16.msra.mxu1 %v9573_v15  ;;  %6466 = vmatprep.subr.bf16.mxu0 %v9575_v17  ;;  %v132_v15 = vlaneseq }
  0xb0   :  { %6530 = vmatprep.subr.bf16.mxu1 %v9578_v10 }
  0xb1   :  { %v9622_v33 = vshrl.u32 %v132_v15, 7 }
  0xb2   :  { %6468 = vmatpush1.bf16.msra.mxu0 %v9581_v61 }
  0xb3   :  { %6532 = vmatpush1.bf16.msra.mxu1 %v9585_v2  ;;  %6534 = vmatprep.subr.bf16.mxu0 %v9243_v23  ;;  %v11780_v53 = vsub.s32 0, %v9622_v33  ;;  %v11789_v20 = vsub.s32 1, %v9622_v33  ;;  %v11792_v19 = vsub.s32 2, %v9622_v33 }
  0xb4   :  { %6566 = vmatprep.subr.bf16.mxu1 %v9245_v24 }
  0xb5   :  { %v135_v11 = vrot.slane %v130_v43, %v11780_v53  ;;  %v9652_v56 = vrot.slane %v130_v43, %v11789_v20  ;;  %v9656_v48 = vrot.slane %v130_v43, %v11792_v19 }
 0x126   :  { %v256_v41 = vpop.f32.mrb[0].mxu0 }
 0x127   :  { %v9589_v58 = vpop.f32.mrb[1].mxu0  ;;  %v9591_v27 = vpop.f32.mrb[0].mxu1  ;;  %v9659_v46 = vadd.f32 %v256_v41, %v135_v11 }
 0x128   :  { %v9595_v40 = vpop.f32.mrb[1].mxu1 }
 0x129   :  { %11968 = vst [vmem:[#allocation99_spill] sm:$0xff] %v9659_v46 }
 0x12a   :  { %v262_v45 = vpop.f32.mrb[2].mxu0 }
 0x12b   :  { %v9598_v54 = vpop.f32.mrb[3].mxu0  ;;  %v9600_v39 = vpop.f32.mrb[2].mxu1  ;;  %v9661_v53 = vadd.f32 %v262_v45, %v135_v11 }
 0x12c   :  { %v9602_v22 = vpop.f32.mrb[3].mxu1 }
 0x12d   :  { %11969 = vst [vmem:[#allocation100_spill] sm:$0xff] %v9661_v53 }
 0x12e   :  { %v268_v32 = vpop.f32.mrb[4].mxu0 }
 0x12f   :  { %v9604_v16 = vpop.f32.mrb[5].mxu0  ;;  %v9606_v61 = vpop.f32.mrb[4].mxu1  ;;  %v9663_v35 = vadd.f32 %v268_v32, %v135_v11 }
 0x130   :  { %v9608_v10 = vpop.f32.mrb[5].mxu1 }
 0x131   :  { %11970 = vst [vmem:[#allocation101_spill] sm:$0xff] %v9663_v35 }
 0x132   :  { %v274_v2 = vpop.f32.mrb[6].mxu0 }
 0x133   :  { %v9610_v23 = vpop.f32.mrb[7].mxu0  ;;  %v9612_v17 = vpop.f32.mrb[6].mxu1  ;;  %v9665_v31 = vadd.f32 %v274_v2, %v135_v11 }
 0x134   :  { %v9614_v24 = vpop.f32.mrb[7].mxu1 }
 0x135   :  { %11971 = vst [vmem:[#allocation102_spill] sm:$0xff] %v9665_v31 }
 0x136   :  { %v280_v57 = vpop.f32.mrb[8].mxu0 }
 0x137   :  { %v9616_v0 = vpop.f32.mrb[9].mxu0  ;;  %v9618_v52 = vpop.f32.mrb[8].mxu1  ;;  %v9667_v30 = vadd.f32 %v280_v57, %v135_v11 }
 0x138   :  { %v9620_v21 = vpop.f32.mrb[9].mxu1 }
 0x139   :  { %11972 = vst [vmem:[#allocation103_spill] sm:$0xff] %v9667_v30 }
 0x13a   :  { %v286_v60 = vpop.f32.mrb[10].mxu0 }
 0x13b   :  { %v9624_v9 = vpop.f32.mrb[11].mxu0  ;;  %v9626_v8 = vpop.f32.mrb[10].mxu1  ;;  %v9669_v28 = vadd.f32 %v286_v60, %v135_v11 }
 0x13c   :  { %v9628_v59 = vpop.f32.mrb[11].mxu1 }
 0x13d   :  { %11973 = vst [vmem:[#allocation104_spill] sm:$0xff] %v9669_v28 }
 0x13e   :  { %v292_v44 = vpop.f32.mrb[12].mxu0 }
 0x13f   :  { %v9634_v34 = vpop.f32.mrb[13].mxu0  ;;  %v9636_v26 = vpop.f32.mrb[12].mxu1  ;;  %v9671_v20 = vadd.f32 %v292_v44, %v135_v11 }
 0x140   :  { %v9638_v15 = vpop.f32.mrb[13].mxu1 }
 0x141   :  { %11974 = vst [vmem:[#allocation105_spill] sm:$0xff] %v9671_v20 }
 0x142   :  { %v298_v7 = vpop.f32.mrb[14].mxu0 }
 0x143   :  { %v9644_v6 = vpop.f32.mrb[15].mxu0  ;;  %v9646_v4 = vpop.f32.mrb[14].mxu1  ;;  %v9673_v18 = vadd.f32 %v298_v7, %v135_v11 }
 0x144   :  { %v9648_v3 = vpop.f32.mrb[15].mxu1 }
 0x145   :  { %11975 = vst [vmem:[#allocation106_spill] sm:$0xff] %v9673_v18 }
 0x147   :  { %v696_v19 = vpop.f32.mrb[16].mxu0 }
 0x148   :  { %v776_v14 = vrot.slane %v696_v19, 1  ;;  %v780_v13 = vrot.slane %v696_v19, 2  ;;  %v784_v47 = vrot.slane %v696_v19, 3  ;;  %v788_v41 = vrot.slane %v696_v19, 4  ;;  %v9675_v12 = vpop.f32.mrb[16].mxu1  ;;  %v9677_v45 = vpop.f32.mrb[17].mxu0 }
 0x149   :  { %v792_v32 = vrot.slane %v696_v19, 5  ;;  %v796_v2 = vrot.slane %v696_v19, 6  ;;  %v800_v5 = vrot.slane %v696_v19, 7  ;;  %v836_v57 = vadd.f32 %v696_v19, %v9659_v46  ;;  %v9680_v60 = vpop.f32.mrb[17].mxu1 }
 0x14a   :  { %v840_v44 = vadd.f32 %v776_v14, %v9661_v53  ;;  %v844_v7 = vadd.f32 %v780_v13, %v9663_v35  ;;  %v848_v11 = vadd.f32 %v784_v47, %v9665_v31  ;;  %v852_v1 = vadd.f32 %v788_v41, %v9667_v30 }
 0x14b   :  { %v856_v63 = vadd.f32 %v792_v32, %v9669_v28  ;;  %v860_v62 = vadd.f32 %v796_v2, %v9671_v20  ;;  %v6023_v55 = vmul.f32 -1.442695, %v836_v57  ;;  %v864_v51 = vadd.f32 %v800_v5, %v9673_v18 }
 0x14c   :  { %v6024_v50 = vmul.f32 -1.442695, %v840_v44  ;;  %v6025_v49 = vmul.f32 -1.442695, %v844_v7  ;;  %v6026_v19 = vmul.f32 -1.442695, %v848_v11  ;;  %v9691_v46 = vadd.f32 %v9589_v58, %v9652_v56 }
 0x14d   :  { %v11977_v13 = vsub.s32 3, %v9622_v33  ;;  %7909 = vpow2.f32 %v6023_v55  ;;  %v6027_v47 = vmul.f32 -1.442695, %v852_v1  ;;  %v9699_v41 = vadd.f32 %v9591_v27, %v9656_v48 }
 0x14e   :  { %11976 = vst [vmem:[#allocation107_spill] sm:$0xff] %v9691_v46  ;;  %7911 = vpow2.f32 %v6024_v50  ;;  %v6028_v32 = vmul.f32 -1.442695, %v856_v63  ;;  %v778_v5 = vrot.slane %v9675_v12, 1  ;;  %v9704_v2 = vadd.f32 %v9600_v39, %v9656_v48 }
 0x14f   :  { %v9695_v14 = vrot.slane %v130_v43, %v11977_v13  ;;  %11978 = vst [vmem:[#allocation108_spill] sm:$0xff] %v9699_v41  ;;  %7913 = vpow2.f32 %v6025_v49  ;;  %v6029_v58 = vmul.f32 -1.442695, %v860_v62  ;;  %v782_v57 = vrot.slane %v9675_v12, 2 }
 0x150   :  { %11979 = vst [vmem:[#allocation109_spill] sm:$0xff] %v9704_v2  ;;  %v9709_v55 = vadd.f32 %v9606_v61, %v9656_v48  ;;  %7915 = vpow2.f32 %v6026_v19  ;;  %v6030_v1 = vmul.f32 -1.442695, %v864_v51  ;;  %v786_v43 = vrot.slane %v9675_v12, 3 }
 0x151   :  { %v9714_v50 = vadd.f32 %v9618_v52, %v9656_v48  ;;  %7917 = vpow2.f32 %v6027_v47  ;;  %v790_v63 = vrot.slane %v9675_v12, 4  ;;  %v838_v49 = vadd.f32 %v9675_v12, %v9699_v41 }
 0x152   :  { %11980 = vst [vmem:[#allocation110_spill] sm:$0xff] %v9709_v55  ;;  %v9721_v62 = vadd.f32 %v9595_v40, %v9695_v14  ;;  %v9725_v61 = vadd.f32 %v9612_v17, %v9656_v48  ;;  %7919 = vpow2.f32 %v6028_v32  ;;  %v842_v51 = vadd.f32 %v778_v5, %v9704_v2 }
 0x153   :  { %11981 = vst [vmem:[#allocation111_spill] sm:$0xff] %v9714_v50  ;;  %v9730_v52 = vadd.f32 %v9598_v54, %v9652_v56  ;;  %v9734_v27 = vadd.f32 %v9602_v22, %v9695_v14  ;;  %7921 = vpow2.f32 %v6029_v58  ;;  %v846_v39 = vadd.f32 %v782_v57, %v9709_v55 }
 0x154   :  { %11982 = vst [vmem:[#allocation112_spill] sm:$0xff] %v9721_v62  ;;  %11983 = vst [vmem:[#allocation113_spill] sm:$0xff] %v9725_v61  ;;  %v9739_v40 = vadd.f32 %v9604_v16, %v9652_v56  ;;  %v9743_v17 = vadd.f32 %v9608_v10, %v9695_v14  ;;  %7923 = vpow2.f32 %v6030_v1  ;;  %v850_v44 = vadd.f32 %v786_v43, %v9725_v61 }
 0x155   :  { %11984 = vst [vmem:[#allocation114_spill] sm:$0xff] %v9730_v52  ;;  %v9748_v54 = vadd.f32 %v9610_v23, %v9652_v56  ;;  %v9752_v22 = vadd.f32 %v9614_v24, %v9695_v14  ;;  %v854_v7 = vadd.f32 %v790_v63, %v9714_v50  ;;  %7925 = vtanh.f32 %v838_v49 }
 0x156   :  { %11985 = vst [vmem:[#allocation115_spill] sm:$0xff] %v9739_v40  ;;  %v9757_v16 = vadd.f32 %v9616_v0, %v9652_v56  ;;  %v9761_v10 = vadd.f32 %v9626_v8, %v9656_v48  ;;  %v794_v11 = vrot.slane %v9675_v12, 5  ;;  %7927 = vtanh.f32 %v842_v51 }
 0x157   :  { %11986 = vst [vmem:[#allocation116_spill] sm:$0xff] %v9748_v54  ;;  %v7910_v23 = vpop.eup %7909  ;;  %v9766_v19 = vadd.f32 %v9620_v21, %v9695_v14  ;;  %v9770_v24 = vadd.f32 %v9636_v26, %v9656_v48  ;;  %v798_v13 = vrot.slane %v9675_v12, 6  ;;  %7929 = vtanh.f32 %v846_v39 }
 0x158   :  { %11987 = vst [vmem:[#allocation117_spill] sm:$0xff] %v9757_v16  ;;  %11988 = vst [vmem:[#allocation118_spill] sm:$0xff] %v9761_v10  ;;  %v7912_v0 = vpop.eup %7911  ;;  %v9775_v8 = vadd.f32 %v9624_v9, %v9652_v56  ;;  %v9779_v47 = vadd.f32 %v9634_v34, %v9652_v56  ;;  %v892_v32 = vadd.f32 1.0, %v7910_v23  ;;  %7931 = vtanh.f32 %v850_v44 }
 0x159   :  { %11989 = vst [vmem:[#allocation119_spill] sm:$0xff] %v9770_v24  ;;  %v7914_v21 = vpop.eup %7913  ;;  %v9783_v5 = vadd.f32 %v9646_v4, %v9656_v48  ;;  %v893_v26 = vadd.f32 1.0, %v7912_v0  ;;  %v802_v58 = vrot.slane %v9675_v12, 7  ;;  %7933 = vtanh.f32 %v854_v7 }
 0x15a   :  { %11990 = vst [vmem:[#allocation120_spill] sm:$0xff] %v9775_v8  ;;  %11991 = vst [vmem:[#allocation121_spill] sm:$0xff] %v9779_v47  ;;  %v7916_v57 = vpop.eup %7915  ;;  %v894_v1 = vadd.f32 1.0, %v7914_v21  ;;  %7935 = vrcp.f32 %v892_v32  ;;  %v858_v9 = vadd.f32 %v794_v11, %v9761_v10  ;;  %v777_v43 = vrot.slane %v9677_v45, 1 }
 0x15b   :  { %11992 = vst [vmem:[#allocation122_spill] sm:$0xff] %v9783_v5  ;;  %v7918_v34 = vpop.eup %7917  ;;  %v895_v63 = vadd.f32 1.0, %v7916_v57  ;;  %7937 = vrcp.f32 %v893_v26  ;;  %v862_v49 = vadd.f32 %v798_v13, %v9770_v24  ;;  %v781_v51 = vrot.slane %v9677_v45, 2 }
 0x15c   :  { %v7920_v48 = vpop.eup %7919  ;;  %v896_v4 = vadd.f32 1.0, %v7918_v34  ;;  %7939 = vrcp.f32 %v894_v1  ;;  %v785_v12 = vrot.slane %v9677_v45, 3  ;;  %v789_v39 = vrot.slane %v9677_v45, 4 }
 0x15d   :  { %v7922_v44 = vpop.eup %7921  ;;  %v897_v7 = vadd.f32 1.0, %v7920_v48  ;;  %7941 = vrcp.f32 %v895_v63  ;;  %v793_v11 = vrot.slane %v9677_v45, 5  ;;  %v837_v23 = vadd.f32 %v9677_v45, %v9691_v46 }
 0x15e   :  { %v7924_v0 = vpop.eup %7923  ;;  %v898_v32 = vadd.f32 1.0, %v7922_v44  ;;  %7943 = vrcp.f32 %v896_v4  ;;  %v797_v13 = vrot.slane %v9677_v45, 6  ;;  %v841_v21 = vadd.f32 %v777_v43, %v9730_v52 }
 0x15f   :  { %v7926_v26 = vpop.eup %7925  ;;  %v899_v57 = vadd.f32 1.0, %v7924_v0  ;;  %7945 = vrcp.f32 %v897_v7  ;;  %v801_v1 = vrot.slane %v9677_v45, 7  ;;  %v845_v34 = vadd.f32 %v781_v51, %v9739_v40 }
 0x160   :  { %v7928_v63 = vpop.eup %7927  ;;  %7947 = vrcp.f32 %v898_v32  ;;  %v866_v48 = vadd.f32 %v802_v58, %v9783_v5  ;;  %v849_v46 = vadd.f32 %v785_v12, %v9748_v54  ;;  %v853_v44 = vadd.f32 %v789_v39, %v9757_v16 }
 0x161   :  { %v7930_v4 = vpop.eup %7929  ;;  %v9804_v24 = vadd.f32 %v9644_v6, %v9652_v56  ;;  %7949 = vrcp.f32 %v899_v57  ;;  %v857_v43 = vadd.f32 %v793_v11, %v9775_v8  ;;  %v6031_v7 = vmul.f32 -1.442695, %v837_v23 }
 0x162   :  { %v7932_v45 = vpop.eup %7931  ;;  %7951 = vtanh.f32 %v858_v9  ;;  %v861_v51 = vadd.f32 %v797_v13, %v9779_v47  ;;  %v6032_v0 = vmul.f32 -1.442695, %v841_v21  ;;  %v779_v58 = vrot.slane %v9680_v60, 1 }
 0x163   :  { %11993 = vst [vmem:[#allocation123_spill] sm:$0xff] %v9804_v24  ;;  %v7934_v32 = vpop.eup %7933  ;;  %7953 = vtanh.f32 %v862_v49  ;;  %v865_v12 = vadd.f32 %v801_v1, %v9804_v24  ;;  %v6033_v39 = vmul.f32 -1.442695, %v845_v34  ;;  %v783_v5 = vrot.slane %v9680_v60, 2 }
 0x164   :  { %v7936_v56 = vpop.eup %7935  ;;  %7955 = vtanh.f32 %v866_v48  ;;  %v6034_v6 = vmul.f32 -1.442695, %v849_v46  ;;  %v6035_v57 = vmul.f32 -1.442695, %v853_v44  ;;  %v787_v11 = vrot.slane %v9680_v60, 3 }
 0x165   :  { %v7938_v23 = vpop.eup %7937  ;;  %7957 = vpow2.f32 %v6031_v7  ;;  %v9812_v9 = vmul.f32 %v7936_v56, %v7926_v26  ;;  %v791_v13 = vrot.slane %v9680_v60, 4  ;;  %v839_v49 = vadd.f32 %v9680_v60, %v9721_v62 }
 0x166   :  { %v7940_v21 = vpop.eup %7939  ;;  %7959 = vpow2.f32 %v6032_v0  ;;  %v6036_v1 = vmul.f32 -1.442695, %v857_v43  ;;  %v9817_v34 = vmul.f32 %v7938_v23, %v7928_v63  ;;  %v843_v48 = vadd.f32 %v779_v58, %v9734_v27 }
 0x167   :  { %v7942_v46 = vpop.eup %7941  ;;  %7961 = vpow2.f32 %v6033_v39  ;;  %v6037_v44 = vmul.f32 -1.442695, %v861_v51  ;;  %v9820_v24 = vmul.f32 %v7940_v21, %v7930_v4  ;;  %v847_v26 = vadd.f32 %v783_v5, %v9743_v17 }
 0x168   :  { %v7944_v7 = vpop.eup %7943  ;;  %7963 = vpow2.f32 %v6034_v6  ;;  %v6038_v56 = vmul.f32 -1.442695, %v865_v12  ;;  %v851_v47 = vadd.f32 %v787_v11, %v9752_v22  ;;  %v9824_v62 = vmul.f32 %v7942_v46, %v7932_v45 }
 0x169   :  { %v7946_v0 = vpop.eup %7945  ;;  %7965 = vpow2.f32 %v6035_v57  ;;  %v855_v63 = vadd.f32 %v791_v13, %v9766_v19  ;;  %v6039_v43 = vmul.f32 -1.442695, %v839_v49  ;;  %v9827_v58 = vmul.f32 %v7944_v7, %v7934_v32 }
 0x16a   :  { %v7948_v39 = vpop.eup %7947  ;;  %7967 = vpow2.f32 %v6036_v1  ;;  %v6040_v4 = vmul.f32 -1.442695, %v843_v48  ;;  %v6041_v5 = vmul.f32 -1.442695, %v847_v26  ;;  %v6042_v12 = vmul.f32 -1.442695, %v851_v47 }
 0x16b   :  { %v7950_v51 = vpop.eup %7949  ;;  %7969 = vpow2.f32 %v6037_v44  ;;  %v6043_v45 = vmul.f32 -1.442695, %v855_v63  ;;  %v9833_v13 = vadd.f32 %v9628_v59, %v9695_v14  ;;  %v795_v32 = vrot.slane %v9680_v60, 5 }
 0x16c   :  { %v7952_v23 = vpop.eup %7951  ;;  %7971 = vpow2.f32 %v6038_v56  ;;  %v9840_v1 = vadd.f32 %v9638_v15, %v9695_v14  ;;  %v799_v47 = vrot.slane %v9680_v60, 6 }
 0x16d   :  { %v7954_v6 = vpop.eup %7953  ;;  %7973 = vpow2.f32 %v6039_v43  ;;  %v9829_v11 = vmul.f32 %v7952_v23, %v7946_v0  ;;  %v859_v0 = vadd.f32 %v795_v32, %v9833_v13 }
 0x16e   :  { %v7956_v57 = vpop.eup %7955  ;;  %7975 = vpow2.f32 %v6040_v4  ;;  %v9836_v49 = vmul.f32 %v7954_v6, %v7948_v39  ;;  %v863_v15 = vadd.f32 %v799_v47, %v9840_v1 }
 0x16f   :  { %v7958_v21 = vpop.eup %7957  ;;  %7977 = vpow2.f32 %v6041_v5  ;;  %v9843_v48 = vmul.f32 %v7956_v57, %v7950_v51 }
 0x170   :  { %v7960_v46 = vpop.eup %7959  ;;  %v940_v44 = vadd.f32 1.0, %v7958_v21  ;;  %7979 = vpow2.f32 %v6042_v12  ;;  %v9849_v12 = vadd.f32 %v9648_v3, %v9695_v14  ;;  %v803_v21 = vrot.slane %v9680_v60, 7 }
 0x171   :  { %v7962_v59 = vpop.eup %7961  ;;  %v941_v26 = vadd.f32 1.0, %v7960_v46  ;;  %7981 = vpow2.f32 %v6043_v45  ;;  %v6044_v45 = vmul.f32 -1.442695, %v859_v0  ;;  %v6045_v47 = vmul.f32 -1.442695, %v863_v15 }
 0x172   :  { %v7964_v7 = vpop.eup %7963  ;;  %v942_v56 = vadd.f32 1.0, %v7962_v59  ;;  %7983 = vrcp.f32 %v940_v44  ;;  %v867_v14 = vadd.f32 %v803_v21, %v9849_v12 }
 0x173   :  { %v7966_v63 = vpop.eup %7965  ;;  %v943_v43 = vadd.f32 1.0, %v7964_v7  ;;  %7985 = vrcp.f32 %v941_v26 }
 0x174   :  { %v7968_v39 = vpop.eup %7967  ;;  %v944_v4 = vadd.f32 1.0, %v7966_v63  ;;  %7987 = vrcp.f32 %v942_v56 }
 0x175   :  { %v7970_v51 = vpop.eup %7969  ;;  %v945_v5 = vadd.f32 1.0, %v7968_v39  ;;  %7989 = vrcp.f32 %v943_v43 }
 0x176   :  { %v7972_v23 = vpop.eup %7971  ;;  %v946_v6 = vadd.f32 1.0, %v7970_v51  ;;  %7991 = vrcp.f32 %v944_v4 }
 0x177   :  { %v7974_v57 = vpop.eup %7973  ;;  %v947_v32 = vadd.f32 1.0, %v7972_v23  ;;  %7993 = vrcp.f32 %v945_v5 }
 0x178   :  { %v7976_v46 = vpop.eup %7975  ;;  %7995 = vrcp.f32 %v946_v6  ;;  %v996_v44 = vadd.f32 1.0, %v7974_v57  ;;  %v6046_v6 = vmul.f32 -1.442695, %v867_v14 }
 0x179   :  { %v7978_v59 = vpop.eup %7977  ;;  %7997 = vrcp.f32 %v947_v32  ;;  %v997_v26 = vadd.f32 1.0, %v7976_v46 }
 0x17a   :  { %v7980_v7 = vpop.eup %7979  ;;  %7999 = vpow2.f32 %v6044_v45  ;;  %v998_v56 = vadd.f32 1.0, %v7978_v59 }
 0x17b   :  { %v7982_v3 = vpop.eup %7981  ;;  %8001 = vpow2.f32 %v6045_v47  ;;  %v999_v0 = vadd.f32 1.0, %v7980_v7 }
 0x17c   :  { %v7984_v63 = vpop.eup %7983  ;;  %v1000_v43 = vadd.f32 1.0, %v7982_v3  ;;  %8003 = vrcp.f32 %v996_v44 }
 0x17d   :  { %v7986_v39 = vpop.eup %7985  ;;  %v1020_v60 = vmul.f32 0.0, %v7984_v63  ;;  %8005 = vrcp.f32 %v997_v26 }
 0x17e   :  { %v7988_v15 = vpop.eup %7987  ;;  %v1021_v4 = vmul.f32 0.0, %v7986_v39  ;;  %8007 = vrcp.f32 %v998_v56 }
 0x17f   :  { %v7990_v51 = vpop.eup %7989  ;;  %v1022_v5 = vmul.f32 0.0, %v7988_v15  ;;  %v9854_v23 = vadd.f32 %v9812_v9, %v1020_v60  ;;  %8009 = vrcp.f32 %v999_v0 }
 0x180   :  { %v7992_v45 = vpop.eup %7991  ;;  %v1023_v57 = vmul.f32 0.0, %v7990_v51  ;;  %v9857_v32 = vadd.f32 %v9817_v34, %v1021_v4  ;;  %8011 = vrcp.f32 %v1000_v43 }
 0x181   :  { %v7994_v21 = vpop.eup %7993  ;;  %v1024_v47 = vmul.f32 0.0, %v7992_v45  ;;  %v9860_v46 = vadd.f32 %v9820_v24, %v1022_v5  ;;  %8013 = vtanh.f32 %v9854_v23 }
 0x182   :  { %v7996_v44 = vpop.eup %7995  ;;  %8015 = vtanh.f32 %v9857_v32  ;;  %v1025_v9 = vmul.f32 0.0, %v7994_v21  ;;  %v9865_v59 = vadd.f32 %v9824_v62, %v1023_v57 }
 0x183   :  { %v7998_v26 = vpop.eup %7997  ;;  %8017 = vpow2.f32 %v6046_v6  ;;  %v1026_v7 = vmul.f32 0.0, %v7996_v44  ;;  %v9868_v34 = vadd.f32 %v9827_v58, %v1024_v47 }
 0x184   :  { %v8000_v56 = vpop.eup %7999  ;;  %v1027_v3 = vmul.f32 0.0, %v7998_v26  ;;  %v9871_v24 = vadd.f32 %v9829_v11, %v1025_v9  ;;  %8019 = vtanh.f32 %v9860_v46 }
 0x185   :  { %v8002_v14 = vpop.eup %8001  ;;  %v1001_v0 = vadd.f32 1.0, %v8000_v56  ;;  %v9875_v63 = vadd.f32 %v9836_v49, %v1026_v7  ;;  %8021 = vtanh.f32 %v9865_v59 }
 0x186   :  { %v8004_v62 = vpop.eup %8003  ;;  %v1002_v43 = vadd.f32 1.0, %v8002_v14  ;;  %v9879_v39 = vadd.f32 %v9843_v48, %v1027_v3  ;;  %8023 = vtanh.f32 %v9868_v34 }
 0x187   :  { %v8006_v58 = vpop.eup %8005  ;;  %8025 = vrcp.f32 %v1001_v0 }
 0x188   :  { %v8008_v11 = vpop.eup %8007  ;;  %8027 = vrcp.f32 %v1002_v43 }
 0x189   :  { %v8010_v60 = vpop.eup %8009  ;;  %8029 = vtanh.f32 %v9871_v24 }
 0x18a   :  { %v8012_v15 = vpop.eup %8011  ;;  %8031 = vtanh.f32 %v9875_v63 }
 0x18b   :  { %v8014_v49 = vpop.eup %8013  ;;  %8033 = vtanh.f32 %v9879_v39 }
 0x18c   :  { %v8016_v4 = vpop.eup %8015  ;;  %v1052_v51 = vmul.f32 %v8014_v49, %v8004_v62 }
 0x18d   :  { %v8018_v5 = vpop.eup %8017  ;;  %v1053_v6 = vmul.f32 %v8016_v4, %v8006_v58 }
 0x18e   :  { %v8020_v45 = vpop.eup %8019  ;;  %v1003_v48 = vadd.f32 1.0, %v8018_v5 }
 0x18f   :  { %v8022_v57 = vpop.eup %8021  ;;  %v1054_v21 = vmul.f32 %v8020_v45, %v8008_v11  ;;  %v1068_v47 = vrot.slane %v1053_v6, 7 }
 0x190   :  { %v8024_v44 = vpop.eup %8023  ;;  %8035 = vrcp.f32 %v1003_v48  ;;  %v1055_v9 = vmul.f32 %v8022_v57, %v8010_v60 }
 0x191   :  { %v8026_v26 = vpop.eup %8025  ;;  %v1056_v7 = vmul.f32 %v8024_v44, %v8012_v15  ;;  %v1070_v56 = vsel %vm1069_vm2, %v1068_v47, %v1052_v51  ;;  %v1071_v3 = vrot.slane %v1054_v21, 6 }
 0x192   :  { %v8028_v14 = vpop.eup %8027  ;;  %v1074_v0 = vrot.slane %v1055_v9, 5  ;;  %v11994_v9 = vmov 0.0  }
 0x193   :  { %v8030_v62 = vpop.eup %8029  ;;  %v1073_v43 = vsel %vm1072_vm3, %v1071_v3, %v1070_v56  ;;  %v1077_v58 = vrot.slane %v1056_v7, 4  ;;  %v11996_v7 = vld [vmem:[#allocation12_spill] sm:$0xff]  ;;  %v11997_v56 = vld [vmem:[#allocation13_spill] sm:$0xff]  ;;  %v11998_v3 = vld [vmem:[#allocation14_spill] sm:$0xff] }
 0x194   :  { %v8032_v49 = vpop.eup %8031  ;;  %v1057_v11 = vmul.f32 %v8030_v62, %v8026_v26  ;;  %v1076_v4 = vsel %vm1075_vm4, %v1074_v0, %v1073_v43  ;;  %v11995_v26 = vld [vmem:[#allocation11_spill] sm:$0xff]  ;;  %v12000_v0 = vld [vmem:[#allocation16_spill] sm:$0xff]  ;;  %v12001_v62 = vld [vmem:[#allocation17_spill] sm:$0xff] }
 0x195   :  { %v1058_v5 = vmul.f32 %v8032_v49, %v8028_v14  ;;  %v1079_v60 = vsel %vm1078_vm5, %v1077_v58, %v1076_v4  ;;  %v8034_v6 = vpop.eup %8033  ;;  %v11999_v14 = vld [vmem:[#allocation15_spill] sm:$0xff]  ;;  %v12002_v43 = vld [vmem:[#allocation18_spill] sm:$0xff]  ;;  %v12004_v49 = vld [vmem:[#allocation20_spill] sm:$0xff] }
 0x196   :  { %v1080_v15 = vrot.slane %v1057_v11, 3  ;;  %v12003_v58 = vld [vmem:[#allocation19_spill] sm:$0xff]  ;;  %v12005_v11 = vld [vmem:[#allocation21_spill] sm:$0xff]  ;;  %v12006_v4 = vld [vmem:[#allocation22_spill] sm:$0xff] }
 0x197   :  { %v1083_v51 = vrot.slane %v1058_v5, 2  ;;  %v12007_v5 = vld [vmem:[#allocation23_spill] sm:$0xff] }
 0x198   :  { %v1082_v45 = vsel %vm1081_vm6, %v1080_v15, %v1079_v60  ;;  %v12008_v60 = vld [vmem:[#allocation24_spill] sm:$0xff]  ;;  %v12009_v15 = vld [vmem:[#allocation25_spill] sm:$0xff] }
 0x199   :  { %v1085_v48 = vsel %vm1084_vm7, %v1083_v51, %v1082_v45  ;;  %v12010_v51 = vld [vmem:[#allocation26_spill] sm:$0xff]  ;;  %v12012_v45 = vld [vmem:[#allocation28_spill] sm:$0xff] }
 0x19a   :  { %v8036_v57 = vpop.eup %8035 }
 0x19b   :  { %v1059_v21 = vmul.f32 %v8036_v57, %v8034_v6  ;;  %v12011_v6 = vld [vmem:[#allocation27_spill] sm:$0xff]  ;;  %v12014_v57 = vld [vmem:[#allocation30_spill] sm:$0xff] }
 0x19d   :  { %v1086_v47 = vrot.slane %v1059_v21, 1  ;;  %v12015_v21 = vld [vmem:[#allocation31_spill] sm:$0xff] }
 0x19f   :  { %v1088_v44 = vsel %vm1087_vm8, %v1086_v47, %v1085_v48  ;;  %v12013_v48 = vld [vmem:[#allocation29_spill] sm:$0xff]  ;;  %v12016_v47 = vld [vmem:[#allocation32_spill] sm:$0xff] }
 0x1a0   :  { %1155 = vmatmul.mubr.f32.vlgmr.msra.gmra.mrb[18].mxu0 %v1088_v44  ;;  %1226 = vmatmul.mubr.f32.vlgmr.msra.gmra.mrb[18].mxu1 %v1088_v44 }
 0x1a1   :  { %6536 = vmatpush1.bf16.msra.mxu0 %v9247_v25  ;;  %6568 = vmatpush1.bf16.msra.mxu1 %v9250_v29 }
 0x1a2   :  { %6538 = vmatprep.subr.bf16.mxu0 %v9259_v36  ;;  %6570 = vmatprep.subr.bf16.mxu1 %v9263_v37 }
 0x1a3   :  { %1320 = vmatprep.mubr.f32.mxu0 %v11994_v9  ;;  %1391 = vmatprep.mubr.f32.mxu1 %v11994_v9 }
 0x1a5   :  { %6540 = vmatpush1.bf16.msra.mxu0 %v9265_v38  ;;  %6572 = vmatpush1.bf16.msra.mxu1 %v9269_v42 }
 0x1a6   :  { %6542 = vmatprep.subr.bf16.mxu0 %v11995_v26  ;;  %6574 = vmatprep.subr.bf16.mxu1 %v11996_v7 }
 0x1a9   :  { %6544 = vmatpush1.bf16.msra.mxu0 %v11997_v56  ;;  %6576 = vmatpush1.bf16.msra.mxu1 %v11998_v3 }
 0x1aa   :  { %6546 = vmatprep.subr.bf16.mxu0 %v11999_v14  ;;  %6578 = vmatprep.subr.bf16.mxu1 %v12000_v0  ;;  %v12093_v14 = vld [vmem:[#allocation99_spill] sm:$0xff] }
 0x1ad   :  { %6548 = vmatpush1.bf16.msra.mxu0 %v12001_v62  ;;  %6580 = vmatpush1.bf16.msra.mxu1 %v12002_v43 }
 0x1ae   :  { %6550 = vmatprep.subr.bf16.mxu0 %v12003_v58  ;;  %6582 = vmatprep.subr.bf16.mxu1 %v12004_v49  ;;  %v12089_v49 = vsub.s32 3, %v9622_v33 }
 0x1b1   :  { %6552 = vmatpush1.bf16.msra.mxu0 %v12005_v11  ;;  %6584 = vmatpush1.bf16.msra.mxu1 %v12006_v4  ;;  %v12017_v4 = vld [vmem:[#allocation33_spill] sm:$0xff] }
 0x1b2   :  { %6554 = vmatprep.subr.bf16.mxu0 %v12007_v5  ;;  %6586 = vmatprep.subr.bf16.mxu1 %v12008_v60  ;;  %v12018_v5 = vld [vmem:[#allocation34_spill] sm:$0xff]  ;;  %v12019_v60 = vld [vmem:[#allocation35_spill] sm:$0xff] }
 0x1b5   :  { %6556 = vmatpush1.bf16.msra.mxu0 %v12009_v15  ;;  %6588 = vmatpush1.bf16.msra.mxu1 %v12010_v51  ;;  %v12020_v15 = vld [vmem:[#allocation36_spill] sm:$0xff] }
 0x1b6   :  { %6558 = vmatprep.subr.bf16.mxu0 %v12011_v6  ;;  %6590 = vmatprep.subr.bf16.mxu1 %v12012_v45  ;;  %v12021_v6 = vld [vmem:[#allocation37_spill] sm:$0xff]  ;;  %v12022_v45 = vld [vmem:[#allocation38_spill] sm:$0xff] }
 0x1b9   :  { %6560 = vmatpush1.bf16.msra.mxu0 %v12013_v48  ;;  %6592 = vmatpush1.bf16.msra.mxu1 %v12014_v57  ;;  %v12023_v48 = vld [vmem:[#allocation39_spill] sm:$0xff]  ;;  %v12024_v57 = vld [vmem:[#allocation40_spill] sm:$0xff] }
 0x1ba   :  { %6562 = vmatprep.subr.bf16.mxu0 %v12015_v21  ;;  %6594 = vmatprep.subr.bf16.mxu1 %v12016_v47  ;;  %v12025_v21 = vld [vmem:[#allocation41_spill] sm:$0xff]  ;;  %v12026_v47 = vld [vmem:[#allocation42_spill] sm:$0xff] }
 0x1bd   :  { %6564 = vmatpush1.bf16.msra.mxu0 %v12017_v4  ;;  %6596 = vmatpush1.bf16.msra.mxu1 %v12018_v5  ;;  %v12027_v4 = vld [vmem:[#allocation43_spill] sm:$0xff]  ;;  %v12028_v5 = vld [vmem:[#allocation44_spill] sm:$0xff] }
 0x1be   :  { %6598 = vmatprep.subr.bf16.mxu0 %v12019_v60  ;;  %6662 = vmatprep.subr.bf16.mxu1 %v12020_v15  ;;  %v12029_v60 = vld [vmem:[#allocation45_spill] sm:$0xff]  ;;  %v12030_v15 = vld [vmem:[#allocation46_spill] sm:$0xff] }
 0x1c0   :  { %1321 = vmatmul.mubr.f32.vlgmr.msra.gmra.mrb[20].mxu0 %v1088_v44  ;;  %1392 = vmatmul.mubr.f32.vlgmr.msra.gmra.mrb[20].mxu1 %v1088_v44  ;;  %v12031_v44 = vld [vmem:[#allocation47_spill] sm:$0xff] }
 0x1c1   :  { %6600 = vmatpush1.bf16.msra.mxu0 %v12021_v6  ;;  %6664 = vmatpush1.bf16.msra.mxu1 %v12022_v45  ;;  %v12032_v6 = vld [vmem:[#allocation48_spill] sm:$0xff]  ;;  %v12033_v45 = vld [vmem:[#allocation49_spill] sm:$0xff] }
 0x1c2   :  { %6602 = vmatprep.subr.bf16.mxu0 %v12023_v48  ;;  %6666 = vmatprep.subr.bf16.mxu1 %v12024_v57  ;;  %v12034_v48 = vld [vmem:[#allocation50_spill] sm:$0xff]  ;;  %v12035_v57 = vld [vmem:[#allocation51_spill] sm:$0xff] }
 0x1c5   :  { %6604 = vmatpush1.bf16.msra.mxu0 %v12025_v21  ;;  %6668 = vmatpush1.bf16.msra.mxu1 %v12026_v47  ;;  %v12036_v21 = vld [vmem:[#allocation52_spill] sm:$0xff]  ;;  %v12037_v47 = vld [vmem:[#allocation53_spill] sm:$0xff] }
 0x1c6   :  { %6606 = vmatprep.subr.bf16.mxu0 %v12027_v4  ;;  %6670 = vmatprep.subr.bf16.mxu1 %v12028_v5  ;;  %v12038_v4 = vld [vmem:[#allocation54_spill] sm:$0xff]  ;;  %v12039_v5 = vld [vmem:[#allocation55_spill] sm:$0xff] }
 0x1c9   :  { %6608 = vmatpush1.bf16.msra.mxu0 %v12029_v60  ;;  %6672 = vmatpush1.bf16.msra.mxu1 %v12030_v15  ;;  %v12040_v60 = vld [vmem:[#allocation56_spill] sm:$0xff]  ;;  %v12041_v15 = vld [vmem:[#allocation57_spill] sm:$0xff] }
 0x1ca   :  { %6610 = vmatprep.subr.bf16.mxu0 %v12031_v44  ;;  %6674 = vmatprep.subr.bf16.mxu1 %v12032_v6  ;;  %v12042_v44 = vld [vmem:[#allocation58_spill] sm:$0xff]  ;;  %v12043_v6 = vld [vmem:[#allocation59_spill] sm:$0xff] }
 0x1cd   :  { %6612 = vmatpush1.bf16.msra.mxu0 %v12033_v45  ;;  %6676 = vmatpush1.bf16.msra.mxu1 %v12034_v48  ;;  %v12044_v45 = vld [vmem:[#allocation60_spill] sm:$0xff]  ;;  %v12045_v48 = vld [vmem:[#allocation61_spill] sm:$0xff] }
 0x1ce   :  { %6614 = vmatprep.subr.bf16.mxu0 %v12035_v57  ;;  %6678 = vmatprep.subr.bf16.mxu1 %v12036_v21  ;;  %v12046_v57 = vld [vmem:[#allocation62_spill] sm:$0xff]  ;;  %v12047_v21 = vld [vmem:[#allocation63_spill] sm:$0xff] }
 0x1d1   :  { %6616 = vmatpush1.bf16.msra.mxu0 %v12037_v47  ;;  %6680 = vmatpush1.bf16.msra.mxu1 %v12038_v4  ;;  %v12048_v47 = vld [vmem:[#allocation64_spill] sm:$0xff]  ;;  %v12049_v4 = vld [vmem:[#allocation65_spill] sm:$0xff] }
 0x1d2   :  { %6618 = vmatprep.subr.bf16.mxu0 %v12039_v5  ;;  %6682 = vmatprep.subr.bf16.mxu1 %v12040_v60  ;;  %v12050_v5 = vld [vmem:[#allocation66_spill] sm:$0xff]  ;;  %v12051_v60 = vld [vmem:[#allocation67_spill] sm:$0xff] }
 0x1d5   :  { %6620 = vmatpush1.bf16.msra.mxu0 %v12041_v15  ;;  %6684 = vmatpush1.bf16.msra.mxu1 %v12042_v44  ;;  %v12052_v15 = vld [vmem:[#allocation68_spill] sm:$0xff]  ;;  %v12053_v44 = vld [vmem:[#allocation69_spill] sm:$0xff] }
 0x1d6   :  { %6622 = vmatprep.subr.bf16.mxu0 %v12043_v6  ;;  %6686 = vmatprep.subr.bf16.mxu1 %v12044_v45  ;;  %v12054_v6 = vld [vmem:[#allocation70_spill] sm:$0xff]  ;;  %v12055_v45 = vld [vmem:[#allocation71_spill] sm:$0xff] }
 0x1d9   :  { %6624 = vmatpush1.bf16.msra.mxu0 %v12045_v48  ;;  %6688 = vmatpush1.bf16.msra.mxu1 %v12046_v57  ;;  %v12056_v48 = vld [vmem:[#allocation72_spill] sm:$0xff]  ;;  %v12057_v57 = vld [vmem:[#allocation73_spill] sm:$0xff] }
 0x1da   :  { %6626 = vmatprep.subr.bf16.mxu0 %v12047_v21  ;;  %6690 = vmatprep.subr.bf16.mxu1 %v12048_v47  ;;  %v12058_v21 = vld [vmem:[#allocation74_spill] sm:$0xff]  ;;  %v12059_v47 = vld [vmem:[#allocation75_spill] sm:$0xff] }
 0x1dd   :  { %6628 = vmatpush1.bf16.msra.mxu0 %v12049_v4  ;;  %6692 = vmatpush1.bf16.msra.mxu1 %v12050_v5  ;;  %v12060_v4 = vld [vmem:[#allocation76_spill] sm:$0xff]  ;;  %v12061_v5 = vld [vmem:[#allocation77_spill] sm:$0xff] }
 0x1de   :  { %6630 = vmatprep.subr.bf16.mxu0 %v12051_v60  ;;  %6694 = vmatprep.subr.bf16.mxu1 %v12052_v15  ;;  %v12062_v60 = vld [vmem:[#allocation78_spill] sm:$0xff]  ;;  %v12063_v15 = vld [vmem:[#allocation79_spill] sm:$0xff] }
 0x1e1   :  { %6632 = vmatpush1.bf16.msra.mxu0 %v12053_v44  ;;  %6696 = vmatpush1.bf16.msra.mxu1 %v12054_v6  ;;  %v12064_v44 = vld [vmem:[#allocation80_spill] sm:$0xff]  ;;  %v12065_v6 = vld [vmem:[#allocation81_spill] sm:$0xff] }
 0x1e2   :  { %6634 = vmatprep.subr.bf16.mxu0 %v12055_v45  ;;  %6698 = vmatprep.subr.bf16.mxu1 %v12056_v48  ;;  %v12066_v45 = vld [vmem:[#allocation82_spill] sm:$0xff]  ;;  %v12067_v48 = vld [vmem:[#allocation83_spill] sm:$0xff] }
 0x1e5   :  { %6636 = vmatpush1.bf16.msra.mxu0 %v12057_v57  ;;  %6700 = vmatpush1.bf16.msra.mxu1 %v12058_v21  ;;  %v12068_v57 = vld [vmem:[#allocation84_spill] sm:$0xff]  ;;  %v12069_v21 = vld [vmem:[#allocation85_spill] sm:$0xff] }
 0x1e6   :  { %6638 = vmatprep.subr.bf16.mxu0 %v12059_v47  ;;  %6702 = vmatprep.subr.bf16.mxu1 %v12060_v4  ;;  %v12070_v47 = vld [vmem:[#allocation86_spill] sm:$0xff]  ;;  %v12071_v4 = vld [vmem:[#allocation87_spill] sm:$0xff] }
 0x1e9   :  { %6640 = vmatpush1.bf16.msra.mxu0 %v12061_v5  ;;  %6704 = vmatpush1.bf16.msra.mxu1 %v12062_v60  ;;  %v12072_v5 = vld [vmem:[#allocation88_spill] sm:$0xff]  ;;  %v12073_v60 = vld [vmem:[#allocation89_spill] sm:$0xff] }
 0x1ea   :  { %6642 = vmatprep.subr.bf16.mxu0 %v12063_v15  ;;  %6706 = vmatprep.subr.bf16.mxu1 %v12064_v44  ;;  %v12074_v15 = vld [vmem:[#allocation90_spill] sm:$0xff]  ;;  %v12075_v44 = vld [vmem:[#allocation91_spill] sm:$0xff] }
 0x1ed   :  { %6644 = vmatpush1.bf16.msra.mxu0 %v12065_v6  ;;  %6708 = vmatpush1.bf16.msra.mxu1 %v12066_v45  ;;  %v12076_v6 = vld [vmem:[#allocation92_spill] sm:$0xff]  ;;  %v12077_v45 = vld [vmem:[#allocation93_spill] sm:$0xff] }
 0x1ee   :  { %6646 = vmatprep.subr.bf16.mxu0 %v12067_v48  ;;  %6710 = vmatprep.subr.bf16.mxu1 %v12068_v57  ;;  %v12078_v48 = vld [vmem:[#allocation94_spill] sm:$0xff]  ;;  %v12079_v57 = vld [vmem:[#allocation95_spill] sm:$0xff] }
 0x1f1   :  { %6648 = vmatpush1.bf16.msra.mxu0 %v12069_v21  ;;  %6712 = vmatpush1.bf16.msra.mxu1 %v12070_v47  ;;  %v12080_v21 = vld [vmem:[#allocation96_spill] sm:$0xff]  ;;  %v12081_v47 = vld [vmem:[#allocation97_spill] sm:$0xff] }
 0x1f2   :  { %6650 = vmatprep.subr.bf16.mxu0 %v12071_v4  ;;  %6714 = vmatprep.subr.bf16.mxu1 %v12072_v5  ;;  %v12082_v4 = vld [vmem:[#allocation98_spill] sm:$0xff]  ;;  %v12083_v5 = vld [vmem:[#allocation9_spill] sm:$0xff] }
 0x1f5   :  { %6652 = vmatpush1.bf16.msra.mxu0 %v12073_v60  ;;  %6716 = vmatpush1.bf16.msra.mxu1 %v12074_v15  ;;  %v12084_v60 = vld [vmem:[#allocation10_spill] sm:$0xff] }
 0x1f6   :  { %6654 = vmatprep.subr.bf16.mxu0 %v12075_v44  ;;  %6718 = vmatprep.subr.bf16.mxu1 %v12076_v6  ;;  %v608_v6 = vld [vmem:[%s11626_s5] sm:$0xf] }
 0x1f7   :  { %v10005_v58 = vrot.slane %v608_v6, %v12089_v49 }
 0x1f9   :  { %6656 = vmatpush1.bf16.msra.mxu0 %v12077_v45  ;;  %6720 = vmatpush1.bf16.msra.mxu1 %v12078_v48  ;;  %v12085_v45 = vsub.s32 0, %v9622_v33  ;;  %12090 = vst [vmem:[#allocation126_spill] sm:$0xff] %v10005_v58 }
 0x1fa   :  { %6658 = vmatprep.subr.bf16.mxu0 %v12079_v57  ;;  %6722 = vmatprep.subr.bf16.mxu1 %v12080_v21  ;;  %v12087_v57 = vsub.s32 1, %v9622_v33 }
 0x1fb   :  { %v9995_v44 = vrot.slane %v608_v6, %v12085_v45  ;;  %v12091_v45 = vsub.s32 2, %v9622_v33 }
 0x1fc   :  { %v9999_v48 = vrot.slane %v608_v6, %v12087_v57 }
 0x1fd   :  { %6660 = vmatpush1.bf16.msra.mxu0 %v12081_v47  ;;  %6724 = vmatpush1.bf16.msra.mxu1 %v12082_v4  ;;  %12086 = vst [vmem:[#allocation124_spill] sm:$0xff] %v9995_v44  ;;  %v10009_v57 = vrot.slane %v608_v6, %v12091_v45 }
 0x1fe   :  { %6726 = vmatprep.subr.bf16.mxu0 %v12083_v5  ;;  %6758 = vmatprep.subr.bf16.mxu1 %v12084_v60  ;;  %12088 = vst [vmem:[#allocation125_spill] sm:$0xff] %v9999_v48 }
 0x1ff   :  { %12092 = vst [vmem:[#allocation127_spill] sm:$0xff] %v10009_v57 }
 0x273   :  { %v1156_v21 = vpop.f32.mrb[18].mxu0  ;;  %v1227_v47 = vpop.f32.mrb[18].mxu1 }
 0x274   :  { %v1157_v4 = vadd.f32 %v1156_v21, %v9995_v44  ;;  %v1158_v15 = vpop.f32.mrb[19].mxu0  ;;  %v1229_v5 = vpop.f32.mrb[19].mxu1  ;;  %v1228_v21 = vadd.f32 %v1227_v47, %v10009_v57 }
 0x275   :  { %v1159_v60 = vadd.f32 %v1158_v15, %v9999_v48  ;;  %v1230_v43 = vadd.f32 %v1229_v5, %v10005_v58 }
 0x276   :  { %v6047_v51 = vmul.f32 -1.442695, %v1157_v4 }
 0x277   :  { %v6048_v11 = vmul.f32 -1.442695, %v1159_v60  ;;  %v6049_v44 = vmul.f32 -1.442695, %v1230_v43 }
 0x278   :  { %8037 = vpow2.f32 %v6047_v51 }
 0x279   :  { %8039 = vpow2.f32 %v6048_v11 }
 0x27a   :  { %8041 = vtanh.f32 %v1228_v21 }
 0x27b   :  { %8043 = vpow2.f32 %v6049_v44 }
 0x282   :  { %v8038_v62 = vpop.eup %8037 }
 0x283   :  { %v8040_v0 = vpop.eup %8039  ;;  %v1235_v15 = vadd.f32 1.0, %v8038_v62 }
 0x284   :  { %v1241_v4 = vadd.f32 1.0, %v8040_v0  ;;  %v8042_v49 = vpop.eup %8041 }
 0x285   :  { %8045 = vrcp.f32 %v1235_v15  ;;  %v8044_v60 = vpop.eup %8043 }
 0x286   :  { %8047 = vrcp.f32 %v1241_v4  ;;  %v1248_v5 = vadd.f32 1.0, %v8044_v60 }
 0x288   :  { %8049 = vrcp.f32 %v1248_v5 }
 0x28f   :  { %v8046_v11 = vpop.eup %8045 }
 0x290   :  { %v8048_v51 = vpop.eup %8047  ;;  %v1252_v33 = vmul.f32 %v8046_v11, %v8042_v49 }
 0x291   :  { %v1251_v6 = vmul.f32 0.0, %v8048_v51 }
 0x293   :  { %v10013_v45 = vadd.f32 %v1252_v33, %v1251_v6  ;;  %v1322_v58 = vpop.f32.mrb[20].mxu0  ;;  %v10015_v47 = vpop.f32.mrb[20].mxu1 }
 0x294   :  { %v1402_v43 = vrot.slane %v1322_v58, 7  ;;  %v1406_v57 = vrot.slane %v1322_v58, 1  ;;  %v1410_v62 = vrot.slane %v1322_v58, 2  ;;  %v1414_v21 = vrot.slane %v1322_v58, 3  ;;  %v10017_v0 = vpop.f32.mrb[21].mxu0  ;;  %v10019_v44 = vpop.f32.mrb[21].mxu1 }
 0x295   :  { %v1418_v15 = vrot.slane %v1322_v58, 4  ;;  %v1422_v4 = vrot.slane %v1322_v58, 5  ;;  %v1426_v48 = vrot.slane %v1322_v58, 6  ;;  %v1466_v11 = vadd.f32 %v1322_v58, %v9661_v53 }
 0x296   :  { %v1462_v49 = vadd.f32 %v1402_v43, %v12093_v14  ;;  %v1470_v60 = vadd.f32 %v1406_v57, %v9663_v35  ;;  %v1474_v51 = vadd.f32 %v1410_v62, %v9665_v31  ;;  %v1478_v33 = vadd.f32 %v1414_v21, %v9667_v30 }
 0x297   :  { %v1482_v6 = vadd.f32 %v1418_v15, %v9669_v28  ;;  %v1486_v3 = vadd.f32 %v1422_v4, %v9671_v20  ;;  %v6051_v7 = vmul.f32 -1.442695, %v1466_v11  ;;  %8051 = vtanh.f32 %v10013_v45 }
 0x298   :  { %v6050_v56 = vmul.f32 -1.442695, %v1462_v49  ;;  %v6052_v26 = vmul.f32 -1.442695, %v1470_v60  ;;  %v1490_v43 = vadd.f32 %v1426_v48, %v9673_v18  ;;  %v6053_v14 = vmul.f32 -1.442695, %v1474_v51 }
 0x299   :  { %v6054_v58 = vmul.f32 -1.442695, %v1478_v33  ;;  %v1404_v57 = vrot.slane %v10015_v47, 7  ;;  %v6055_v5 = vmul.f32 -1.442695, %v1482_v6  ;;  %v1408_v21 = vrot.slane %v10015_v47, 1 }
 0x29a   :  { %8053 = vpow2.f32 %v6050_v56  ;;  %v6056_v62 = vmul.f32 -1.442695, %v1486_v3  ;;  %v6057_v15 = vmul.f32 -1.442695, %v1490_v43  ;;  %v1412_v4 = vrot.slane %v10015_v47, 2  ;;  %v12097_v18 = vld [vmem:[#allocation121_spill] sm:$0xff] }
 0x29b   :  { %8055 = vpow2.f32 %v6051_v7  ;;  %v1416_v49 = vrot.slane %v10015_v47, 3  ;;  %v1464_v48 = vadd.f32 %v1404_v57, %v9699_v41  ;;  %v1468_v56 = vadd.f32 %v10015_v47, %v9704_v2 }
 0x29c   :  { %8057 = vpow2.f32 %v6052_v26  ;;  %v1472_v7 = vadd.f32 %v1408_v21, %v9709_v55  ;;  %v10038_v26 = vpop.eup %8049  ;;  %v1476_v3 = vadd.f32 %v1412_v4, %v9725_v61  ;;  %v1467_v33 = vadd.f32 %v10017_v0, %v9730_v52  ;;  %v12095_v61 = vld [vmem:[#allocation107_spill] sm:$0xff] }
 0x29d   :  { %8059 = vpow2.f32 %v6053_v14  ;;  %v1420_v14 = vrot.slane %v10015_v47, 4  ;;  %v1480_v11 = vadd.f32 %v1416_v49, %v9714_v50  ;;  %v1428_v57 = vrot.slane %v10015_v47, 6 }
 0x29e   :  { %8061 = vpow2.f32 %v6054_v58  ;;  %v1424_v58 = vrot.slane %v10015_v47, 5  ;;  %v1415_v47 = vrot.slane %v10017_v0, 3  ;;  %v1427_v50 = vrot.slane %v10017_v0, 6 }
 0x29f   :  { %8063 = vpow2.f32 %v6055_v5  ;;  %v1484_v21 = vadd.f32 %v1420_v14, %v9761_v10  ;;  %v12094_v14 = vld [vmem:[#allocation119_spill] sm:$0xff]  ;;  %v1423_v10 = vrot.slane %v10017_v0, 5 }
 0x2a0   :  { %8065 = vpow2.f32 %v6056_v62 }
 0x2a1   :  { %8067 = vpow2.f32 %v6057_v15  ;;  %v10043_v60 = vpop.eup %8051  ;;  %v1403_v15 = vrot.slane %v10017_v0, 7 }
 0x2a2   :  { %8069 = vtanh.f32 %v1464_v48  ;;  %v1407_v48 = vrot.slane %v10017_v0, 1 }
 0x2a3   :  { %8071 = vtanh.f32 %v1468_v56  ;;  %v1411_v56 = vrot.slane %v10017_v0, 2  ;;  %v1463_v55 = vadd.f32 %v1403_v15, %v12095_v61  ;;  %v1487_v15 = vadd.f32 %v1423_v10, %v12097_v18 }
 0x2a4   :  { %v8054_v51 = vpop.eup %8053  ;;  %8073 = vtanh.f32 %v1472_v7  ;;  %v1471_v2 = vadd.f32 %v1407_v48, %v9739_v40 }
 0x2a5   :  { %v8056_v6 = vpop.eup %8055  ;;  %v1518_v43 = vadd.f32 1.0, %v8054_v51  ;;  %8075 = vtanh.f32 %v1476_v3  ;;  %v1419_v3 = vrot.slane %v10017_v0, 4  ;;  %v1475_v41 = vadd.f32 %v1411_v56, %v9748_v54 }
 0x2a6   :  { %v8058_v5 = vpop.eup %8057  ;;  %v1519_v62 = vadd.f32 1.0, %v8056_v6  ;;  %8077 = vtanh.f32 %v1480_v11  ;;  %v1488_v11 = vadd.f32 %v1424_v58, %v12094_v14  ;;  %v1479_v58 = vadd.f32 %v1415_v47, %v9757_v16 }
 0x2a7   :  { %v8060_v4 = vpop.eup %8059  ;;  %v1520_v49 = vadd.f32 1.0, %v8058_v5  ;;  %8079 = vrcp.f32 %v1518_v43  ;;  %v1483_v14 = vadd.f32 %v1419_v3, %v9775_v8  ;;  %v6058_v48 = vmul.f32 -1.442695, %v1463_v55 }
 0x2a8   :  { %v8062_v7 = vpop.eup %8061  ;;  %v1521_v51 = vadd.f32 1.0, %v8060_v4  ;;  %8081 = vrcp.f32 %v1519_v62  ;;  %v1405_v56 = vrot.slane %v10019_v44, 7  ;;  %v6061_v47 = vmul.f32 -1.442695, %v1475_v41 }
 0x2a9   :  { %v8064_v6 = vpop.eup %8063  ;;  %v1522_v52 = vadd.f32 1.0, %v8062_v7  ;;  %8083 = vrcp.f32 %v1520_v49  ;;  %v6062_v3 = vmul.f32 -1.442695, %v1479_v58  ;;  %v6064_v10 = vmul.f32 -1.442695, %v1487_v15 }
 0x2aa   :  { %v8066_v5 = vpop.eup %8065  ;;  %v1523_v43 = vadd.f32 1.0, %v8064_v6  ;;  %8085 = vrcp.f32 %v1521_v51  ;;  %v12096_v51 = vld [vmem:[#allocation122_spill] sm:$0xff]  ;;  %v1255_v55 = vmul.f32 %v10043_v60, %v10038_v26  ;;  %v1417_v41 = vrot.slane %v10019_v44, 3 }
 0x2ab   :  { %v8068_v4 = vpop.eup %8067  ;;  %v1524_v62 = vadd.f32 1.0, %v8066_v5  ;;  %8087 = vrcp.f32 %v1522_v52  ;;  %v1492_v0 = vadd.f32 %v1428_v57, %v12096_v51  ;;  %v12098_v52 = vld [vmem:[#allocation123_spill] sm:$0xff]  ;;  %v1409_v57 = vrot.slane %v10019_v44, 1 }
 0x2ac   :  { %v8070_v7 = vpop.eup %8069  ;;  %v1525_v49 = vadd.f32 1.0, %v8068_v4  ;;  %8089 = vrcp.f32 %v1523_v43  ;;  %v1491_v5 = vadd.f32 %v1427_v50, %v12098_v52  ;;  %v6059_v43 = vmul.f32 -1.442695, %v1467_v33 }
 0x2ad   :  { %v8072_v6 = vpop.eup %8071  ;;  %8091 = vrcp.f32 %v1524_v62  ;;  %v6060_v4 = vmul.f32 -1.442695, %v1471_v2  ;;  %v6063_v62 = vmul.f32 -1.442695, %v1483_v14  ;;  %v12099_v2 = vld [vmem:[#allocation112_spill] sm:$0xff]  ;;  %v1732_v58 = vrot.slane %v1255_v55, 7 }
 0x2ae   :  { %v8074_v61 = vpop.eup %8073  ;;  %8093 = vrcp.f32 %v1525_v49  ;;  %v1413_v49 = vrot.slane %v10019_v44, 2  ;;  %v1465_v33 = vadd.f32 %v1405_v56, %v12099_v2  ;;  %v6065_v26 = vmul.f32 -1.442695, %v1491_v5 }
 0x2af   :  { %v8076_v54 = vpop.eup %8075  ;;  %8095 = vtanh.f32 %v1484_v21  ;;  %v1481_v55 = vadd.f32 %v1417_v41, %v9766_v19  ;;  %v1421_v41 = vrot.slane %v10019_v44, 4 }
 0x2b0   :  { %v8078_v16 = vpop.eup %8077  ;;  %8097 = vtanh.f32 %v1488_v11  ;;  %v1469_v11 = vadd.f32 %v10019_v44, %v9734_v27 }
 0x2b1   :  { %v8080_v8 = vpop.eup %8079  ;;  %8099 = vtanh.f32 %v1492_v0 }
 0x2b2   :  { %v8082_v50 = vpop.eup %8081  ;;  %v10071_v52 = vmul.f32 %v8080_v8, %v8070_v7  ;;  %8101 = vpow2.f32 %v6058_v48  ;;  %v1473_v8 = vadd.f32 %v1409_v57, %v9743_v17  ;;  %v1477_v48 = vadd.f32 %v1413_v49, %v9752_v22 }
 0x2b3   :  { %v8084_v21 = vpop.eup %8083  ;;  %v10075_v14 = vmul.f32 %v8082_v50, %v8072_v6  ;;  %8103 = vpow2.f32 %v6059_v43  ;;  %v1737_v6 = vrot.slane %v1732_v58, 1  ;;  %v6066_v50 = vmul.f32 -1.442695, %v1465_v33 }
 0x2b4   :  { %v8086_v0 = vpop.eup %8085  ;;  %v10079_v15 = vmul.f32 %v8084_v21, %v8074_v61  ;;  %8105 = vpow2.f32 %v6060_v4  ;;  %v6067_v4 = vmul.f32 -1.442695, %v1469_v11  ;;  %v6070_v21 = vmul.f32 -1.442695, %v1481_v55 }
 0x2b5   :  { %v8088_v60 = vpop.eup %8087  ;;  %v10082_v7 = vmul.f32 %v8086_v0, %v8076_v54  ;;  %8107 = vpow2.f32 %v6061_v47  ;;  %1805 = vmatprep.mubr.f32.mxu0 %v1737_v6  ;;  %1876 = vmatprep.mubr.f32.mxu1 %v1737_v6  ;;  %v6068_v54 = vmul.f32 -1.442695, %v1473_v8  ;;  %v6069_v47 = vmul.f32 -1.442695, %v1477_v48 }
 0x2b6   :  { %v8090_v56 = vpop.eup %8089  ;;  %v10085_v43 = vmul.f32 %v8088_v60, %v8078_v16  ;;  %8109 = vpow2.f32 %v6062_v3  ;;  %v1425_v11 = vrot.slane %v10019_v44, 5  ;;  %v1485_v6 = vadd.f32 %v1421_v41, %v9833_v13 }
 0x2b7   :  { %v8092_v61 = vpop.eup %8091  ;;  %8111 = vpow2.f32 %v6063_v62 }
 0x2b8   :  { %v8094_v5 = vpop.eup %8093  ;;  %8113 = vpow2.f32 %v6064_v10 }
 0x2b9   :  { %v8096_v57 = vpop.eup %8095  ;;  %8115 = vpow2.f32 %v6065_v26 }
 0x2ba   :  { %v8098_v49 = vpop.eup %8097  ;;  %8117 = vpow2.f32 %v6066_v50  ;;  %v10088_v16 = vmul.f32 %v8096_v57, %v8090_v56  ;;  %v1489_v50 = vadd.f32 %v1425_v11, %v9840_v1  ;;  %v1429_v57 = vrot.slane %v10019_v44, 6 }
 0x2bb   :  { %v8100_v3 = vpop.eup %8099  ;;  %8119 = vpow2.f32 %v6067_v4  ;;  %v10091_v33 = vmul.f32 %v8098_v49, %v8092_v61 }
 0x2bc   :  { %v8102_v62 = vpop.eup %8101  ;;  %8121 = vpow2.f32 %v6068_v54  ;;  %v10094_v10 = vmul.f32 %v8100_v3, %v8094_v5  ;;  %v6072_v41 = vmul.f32 -1.442695, %v1489_v50 }
 0x2bd   :  { %v8104_v58 = vpop.eup %8103  ;;  %v1566_v0 = vadd.f32 1.0, %v8102_v62  ;;  %8123 = vpow2.f32 %v6069_v47 }
 0x2be   :  { %v8106_v26 = vpop.eup %8105  ;;  %v1567_v8 = vadd.f32 1.0, %v8104_v58  ;;  %8125 = vpow2.f32 %v6070_v21  ;;  %v6071_v21 = vmul.f32 -1.442695, %v1485_v6 }
 0x2bf   :  { %v8108_v60 = vpop.eup %8107  ;;  %v1568_v48 = vadd.f32 1.0, %v8106_v26  ;;  %8127 = vrcp.f32 %v1566_v0  ;;  %v1493_v26 = vadd.f32 %v1429_v57, %v9849_v12 }
 0x2c0   :  { %v8110_v56 = vpop.eup %8109  ;;  %v1569_v55 = vadd.f32 1.0, %v8108_v60  ;;  %8129 = vrcp.f32 %v1567_v8 }
 0x2c1   :  { %v8112_v61 = vpop.eup %8111  ;;  %v1570_v4 = vadd.f32 1.0, %v8110_v56  ;;  %8131 = vrcp.f32 %v1568_v48  ;;  %v1654_v56 = vrot.slane %v9854_v23, 7  ;;  %v1658_v23 = vrot.slane %v9868_v34, 7 }
 0x2c2   :  { %v8114_v5 = vpop.eup %8113  ;;  %v1571_v54 = vadd.f32 1.0, %v8112_v61  ;;  %8133 = vrcp.f32 %v1569_v55  ;;  %v1655_v61 = vrot.slane %v9857_v32, 7 }
 0x2c3   :  { %v8116_v47 = vpop.eup %8115  ;;  %v1572_v49 = vadd.f32 1.0, %v8114_v5  ;;  %8135 = vrcp.f32 %v1570_v4  ;;  %v1656_v5 = vrot.slane %v9860_v46, 7 }
 0x2c4   :  { %v8118_v3 = vpop.eup %8117  ;;  %v1573_v62 = vadd.f32 1.0, %v8116_v47  ;;  %8137 = vrcp.f32 %v1571_v54  ;;  %v6073_v47 = vmul.f32 -1.442695, %v1493_v26 }
 0x2c5   :  { %v8120_v58 = vpop.eup %8119  ;;  %8139 = vrcp.f32 %v1572_v49  ;;  %v1622_v0 = vadd.f32 1.0, %v8118_v3  ;;  %v1657_v49 = vrot.slane %v9865_v59, 7  ;;  %v1660_v59 = vrot.slane %v9875_v63, 7 }
 0x2c6   :  { %v8122_v11 = vpop.eup %8121  ;;  %8141 = vrcp.f32 %v1573_v62  ;;  %v1623_v8 = vadd.f32 1.0, %v8120_v58  ;;  %v1659_v58 = vrot.slane %v9871_v24, 7 }
 0x2c7   :  { %v8124_v60 = vpop.eup %8123  ;;  %8143 = vpow2.f32 %v6071_v21  ;;  %v1624_v48 = vadd.f32 1.0, %v8122_v11 }
 0x2c8   :  { %v8126_v44 = vpop.eup %8125  ;;  %8145 = vpow2.f32 %v6072_v41  ;;  %v1625_v6 = vadd.f32 1.0, %v8124_v60 }
 0x2c9   :  { %v8128_v55 = vpop.eup %8127  ;;  %v1626_v50 = vadd.f32 1.0, %v8126_v44  ;;  %8147 = vrcp.f32 %v1622_v0 }
 0x2ca   :  { %v8130_v4 = vpop.eup %8129  ;;  %v1670_v54 = vmul.f32 %v8128_v55, %v1654_v56  ;;  %8149 = vrcp.f32 %v1623_v8 }
 0x2cb   :  { %v8132_v57 = vpop.eup %8131  ;;  %v1671_v21 = vmul.f32 %v8130_v4, %v1655_v61  ;;  %8151 = vrcp.f32 %v1624_v48 }
 0x2cc   :  { %v8134_v3 = vpop.eup %8133  ;;  %v1672_v62 = vmul.f32 %v8132_v57, %v1656_v5  ;;  %8153 = vrcp.f32 %v1625_v6  ;;  %v10106_v32 = vadd.f32 %v10071_v52, %v1670_v54  ;;  %v1661_v52 = vrot.slane %v9879_v39, 7 }
 0x2cd   :  { %v8136_v41 = vpop.eup %8135  ;;  %v10110_v46 = vadd.f32 %v10075_v14, %v1671_v21  ;;  %8155 = vrcp.f32 %v1626_v50  ;;  %v1673_v0 = vmul.f32 %v8134_v3, %v1657_v49 }
 0x2ce   :  { %v8138_v11 = vpop.eup %8137  ;;  %8157 = vpow2.f32 %v6073_v47  ;;  %v1674_v26 = vmul.f32 %v8136_v41, %v1658_v23  ;;  %v10114_v34 = vadd.f32 %v10079_v15, %v1672_v62 }
 0x2cf   :  { %v8140_v8 = vpop.eup %8139  ;;  %v1675_v60 = vmul.f32 %v8138_v11, %v1659_v58  ;;  %v10118_v48 = vadd.f32 %v10082_v7, %v1673_v0  ;;  %8159 = vtanh.f32 %v10106_v32 }
 0x2d0   :  { %v8142_v24 = vpop.eup %8141  ;;  %v1676_v14 = vmul.f32 %v8140_v8, %v1660_v59  ;;  %v10122_v44 = vadd.f32 %v10085_v43, %v1674_v26  ;;  %8161 = vtanh.f32 %v10110_v46 }
 0x2d1   :  { %v8144_v63 = vpop.eup %8143  ;;  %v1677_v56 = vmul.f32 %v8142_v24, %v1661_v52  ;;  %v10126_v15 = vadd.f32 %v10088_v16, %v1675_v60  ;;  %8163 = vtanh.f32 %v10114_v34 }
 0x2d2   :  { %v8146_v39 = vpop.eup %8145  ;;  %v1627_v6 = vadd.f32 1.0, %v8144_v63  ;;  %v10130_v7 = vadd.f32 %v10091_v33, %v1676_v14  ;;  %8165 = vtanh.f32 %v10118_v48 }
 0x2d3   :  { %v8148_v55 = vpop.eup %8147  ;;  %v1628_v61 = vadd.f32 1.0, %v8146_v39  ;;  %v10134_v43 = vadd.f32 %v10094_v10, %v1677_v56  ;;  %8167 = vtanh.f32 %v10122_v44 }
 0x2d4   :  { %v8150_v50 = vpop.eup %8149  ;;  %8169 = vrcp.f32 %v1627_v6 }
 0x2d5   :  { %v8152_v16 = vpop.eup %8151  ;;  %8171 = vrcp.f32 %v1628_v61 }
 0x2d6   :  { %v8154_v4 = vpop.eup %8153  ;;  %8173 = vtanh.f32 %v10126_v15 }
 0x2d7   :  { %v8156_v5 = vpop.eup %8155  ;;  %8175 = vtanh.f32 %v10130_v7 }
 0x2d8   :  { %v8158_v33 = vpop.eup %8157  ;;  %8177 = vtanh.f32 %v10134_v43 }
 0x2d9   :  { %v8160_v54 = vpop.eup %8159  ;;  %v1629_v47 = vadd.f32 1.0, %v8158_v33 }
 0x2da   :  { %v8162_v57 = vpop.eup %8161  ;;  %v1702_v10 = vmul.f32 %v8160_v54, %v8148_v55 }
 0x2db   :  { %v8164_v49 = vpop.eup %8163  ;;  %8179 = vrcp.f32 %v1629_v47  ;;  %v1703_v21 = vmul.f32 %v8162_v57, %v8150_v50 }
 0x2dc   :  { %v8166_v3 = vpop.eup %8165  ;;  %v1704_v23 = vmul.f32 %v8164_v49, %v8152_v16  ;;  %v1907_v62 = vrot.slane %v1702_v10, 1 }
 0x2dd   :  { %v8168_v41 = vpop.eup %8167  ;;  %v1705_v58 = vmul.f32 %v8166_v3, %v8154_v4  ;;  %v1718_v0 = vrot.slane %v1703_v21, 7 }
 0x2de   :  { %v8170_v11 = vpop.eup %8169  ;;  %v1706_v59 = vmul.f32 %v8168_v41, %v8156_v5  ;;  %v1720_v26 = vrot.slane %v1704_v23, 6  ;;  %v1908_v8 = vsel %vm1069_vm2, %v1703_v21, %v1907_v62  ;;  %v1909_v52 = vrot.slane %v1704_v23, 7 }
 0x2df   :  { %v8172_v60 = vpop.eup %8171  ;;  %v1719_v24 = vsel %vm1072_vm3, %v1718_v0, %v1702_v10  ;;  %v1722_v14 = vrot.slane %v1705_v58, 5  ;;  %v1911_v63 = vrot.slane %v1705_v58, 6 }
 0x2e0   :  { %v8174_v56 = vpop.eup %8173  ;;  %v1721_v39 = vsel %vm1075_vm4, %v1720_v26, %v1719_v24  ;;  %v1724_v6 = vrot.slane %v1706_v59, 4  ;;  %v1910_v55 = vsel %vm1072_vm3, %v1909_v52, %v1908_v8  ;;  %v1913_v61 = vrot.slane %v1706_v59, 5  ;;  %v12101_v24 = vld [vmem:[#allocation12_spill] sm:$0xff] }
 0x2e1   :  { %v8176_v50 = vpop.eup %8175  ;;  %v1707_v16 = vmul.f32 %v8174_v56, %v8170_v11  ;;  %v1723_v4 = vsel %vm1078_vm5, %v1722_v14, %v1721_v39  ;;  %v1912_v5 = vsel %vm1075_vm4, %v1911_v63, %v1910_v55  ;;  %v12102_v14 = vld [vmem:[#allocation13_spill] sm:$0xff]  ;;  %v12103_v63 = vld [vmem:[#allocation14_spill] sm:$0xff]  ;;  %v12104_v56 = vld [vmem:[#allocation15_spill] sm:$0xff] }
 0x2e2   :  { %v1708_v33 = vmul.f32 %v8176_v50, %v8172_v60  ;;  %v1725_v54 = vsel %vm1081_vm6, %v1724_v6, %v1723_v4  ;;  %v1914_v47 = vsel %vm1078_vm5, %v1913_v61, %v1912_v5  ;;  %v8178_v57 = vpop.eup %8177  ;;  %v12100_v60 = vld [vmem:[#allocation11_spill] sm:$0xff]  ;;  %v12105_v39 = vld [vmem:[#allocation16_spill] sm:$0xff]  ;;  %v12106_v6 = vld [vmem:[#allocation17_spill] sm:$0xff] }
 0x2e3   :  { %v1726_v10 = vrot.slane %v1707_v16, 3  ;;  %v1915_v49 = vrot.slane %v1707_v16, 4  ;;  %v12107_v55 = vld [vmem:[#allocation18_spill] sm:$0xff]  ;;  %v12108_v61 = vld [vmem:[#allocation19_spill] sm:$0xff]  ;;  %v12109_v50 = vld [vmem:[#allocation20_spill] sm:$0xff] }
 0x2e4   :  { %v1728_v21 = vrot.slane %v1708_v33, 2  ;;  %v1917_v3 = vrot.slane %v1708_v33, 3  ;;  %v12110_v16 = vld [vmem:[#allocation21_spill] sm:$0xff]  ;;  %v12111_v4 = vld [vmem:[#allocation22_spill] sm:$0xff]  ;;  %v12112_v5 = vld [vmem:[#allocation23_spill] sm:$0xff] }
 0x2e5   :  { %v8180_v23 = vpop.eup %8179  ;;  %v1727_v62 = vsel %vm1084_vm7, %v1726_v10, %v1725_v54  ;;  %v1916_v41 = vsel %vm1081_vm6, %v1915_v49, %v1914_v47  ;;  %v12113_v33 = vld [vmem:[#allocation24_spill] sm:$0xff]  ;;  %v12114_v54 = vld [vmem:[#allocation25_spill] sm:$0xff]  ;;  %v12115_v47 = vld [vmem:[#allocation26_spill] sm:$0xff] }
 0x2e6   :  { %v1709_v58 = vmul.f32 %v8180_v23, %v8178_v57  ;;  %v1729_v0 = vsel %vm1087_vm8, %v1728_v21, %v1727_v62  ;;  %v1918_v11 = vsel %vm1084_vm7, %v1917_v3, %v1916_v41  ;;  %v12116_v57 = vld [vmem:[#allocation27_spill] sm:$0xff]  ;;  %v12117_v10 = vld [vmem:[#allocation28_spill] sm:$0xff]  ;;  %v12118_v49 = vld [vmem:[#allocation29_spill] sm:$0xff] }
 0x2e7   :  { %v1734_v59 = vrot.slane %v1729_v0, 1  ;;  %v12119_v21 = vld [vmem:[#allocation30_spill] sm:$0xff]  ;;  %v12120_v3 = vld [vmem:[#allocation31_spill] sm:$0xff]  ;;  %v12121_v23 = vld [vmem:[#allocation32_spill] sm:$0xff] }
 0x2e8   :  { %v6074_v26 = vrot.slane %v1709_v58, 2  ;;  %v12122_v62 = vld [vmem:[#allocation33_spill] sm:$0xff]  ;;  %v12123_v41 = vld [vmem:[#allocation34_spill] sm:$0xff]  ;;  %v12124_v58 = vld [vmem:[#allocation35_spill] sm:$0xff] }
 0x2e9   :  { %v12125_v0 = vld [vmem:[#allocation36_spill] sm:$0xff] }
 0x2ea   :  { %v1736_v8 = vsel %vm1733_vm9, %v1734_v59, %v6074_v26  ;;  %v1920_v52 = vsel %vm1087_vm8, %v6074_v26, %v1918_v11  ;;  %v12126_v11 = vld [vmem:[#allocation37_spill] sm:$0xff]  ;;  %v12127_v59 = vld [vmem:[#allocation38_spill] sm:$0xff]  ;;  %v12128_v26 = vld [vmem:[#allocation39_spill] sm:$0xff] }
 0x2eb   :  { %1806 = vmatmul.mubr.f32.vlgmr.msra.gmra.mrb[22].mxu0 %v1736_v8  ;;  %1877 = vmatmul.mubr.f32.vlgmr.msra.gmra.mrb[22].mxu1 %v1736_v8  ;;  %v12129_v8 = vld [vmem:[#allocation40_spill] sm:$0xff] }
 0x2ec   :  { %6728 = vmatpush1.bf16.msra.mxu0 %v9247_v25  ;;  %6760 = vmatpush1.bf16.msra.mxu1 %v9250_v29 }
 0x2ed   :  { %6730 = vmatprep.subr.bf16.mxu0 %v9259_v36  ;;  %6762 = vmatprep.subr.bf16.mxu1 %v9263_v37 }
 0x2ee   :  { %1986 = vmatprep.mubr.f32.mxu0 %v11994_v9  ;;  %2057 = vmatprep.mubr.f32.mxu1 %v11994_v9 }
 0x2f0   :  { %6732 = vmatpush1.bf16.msra.mxu0 %v9265_v38  ;;  %6764 = vmatpush1.bf16.msra.mxu1 %v9269_v42 }
 0x2f1   :  { %6734 = vmatprep.subr.bf16.mxu0 %v12100_v60  ;;  %6766 = vmatprep.subr.bf16.mxu1 %v12101_v24 }
 0x2f4   :  { %6736 = vmatpush1.bf16.msra.mxu0 %v12102_v14  ;;  %6768 = vmatpush1.bf16.msra.mxu1 %v12103_v63 }
 0x2f5   :  { %6738 = vmatprep.subr.bf16.mxu0 %v12104_v56  ;;  %6770 = vmatprep.subr.bf16.mxu1 %v12105_v39 }
 0x2f8   :  { %6740 = vmatpush1.bf16.msra.mxu0 %v12106_v6  ;;  %6772 = vmatpush1.bf16.msra.mxu1 %v12107_v55 }
 0x2f9   :  { %6742 = vmatprep.subr.bf16.mxu0 %v12108_v61  ;;  %6774 = vmatprep.subr.bf16.mxu1 %v12109_v50  ;;  %v12195_v50 = vld [vmem:[#allocation106_spill] sm:$0xff] }
 0x2fc   :  { %6744 = vmatpush1.bf16.msra.mxu0 %v12110_v16  ;;  %6776 = vmatpush1.bf16.msra.mxu1 %v12111_v4 }
 0x2fd   :  { %6746 = vmatprep.subr.bf16.mxu0 %v12112_v5  ;;  %6778 = vmatprep.subr.bf16.mxu1 %v12113_v33 }
 0x300   :  { %6748 = vmatpush1.bf16.msra.mxu0 %v12114_v54  ;;  %6780 = vmatpush1.bf16.msra.mxu1 %v12115_v47  ;;  %v12193_v47 = vld [vmem:[#allocation127_spill] sm:$0xff] }
 0x301   :  { %6750 = vmatprep.subr.bf16.mxu0 %v12116_v57  ;;  %6782 = vmatprep.subr.bf16.mxu1 %v12117_v10  ;;  %v12191_v10 = vld [vmem:[#allocation125_spill] sm:$0xff] }
 0x304   :  { %6752 = vmatpush1.bf16.msra.mxu0 %v12118_v49  ;;  %6784 = vmatpush1.bf16.msra.mxu1 %v12119_v21  ;;  %v12190_v21 = vld [vmem:[#allocation124_spill] sm:$0xff] }
 0x305   :  { %6754 = vmatprep.subr.bf16.mxu0 %v12120_v3  ;;  %6786 = vmatprep.subr.bf16.mxu1 %v12121_v23  ;;  %v12130_v3 = vld [vmem:[#allocation41_spill] sm:$0xff]  ;;  %v12131_v23 = vld [vmem:[#allocation42_spill] sm:$0xff] }
 0x308   :  { %6756 = vmatpush1.bf16.msra.mxu0 %v12122_v62  ;;  %6788 = vmatpush1.bf16.msra.mxu1 %v12123_v41  ;;  %v12132_v62 = vld [vmem:[#allocation43_spill] sm:$0xff]  ;;  %v12133_v41 = vld [vmem:[#allocation44_spill] sm:$0xff] }
 0x309   :  { %6790 = vmatprep.subr.bf16.mxu0 %v12124_v58  ;;  %6854 = vmatprep.subr.bf16.mxu1 %v12125_v0  ;;  %v12134_v58 = vld [vmem:[#allocation45_spill] sm:$0xff]  ;;  %v12135_v0 = vld [vmem:[#allocation46_spill] sm:$0xff] }
 0x30b   :  { %1987 = vmatmul.mubr.f32.vlgmr.msra.gmra.mrb[24].mxu0 %v1920_v52  ;;  %2058 = vmatmul.mubr.f32.vlgmr.msra.gmra.mrb[24].mxu1 %v1920_v52  ;;  %v12136_v52 = vld [vmem:[#allocation47_spill] sm:$0xff] }
 0x30c   :  { %6792 = vmatpush1.bf16.msra.mxu0 %v12126_v11  ;;  %6856 = vmatpush1.bf16.msra.mxu1 %v12127_v59  ;;  %v12137_v11 = vld [vmem:[#allocation48_spill] sm:$0xff]  ;;  %v12138_v59 = vld [vmem:[#allocation49_spill] sm:$0xff] }
 0x30d   :  { %6794 = vmatprep.subr.bf16.mxu0 %v12128_v26  ;;  %6858 = vmatprep.subr.bf16.mxu1 %v12129_v8  ;;  %v12139_v26 = vld [vmem:[#allocation50_spill] sm:$0xff]  ;;  %v12140_v8 = vld [vmem:[#allocation51_spill] sm:$0xff] }
 0x310   :  { %6796 = vmatpush1.bf16.msra.mxu0 %v12130_v3  ;;  %6860 = vmatpush1.bf16.msra.mxu1 %v12131_v23  ;;  %v12141_v3 = vld [vmem:[#allocation52_spill] sm:$0xff]  ;;  %v12142_v23 = vld [vmem:[#allocation53_spill] sm:$0xff] }
 0x311   :  { %6798 = vmatprep.subr.bf16.mxu0 %v12132_v62  ;;  %6862 = vmatprep.subr.bf16.mxu1 %v12133_v41  ;;  %v12143_v62 = vld [vmem:[#allocation54_spill] sm:$0xff]  ;;  %v12144_v41 = vld [vmem:[#allocation55_spill] sm:$0xff] }
 0x314   :  { %6800 = vmatpush1.bf16.msra.mxu0 %v12134_v58  ;;  %6864 = vmatpush1.bf16.msra.mxu1 %v12135_v0  ;;  %v12145_v58 = vld [vmem:[#allocation56_spill] sm:$0xff]  ;;  %v12146_v0 = vld [vmem:[#allocation57_spill] sm:$0xff] }
 0x315   :  { %6802 = vmatprep.subr.bf16.mxu0 %v12136_v52  ;;  %6866 = vmatprep.subr.bf16.mxu1 %v12137_v11  ;;  %v12147_v52 = vld [vmem:[#allocation58_spill] sm:$0xff]  ;;  %v12148_v11 = vld [vmem:[#allocation59_spill] sm:$0xff] }
 0x318   :  { %6804 = vmatpush1.bf16.msra.mxu0 %v12138_v59  ;;  %6868 = vmatpush1.bf16.msra.mxu1 %v12139_v26  ;;  %v12149_v59 = vld [vmem:[#allocation60_spill] sm:$0xff]  ;;  %v12150_v26 = vld [vmem:[#allocation61_spill] sm:$0xff] }
 0x319   :  { %6806 = vmatprep.subr.bf16.mxu0 %v12140_v8  ;;  %6870 = vmatprep.subr.bf16.mxu1 %v12141_v3  ;;  %v12151_v8 = vld [vmem:[#allocation62_spill] sm:$0xff]  ;;  %v12152_v3 = vld [vmem:[#allocation63_spill] sm:$0xff] }
 0x31c   :  { %6808 = vmatpush1.bf16.msra.mxu0 %v12142_v23  ;;  %6872 = vmatpush1.bf16.msra.mxu1 %v12143_v62  ;;  %v12153_v23 = vld [vmem:[#allocation64_spill] sm:$0xff]  ;;  %v12154_v62 = vld [vmem:[#allocation65_spill] sm:$0xff] }
 0x31d   :  { %6810 = vmatprep.subr.bf16.mxu0 %v12144_v41  ;;  %6874 = vmatprep.subr.bf16.mxu1 %v12145_v58  ;;  %v12155_v41 = vld [vmem:[#allocation66_spill] sm:$0xff]  ;;  %v12156_v58 = vld [vmem:[#allocation67_spill] sm:$0xff] }
 0x320   :  { %6812 = vmatpush1.bf16.msra.mxu0 %v12146_v0  ;;  %6876 = vmatpush1.bf16.msra.mxu1 %v12147_v52  ;;  %v12157_v0 = vld [vmem:[#allocation68_spill] sm:$0xff]  ;;  %v12158_v52 = vld [vmem:[#allocation69_spill] sm:$0xff] }
 0x321   :  { %6814 = vmatprep.subr.bf16.mxu0 %v12148_v11  ;;  %6878 = vmatprep.subr.bf16.mxu1 %v12149_v59  ;;  %v12159_v11 = vld [vmem:[#allocation70_spill] sm:$0xff]  ;;  %v12160_v59 = vld [vmem:[#allocation71_spill] sm:$0xff] }
 0x324   :  { %6816 = vmatpush1.bf16.msra.mxu0 %v12150_v26  ;;  %6880 = vmatpush1.bf16.msra.mxu1 %v12151_v8  ;;  %v12161_v26 = vld [vmem:[#allocation72_spill] sm:$0xff]  ;;  %v12162_v8 = vld [vmem:[#allocation73_spill] sm:$0xff] }
 0x325   :  { %6818 = vmatprep.subr.bf16.mxu0 %v12152_v3  ;;  %6882 = vmatprep.subr.bf16.mxu1 %v12153_v23  ;;  %v12163_v3 = vld [vmem:[#allocation74_spill] sm:$0xff]  ;;  %v12164_v23 = vld [vmem:[#allocation75_spill] sm:$0xff] }
 0x328   :  { %6820 = vmatpush1.bf16.msra.mxu0 %v12154_v62  ;;  %6884 = vmatpush1.bf16.msra.mxu1 %v12155_v41  ;;  %v12165_v62 = vld [vmem:[#allocation76_spill] sm:$0xff]  ;;  %v12166_v41 = vld [vmem:[#allocation77_spill] sm:$0xff] }
 0x329   :  { %6822 = vmatprep.subr.bf16.mxu0 %v12156_v58  ;;  %6886 = vmatprep.subr.bf16.mxu1 %v12157_v0  ;;  %v12167_v58 = vld [vmem:[#allocation78_spill] sm:$0xff]  ;;  %v12168_v0 = vld [vmem:[#allocation79_spill] sm:$0xff] }
 0x32c   :  { %6824 = vmatpush1.bf16.msra.mxu0 %v12158_v52  ;;  %6888 = vmatpush1.bf16.msra.mxu1 %v12159_v11  ;;  %v12169_v52 = vld [vmem:[#allocation80_spill] sm:$0xff]  ;;  %v12170_v11 = vld [vmem:[#allocation81_spill] sm:$0xff] }
 0x32d   :  { %6826 = vmatprep.subr.bf16.mxu0 %v12160_v59  ;;  %6890 = vmatprep.subr.bf16.mxu1 %v12161_v26  ;;  %v12171_v59 = vld [vmem:[#allocation82_spill] sm:$0xff]  ;;  %v12172_v26 = vld [vmem:[#allocation83_spill] sm:$0xff] }
 0x330   :  { %6828 = vmatpush1.bf16.msra.mxu0 %v12162_v8  ;;  %6892 = vmatpush1.bf16.msra.mxu1 %v12163_v3  ;;  %v12173_v8 = vld [vmem:[#allocation84_spill] sm:$0xff]  ;;  %v12174_v3 = vld [vmem:[#allocation85_spill] sm:$0xff] }
 0x331   :  { %6830 = vmatprep.subr.bf16.mxu0 %v12164_v23  ;;  %6894 = vmatprep.subr.bf16.mxu1 %v12165_v62  ;;  %v12175_v23 = vld [vmem:[#allocation86_spill] sm:$0xff]  ;;  %v12176_v62 = vld [vmem:[#allocation87_spill] sm:$0xff] }
 0x334   :  { %6832 = vmatpush1.bf16.msra.mxu0 %v12166_v41  ;;  %6896 = vmatpush1.bf16.msra.mxu1 %v12167_v58  ;;  %v12177_v41 = vld [vmem:[#allocation88_spill] sm:$0xff]  ;;  %v12178_v58 = vld [vmem:[#allocation89_spill] sm:$0xff] }
 0x335   :  { %6834 = vmatprep.subr.bf16.mxu0 %v12168_v0  ;;  %6898 = vmatprep.subr.bf16.mxu1 %v12169_v52  ;;  %v12179_v0 = vld [vmem:[#allocation90_spill] sm:$0xff]  ;;  %v12180_v52 = vld [vmem:[#allocation91_spill] sm:$0xff] }
 0x338   :  { %6836 = vmatpush1.bf16.msra.mxu0 %v12170_v11  ;;  %6900 = vmatpush1.bf16.msra.mxu1 %v12171_v59  ;;  %v12181_v11 = vld [vmem:[#allocation92_spill] sm:$0xff]  ;;  %v12182_v59 = vld [vmem:[#allocation93_spill] sm:$0xff] }
 0x339   :  { %6838 = vmatprep.subr.bf16.mxu0 %v12172_v26  ;;  %6902 = vmatprep.subr.bf16.mxu1 %v12173_v8  ;;  %v12183_v26 = vld [vmem:[#allocation94_spill] sm:$0xff]  ;;  %v12184_v8 = vld [vmem:[#allocation95_spill] sm:$0xff] }
 0x33c   :  { %6840 = vmatpush1.bf16.msra.mxu0 %v12174_v3  ;;  %6904 = vmatpush1.bf16.msra.mxu1 %v12175_v23  ;;  %v12185_v3 = vld [vmem:[#allocation96_spill] sm:$0xff]  ;;  %v12186_v23 = vld [vmem:[#allocation97_spill] sm:$0xff] }
 0x33d   :  { %6842 = vmatprep.subr.bf16.mxu0 %v12176_v62  ;;  %6906 = vmatprep.subr.bf16.mxu1 %v12177_v41  ;;  %v12187_v62 = vld [vmem:[#allocation98_spill] sm:$0xff]  ;;  %v12188_v41 = vld [vmem:[#allocation9_spill] sm:$0xff] }
 0x340   :  { %6844 = vmatpush1.bf16.msra.mxu0 %v12178_v58  ;;  %6908 = vmatpush1.bf16.msra.mxu1 %v12179_v0  ;;  %v12189_v58 = vld [vmem:[#allocation10_spill] sm:$0xff] }
 0x341   :  { %6846 = vmatprep.subr.bf16.mxu0 %v12180_v52  ;;  %6910 = vmatprep.subr.bf16.mxu1 %v12181_v11 }
 0x344   :  { %6848 = vmatpush1.bf16.msra.mxu0 %v12182_v59  ;;  %6912 = vmatpush1.bf16.msra.mxu1 %v12183_v26 }
 0x345   :  { %6850 = vmatprep.subr.bf16.mxu0 %v12184_v8  ;;  %6914 = vmatprep.subr.bf16.mxu1 %v12185_v3  ;;  %v12192_v3 = vld [vmem:[#allocation126_spill] sm:$0xff] }
 0x348   :  { %6852 = vmatpush1.bf16.msra.mxu0 %v12186_v23  ;;  %6916 = vmatpush1.bf16.msra.mxu1 %v12187_v62 }
 0x349   :  { %6918 = vmatprep.subr.bf16.mxu0 %v12188_v41  ;;  %6950 = vmatprep.subr.bf16.mxu1 %v12189_v58 }
 0x3be   :  { %v1807_v0 = vpop.f32.mrb[22].mxu0  ;;  %v1878_v52 = vpop.f32.mrb[22].mxu1 }
 0x3bf   :  { %v1808_v11 = vadd.f32 %v1807_v0, %v12190_v21  ;;  %v1809_v49 = vpop.f32.mrb[23].mxu0  ;;  %v1880_v59 = vpop.f32.mrb[23].mxu1  ;;  %v1879_v62 = vadd.f32 %v1878_v52, %v12193_v47 }
 0x3c0   :  { %v1810_v26 = vadd.f32 %v1809_v49, %v12191_v10  ;;  %v1881_v23 = vadd.f32 %v1880_v59, %v12192_v3 }
 0x3c1   :  { %v6075_v57 = vmul.f32 -1.442695, %v1808_v11 }
 0x3c2   :  { %v6076_v8 = vmul.f32 -1.442695, %v1810_v26  ;;  %v6077_v54 = vmul.f32 -1.442695, %v1881_v23 }
 0x3c3   :  { %8181 = vpow2.f32 %v6075_v57 }
 0x3c4   :  { %8183 = vpow2.f32 %v6076_v8 }
 0x3c5   :  { %8185 = vtanh.f32 %v1879_v62 }
 0x3c6   :  { %8187 = vpow2.f32 %v6077_v54 }
 0x3cd   :  { %v8182_v41 = vpop.eup %8181 }
 0x3ce   :  { %v8184_v33 = vpop.eup %8183  ;;  %v1886_v58 = vadd.f32 1.0, %v8182_v41 }
 0x3cf   :  { %v1892_v5 = vadd.f32 1.0, %v8184_v33  ;;  %v8186_v0 = vpop.eup %8185 }
 0x3d0   :  { %8189 = vrcp.f32 %v1886_v58  ;;  %v8188_v21 = vpop.eup %8187 }
 0x3d1   :  { %8191 = vrcp.f32 %v1892_v5  ;;  %v1899_v59 = vadd.f32 1.0, %v8188_v21 }
 0x3d3   :  { %8193 = vrcp.f32 %v1899_v59 }
 0x3da   :  { %v8190_v49 = vpop.eup %8189 }
 0x3db   :  { %v8192_v11 = vpop.eup %8191  ;;  %v1903_v26 = vmul.f32 %v8190_v49, %v8186_v0 }
 0x3dc   :  { %v1902_v57 = vmul.f32 %v8192_v11, %v10013_v45  ;;  %v12194_v45 = vld [vmem:[#allocation99_spill] sm:$0xff] }
 0x3de   :  { %v10256_v8 = vadd.f32 %v1903_v26, %v1902_v57  ;;  %v1988_v52 = vpop.f32.mrb[24].mxu0  ;;  %v10258_v23 = vpop.f32.mrb[24].mxu1 }
 0x3df   :  { %v2068_v47 = vrot.slane %v1988_v52, 6  ;;  %v2072_v41 = vrot.slane %v1988_v52, 7  ;;  %v2076_v62 = vrot.slane %v1988_v52, 1  ;;  %v2080_v33 = vrot.slane %v1988_v52, 2  ;;  %v10260_v54 = vpop.f32.mrb[25].mxu0  ;;  %v10262_v5 = vpop.f32.mrb[25].mxu1 }
 0x3e0   :  { %v2084_v58 = vrot.slane %v1988_v52, 3  ;;  %v2088_v3 = vrot.slane %v1988_v52, 4  ;;  %v2092_v10 = vrot.slane %v1988_v52, 5  ;;  %v2136_v0 = vadd.f32 %v1988_v52, %v9663_v35 }
 0x3e1   :  { %v2128_v49 = vadd.f32 %v2068_v47, %v12194_v45  ;;  %v2132_v21 = vadd.f32 %v2072_v41, %v9661_v53  ;;  %v2140_v11 = vadd.f32 %v2076_v62, %v9665_v31  ;;  %v2144_v26 = vadd.f32 %v2080_v33, %v9667_v30 }
 0x3e2   :  { %v2148_v57 = vadd.f32 %v2084_v58, %v9669_v28  ;;  %v2152_v4 = vadd.f32 %v2088_v3, %v9671_v20  ;;  %v6080_v16 = vmul.f32 -1.442695, %v2136_v0  ;;  %v2156_v61 = vadd.f32 %v2092_v10, %v12195_v50  ;;  %v12196_v58 = vld [vmem:[#allocation108_spill] sm:$0xff]  ;;  %v12203_v50 = vld [vmem:[#allocation107_spill] sm:$0xff] }
 0x3e3   :  { %v6078_v55 = vmul.f32 -1.442695, %v2128_v49  ;;  %v6079_v6 = vmul.f32 -1.442695, %v2132_v21  ;;  %v6081_v39 = vmul.f32 -1.442695, %v2140_v11 }
 0x3e4   :  { %8195 = vpow2.f32 %v6080_v16  ;;  %v6082_v52 = vmul.f32 -1.442695, %v2144_v26  ;;  %v6083_v47 = vmul.f32 -1.442695, %v2148_v57  ;;  %v2070_v41 = vrot.slane %v10258_v23, 6  ;;  %v12197_v16 = vld [vmem:[#allocation109_spill] sm:$0xff] }
 0x3e5   :  { %8197 = vpow2.f32 %v6078_v55  ;;  %v2074_v62 = vrot.slane %v10258_v23, 7  ;;  %v6084_v59 = vmul.f32 -1.442695, %v2152_v4  ;;  %v6085_v33 = vmul.f32 -1.442695, %v2156_v61  ;;  %v12198_v55 = vld [vmem:[#allocation110_spill] sm:$0xff]  ;;  %v10281_v4 = vpop.eup %8193 }
 0x3e6   :  { %8199 = vpow2.f32 %v6079_v6  ;;  %v2078_v3 = vrot.slane %v10258_v23, 1  ;;  %v2082_v10 = vrot.slane %v10258_v23, 2  ;;  %v2130_v0 = vadd.f32 %v2070_v41, %v12196_v58  ;;  %v12199_v11 = vld [vmem:[#allocation113_spill] sm:$0xff] }
 0x3e7   :  { %8201 = vpow2.f32 %v6081_v39  ;;  %v2134_v49 = vadd.f32 %v2074_v62, %v12197_v16  ;;  %v2138_v21 = vadd.f32 %v10258_v23, %v12198_v55  ;;  %v12200_v39 = vld [vmem:[#allocation111_spill] sm:$0xff]  ;;  %v2086_v57 = vrot.slane %v10258_v23, 3  ;;  %v12201_v55 = vld [vmem:[#allocation118_spill] sm:$0xff] }
 0x3e8   :  { %8203 = vpow2.f32 %v6082_v52  ;;  %v2142_v6 = vadd.f32 %v2078_v3, %v12199_v11  ;;  %v2146_v61 = vadd.f32 %v2082_v10, %v12200_v39  ;;  %v2090_v52 = vrot.slane %v10258_v23, 4  ;;  %v12202_v16 = vld [vmem:[#allocation119_spill] sm:$0xff] }
 0x3e9   :  { %8205 = vpow2.f32 %v6083_v47  ;;  %v2094_v10 = vrot.slane %v10258_v23, 5  ;;  %v2085_v23 = vrot.slane %v10260_v54, 3 }
 0x3ea   :  { %8207 = vpow2.f32 %v6084_v59 }
 0x3eb   :  { %8209 = vpow2.f32 %v6085_v33  ;;  %v2069_v33 = vrot.slane %v10260_v54, 6  ;;  %v2158_v28 = vadd.f32 %v2094_v10, %v12096_v51 }
 0x3ec   :  { %8211 = vtanh.f32 %v2130_v0  ;;  %v2073_v0 = vrot.slane %v10260_v54, 7 }
 0x3ed   :  { %8213 = vtanh.f32 %v2134_v49  ;;  %v2129_v20 = vadd.f32 %v2069_v33, %v12203_v50  ;;  %v12205_v33 = vld [vmem:[#allocation116_spill] sm:$0xff] }
 0x3ee   :  { %v8196_v26 = vpop.eup %8195  ;;  %8215 = vtanh.f32 %v2138_v21  ;;  %v2150_v21 = vadd.f32 %v2086_v57, %v12201_v55  ;;  %v2089_v57 = vrot.slane %v10260_v54, 4  ;;  %v2093_v55 = vrot.slane %v10260_v54, 5 }
 0x3ef   :  { %v8198_v47 = vpop.eup %8197  ;;  %v2186_v41 = vadd.f32 1.0, %v8196_v26  ;;  %8217 = vtanh.f32 %v2142_v6  ;;  %v2154_v26 = vadd.f32 %v2090_v52, %v12202_v16  ;;  %v12204_v52 = vld [vmem:[#allocation114_spill] sm:$0xff]  ;;  %v6086_v35 = vmul.f32 -1.442695, %v2129_v20 }
 0x3f0   :  { %v8200_v62 = vpop.eup %8199  ;;  %v2184_v59 = vadd.f32 1.0, %v8198_v47  ;;  %8219 = vtanh.f32 %v2146_v61  ;;  %v2077_v61 = vrot.slane %v10260_v54, 1  ;;  %v2081_v47 = vrot.slane %v10260_v54, 2 }
 0x3f1   :  { %v8202_v3 = vpop.eup %8201  ;;  %v2185_v11 = vadd.f32 1.0, %v8200_v62  ;;  %8221 = vrcp.f32 %v2186_v41  ;;  %v2133_v16 = vadd.f32 %v2073_v0, %v12204_v52  ;;  %v2071_v0 = vrot.slane %v10262_v5, 6 }
 0x3f2   :  { %v8204_v49 = vpop.eup %8203  ;;  %v2187_v39 = vadd.f32 1.0, %v8202_v3  ;;  %8223 = vrcp.f32 %v2184_v59  ;;  %v2141_v50 = vadd.f32 %v2077_v61, %v12205_v33  ;;  %v2153_v10 = vadd.f32 %v2089_v57, %v12097_v18 }
 0x3f3   :  { %v8206_v6 = vpop.eup %8205  ;;  %v2188_v58 = vadd.f32 1.0, %v8204_v49  ;;  %8225 = vrcp.f32 %v2185_v11  ;;  %v6087_v53 = vmul.f32 -1.442695, %v2133_v16  ;;  %v2083_v16 = vrot.slane %v10262_v5, 2 }
 0x3f4   :  { %v8208_v62 = vpop.eup %8207  ;;  %v2189_v41 = vadd.f32 1.0, %v8206_v6  ;;  %8227 = vrcp.f32 %v2187_v39  ;;  %v2137_v6 = vadd.f32 %v10260_v54, %v9739_v40  ;;  %v2075_v54 = vrot.slane %v10262_v5, 7 }
 0x3f5   :  { %v8210_v3 = vpop.eup %8209  ;;  %v2190_v59 = vadd.f32 1.0, %v8208_v62  ;;  %8229 = vrcp.f32 %v2188_v58  ;;  %v12206_v62 = vld [vmem:[#allocation117_spill] sm:$0xff] }
 0x3f6   :  { %v8212_v49 = vpop.eup %8211  ;;  %v2191_v11 = vadd.f32 1.0, %v8210_v3  ;;  %8231 = vrcp.f32 %v2189_v41  ;;  %v2145_v58 = vadd.f32 %v2081_v47, %v12206_v62  ;;  %v12207_v41 = vld [vmem:[#allocation120_spill] sm:$0xff]  ;;  %v6088_v33 = vmul.f32 -1.442695, %v2137_v6 }
 0x3f7   :  { %v8214_v39 = vpop.eup %8213  ;;  %8233 = vrcp.f32 %v2190_v59  ;;  %v2149_v52 = vadd.f32 %v2085_v23, %v12207_v41  ;;  %v12208_v59 = vld [vmem:[#allocation123_spill] sm:$0xff]  ;;  %v2079_v62 = vrot.slane %v10262_v5, 1  ;;  %v2131_v23 = vadd.f32 %v2071_v0, %v12099_v2 }
 0x3f8   :  { %v8216_v30 = vpop.eup %8215  ;;  %8235 = vrcp.f32 %v2191_v11  ;;  %v2157_v61 = vadd.f32 %v2093_v55, %v12208_v59  ;;  %v6089_v11 = vmul.f32 -1.442695, %v2141_v50  ;;  %v6090_v20 = vmul.f32 -1.442695, %v2145_v58 }
 0x3f9   :  { %v8218_v3 = vpop.eup %8217  ;;  %8237 = vtanh.f32 %v2150_v21  ;;  %v6091_v55 = vmul.f32 -1.442695, %v2149_v52  ;;  %v2135_v57 = vadd.f32 %v2075_v54, %v9734_v27  ;;  %v6092_v6 = vmul.f32 -1.442695, %v2153_v10 }
 0x3fa   :  { %v8220_v40 = vpop.eup %8219  ;;  %8239 = vtanh.f32 %v2154_v26  ;;  %v6093_v0 = vmul.f32 -1.442695, %v2157_v61  ;;  %v6094_v52 = vmul.f32 -1.442695, %v2131_v23 }
 0x3fb   :  { %v8222_v47 = vpop.eup %8221  ;;  %8241 = vtanh.f32 %v2158_v28 }
 0x3fc   :  { %v8224_v51 = vpop.eup %8223  ;;  %v10309_v21 = vmul.f32 %v8222_v47, %v8216_v30  ;;  %8243 = vpow2.f32 %v6086_v35  ;;  %v2139_v30 = vadd.f32 %v10262_v5, %v9743_v17 }
 0x3fd   :  { %v8226_v26 = vpop.eup %8225  ;;  %v10313_v41 = vmul.f32 %v8224_v51, %v8212_v49  ;;  %8245 = vpow2.f32 %v6087_v53  ;;  %v2143_v51 = vadd.f32 %v2079_v62, %v9752_v22  ;;  %v2147_v53 = vadd.f32 %v2083_v16, %v9766_v19 }
 0x3fe   :  { %v8228_v28 = vpop.eup %8227  ;;  %v10316_v50 = vmul.f32 %v8226_v26, %v8214_v39  ;;  %8247 = vpow2.f32 %v6088_v33  ;;  %v6095_v33 = vmul.f32 -1.442695, %v2135_v57  ;;  %v6096_v47 = vmul.f32 -1.442695, %v2139_v30 }
 0x3ff   :  { %v8230_v35 = vpop.eup %8229  ;;  %v10320_v58 = vmul.f32 %v8228_v28, %v8218_v3  ;;  %8249 = vpow2.f32 %v6089_v11  ;;  %v6097_v3 = vmul.f32 -1.442695, %v2143_v51  ;;  %v6098_v61 = vmul.f32 -1.442695, %v2147_v53 }
 0x400   :  { %v8232_v49 = vpop.eup %8231  ;;  %8251 = vpow2.f32 %v6090_v20  ;;  %v10324_v54 = vmul.f32 %v8230_v35, %v8220_v40  ;;  %v2087_v16 = vrot.slane %v10262_v5, 3  ;;  %v2095_v30 = vrot.slane %v10262_v5, 5 }
 0x401   :  { %v8234_v39 = vpop.eup %8233  ;;  %8253 = vpow2.f32 %v6091_v55  ;;  %v2091_v55 = vrot.slane %v10262_v5, 4 }
 0x402   :  { %v8236_v10 = vpop.eup %8235  ;;  %8255 = vpow2.f32 %v6092_v6  ;;  %v2151_v53 = vadd.f32 %v2087_v16, %v9833_v13 }
 0x403   :  { %v8238_v26 = vpop.eup %8237  ;;  %8257 = vpow2.f32 %v6093_v0 }
 0x404   :  { %v8240_v11 = vpop.eup %8239  ;;  %8259 = vpow2.f32 %v6094_v52  ;;  %v10326_v62 = vmul.f32 %v8238_v26, %v8232_v49  ;;  %v2159_v26 = vadd.f32 %v2095_v30, %v9849_v12 }
 0x405   :  { %v8242_v20 = vpop.eup %8241  ;;  %8261 = vpow2.f32 %v6095_v33  ;;  %v10329_v40 = vmul.f32 %v8240_v11, %v8234_v39  ;;  %v2155_v33 = vadd.f32 %v2091_v55, %v9840_v1 }
 0x406   :  { %v8244_v23 = vpop.eup %8243  ;;  %8263 = vpow2.f32 %v6096_v47  ;;  %v10332_v57 = vmul.f32 %v8242_v20, %v8236_v10  ;;  %v6099_v20 = vmul.f32 -1.442695, %v2151_v53  ;;  %v2321_v53 = vrot.slane %v10110_v46, 7 }
 0x407   :  { %v8246_v28 = vpop.eup %8245  ;;  %v2232_v6 = vadd.f32 1.0, %v8244_v23  ;;  %8265 = vpow2.f32 %v6097_v3  ;;  %v6100_v16 = vmul.f32 -1.442695, %v2155_v33 }
 0x408   :  { %v8248_v35 = vpop.eup %8247  ;;  %v2233_v0 = vadd.f32 1.0, %v8246_v28  ;;  %8267 = vpow2.f32 %v6098_v61 }
 0x409   :  { %v8250_v51 = vpop.eup %8249  ;;  %v2234_v49 = vadd.f32 1.0, %v8248_v35  ;;  %8269 = vrcp.f32 %v2232_v6  ;;  %v6101_v35 = vmul.f32 -1.442695, %v2159_v26 }
 0x40a   :  { %v8252_v52 = vpop.eup %8251  ;;  %v2235_v39 = vadd.f32 1.0, %v8250_v51  ;;  %8271 = vrcp.f32 %v2233_v0 }
 0x40b   :  { %v8254_v10 = vpop.eup %8253  ;;  %v2236_v47 = vadd.f32 1.0, %v8252_v52  ;;  %8273 = vrcp.f32 %v2234_v49 }
 0x40c   :  { %v8256_v5 = vpop.eup %8255  ;;  %v2237_v3 = vadd.f32 1.0, %v8254_v10  ;;  %8275 = vrcp.f32 %v2235_v39  ;;  %v2320_v39 = vrot.slane %v10106_v32, 7  ;;  %v2324_v32 = vrot.slane %v10122_v44, 7 }
 0x40d   :  { %v8258_v11 = vpop.eup %8257  ;;  %v2238_v61 = vadd.f32 1.0, %v8256_v5  ;;  %8277 = vrcp.f32 %v2236_v47  ;;  %v2322_v5 = vrot.slane %v10114_v34, 7  ;;  %v2325_v34 = vrot.slane %v10126_v15, 7 }
 0x40e   :  { %v8260_v23 = vpop.eup %8259  ;;  %v2239_v28 = vadd.f32 1.0, %v8258_v11  ;;  %8279 = vrcp.f32 %v2237_v3 }
 0x40f   :  { %v8262_v6 = vpop.eup %8261  ;;  %8281 = vrcp.f32 %v2238_v61  ;;  %v2288_v0 = vadd.f32 1.0, %v8260_v23 }
 0x410   :  { %v8264_v55 = vpop.eup %8263  ;;  %8283 = vrcp.f32 %v2239_v28  ;;  %v2289_v30 = vadd.f32 1.0, %v8262_v6 }
 0x411   :  { %v8266_v51 = vpop.eup %8265  ;;  %8285 = vpow2.f32 %v6099_v20  ;;  %v2290_v52 = vadd.f32 1.0, %v8264_v55  ;;  %v2323_v20 = vrot.slane %v10118_v48, 7 }
 0x412   :  { %v8268_v49 = vpop.eup %8267  ;;  %8287 = vpow2.f32 %v6100_v16  ;;  %v2291_v47 = vadd.f32 1.0, %v8266_v51 }
 0x413   :  { %v8270_v10 = vpop.eup %8269  ;;  %8289 = vpow2.f32 %v6101_v35  ;;  %v2292_v26 = vadd.f32 1.0, %v8268_v49 }
 0x414   :  { %v8272_v33 = vpop.eup %8271  ;;  %8291 = vrcp.f32 %v2288_v0  ;;  %v2336_v3 = vmul.f32 %v8270_v10, %v2320_v39  ;;  %v2326_v0 = vrot.slane %v10130_v7, 7 }
 0x415   :  { %v8274_v11 = vpop.eup %8273  ;;  %v2337_v61 = vmul.f32 %v8272_v33, %v2321_v53  ;;  %8293 = vrcp.f32 %v2289_v30 }
 0x416   :  { %v8276_v23 = vpop.eup %8275  ;;  %v2338_v28 = vmul.f32 %v8274_v11, %v2322_v5  ;;  %8295 = vrcp.f32 %v2290_v52  ;;  %v10344_v46 = vadd.f32 %v10313_v41, %v2336_v3  ;;  %v2327_v41 = vrot.slane %v10134_v43, 7 }
 0x417   :  { %v8278_v16 = vpop.eup %8277  ;;  %8297 = vrcp.f32 %v2291_v47  ;;  %v2339_v6 = vmul.f32 %v8276_v23, %v2323_v20  ;;  %v10348_v35 = vadd.f32 %v10316_v50, %v2337_v61 }
 0x418   :  { %v8280_v55 = vpop.eup %8279  ;;  %8299 = vrcp.f32 %v2292_v26  ;;  %v2340_v48 = vmul.f32 %v8278_v16, %v2324_v32  ;;  %v10352_v51 = vadd.f32 %v10309_v21, %v2338_v28 }
 0x419   :  { %v8282_v44 = vpop.eup %8281  ;;  %8301 = vtanh.f32 %v10256_v8  ;;  %v2341_v30 = vmul.f32 %v8280_v55, %v2325_v34  ;;  %v10357_v15 = vadd.f32 %v10320_v58, %v2339_v6 }
 0x41a   :  { %v8284_v49 = vpop.eup %8283  ;;  %v2342_v50 = vmul.f32 %v8282_v44, %v2326_v0  ;;  %v10360_v52 = vadd.f32 %v10324_v54, %v2340_v48  ;;  %8303 = vtanh.f32 %v10344_v46 }
 0x41b   :  { %v8286_v7 = vpop.eup %8285  ;;  %v2343_v39 = vmul.f32 %v8284_v49, %v2327_v41  ;;  %v10364_v21 = vadd.f32 %v10326_v62, %v2341_v30  ;;  %8305 = vtanh.f32 %v10348_v35 }
 0x41c   :  { %v8288_v43 = vpop.eup %8287  ;;  %v2293_v10 = vadd.f32 1.0, %v8286_v7  ;;  %v10368_v53 = vadd.f32 %v10329_v40, %v2342_v50  ;;  %8307 = vtanh.f32 %v10352_v51 }
 0x41d   :  { %v8290_v58 = vpop.eup %8289  ;;  %v2294_v47 = vadd.f32 1.0, %v8288_v43  ;;  %v10372_v54 = vadd.f32 %v10332_v57, %v2343_v39  ;;  %8309 = vtanh.f32 %v10357_v15 }
 0x41e   :  { %v8292_v33 = vpop.eup %8291  ;;  %v2295_v5 = vadd.f32 1.0, %v8290_v58  ;;  %8311 = vrcp.f32 %v2293_v10 }
 0x41f   :  { %v8294_v62 = vpop.eup %8293  ;;  %8313 = vrcp.f32 %v2294_v47 }
 0x420   :  { %v8296_v26 = vpop.eup %8295  ;;  %8315 = vrcp.f32 %v2295_v5 }
 0x421   :  { %v8298_v3 = vpop.eup %8297  ;;  %8317 = vtanh.f32 %v10360_v52 }
 0x422   :  { %v8300_v40 = vpop.eup %8299  ;;  %8319 = vtanh.f32 %v10364_v21 }
 0x423   :  { %v8302_v11 = vpop.eup %8301  ;;  %8321 = vtanh.f32 %v10368_v53 }
 0x424   :  { %v8304_v57 = vpop.eup %8303  ;;  %v1906_v61 = vmul.f32 %v8302_v11, %v10281_v4  ;;  %8323 = vtanh.f32 %v10372_v54 }
 0x425   :  { %v8306_v20 = vpop.eup %8305  ;;  %v2368_v23 = vmul.f32 %v8304_v57, %v8292_v33 }
 0x426   :  { %v8308_v28 = vpop.eup %8307  ;;  %v2398_v32 = vrot.slane %v1906_v61, 6  ;;  %v2369_v16 = vmul.f32 %v8306_v20, %v8294_v62 }
 0x427   :  { %v8310_v34 = vpop.eup %8309  ;;  %v2370_v6 = vmul.f32 %v8308_v28, %v8296_v26  ;;  %v2573_v55 = vrot.slane %v2368_v23, 2 }
 0x428   :  { %v8312_v0 = vpop.eup %8311  ;;  %v2403_v48 = vrot.slane %v2398_v32, 2  ;;  %v2371_v44 = vmul.f32 %v8310_v34, %v8298_v3  ;;  %v2384_v41 = vrot.slane %v2369_v16, 7  ;;  %v2574_v30 = vrot.slane %v2369_v16, 1 }
 0x429   :  { %v8314_v49 = vpop.eup %8313  ;;  %v2386_v50 = vrot.slane %v2370_v6, 6 }
 0x42a   :  { %v8316_v7 = vpop.eup %8315  ;;  %2471 = vmatprep.mubr.f32.mxu0 %v2403_v48  ;;  %2542 = vmatprep.mubr.f32.mxu1 %v2403_v48  ;;  %v2385_v4 = vsel %vm1075_vm4, %v2384_v41, %v2368_v23  ;;  %v2388_v39 = vrot.slane %v2371_v44, 5  ;;  %v2575_v43 = vsel %vm1069_vm2, %v2574_v30, %v2573_v55  ;;  %v2577_v10 = vrot.slane %v2371_v44, 7 }
 0x42b   :  { %v8318_v58 = vpop.eup %8317  ;;  %v2387_v47 = vsel %vm1078_vm5, %v2386_v50, %v2385_v4  ;;  %v2576_v33 = vsel %vm1072_vm3, %v2370_v6, %v2575_v43 }
 0x42c   :  { %v8320_v5 = vpop.eup %8319  ;;  %v2372_v62 = vmul.f32 %v8318_v58, %v8300_v40  ;;  %v2389_v26 = vsel %vm1081_vm6, %v2388_v39, %v2387_v47  ;;  %v2578_v3 = vsel %vm1075_vm4, %v2577_v10, %v2576_v33  ;;  %v12209_v10 = vld [vmem:[#allocation16_spill] sm:$0xff]  ;;  %v12210_v58 = vld [vmem:[#allocation17_spill] sm:$0xff]  ;;  %v12211_v47 = vld [vmem:[#allocation18_spill] sm:$0xff] }
 0x42d   :  { %v8322_v11 = vpop.eup %8321  ;;  %v2373_v57 = vmul.f32 %v8320_v5, %v8312_v0  ;;  %v12212_v33 = vld [vmem:[#allocation19_spill] sm:$0xff]  ;;  %v12213_v5 = vld [vmem:[#allocation20_spill] sm:$0xff] }
 0x42e   :  { %v8324_v61 = vpop.eup %8323  ;;  %v2374_v20 = vmul.f32 %v8322_v11, %v8314_v49  ;;  %v2390_v23 = vrot.slane %v2372_v62, 4  ;;  %v2579_v28 = vrot.slane %v2372_v62, 6  ;;  %v12214_v62 = vld [vmem:[#allocation21_spill] sm:$0xff]  ;;  %v12217_v11 = vld [vmem:[#allocation24_spill] sm:$0xff] }
 0x42f   :  { %v2375_v32 = vmul.f32 %v8324_v61, %v8316_v7  ;;  %v2392_v16 = vrot.slane %v2373_v57, 3  ;;  %v2581_v34 = vrot.slane %v2373_v57, 5  ;;  %v12218_v57 = vld [vmem:[#allocation25_spill] sm:$0xff]  ;;  %v12219_v61 = vld [vmem:[#allocation26_spill] sm:$0xff] }
 0x430   :  { %v2391_v55 = vsel %vm1084_vm7, %v2390_v23, %v2389_v26  ;;  %v2394_v48 = vrot.slane %v2374_v20, 2  ;;  %v2580_v6 = vsel %vm1078_vm5, %v2579_v28, %v2578_v3  ;;  %v2583_v44 = vrot.slane %v2374_v20, 4  ;;  %v12215_v26 = vld [vmem:[#allocation22_spill] sm:$0xff]  ;;  %v12216_v3 = vld [vmem:[#allocation23_spill] sm:$0xff]  ;;  %v12221_v23 = vld [vmem:[#allocation28_spill] sm:$0xff] }
 0x431   :  { %v2393_v40 = vsel %vm1087_vm8, %v2392_v16, %v2391_v55  ;;  %v2395_v41 = vrot.slane %v2375_v32, 1  ;;  %v2582_v30 = vsel %vm1081_vm6, %v2581_v34, %v2580_v6  ;;  %v2585_v50 = vrot.slane %v2375_v32, 3  ;;  %v12220_v20 = vld [vmem:[#allocation27_spill] sm:$0xff]  ;;  %v12222_v28 = vld [vmem:[#allocation29_spill] sm:$0xff]  ;;  %v12223_v32 = vld [vmem:[#allocation30_spill] sm:$0xff] }
 0x432   :  { %v2400_v0 = vrot.slane %v2393_v40, 2  ;;  %v2584_v49 = vsel %vm1084_vm7, %v2583_v44, %v2582_v30  ;;  %v12224_v16 = vld [vmem:[#allocation31_spill] sm:$0xff]  ;;  %v12225_v34 = vld [vmem:[#allocation32_spill] sm:$0xff]  ;;  %v12226_v55 = vld [vmem:[#allocation33_spill] sm:$0xff] }
 0x433   :  { %v2396_v4 = vsel %vm1069_vm2, %v2395_v41, %v2394_v48  ;;  %v2586_v7 = vsel %vm1087_vm8, %v2585_v50, %v2584_v49  ;;  %v12227_v48 = vld [vmem:[#allocation34_spill] sm:$0xff]  ;;  %v12228_v6 = vld [vmem:[#allocation35_spill] sm:$0xff]  ;;  %v12229_v44 = vld [vmem:[#allocation36_spill] sm:$0xff] }
 0x434   :  { %v2401_v39 = vrot.slane %v2396_v4, 2  ;;  %v12230_v40 = vld [vmem:[#allocation37_spill] sm:$0xff]  ;;  %v12231_v41 = vld [vmem:[#allocation38_spill] sm:$0xff]  ;;  %v12232_v30 = vld [vmem:[#allocation39_spill] sm:$0xff] }
 0x435   :  { %v12233_v50 = vld [vmem:[#allocation40_spill] sm:$0xff]  ;;  %v12235_v49 = vld [vmem:[#allocation42_spill] sm:$0xff]  ;;  %v12236_v4 = vld [vmem:[#allocation43_spill] sm:$0xff] }
 0x436   :  { %v2402_v43 = vsel %vm2399_vm10, %v2400_v0, %v2401_v39  ;;  %v12234_v0 = vld [vmem:[#allocation41_spill] sm:$0xff]  ;;  %v12237_v39 = vld [vmem:[#allocation44_spill] sm:$0xff] }
 0x437   :  { %2472 = vmatmul.mubr.f32.vlgmr.msra.gmra.mrb[26].mxu0 %v2402_v43  ;;  %2543 = vmatmul.mubr.f32.vlgmr.msra.gmra.mrb[26].mxu1 %v2402_v43  ;;  %v12238_v43 = vld [vmem:[#allocation45_spill] sm:$0xff] }
 0x438   :  { %6920 = vmatpush1.bf16.msra.mxu0 %v9247_v25  ;;  %6952 = vmatpush1.bf16.msra.mxu1 %v9250_v29 }
 0x439   :  { %6922 = vmatprep.subr.bf16.mxu0 %v9259_v36  ;;  %6954 = vmatprep.subr.bf16.mxu1 %v9263_v37 }
 0x43a   :  { %2652 = vmatprep.mubr.f32.mxu0 %v11994_v9  ;;  %2723 = vmatprep.mubr.f32.mxu1 %v11994_v9 }
 0x43c   :  { %6924 = vmatpush1.bf16.msra.mxu0 %v9265_v38  ;;  %6956 = vmatpush1.bf16.msra.mxu1 %v9269_v42 }
 0x43d   :  { %6926 = vmatprep.subr.bf16.mxu0 %v12100_v60  ;;  %6958 = vmatprep.subr.bf16.mxu1 %v12101_v24 }
 0x440   :  { %6928 = vmatpush1.bf16.msra.mxu0 %v12102_v14  ;;  %6960 = vmatpush1.bf16.msra.mxu1 %v12103_v63 }
 0x441   :  { %6930 = vmatprep.subr.bf16.mxu0 %v12104_v56  ;;  %6962 = vmatprep.subr.bf16.mxu1 %v12209_v10 }
 0x444   :  { %6932 = vmatpush1.bf16.msra.mxu0 %v12210_v58  ;;  %6964 = vmatpush1.bf16.msra.mxu1 %v12211_v47 }
 0x445   :  { %6934 = vmatprep.subr.bf16.mxu0 %v12212_v33  ;;  %6966 = vmatprep.subr.bf16.mxu1 %v12213_v5 }
 0x448   :  { %6936 = vmatpush1.bf16.msra.mxu0 %v12214_v62  ;;  %6968 = vmatpush1.bf16.msra.mxu1 %v12215_v26  ;;  %v12303_v62 = vld [vmem:[#allocation106_spill] sm:$0xff] }
 0x449   :  { %6938 = vmatprep.subr.bf16.mxu0 %v12216_v3  ;;  %6970 = vmatprep.subr.bf16.mxu1 %v12217_v11  ;;  %v12302_v11 = vld [vmem:[#allocation105_spill] sm:$0xff] }
 0x44c   :  { %6940 = vmatpush1.bf16.msra.mxu0 %v12218_v57  ;;  %6972 = vmatpush1.bf16.msra.mxu1 %v12219_v61  ;;  %v12301_v61 = vld [vmem:[#allocation104_spill] sm:$0xff] }
 0x44d   :  { %6942 = vmatprep.subr.bf16.mxu0 %v12220_v20  ;;  %6974 = vmatprep.subr.bf16.mxu1 %v12221_v23 }
 0x450   :  { %6944 = vmatpush1.bf16.msra.mxu0 %v12222_v28  ;;  %6976 = vmatpush1.bf16.msra.mxu1 %v12223_v32 }
 0x451   :  { %6946 = vmatprep.subr.bf16.mxu0 %v12224_v16  ;;  %6978 = vmatprep.subr.bf16.mxu1 %v12225_v34  ;;  %v12297_v16 = vld [vmem:[#allocation127_spill] sm:$0xff] }
 0x454   :  { %6948 = vmatpush1.bf16.msra.mxu0 %v12226_v55  ;;  %6980 = vmatpush1.bf16.msra.mxu1 %v12227_v48  ;;  %v12295_v55 = vld [vmem:[#allocation125_spill] sm:$0xff] }
 0x455   :  { %6982 = vmatprep.subr.bf16.mxu0 %v12228_v6  ;;  %7046 = vmatprep.subr.bf16.mxu1 %v12229_v44  ;;  %v12239_v44 = vld [vmem:[#allocation46_spill] sm:$0xff]  ;;  %v12294_v6 = vld [vmem:[#allocation124_spill] sm:$0xff] }
 0x457   :  { %2653 = vmatmul.mubr.f32.vlgmr.msra.gmra.mrb[28].mxu0 %v2586_v7  ;;  %2724 = vmatmul.mubr.f32.vlgmr.msra.gmra.mrb[28].mxu1 %v2586_v7  ;;  %v12240_v7 = vld [vmem:[#allocation47_spill] sm:$0xff] }
 0x458   :  { %6984 = vmatpush1.bf16.msra.mxu0 %v12230_v40  ;;  %7048 = vmatpush1.bf16.msra.mxu1 %v12231_v41  ;;  %v12241_v40 = vld [vmem:[#allocation48_spill] sm:$0xff]  ;;  %v12242_v41 = vld [vmem:[#allocation49_spill] sm:$0xff] }
 0x459   :  { %6986 = vmatprep.subr.bf16.mxu0 %v12232_v30  ;;  %7050 = vmatprep.subr.bf16.mxu1 %v12233_v50  ;;  %v12243_v30 = vld [vmem:[#allocation50_spill] sm:$0xff]  ;;  %v12244_v50 = vld [vmem:[#allocation51_spill] sm:$0xff] }
 0x45c   :  { %6988 = vmatpush1.bf16.msra.mxu0 %v12234_v0  ;;  %7052 = vmatpush1.bf16.msra.mxu1 %v12235_v49  ;;  %v12245_v0 = vld [vmem:[#allocation52_spill] sm:$0xff]  ;;  %v12246_v49 = vld [vmem:[#allocation53_spill] sm:$0xff] }
 0x45d   :  { %6990 = vmatprep.subr.bf16.mxu0 %v12236_v4  ;;  %7054 = vmatprep.subr.bf16.mxu1 %v12237_v39  ;;  %v12247_v4 = vld [vmem:[#allocation54_spill] sm:$0xff]  ;;  %v12248_v39 = vld [vmem:[#allocation55_spill] sm:$0xff] }
 0x460   :  { %6992 = vmatpush1.bf16.msra.mxu0 %v12238_v43  ;;  %7056 = vmatpush1.bf16.msra.mxu1 %v12239_v44  ;;  %v12249_v43 = vld [vmem:[#allocation56_spill] sm:$0xff]  ;;  %v12250_v44 = vld [vmem:[#allocation57_spill] sm:$0xff] }
 0x461   :  { %6994 = vmatprep.subr.bf16.mxu0 %v12240_v7  ;;  %7058 = vmatprep.subr.bf16.mxu1 %v12241_v40  ;;  %v12251_v7 = vld [vmem:[#allocation58_spill] sm:$0xff]  ;;  %v12252_v40 = vld [vmem:[#allocation59_spill] sm:$0xff] }
 0x464   :  { %6996 = vmatpush1.bf16.msra.mxu0 %v12242_v41  ;;  %7060 = vmatpush1.bf16.msra.mxu1 %v12243_v30  ;;  %v12253_v41 = vld [vmem:[#allocation60_spill] sm:$0xff]  ;;  %v12254_v30 = vld [vmem:[#allocation61_spill] sm:$0xff] }
 0x465   :  { %6998 = vmatprep.subr.bf16.mxu0 %v12244_v50  ;;  %7062 = vmatprep.subr.bf16.mxu1 %v12245_v0  ;;  %v12255_v50 = vld [vmem:[#allocation62_spill] sm:$0xff]  ;;  %v12256_v0 = vld [vmem:[#allocation63_spill] sm:$0xff] }
 0x468   :  { %7000 = vmatpush1.bf16.msra.mxu0 %v12246_v49  ;;  %7064 = vmatpush1.bf16.msra.mxu1 %v12247_v4  ;;  %v12257_v49 = vld [vmem:[#allocation64_spill] sm:$0xff]  ;;  %v12258_v4 = vld [vmem:[#allocation65_spill] sm:$0xff] }
 0x469   :  { %7002 = vmatprep.subr.bf16.mxu0 %v12248_v39  ;;  %7066 = vmatprep.subr.bf16.mxu1 %v12249_v43  ;;  %v12259_v39 = vld [vmem:[#allocation66_spill] sm:$0xff]  ;;  %v12260_v43 = vld [vmem:[#allocation67_spill] sm:$0xff] }
 0x46c   :  { %7004 = vmatpush1.bf16.msra.mxu0 %v12250_v44  ;;  %7068 = vmatpush1.bf16.msra.mxu1 %v12251_v7  ;;  %v12261_v44 = vld [vmem:[#allocation68_spill] sm:$0xff]  ;;  %v12262_v7 = vld [vmem:[#allocation69_spill] sm:$0xff] }
 0x46d   :  { %7006 = vmatprep.subr.bf16.mxu0 %v12252_v40  ;;  %7070 = vmatprep.subr.bf16.mxu1 %v12253_v41  ;;  %v12263_v40 = vld [vmem:[#allocation70_spill] sm:$0xff]  ;;  %v12264_v41 = vld [vmem:[#allocation71_spill] sm:$0xff] }
 0x470   :  { %7008 = vmatpush1.bf16.msra.mxu0 %v12254_v30  ;;  %7072 = vmatpush1.bf16.msra.mxu1 %v12255_v50  ;;  %v12265_v30 = vld [vmem:[#allocation72_spill] sm:$0xff]  ;;  %v12266_v50 = vld [vmem:[#allocation73_spill] sm:$0xff] }
 0x471   :  { %7010 = vmatprep.subr.bf16.mxu0 %v12256_v0  ;;  %7074 = vmatprep.subr.bf16.mxu1 %v12257_v49  ;;  %v12267_v0 = vld [vmem:[#allocation74_spill] sm:$0xff]  ;;  %v12268_v49 = vld [vmem:[#allocation75_spill] sm:$0xff] }
 0x474   :  { %7012 = vmatpush1.bf16.msra.mxu0 %v12258_v4  ;;  %7076 = vmatpush1.bf16.msra.mxu1 %v12259_v39  ;;  %v12269_v4 = vld [vmem:[#allocation76_spill] sm:$0xff]  ;;  %v12270_v39 = vld [vmem:[#allocation77_spill] sm:$0xff] }
 0x475   :  { %7014 = vmatprep.subr.bf16.mxu0 %v12260_v43  ;;  %7078 = vmatprep.subr.bf16.mxu1 %v12261_v44  ;;  %v12271_v43 = vld [vmem:[#allocation78_spill] sm:$0xff]  ;;  %v12272_v44 = vld [vmem:[#allocation79_spill] sm:$0xff] }
 0x478   :  { %7016 = vmatpush1.bf16.msra.mxu0 %v12262_v7  ;;  %7080 = vmatpush1.bf16.msra.mxu1 %v12263_v40  ;;  %v12273_v7 = vld [vmem:[#allocation80_spill] sm:$0xff]  ;;  %v12274_v40 = vld [vmem:[#allocation81_spill] sm:$0xff] }
 0x479   :  { %7018 = vmatprep.subr.bf16.mxu0 %v12264_v41  ;;  %7082 = vmatprep.subr.bf16.mxu1 %v12265_v30  ;;  %v12275_v41 = vld [vmem:[#allocation82_spill] sm:$0xff]  ;;  %v12276_v30 = vld [vmem:[#allocation83_spill] sm:$0xff] }
 0x47c   :  { %7020 = vmatpush1.bf16.msra.mxu0 %v12266_v50  ;;  %7084 = vmatpush1.bf16.msra.mxu1 %v12267_v0  ;;  %v12277_v50 = vld [vmem:[#allocation84_spill] sm:$0xff]  ;;  %v12278_v0 = vld [vmem:[#allocation85_spill] sm:$0xff] }
 0x47d   :  { %7022 = vmatprep.subr.bf16.mxu0 %v12268_v49  ;;  %7086 = vmatprep.subr.bf16.mxu1 %v12269_v4  ;;  %v12279_v49 = vld [vmem:[#allocation86_spill] sm:$0xff]  ;;  %v12280_v4 = vld [vmem:[#allocation87_spill] sm:$0xff] }
 0x480   :  { %7024 = vmatpush1.bf16.msra.mxu0 %v12270_v39  ;;  %7088 = vmatpush1.bf16.msra.mxu1 %v12271_v43  ;;  %v12281_v39 = vld [vmem:[#allocation88_spill] sm:$0xff]  ;;  %v12282_v43 = vld [vmem:[#allocation89_spill] sm:$0xff] }
 0x481   :  { %7026 = vmatprep.subr.bf16.mxu0 %v12272_v44  ;;  %7090 = vmatprep.subr.bf16.mxu1 %v12273_v7  ;;  %v12283_v44 = vld [vmem:[#allocation90_spill] sm:$0xff]  ;;  %v12284_v7 = vld [vmem:[#allocation91_spill] sm:$0xff] }
 0x484   :  { %7028 = vmatpush1.bf16.msra.mxu0 %v12274_v40  ;;  %7092 = vmatpush1.bf16.msra.mxu1 %v12275_v41  ;;  %v12285_v40 = vld [vmem:[#allocation92_spill] sm:$0xff]  ;;  %v12286_v41 = vld [vmem:[#allocation93_spill] sm:$0xff] }
 0x485   :  { %7030 = vmatprep.subr.bf16.mxu0 %v12276_v30  ;;  %7094 = vmatprep.subr.bf16.mxu1 %v12277_v50  ;;  %v12287_v30 = vld [vmem:[#allocation94_spill] sm:$0xff]  ;;  %v12288_v50 = vld [vmem:[#allocation95_spill] sm:$0xff] }
 0x488   :  { %7032 = vmatpush1.bf16.msra.mxu0 %v12278_v0  ;;  %7096 = vmatpush1.bf16.msra.mxu1 %v12279_v49  ;;  %v12289_v0 = vld [vmem:[#allocation96_spill] sm:$0xff]  ;;  %v12290_v49 = vld [vmem:[#allocation97_spill] sm:$0xff] }
 0x489   :  { %7034 = vmatprep.subr.bf16.mxu0 %v12280_v4  ;;  %7098 = vmatprep.subr.bf16.mxu1 %v12281_v39  ;;  %v12291_v4 = vld [vmem:[#allocation98_spill] sm:$0xff]  ;;  %v12292_v39 = vld [vmem:[#allocation9_spill] sm:$0xff] }
 0x48c   :  { %7036 = vmatpush1.bf16.msra.mxu0 %v12282_v43  ;;  %7100 = vmatpush1.bf16.msra.mxu1 %v12283_v44  ;;  %v12293_v43 = vld [vmem:[#allocation10_spill] sm:$0xff] }
 0x48d   :  { %7038 = vmatprep.subr.bf16.mxu0 %v12284_v7  ;;  %7102 = vmatprep.subr.bf16.mxu1 %v12285_v40 }
 0x490   :  { %7040 = vmatpush1.bf16.msra.mxu0 %v12286_v41  ;;  %7104 = vmatpush1.bf16.msra.mxu1 %v12287_v30 }
 0x491   :  { %7042 = vmatprep.subr.bf16.mxu0 %v12288_v50  ;;  %7106 = vmatprep.subr.bf16.mxu1 %v12289_v0  ;;  %v12296_v0 = vld [vmem:[#allocation126_spill] sm:$0xff] }
 0x494   :  { %7044 = vmatpush1.bf16.msra.mxu0 %v12290_v49  ;;  %7108 = vmatpush1.bf16.msra.mxu1 %v12291_v4 }
 0x495   :  { %7110 = vmatprep.subr.bf16.mxu0 %v12292_v39  ;;  %7142 = vmatprep.subr.bf16.mxu1 %v12293_v43 }
 0x50a   :  { %v2473_v44 = vpop.f32.mrb[26].mxu0  ;;  %v2544_v7 = vpop.f32.mrb[26].mxu1 }
 0x50b   :  { %v2474_v40 = vadd.f32 %v2473_v44, %v12294_v6  ;;  %v2475_v48 = vpop.f32.mrb[27].mxu0  ;;  %v2546_v41 = vpop.f32.mrb[27].mxu1  ;;  %v2545_v4 = vadd.f32 %v2544_v7, %v12297_v16 }
 0x50c   :  { %v2476_v30 = vadd.f32 %v2475_v48, %v12295_v55  ;;  %v2547_v49 = vadd.f32 %v2546_v41, %v12296_v0 }
 0x50d   :  { %v6102_v34 = vmul.f32 -1.442695, %v2474_v40 }
 0x50e   :  { %v6103_v50 = vmul.f32 -1.442695, %v2476_v30  ;;  %v6104_v32 = vmul.f32 -1.442695, %v2547_v49 }
 0x50f   :  { %8325 = vpow2.f32 %v6102_v34 }
 0x510   :  { %8327 = vpow2.f32 %v6103_v50 }
 0x511   :  { %8329 = vtanh.f32 %v2545_v4 }
 0x512   :  { %8331 = vpow2.f32 %v6104_v32 }
 0x519   :  { %v8326_v39 = vpop.eup %8325 }
 0x51a   :  { %v8328_v28 = vpop.eup %8327  ;;  %v2552_v43 = vadd.f32 1.0, %v8326_v39 }
 0x51b   :  { %v2558_v23 = vadd.f32 1.0, %v8328_v28  ;;  %v8330_v44 = vpop.eup %8329 }
 0x51c   :  { %8333 = vrcp.f32 %v2552_v43  ;;  %v8332_v6 = vpop.eup %8331 }
 0x51d   :  { %8335 = vrcp.f32 %v2558_v23  ;;  %v2565_v41 = vadd.f32 1.0, %v8332_v6 }
 0x51f   :  { %8337 = vrcp.f32 %v2565_v41 }
 0x526   :  { %v8334_v48 = vpop.eup %8333 }
 0x527   :  { %v8336_v40 = vpop.eup %8335  ;;  %v2569_v30 = vmul.f32 %v8334_v48, %v8330_v44  ;;  %v12298_v48 = vld [vmem:[#allocation100_spill] sm:$0xff] }
 0x528   :  { %v2568_v34 = vmul.f32 %v8336_v40, %v10256_v8  ;;  %v12299_v40 = vld [vmem:[#allocation101_spill] sm:$0xff] }
 0x52a   :  { %v10496_v50 = vadd.f32 %v2569_v30, %v2568_v34  ;;  %v2654_v7 = vpop.f32.mrb[28].mxu0  ;;  %v10498_v49 = vpop.f32.mrb[28].mxu1  ;;  %v12300_v34 = vld [vmem:[#allocation103_spill] sm:$0xff] }
 0x52b   :  { %v2734_v16 = vrot.slane %v2654_v7, 5  ;;  %v2738_v39 = vrot.slane %v2654_v7, 6  ;;  %v2742_v4 = vrot.slane %v2654_v7, 7  ;;  %v2746_v28 = vrot.slane %v2654_v7, 1  ;;  %v10500_v32 = vpop.f32.mrb[29].mxu0  ;;  %v10502_v23 = vpop.f32.mrb[29].mxu1 }
 0x52c   :  { %v2750_v43 = vrot.slane %v2654_v7, 2  ;;  %v2754_v0 = vrot.slane %v2654_v7, 3  ;;  %v2758_v55 = vrot.slane %v2654_v7, 4  ;;  %v2806_v44 = vadd.f32 %v2654_v7, %v9665_v31 }
 0x52d   :  { %v2794_v8 = vadd.f32 %v2734_v16, %v12194_v45  ;;  %v2798_v6 = vadd.f32 %v2738_v39, %v12298_v48  ;;  %v2802_v30 = vadd.f32 %v2742_v4, %v12299_v40  ;;  %v2810_v20 = vadd.f32 %v2746_v28, %v12300_v34 }
 0x52e   :  { %v2814_v57 = vadd.f32 %v2750_v43, %v12301_v61  ;;  %v2818_v3 = vadd.f32 %v2754_v0, %v12302_v11  ;;  %v6108_v26 = vmul.f32 -1.442695, %v2806_v44  ;;  %v2822_v5 = vadd.f32 %v2758_v55, %v12303_v62  ;;  %v12304_v43 = vld [vmem:[#allocation108_spill] sm:$0xff]  ;;  %v12312_v11 = vld [vmem:[#allocation107_spill] sm:$0xff] }
 0x52f   :  { %v6105_v33 = vmul.f32 -1.442695, %v2794_v8  ;;  %v6106_v47 = vmul.f32 -1.442695, %v2798_v6  ;;  %v6107_v58 = vmul.f32 -1.442695, %v2802_v30 }
 0x530   :  { %8339 = vpow2.f32 %v6108_v26  ;;  %v6109_v7 = vmul.f32 -1.442695, %v2810_v20  ;;  %v6110_v16 = vmul.f32 -1.442695, %v2814_v57  ;;  %v2736_v39 = vrot.slane %v10498_v49, 5  ;;  %v12305_v26 = vld [vmem:[#allocation109_spill] sm:$0xff] }
 0x531   :  { %8341 = vpow2.f32 %v6105_v33  ;;  %v2740_v4 = vrot.slane %v10498_v49, 6  ;;  %v6111_v41 = vmul.f32 -1.442695, %v2818_v3  ;;  %v2744_v28 = vrot.slane %v10498_v49, 7  ;;  %v12306_v33 = vld [vmem:[#allocation110_spill] sm:$0xff]  ;;  %v12307_v8 = vld [vmem:[#allocation113_spill] sm:$0xff]  ;;  %v10521_v3 = vpop.eup %8337 }
 0x532   :  { %8343 = vpow2.f32 %v6106_v47  ;;  %v6112_v0 = vmul.f32 -1.442695, %v2822_v5  ;;  %v2748_v55 = vrot.slane %v10498_v49, 1  ;;  %v2796_v44 = vadd.f32 %v2736_v39, %v12304_v43  ;;  %v12308_v6 = vld [vmem:[#allocation111_spill] sm:$0xff] }
 0x533   :  { %8345 = vpow2.f32 %v6107_v58  ;;  %v2800_v20 = vadd.f32 %v2740_v4, %v12305_v26  ;;  %v2804_v57 = vadd.f32 %v2744_v28, %v12306_v33  ;;  %v2808_v47 = vadd.f32 %v10498_v49, %v12307_v8 }
 0x534   :  { %8347 = vpow2.f32 %v6109_v7  ;;  %v2812_v58 = vadd.f32 %v2748_v55, %v12308_v6  ;;  %v2752_v30 = vrot.slane %v10498_v49, 2  ;;  %v2756_v39 = vrot.slane %v10498_v49, 3 }
 0x535   :  { %8349 = vpow2.f32 %v6110_v16  ;;  %v2760_v28 = vrot.slane %v10498_v49, 4  ;;  %v2743_v33 = vrot.slane %v10500_v32, 7 }
 0x536   :  { %8351 = vpow2.f32 %v6111_v41 }
 0x537   :  { %8353 = vpow2.f32 %v6112_v0  ;;  %v2735_v0 = vrot.slane %v10500_v32, 5 }
 0x538   :  { %8355 = vtanh.f32 %v2796_v44  ;;  %v2739_v44 = vrot.slane %v10500_v32, 6 }
 0x539   :  { %8357 = vtanh.f32 %v2800_v20  ;;  %v2795_v61 = vadd.f32 %v2735_v0, %v12312_v11 }
 0x53a   :  { %v8340_v5 = vpop.eup %8339  ;;  %8359 = vtanh.f32 %v2804_v57  ;;  %v12309_v57 = vld [vmem:[#allocation118_spill] sm:$0xff] }
 0x53b   :  { %v8342_v7 = vpop.eup %8341  ;;  %v2853_v16 = vadd.f32 1.0, %v8340_v5  ;;  %8361 = vtanh.f32 %v2808_v47  ;;  %v2816_v5 = vadd.f32 %v2752_v30, %v12309_v57  ;;  %v2751_v30 = vrot.slane %v10500_v32, 2  ;;  %v12313_v57 = vld [vmem:[#allocation114_spill] sm:$0xff] }
 0x53c   :  { %v8344_v4 = vpop.eup %8343  ;;  %v2850_v41 = vadd.f32 1.0, %v8342_v7  ;;  %8363 = vtanh.f32 %v2812_v58  ;;  %v12310_v7 = vld [vmem:[#allocation119_spill] sm:$0xff]  ;;  %v2747_v58 = vrot.slane %v10500_v32, 1  ;;  %v2799_v31 = vadd.f32 %v2739_v44, %v12313_v57 }
 0x53d   :  { %v8346_v8 = vpop.eup %8345  ;;  %v2851_v55 = vadd.f32 1.0, %v8344_v4  ;;  %8365 = vrcp.f32 %v2853_v16  ;;  %v2820_v49 = vadd.f32 %v2756_v39, %v12310_v7  ;;  %v12311_v16 = vld [vmem:[#allocation122_spill] sm:$0xff]  ;;  %v2755_v39 = vrot.slane %v10500_v32, 3  ;;  %v12314_v7 = vld [vmem:[#allocation115_spill] sm:$0xff] }
 0x53e   :  { %v8348_v20 = vpop.eup %8347  ;;  %v2852_v6 = vadd.f32 1.0, %v8346_v8  ;;  %8367 = vrcp.f32 %v2850_v41  ;;  %v2824_v4 = vadd.f32 %v2760_v28, %v12311_v16  ;;  %v2803_v40 = vadd.f32 %v2743_v33, %v12314_v7  ;;  %v12315_v28 = vld [vmem:[#allocation116_spill] sm:$0xff] }
 0x53f   :  { %v8350_v47 = vpop.eup %8349  ;;  %v2854_v26 = vadd.f32 1.0, %v8348_v20  ;;  %8369 = vrcp.f32 %v2851_v55  ;;  %v2807_v0 = vadd.f32 %v10500_v32, %v12315_v28  ;;  %v6113_v11 = vmul.f32 -1.442695, %v2795_v61 }
 0x540   :  { %v8352_v43 = vpop.eup %8351  ;;  %v2855_v62 = vadd.f32 1.0, %v8350_v47  ;;  %8371 = vrcp.f32 %v2852_v6  ;;  %v2759_v6 = vrot.slane %v10500_v32, 4  ;;  %v2737_v44 = vrot.slane %v10502_v23, 5 }
 0x541   :  { %v8354_v8 = vpop.eup %8353  ;;  %v2856_v41 = vadd.f32 1.0, %v8352_v43  ;;  %8373 = vrcp.f32 %v2854_v26  ;;  %v12316_v43 = vld [vmem:[#allocation117_spill] sm:$0xff]  ;;  %v6114_v48 = vmul.f32 -1.442695, %v2799_v31  ;;  %v2741_v33 = vrot.slane %v10502_v23, 6 }
 0x542   :  { %v8356_v20 = vpop.eup %8355  ;;  %v2857_v55 = vadd.f32 1.0, %v8354_v8  ;;  %8375 = vrcp.f32 %v2855_v62  ;;  %v2811_v26 = vadd.f32 %v2747_v58, %v12316_v43  ;;  %v12317_v62 = vld [vmem:[#allocation120_spill] sm:$0xff]  ;;  %v2819_v7 = vadd.f32 %v2755_v39, %v12097_v18 }
 0x543   :  { %v8358_v47 = vpop.eup %8357  ;;  %8377 = vrcp.f32 %v2856_v41  ;;  %v2815_v57 = vadd.f32 %v2751_v30, %v12317_v62  ;;  %v6115_v45 = vmul.f32 -1.442695, %v2803_v40  ;;  %v2745_v32 = vrot.slane %v10502_v23, 7 }
 0x544   :  { %v8360_v16 = vpop.eup %8359  ;;  %8379 = vrcp.f32 %v2857_v55  ;;  %v2823_v61 = vadd.f32 %v2759_v6, %v12208_v59  ;;  %v6116_v55 = vmul.f32 -1.442695, %v2807_v0  ;;  %v6117_v43 = vmul.f32 -1.442695, %v2811_v26 }
 0x545   :  { %v8362_v8 = vpop.eup %8361  ;;  %8381 = vtanh.f32 %v2816_v5  ;;  %v2749_v31 = vrot.slane %v10502_v23, 1  ;;  %v2797_v30 = vadd.f32 %v2737_v44, %v12099_v2  ;;  %v6118_v40 = vmul.f32 -1.442695, %v2815_v57 }
 0x546   :  { %v8364_v41 = vpop.eup %8363  ;;  %8383 = vtanh.f32 %v2820_v49  ;;  %v2801_v39 = vadd.f32 %v2741_v33, %v9734_v27  ;;  %v6119_v6 = vmul.f32 -1.442695, %v2819_v7  ;;  %v2805_v0 = vadd.f32 %v2745_v32, %v9743_v17 }
 0x547   :  { %v8366_v58 = vpop.eup %8365  ;;  %8385 = vtanh.f32 %v2824_v4  ;;  %v6121_v57 = vmul.f32 -1.442695, %v2797_v30 }
 0x548   :  { %v8368_v28 = vpop.eup %8367  ;;  %v10549_v5 = vmul.f32 %v8366_v58, %v8362_v8  ;;  %8387 = vpow2.f32 %v6113_v11  ;;  %v6120_v8 = vmul.f32 -1.442695, %v2823_v61  ;;  %v6123_v33 = vmul.f32 -1.442695, %v2805_v0 }
 0x549   :  { %v8370_v49 = vpop.eup %8369  ;;  %v10553_v62 = vmul.f32 %v8368_v28, %v8356_v20  ;;  %8389 = vpow2.f32 %v6114_v48  ;;  %v2809_v20 = vadd.f32 %v10502_v23, %v9752_v22  ;;  %v2813_v48 = vadd.f32 %v2749_v31, %v9766_v19 }
 0x54a   :  { %v8372_v4 = vpop.eup %8371  ;;  %v10556_v18 = vmul.f32 %v8370_v49, %v8358_v47  ;;  %8391 = vpow2.f32 %v6115_v45  ;;  %v6122_v45 = vmul.f32 -1.442695, %v2801_v39  ;;  %v2753_v31 = vrot.slane %v10502_v23, 2 }
 0x54b   :  { %v8374_v26 = vpop.eup %8373  ;;  %v10559_v11 = vmul.f32 %v8372_v4, %v8360_v16  ;;  %8393 = vpow2.f32 %v6116_v55  ;;  %v6124_v32 = vmul.f32 -1.442695, %v2809_v20  ;;  %v6125_v61 = vmul.f32 -1.442695, %v2813_v48 }
 0x54c   :  { %v8376_v28 = vpop.eup %8375  ;;  %8395 = vpow2.f32 %v6117_v43  ;;  %v10564_v44 = vmul.f32 %v8374_v26, %v8364_v41  ;;  %v2757_v49 = vrot.slane %v10502_v23, 3 }
 0x54d   :  { %v8378_v47 = vpop.eup %8377  ;;  %8397 = vpow2.f32 %v6118_v40 }
 0x54e   :  { %v8380_v7 = vpop.eup %8379  ;;  %8399 = vpow2.f32 %v6119_v6  ;;  %v2761_v6 = vrot.slane %v10502_v23, 4 }
 0x54f   :  { %v8382_v16 = vpop.eup %8381  ;;  %8401 = vpow2.f32 %v6120_v8 }
 0x550   :  { %v8384_v58 = vpop.eup %8383  ;;  %8403 = vpow2.f32 %v6121_v57  ;;  %v10566_v55 = vmul.f32 %v8382_v16, %v8376_v28  ;;  %v2817_v28 = vadd.f32 %v2753_v31, %v9833_v13 }
 0x551   :  { %v8386_v43 = vpop.eup %8385  ;;  %8405 = vpow2.f32 %v6122_v45  ;;  %v10569_v41 = vmul.f32 %v8384_v58, %v8378_v47  ;;  %v2821_v47 = vadd.f32 %v2757_v49, %v9840_v1 }
 0x552   :  { %v8388_v30 = vpop.eup %8387  ;;  %8407 = vpow2.f32 %v6123_v33  ;;  %v10572_v40 = vmul.f32 %v8386_v43, %v8380_v7  ;;  %v2825_v33 = vadd.f32 %v2761_v6, %v9849_v12 }
 0x553   :  { %v8390_v39 = vpop.eup %8389  ;;  %v2898_v4 = vadd.f32 1.0, %v8388_v30  ;;  %8409 = vpow2.f32 %v6124_v32  ;;  %v6127_v31 = vmul.f32 -1.442695, %v2821_v47 }
 0x554   :  { %v8392_v0 = vpop.eup %8391  ;;  %v2899_v26 = vadd.f32 1.0, %v8390_v39  ;;  %8411 = vpow2.f32 %v6125_v61  ;;  %v6126_v61 = vmul.f32 -1.442695, %v2817_v28 }
 0x555   :  { %v8394_v8 = vpop.eup %8393  ;;  %v2900_v20 = vadd.f32 1.0, %v8392_v0  ;;  %8413 = vrcp.f32 %v2898_v4  ;;  %v6128_v4 = vmul.f32 -1.442695, %v2825_v33 }
 0x556   :  { %v8396_v48 = vpop.eup %8395  ;;  %v2901_v57 = vadd.f32 1.0, %v8394_v8  ;;  %8415 = vrcp.f32 %v2899_v26 }
 0x557   :  { %v8398_v45 = vpop.eup %8397  ;;  %v2902_v7 = vadd.f32 1.0, %v8396_v48  ;;  %8417 = vrcp.f32 %v2900_v20  ;;  %v2986_v48 = vrot.slane %v10344_v46, 7  ;;  %v2990_v46 = vrot.slane %v10360_v52, 7 }
 0x558   :  { %v8400_v23 = vpop.eup %8399  ;;  %v2903_v16 = vadd.f32 1.0, %v8398_v45  ;;  %8419 = vrcp.f32 %v2901_v57  ;;  %v2987_v45 = vrot.slane %v10348_v35, 7 }
 0x559   :  { %v8402_v32 = vpop.eup %8401  ;;  %v2904_v58 = vadd.f32 1.0, %v8400_v23  ;;  %8421 = vrcp.f32 %v2902_v7  ;;  %v2988_v7 = vrot.slane %v10352_v51, 7 }
 0x55a   :  { %v8404_v43 = vpop.eup %8403  ;;  %v2905_v30 = vadd.f32 1.0, %v8402_v32  ;;  %8423 = vrcp.f32 %v2903_v16  ;;  %v2989_v32 = vrot.slane %v10357_v15, 7  ;;  %v2992_v15 = vrot.slane %v10368_v53, 7 }
 0x55b   :  { %v8406_v39 = vpop.eup %8405  ;;  %8425 = vrcp.f32 %v2904_v58  ;;  %v2954_v0 = vadd.f32 1.0, %v8404_v43 }
 0x55c   :  { %v8408_v49 = vpop.eup %8407  ;;  %8427 = vrcp.f32 %v2905_v30  ;;  %v2955_v6 = vadd.f32 1.0, %v8406_v39 }
 0x55d   :  { %v8410_v26 = vpop.eup %8409  ;;  %8429 = vpow2.f32 %v6126_v61  ;;  %v2956_v20 = vadd.f32 1.0, %v8408_v49 }
 0x55e   :  { %v8412_v8 = vpop.eup %8411  ;;  %8431 = vpow2.f32 %v6127_v31  ;;  %v2957_v28 = vadd.f32 1.0, %v8410_v26  ;;  %v2991_v31 = vrot.slane %v10364_v21, 7 }
 0x55f   :  { %v8414_v57 = vpop.eup %8413  ;;  %8433 = vpow2.f32 %v6128_v4  ;;  %v2958_v16 = vadd.f32 1.0, %v8412_v8 }
 0x560   :  { %v8416_v47 = vpop.eup %8415  ;;  %8435 = vrcp.f32 %v2954_v0  ;;  %v3002_v33 = vmul.f32 %v8414_v57, %v2986_v48 }
 0x561   :  { %v8418_v23 = vpop.eup %8417  ;;  %8437 = vrcp.f32 %v2955_v6  ;;  %v3003_v58 = vmul.f32 %v8416_v47, %v2987_v45 }
 0x562   :  { %v8420_v61 = vpop.eup %8419  ;;  %8439 = vrcp.f32 %v2956_v20  ;;  %v3004_v43 = vmul.f32 %v8418_v23, %v2988_v7  ;;  %v10584_v30 = vadd.f32 %v10553_v62, %v3002_v33  ;;  %v2993_v62 = vrot.slane %v10372_v54, 7 }
 0x563   :  { %v8422_v35 = vpop.eup %8421  ;;  %8441 = vrcp.f32 %v2957_v28  ;;  %v3005_v51 = vmul.f32 %v8420_v61, %v2989_v32  ;;  %v10588_v39 = vadd.f32 %v10556_v18, %v3003_v58 }
 0x564   :  { %v8424_v4 = vpop.eup %8423  ;;  %8443 = vtanh.f32 %v10496_v50  ;;  %v3006_v49 = vmul.f32 %v8422_v35, %v2990_v46  ;;  %v10593_v52 = vadd.f32 %v10559_v11, %v3004_v43 }
 0x565   :  { %v8426_v0 = vpop.eup %8425  ;;  %8445 = vrcp.f32 %v2958_v16  ;;  %v3007_v26 = vmul.f32 %v8424_v4, %v2991_v31  ;;  %v10597_v21 = vadd.f32 %v10549_v5, %v3005_v51 }
 0x566   :  { %v8428_v6 = vpop.eup %8427  ;;  %v3008_v18 = vmul.f32 %v8426_v0, %v2992_v15  ;;  %v10600_v8 = vadd.f32 %v10564_v44, %v3006_v49  ;;  %8447 = vtanh.f32 %v10584_v30 }
 0x567   :  { %v8430_v53 = vpop.eup %8429  ;;  %v3009_v20 = vmul.f32 %v8428_v6, %v2993_v62  ;;  %v10604_v11 = vadd.f32 %v10566_v55, %v3007_v26  ;;  %8449 = vtanh.f32 %v10588_v39 }
 0x568   :  { %v8432_v54 = vpop.eup %8431  ;;  %v2959_v48 = vadd.f32 1.0, %v8430_v53  ;;  %v10608_v57 = vadd.f32 %v10569_v41, %v3008_v18  ;;  %8451 = vtanh.f32 %v10593_v52 }
 0x569   :  { %v8434_v5 = vpop.eup %8433  ;;  %v2960_v28 = vadd.f32 1.0, %v8432_v54  ;;  %v10612_v44 = vadd.f32 %v10572_v40, %v3009_v20  ;;  %8453 = vtanh.f32 %v10597_v21 }
 0x56a   :  { %v8436_v45 = vpop.eup %8435  ;;  %v2961_v47 = vadd.f32 1.0, %v8434_v5  ;;  %8455 = vrcp.f32 %v2959_v48 }
 0x56b   :  { %v8438_v55 = vpop.eup %8437  ;;  %8457 = vrcp.f32 %v2960_v28 }
 0x56c   :  { %v8440_v7 = vpop.eup %8439  ;;  %8459 = vrcp.f32 %v2961_v47 }
 0x56d   :  { %v8442_v33 = vpop.eup %8441  ;;  %8461 = vtanh.f32 %v10600_v8 }
 0x56e   :  { %v8444_v41 = vpop.eup %8443  ;;  %8463 = vtanh.f32 %v10604_v11 }
 0x56f   :  { %v8446_v23 = vpop.eup %8445  ;;  %v2572_v16 = vmul.f32 %v8444_v41, %v10521_v3  ;;  %8465 = vtanh.f32 %v10608_v57 }
 0x570   :  { %v8448_v40 = vpop.eup %8447  ;;  %8467 = vtanh.f32 %v10612_v44 }
 0x571   :  { %v8450_v32 = vpop.eup %8449  ;;  %v3064_v58 = vrot.slane %v2572_v16, 5  ;;  %v3034_v61 = vmul.f32 %v8448_v40, %v8436_v45 }
 0x572   :  { %v8452_v46 = vpop.eup %8451  ;;  %v3035_v43 = vmul.f32 %v8450_v32, %v8438_v55 }
 0x573   :  { %v8454_v35 = vpop.eup %8453  ;;  %v3069_v31 = vrot.slane %v3064_v58, 3  ;;  %v3036_v51 = vmul.f32 %v8452_v46, %v8440_v7  ;;  %v3239_v4 = vrot.slane %v3034_v61, 3 }
 0x574   :  { %v8456_v15 = vpop.eup %8455  ;;  %v3037_v49 = vmul.f32 %v8454_v35, %v8442_v33  ;;  %v3050_v0 = vrot.slane %v3035_v43, 7  ;;  %v3240_v62 = vrot.slane %v3035_v43, 2 }
 0x575   :  { %v8458_v26 = vpop.eup %8457  ;;  %3137 = vmatprep.mubr.f32.mxu0 %v3069_v31  ;;  %3208 = vmatprep.mubr.f32.mxu1 %v3069_v31  ;;  %v3052_v3 = vrot.slane %v3036_v51, 6  ;;  %v3242_v6 = vrot.slane %v3036_v51, 1 }
 0x576   :  { %v8460_v18 = vpop.eup %8459  ;;  %v3051_v53 = vsel %vm1078_vm5, %v3050_v0, %v3034_v61  ;;  %v3054_v20 = vrot.slane %v3037_v49, 5  ;;  %v3241_v54 = vsel %vm1069_vm2, %v3240_v62, %v3239_v4 }
 0x577   :  { %v8462_v48 = vpop.eup %8461  ;;  %v3053_v5 = vsel %vm1081_vm6, %v3052_v3, %v3051_v53  ;;  %v3243_v28 = vsel %vm1072_vm3, %v3242_v6, %v3241_v54  ;;  %v12319_v54 = vld [vmem:[#allocation18_spill] sm:$0xff] }
 0x578   :  { %v8464_v45 = vpop.eup %8463  ;;  %v3038_v47 = vmul.f32 %v8462_v48, %v8446_v23  ;;  %v3055_v55 = vsel %vm1084_vm7, %v3054_v20, %v3053_v5  ;;  %v3244_v7 = vsel %vm1075_vm4, %v3037_v49, %v3243_v28  ;;  %v12318_v20 = vld [vmem:[#allocation17_spill] sm:$0xff]  ;;  %v12320_v48 = vld [vmem:[#allocation19_spill] sm:$0xff]  ;;  %v12321_v5 = vld [vmem:[#allocation20_spill] sm:$0xff] }
 0x579   :  { %v8466_v33 = vpop.eup %8465  ;;  %v3039_v41 = vmul.f32 %v8464_v45, %v8456_v15  ;;  %v12322_v28 = vld [vmem:[#allocation21_spill] sm:$0xff]  ;;  %v12323_v45 = vld [vmem:[#allocation22_spill] sm:$0xff] }
 0x57a   :  { %v8468_v16 = vpop.eup %8467  ;;  %v3040_v40 = vmul.f32 %v8466_v33, %v8458_v26  ;;  %v3056_v32 = vrot.slane %v3038_v47, 4  ;;  %v3245_v58 = vrot.slane %v3038_v47, 7  ;;  %v12324_v47 = vld [vmem:[#allocation23_spill] sm:$0xff]  ;;  %v12327_v33 = vld [vmem:[#allocation26_spill] sm:$0xff] }
 0x57b   :  { %v3041_v61 = vmul.f32 %v8468_v16, %v8460_v18  ;;  %v3058_v46 = vrot.slane %v3039_v41, 3  ;;  %v3247_v43 = vrot.slane %v3039_v41, 6  ;;  %v12328_v41 = vld [vmem:[#allocation27_spill] sm:$0xff]  ;;  %v12329_v16 = vld [vmem:[#allocation28_spill] sm:$0xff] }
 0x57c   :  { %v3057_v35 = vsel %vm1087_vm8, %v3056_v32, %v3055_v55  ;;  %v3059_v31 = vrot.slane %v3040_v40, 2  ;;  %v3246_v51 = vsel %vm1078_vm5, %v3245_v58, %v3244_v7  ;;  %v3249_v4 = vrot.slane %v3040_v40, 5  ;;  %v12325_v55 = vld [vmem:[#allocation24_spill] sm:$0xff]  ;;  %v12326_v7 = vld [vmem:[#allocation25_spill] sm:$0xff]  ;;  %v12331_v32 = vld [vmem:[#allocation30_spill] sm:$0xff] }
 0x57d   :  { %v3061_v23 = vrot.slane %v3041_v61, 1  ;;  %v3248_v0 = vsel %vm1081_vm6, %v3247_v43, %v3246_v51  ;;  %v3251_v62 = vrot.slane %v3041_v61, 4  ;;  %v3066_v15 = vrot.slane %v3057_v35, 3  ;;  %v12330_v40 = vld [vmem:[#allocation29_spill] sm:$0xff]  ;;  %v12332_v58 = vld [vmem:[#allocation31_spill] sm:$0xff]  ;;  %v12333_v61 = vld [vmem:[#allocation32_spill] sm:$0xff] }
 0x57e   :  { %v3060_v49 = vsel %vm1069_vm2, %v3059_v31, %v3058_v46  ;;  %v3250_v26 = vsel %vm1084_vm7, %v3249_v4, %v3248_v0  ;;  %v12334_v46 = vld [vmem:[#allocation33_spill] sm:$0xff]  ;;  %v12335_v43 = vld [vmem:[#allocation34_spill] sm:$0xff]  ;;  %v12336_v35 = vld [vmem:[#allocation35_spill] sm:$0xff] }
 0x57f   :  { %v3062_v3 = vsel %vm1072_vm3, %v3061_v23, %v3060_v49  ;;  %v3252_v6 = vsel %vm1087_vm8, %v3251_v62, %v3250_v26  ;;  %v12337_v31 = vld [vmem:[#allocation36_spill] sm:$0xff]  ;;  %v12338_v51 = vld [vmem:[#allocation37_spill] sm:$0xff]  ;;  %v12339_v4 = vld [vmem:[#allocation38_spill] sm:$0xff] }
 0x580   :  { %v3067_v18 = vrot.slane %v3062_v3, 3  ;;  %v12340_v23 = vld [vmem:[#allocation39_spill] sm:$0xff]  ;;  %v12341_v0 = vld [vmem:[#allocation40_spill] sm:$0xff]  ;;  %v12342_v62 = vld [vmem:[#allocation41_spill] sm:$0xff] }
 0x581   :  { %v12343_v49 = vld [vmem:[#allocation42_spill] sm:$0xff]  ;;  %v12345_v26 = vld [vmem:[#allocation44_spill] sm:$0xff]  ;;  %v12346_v3 = vld [vmem:[#allocation45_spill] sm:$0xff] }
 0x582   :  { %v3068_v53 = vsel %vm3065_vm11, %v3066_v15, %v3067_v18  ;;  %v12344_v15 = vld [vmem:[#allocation43_spill] sm:$0xff]  ;;  %v12347_v18 = vld [vmem:[#allocation46_spill] sm:$0xff] }
 0x583   :  { %3138 = vmatmul.mubr.f32.vlgmr.msra.gmra.mrb[30].mxu0 %v3068_v53  ;;  %3209 = vmatmul.mubr.f32.vlgmr.msra.gmra.mrb[30].mxu1 %v3068_v53  ;;  %v12349_v53 = vld [vmem:[#allocation48_spill] sm:$0xff] }
 0x584   :  { %7112 = vmatpush1.bf16.msra.mxu0 %v9247_v25  ;;  %7144 = vmatpush1.bf16.msra.mxu1 %v9250_v29 }
 0x585   :  { %7114 = vmatprep.subr.bf16.mxu0 %v9259_v36  ;;  %7146 = vmatprep.subr.bf16.mxu1 %v9263_v37 }
 0x586   :  { %3318 = vmatprep.mubr.f32.mxu0 %v11994_v9  ;;  %3389 = vmatprep.mubr.f32.mxu1 %v11994_v9 }
 0x588   :  { %7116 = vmatpush1.bf16.msra.mxu0 %v9265_v38  ;;  %7148 = vmatpush1.bf16.msra.mxu1 %v9269_v42 }
 0x589   :  { %7118 = vmatprep.subr.bf16.mxu0 %v12100_v60  ;;  %7150 = vmatprep.subr.bf16.mxu1 %v12101_v24 }
 0x58c   :  { %7120 = vmatpush1.bf16.msra.mxu0 %v12102_v14  ;;  %7152 = vmatpush1.bf16.msra.mxu1 %v12103_v63 }
 0x58d   :  { %7122 = vmatprep.subr.bf16.mxu0 %v12104_v56  ;;  %7154 = vmatprep.subr.bf16.mxu1 %v12209_v10 }
 0x590   :  { %7124 = vmatpush1.bf16.msra.mxu0 %v12318_v20  ;;  %7156 = vmatpush1.bf16.msra.mxu1 %v12319_v54 }
 0x591   :  { %7126 = vmatprep.subr.bf16.mxu0 %v12320_v48  ;;  %7158 = vmatprep.subr.bf16.mxu1 %v12321_v5 }
 0x594   :  { %7128 = vmatpush1.bf16.msra.mxu0 %v12322_v28  ;;  %7160 = vmatpush1.bf16.msra.mxu1 %v12323_v45  ;;  %v12412_v45 = vld [vmem:[#allocation106_spill] sm:$0xff] }
 0x595   :  { %7130 = vmatprep.subr.bf16.mxu0 %v12324_v47  ;;  %7162 = vmatprep.subr.bf16.mxu1 %v12325_v55 }
 0x598   :  { %7132 = vmatpush1.bf16.msra.mxu0 %v12326_v7  ;;  %7164 = vmatpush1.bf16.msra.mxu1 %v12327_v33  ;;  %v12411_v7 = vld [vmem:[#allocation105_spill] sm:$0xff] }
 0x599   :  { %7134 = vmatprep.subr.bf16.mxu0 %v12328_v41  ;;  %7166 = vmatprep.subr.bf16.mxu1 %v12329_v16  ;;  %v12410_v41 = vld [vmem:[#allocation104_spill] sm:$0xff] }
 0x59c   :  { %7136 = vmatpush1.bf16.msra.mxu0 %v12330_v40  ;;  %7168 = vmatpush1.bf16.msra.mxu1 %v12331_v32  ;;  %v12409_v40 = vld [vmem:[#allocation102_spill] sm:$0xff] }
 0x59d   :  { %7138 = vmatprep.subr.bf16.mxu0 %v12332_v58  ;;  %7170 = vmatprep.subr.bf16.mxu1 %v12333_v61 }
 0x5a0   :  { %7140 = vmatpush1.bf16.msra.mxu0 %v12334_v46  ;;  %7172 = vmatpush1.bf16.msra.mxu1 %v12335_v43  ;;  %v12405_v46 = vld [vmem:[#allocation127_spill] sm:$0xff] }
 0x5a1   :  { %7174 = vmatprep.subr.bf16.mxu0 %v12336_v35  ;;  %7238 = vmatprep.subr.bf16.mxu1 %v12337_v31  ;;  %v12403_v35 = vld [vmem:[#allocation125_spill] sm:$0xff] }
 0x5a3   :  { %3319 = vmatmul.mubr.f32.vlgmr.msra.gmra.mrb[32].mxu0 %v3252_v6  ;;  %3390 = vmatmul.mubr.f32.vlgmr.msra.gmra.mrb[32].mxu1 %v3252_v6  ;;  %v12348_v6 = vld [vmem:[#allocation47_spill] sm:$0xff] }
 0x5a4   :  { %7176 = vmatpush1.bf16.msra.mxu0 %v12338_v51  ;;  %7240 = vmatpush1.bf16.msra.mxu1 %v12339_v4  ;;  %v12350_v4 = vld [vmem:[#allocation49_spill] sm:$0xff]  ;;  %v12402_v51 = vld [vmem:[#allocation124_spill] sm:$0xff] }
 0x5a5   :  { %7178 = vmatprep.subr.bf16.mxu0 %v12340_v23  ;;  %7242 = vmatprep.subr.bf16.mxu1 %v12341_v0  ;;  %v12351_v23 = vld [vmem:[#allocation50_spill] sm:$0xff]  ;;  %v12352_v0 = vld [vmem:[#allocation51_spill] sm:$0xff] }
 0x5a8   :  { %7180 = vmatpush1.bf16.msra.mxu0 %v12342_v62  ;;  %7244 = vmatpush1.bf16.msra.mxu1 %v12343_v49  ;;  %v12353_v62 = vld [vmem:[#allocation52_spill] sm:$0xff]  ;;  %v12354_v49 = vld [vmem:[#allocation53_spill] sm:$0xff] }
 0x5a9   :  { %7182 = vmatprep.subr.bf16.mxu0 %v12344_v15  ;;  %7246 = vmatprep.subr.bf16.mxu1 %v12345_v26  ;;  %v12355_v15 = vld [vmem:[#allocation54_spill] sm:$0xff]  ;;  %v12356_v26 = vld [vmem:[#allocation55_spill] sm:$0xff] }
 0x5ac   :  { %7184 = vmatpush1.bf16.msra.mxu0 %v12346_v3  ;;  %7248 = vmatpush1.bf16.msra.mxu1 %v12347_v18  ;;  %v12357_v3 = vld [vmem:[#allocation56_spill] sm:$0xff]  ;;  %v12358_v18 = vld [vmem:[#allocation57_spill] sm:$0xff] }
 0x5ad   :  { %7186 = vmatprep.subr.bf16.mxu0 %v12348_v6  ;;  %7250 = vmatprep.subr.bf16.mxu1 %v12349_v53  ;;  %v12359_v6 = vld [vmem:[#allocation58_spill] sm:$0xff]  ;;  %v12360_v53 = vld [vmem:[#allocation59_spill] sm:$0xff] }
 0x5b0   :  { %7188 = vmatpush1.bf16.msra.mxu0 %v12350_v4  ;;  %7252 = vmatpush1.bf16.msra.mxu1 %v12351_v23  ;;  %v12361_v4 = vld [vmem:[#allocation60_spill] sm:$0xff]  ;;  %v12362_v23 = vld [vmem:[#allocation61_spill] sm:$0xff] }
 0x5b1   :  { %7190 = vmatprep.subr.bf16.mxu0 %v12352_v0  ;;  %7254 = vmatprep.subr.bf16.mxu1 %v12353_v62  ;;  %v12363_v0 = vld [vmem:[#allocation62_spill] sm:$0xff]  ;;  %v12364_v62 = vld [vmem:[#allocation63_spill] sm:$0xff] }
 0x5b4   :  { %7192 = vmatpush1.bf16.msra.mxu0 %v12354_v49  ;;  %7256 = vmatpush1.bf16.msra.mxu1 %v12355_v15  ;;  %v12365_v49 = vld [vmem:[#allocation64_spill] sm:$0xff]  ;;  %v12366_v15 = vld [vmem:[#allocation65_spill] sm:$0xff] }
 0x5b5   :  { %7194 = vmatprep.subr.bf16.mxu0 %v12356_v26  ;;  %7258 = vmatprep.subr.bf16.mxu1 %v12357_v3  ;;  %v12367_v26 = vld [vmem:[#allocation66_spill] sm:$0xff]  ;;  %v12368_v3 = vld [vmem:[#allocation67_spill] sm:$0xff] }
 0x5b8   :  { %7196 = vmatpush1.bf16.msra.mxu0 %v12358_v18  ;;  %7260 = vmatpush1.bf16.msra.mxu1 %v12359_v6  ;;  %v12369_v18 = vld [vmem:[#allocation68_spill] sm:$0xff]  ;;  %v12370_v6 = vld [vmem:[#allocation69_spill] sm:$0xff] }
 0x5b9   :  { %7198 = vmatprep.subr.bf16.mxu0 %v12360_v53  ;;  %7262 = vmatprep.subr.bf16.mxu1 %v12361_v4  ;;  %v12371_v53 = vld [vmem:[#allocation70_spill] sm:$0xff]  ;;  %v12372_v4 = vld [vmem:[#allocation71_spill] sm:$0xff] }
 0x5bc   :  { %7200 = vmatpush1.bf16.msra.mxu0 %v12362_v23  ;;  %7264 = vmatpush1.bf16.msra.mxu1 %v12363_v0  ;;  %v12373_v23 = vld [vmem:[#allocation72_spill] sm:$0xff]  ;;  %v12374_v0 = vld [vmem:[#allocation73_spill] sm:$0xff] }
 0x5bd   :  { %7202 = vmatprep.subr.bf16.mxu0 %v12364_v62  ;;  %7266 = vmatprep.subr.bf16.mxu1 %v12365_v49  ;;  %v12375_v62 = vld [vmem:[#allocation74_spill] sm:$0xff]  ;;  %v12376_v49 = vld [vmem:[#allocation75_spill] sm:$0xff] }
 0x5c0   :  { %7204 = vmatpush1.bf16.msra.mxu0 %v12366_v15  ;;  %7268 = vmatpush1.bf16.msra.mxu1 %v12367_v26  ;;  %v12377_v15 = vld [vmem:[#allocation76_spill] sm:$0xff]  ;;  %v12378_v26 = vld [vmem:[#allocation77_spill] sm:$0xff] }
 0x5c1   :  { %7206 = vmatprep.subr.bf16.mxu0 %v12368_v3  ;;  %7270 = vmatprep.subr.bf16.mxu1 %v12369_v18  ;;  %v12379_v3 = vld [vmem:[#allocation78_spill] sm:$0xff]  ;;  %v12380_v18 = vld [vmem:[#allocation79_spill] sm:$0xff] }
 0x5c4   :  { %7208 = vmatpush1.bf16.msra.mxu0 %v12370_v6  ;;  %7272 = vmatpush1.bf16.msra.mxu1 %v12371_v53  ;;  %v12381_v6 = vld [vmem:[#allocation80_spill] sm:$0xff]  ;;  %v12382_v53 = vld [vmem:[#allocation81_spill] sm:$0xff] }
 0x5c5   :  { %7210 = vmatprep.subr.bf16.mxu0 %v12372_v4  ;;  %7274 = vmatprep.subr.bf16.mxu1 %v12373_v23  ;;  %v12383_v4 = vld [vmem:[#allocation82_spill] sm:$0xff]  ;;  %v12384_v23 = vld [vmem:[#allocation83_spill] sm:$0xff] }
 0x5c8   :  { %7212 = vmatpush1.bf16.msra.mxu0 %v12374_v0  ;;  %7276 = vmatpush1.bf16.msra.mxu1 %v12375_v62  ;;  %v12385_v0 = vld [vmem:[#allocation84_spill] sm:$0xff]  ;;  %v12386_v62 = vld [vmem:[#allocation85_spill] sm:$0xff] }
 0x5c9   :  { %7214 = vmatprep.subr.bf16.mxu0 %v12376_v49  ;;  %7278 = vmatprep.subr.bf16.mxu1 %v12377_v15  ;;  %v12387_v49 = vld [vmem:[#allocation86_spill] sm:$0xff]  ;;  %v12388_v15 = vld [vmem:[#allocation87_spill] sm:$0xff] }
 0x5cc   :  { %7216 = vmatpush1.bf16.msra.mxu0 %v12378_v26  ;;  %7280 = vmatpush1.bf16.msra.mxu1 %v12379_v3  ;;  %v12389_v26 = vld [vmem:[#allocation88_spill] sm:$0xff]  ;;  %v12390_v3 = vld [vmem:[#allocation89_spill] sm:$0xff] }
 0x5cd   :  { %7218 = vmatprep.subr.bf16.mxu0 %v12380_v18  ;;  %7282 = vmatprep.subr.bf16.mxu1 %v12381_v6  ;;  %v12391_v18 = vld [vmem:[#allocation90_spill] sm:$0xff]  ;;  %v12392_v6 = vld [vmem:[#allocation91_spill] sm:$0xff] }
 0x5d0   :  { %7220 = vmatpush1.bf16.msra.mxu0 %v12382_v53  ;;  %7284 = vmatpush1.bf16.msra.mxu1 %v12383_v4  ;;  %v12393_v53 = vld [vmem:[#allocation92_spill] sm:$0xff]  ;;  %v12394_v4 = vld [vmem:[#allocation93_spill] sm:$0xff] }
 0x5d1   :  { %7222 = vmatprep.subr.bf16.mxu0 %v12384_v23  ;;  %7286 = vmatprep.subr.bf16.mxu1 %v12385_v0  ;;  %v12395_v23 = vld [vmem:[#allocation94_spill] sm:$0xff]  ;;  %v12396_v0 = vld [vmem:[#allocation95_spill] sm:$0xff] }
 0x5d4   :  { %7224 = vmatpush1.bf16.msra.mxu0 %v12386_v62  ;;  %7288 = vmatpush1.bf16.msra.mxu1 %v12387_v49  ;;  %v12397_v62 = vld [vmem:[#allocation96_spill] sm:$0xff]  ;;  %v12398_v49 = vld [vmem:[#allocation97_spill] sm:$0xff] }
 0x5d5   :  { %7226 = vmatprep.subr.bf16.mxu0 %v12388_v15  ;;  %7290 = vmatprep.subr.bf16.mxu1 %v12389_v26  ;;  %v12399_v15 = vld [vmem:[#allocation98_spill] sm:$0xff]  ;;  %v12400_v26 = vld [vmem:[#allocation9_spill] sm:$0xff] }
 0x5d8   :  { %7228 = vmatpush1.bf16.msra.mxu0 %v12390_v3  ;;  %7292 = vmatpush1.bf16.msra.mxu1 %v12391_v18  ;;  %v12401_v3 = vld [vmem:[#allocation10_spill] sm:$0xff] }
 0x5d9   :  { %7230 = vmatprep.subr.bf16.mxu0 %v12392_v6  ;;  %7294 = vmatprep.subr.bf16.mxu1 %v12393_v53 }
 0x5dc   :  { %7232 = vmatpush1.bf16.msra.mxu0 %v12394_v4  ;;  %7296 = vmatpush1.bf16.msra.mxu1 %v12395_v23 }
 0x5dd   :  { %7234 = vmatprep.subr.bf16.mxu0 %v12396_v0  ;;  %7298 = vmatprep.subr.bf16.mxu1 %v12397_v62  ;;  %v12404_v62 = vld [vmem:[#allocation126_spill] sm:$0xff] }
 0x5e0   :  { %7236 = vmatpush1.bf16.msra.mxu0 %v12398_v49  ;;  %7300 = vmatpush1.bf16.msra.mxu1 %v12399_v15 }
 0x5e1   :  { %7302 = vmatprep.subr.bf16.mxu0 %v12400_v26  ;;  %7334 = vmatprep.subr.bf16.mxu1 %v12401_v3 }
 0x656   :  { %v3139_v18 = vpop.f32.mrb[30].mxu0  ;;  %v3210_v6 = vpop.f32.mrb[30].mxu1 }
 0x657   :  { %v3140_v53 = vadd.f32 %v3139_v18, %v12402_v51  ;;  %v3141_v31 = vpop.f32.mrb[31].mxu0  ;;  %v3212_v4 = vpop.f32.mrb[31].mxu1  ;;  %v3211_v15 = vadd.f32 %v3210_v6, %v12405_v46 }
 0x658   :  { %v3142_v23 = vadd.f32 %v3141_v31, %v12403_v35  ;;  %v3213_v49 = vadd.f32 %v3212_v4, %v12404_v62 }
 0x659   :  { %v6129_v43 = vmul.f32 -1.442695, %v3140_v53 }
 0x65a   :  { %v6130_v0 = vmul.f32 -1.442695, %v3142_v23  ;;  %v6131_v61 = vmul.f32 -1.442695, %v3213_v49 }
 0x65b   :  { %8469 = vpow2.f32 %v6129_v43 }
 0x65c   :  { %8471 = vpow2.f32 %v6130_v0 }
 0x65d   :  { %8473 = vtanh.f32 %v3211_v15 }
 0x65e   :  { %8475 = vpow2.f32 %v6131_v61 }
 0x665   :  { %v8470_v26 = vpop.eup %8469 }
 0x666   :  { %v8472_v58 = vpop.eup %8471  ;;  %v3218_v3 = vadd.f32 1.0, %v8470_v26 }
 0x667   :  { %v3224_v32 = vadd.f32 1.0, %v8472_v58  ;;  %v8474_v18 = vpop.eup %8473 }
 0x668   :  { %8477 = vrcp.f32 %v3218_v3  ;;  %v8476_v51 = vpop.eup %8475 }
 0x669   :  { %8479 = vrcp.f32 %v3224_v32  ;;  %v3231_v4 = vadd.f32 1.0, %v8476_v51 }
 0x66b   :  { %8481 = vrcp.f32 %v3231_v4 }
 0x672   :  { %v8478_v31 = vpop.eup %8477 }
 0x673   :  { %v8480_v53 = vpop.eup %8479  ;;  %v3235_v23 = vmul.f32 %v8478_v31, %v8474_v18 }
 0x674   :  { %v3234_v43 = vmul.f32 %v8480_v53, %v10496_v50  ;;  %v12406_v50 = vld [vmem:[#allocation99_spill] sm:$0xff]  ;;  %v12407_v53 = vld [vmem:[#allocation100_spill] sm:$0xff] }
 0x676   :  { %v10736_v0 = vadd.f32 %v3235_v23, %v3234_v43  ;;  %v3320_v6 = vpop.f32.mrb[32].mxu0  ;;  %v10738_v49 = vpop.f32.mrb[32].mxu1  ;;  %v12408_v23 = vld [vmem:[#allocation101_spill] sm:$0xff] }
 0x677   :  { %v3400_v46 = vrot.slane %v3320_v6, 4  ;;  %v3404_v26 = vrot.slane %v3320_v6, 5  ;;  %v3408_v15 = vrot.slane %v3320_v6, 6  ;;  %v3412_v58 = vrot.slane %v3320_v6, 7  ;;  %v10740_v61 = vpop.f32.mrb[33].mxu0  ;;  %v10742_v32 = vpop.f32.mrb[33].mxu1 }
 0x678   :  { %v3416_v3 = vrot.slane %v3320_v6, 1  ;;  %v3420_v62 = vrot.slane %v3320_v6, 2  ;;  %v3424_v35 = vrot.slane %v3320_v6, 3  ;;  %v3476_v18 = vadd.f32 %v3320_v6, %v12300_v34  ;;  %v12421_v34 = vld [vmem:[#allocation114_spill] sm:$0xff] }
 0x679   :  { %v3460_v31 = vadd.f32 %v3400_v46, %v12406_v50  ;;  %v3464_v51 = vadd.f32 %v3404_v26, %v12407_v53  ;;  %v3468_v43 = vadd.f32 %v3408_v15, %v12408_v23  ;;  %v3472_v16 = vadd.f32 %v3412_v58, %v12409_v40  ;;  %v12426_v53 = vld [vmem:[#allocation120_spill] sm:$0xff] }
 0x67a   :  { %v3480_v33 = vadd.f32 %v3416_v3, %v12410_v41  ;;  %v3484_v55 = vadd.f32 %v3420_v62, %v12411_v7  ;;  %v6136_v47 = vmul.f32 -1.442695, %v3476_v18  ;;  %v3488_v28 = vadd.f32 %v3424_v35, %v12412_v45  ;;  %v12413_v35 = vld [vmem:[#allocation108_spill] sm:$0xff]  ;;  %v12420_v45 = vld [vmem:[#allocation107_spill] sm:$0xff] }
 0x67b   :  { %v6132_v5 = vmul.f32 -1.442695, %v3460_v31  ;;  %v6133_v48 = vmul.f32 -1.442695, %v3464_v51  ;;  %v6134_v54 = vmul.f32 -1.442695, %v3468_v43 }
 0x67c   :  { %v6135_v6 = vmul.f32 -1.442695, %v3472_v16  ;;  %8483 = vpow2.f32 %v6136_v47  ;;  %v6137_v46 = vmul.f32 -1.442695, %v3480_v33  ;;  %v3402_v26 = vrot.slane %v10738_v49, 4  ;;  %v12414_v16 = vld [vmem:[#allocation109_spill] sm:$0xff] }
 0x67d   :  { %8485 = vpow2.f32 %v6132_v5  ;;  %v3406_v15 = vrot.slane %v10738_v49, 5  ;;  %v6138_v4 = vmul.f32 -1.442695, %v3484_v55  ;;  %v3410_v58 = vrot.slane %v10738_v49, 6  ;;  %v12415_v5 = vld [vmem:[#allocation110_spill] sm:$0xff]  ;;  %v12416_v31 = vld [vmem:[#allocation113_spill] sm:$0xff] }
 0x67e   :  { %8487 = vpow2.f32 %v6133_v48  ;;  %v6139_v62 = vmul.f32 -1.442695, %v3488_v28  ;;  %v3414_v3 = vrot.slane %v10738_v49, 7  ;;  %v3462_v18 = vadd.f32 %v3402_v26, %v12413_v35  ;;  %v10760_v48 = vpop.eup %8481  ;;  %v12417_v55 = vld [vmem:[#allocation111_spill] sm:$0xff] }
 0x67f   :  { %8489 = vpow2.f32 %v6134_v54  ;;  %v3466_v47 = vadd.f32 %v3406_v15, %v12414_v16  ;;  %v3470_v33 = vadd.f32 %v3410_v58, %v12415_v5  ;;  %v3478_v54 = vadd.f32 %v10738_v49, %v12417_v55 }
 0x680   :  { %8491 = vpow2.f32 %v6135_v6  ;;  %v3474_v51 = vadd.f32 %v3414_v3, %v12416_v31  ;;  %v3401_v58 = vrot.slane %v10740_v61, 4 }
 0x681   :  { %8493 = vpow2.f32 %v6137_v46  ;;  %v3418_v46 = vrot.slane %v10738_v49, 1 }
 0x682   :  { %8495 = vpow2.f32 %v6138_v4  ;;  %v3422_v4 = vrot.slane %v10738_v49, 2  ;;  %v3461_v7 = vadd.f32 %v3401_v58, %v12420_v45  ;;  %v3425_v58 = vrot.slane %v10740_v61, 3  ;;  %v12425_v45 = vld [vmem:[#allocation117_spill] sm:$0xff] }
 0x683   :  { %8497 = vpow2.f32 %v6139_v62 }
 0x684   :  { %8499 = vtanh.f32 %v3462_v18  ;;  %v3405_v18 = vrot.slane %v10740_v61, 5 }
 0x685   :  { %8501 = vtanh.f32 %v3466_v47 }
 0x686   :  { %v8484_v28 = vpop.eup %8483  ;;  %8503 = vtanh.f32 %v3470_v33  ;;  %v3426_v33 = vrot.slane %v10738_v49, 3  ;;  %v3417_v49 = vrot.slane %v10740_v61, 1  ;;  %v3465_v40 = vadd.f32 %v3405_v18, %v12421_v34 }
 0x687   :  { %v8486_v43 = vpop.eup %8485  ;;  %v3520_v6 = vadd.f32 1.0, %v8484_v28  ;;  %8505 = vtanh.f32 %v3474_v51  ;;  %v3409_v28 = vrot.slane %v10740_v61, 6  ;;  %v3477_v18 = vadd.f32 %v10740_v61, %v12425_v45 }
 0x688   :  { %v8488_v26 = vpop.eup %8487  ;;  %v3516_v15 = vadd.f32 1.0, %v8486_v43  ;;  %8507 = vtanh.f32 %v3478_v54  ;;  %v12418_v43 = vld [vmem:[#allocation118_spill] sm:$0xff]  ;;  %v3413_v54 = vrot.slane %v10740_v61, 7  ;;  %v6140_v34 = vmul.f32 -1.442695, %v3461_v7 }
 0x689   :  { %v8490_v62 = vpop.eup %8489  ;;  %v3517_v3 = vadd.f32 1.0, %v8488_v26  ;;  %8509 = vrcp.f32 %v3520_v6  ;;  %v3482_v5 = vadd.f32 %v3418_v46, %v12418_v43  ;;  %v12419_v6 = vld [vmem:[#allocation119_spill] sm:$0xff]  ;;  %v3421_v46 = vrot.slane %v10740_v61, 2 }
 0x68a   :  { %v8492_v47 = vpop.eup %8491  ;;  %v3518_v55 = vadd.f32 1.0, %v8490_v62  ;;  %8511 = vrcp.f32 %v3516_v15  ;;  %v3486_v26 = vadd.f32 %v3422_v4, %v12419_v6  ;;  %v12422_v43 = vld [vmem:[#allocation115_spill] sm:$0xff]  ;;  %v12424_v6 = vld [vmem:[#allocation116_spill] sm:$0xff]  ;;  %v3489_v7 = vadd.f32 %v3425_v58, %v12208_v59 }
 0x68b   :  { %v8494_v51 = vpop.eup %8493  ;;  %v3519_v31 = vadd.f32 1.0, %v8492_v47  ;;  %8513 = vrcp.f32 %v3517_v3  ;;  %v3469_v23 = vadd.f32 %v3409_v28, %v12422_v43  ;;  %v3481_v28 = vadd.f32 %v3417_v49, %v12426_v53 }
 0x68c   :  { %v8496_v16 = vpop.eup %8495  ;;  %v3521_v35 = vadd.f32 1.0, %v8494_v51  ;;  %8515 = vrcp.f32 %v3518_v55  ;;  %v12423_v55 = vld [vmem:[#allocation122_spill] sm:$0xff]  ;;  %v6141_v43 = vmul.f32 -1.442695, %v3465_v40  ;;  %v3415_v45 = vrot.slane %v10742_v32, 7 }
 0x68d   :  { %v8498_v62 = vpop.eup %8497  ;;  %v3522_v15 = vadd.f32 1.0, %v8496_v16  ;;  %8517 = vrcp.f32 %v3519_v31  ;;  %v3490_v4 = vadd.f32 %v3426_v33, %v12423_v55  ;;  %v3473_v16 = vadd.f32 %v3413_v54, %v12424_v6  ;;  %v12427_v55 = vld [vmem:[#allocation121_spill] sm:$0xff] }
 0x68e   :  { %v8500_v47 = vpop.eup %8499  ;;  %v3523_v3 = vadd.f32 1.0, %v8498_v62  ;;  %8519 = vrcp.f32 %v3521_v35  ;;  %v3403_v35 = vrot.slane %v10742_v32, 4  ;;  %v3485_v50 = vadd.f32 %v3421_v46, %v12427_v55 }
 0x68f   :  { %v8502_v51 = vpop.eup %8501  ;;  %8521 = vrcp.f32 %v3522_v15  ;;  %v3407_v15 = vrot.slane %v10742_v32, 5  ;;  %v6142_v54 = vmul.f32 -1.442695, %v3469_v23  ;;  %v6143_v61 = vmul.f32 -1.442695, %v3473_v16 }
 0x690   :  { %v8504_v31 = vpop.eup %8503  ;;  %8523 = vrcp.f32 %v3523_v3  ;;  %v3411_v3 = vrot.slane %v10742_v32, 6  ;;  %v6144_v40 = vmul.f32 -1.442695, %v3477_v18  ;;  %v3463_v49 = vadd.f32 %v3403_v35, %v12099_v2 }
 0x691   :  { %v8506_v62 = vpop.eup %8505  ;;  %8525 = vtanh.f32 %v3482_v5  ;;  %v6145_v46 = vmul.f32 -1.442695, %v3481_v28  ;;  %v3467_v23 = vadd.f32 %v3407_v15, %v9734_v27  ;;  %v6146_v58 = vmul.f32 -1.442695, %v3485_v50 }
 0x692   :  { %v8508_v33 = vpop.eup %8507  ;;  %8527 = vtanh.f32 %v3486_v26  ;;  %v3471_v16 = vadd.f32 %v3411_v3, %v9743_v17  ;;  %v3475_v18 = vadd.f32 %v3415_v45, %v9752_v22  ;;  %v6148_v28 = vmul.f32 -1.442695, %v3463_v49 }
 0x693   :  { %v8510_v6 = vpop.eup %8509  ;;  %8529 = vtanh.f32 %v3490_v4  ;;  %v6149_v50 = vmul.f32 -1.442695, %v3467_v23 }
 0x694   :  { %v8512_v5 = vpop.eup %8511  ;;  %v10790_v41 = vmul.f32 %v8510_v6, %v8508_v33  ;;  %8531 = vpow2.f32 %v6140_v34  ;;  %v6147_v34 = vmul.f32 -1.442695, %v3489_v7  ;;  %v6151_v7 = vmul.f32 -1.442695, %v3475_v18 }
 0x695   :  { %v8514_v26 = vpop.eup %8513  ;;  %8533 = vpow2.f32 %v6141_v43  ;;  %v10794_v55 = vmul.f32 %v8512_v5, %v8500_v47  ;;  %v3479_v47 = vadd.f32 %v10742_v32, %v9766_v19 }
 0x696   :  { %v8516_v4 = vpop.eup %8515  ;;  %v10796_v53 = vmul.f32 %v8514_v26, %v8502_v51  ;;  %8535 = vpow2.f32 %v6142_v54  ;;  %v6150_v54 = vmul.f32 -1.442695, %v3471_v16  ;;  %v3423_v26 = vrot.slane %v10742_v32, 2 }
 0x697   :  { %v8518_v6 = vpop.eup %8517  ;;  %8537 = vpow2.f32 %v6143_v61  ;;  %v10800_v35 = vmul.f32 %v8516_v4, %v8504_v31  ;;  %v6152_v61 = vmul.f32 -1.442695, %v3479_v47 }
 0x698   :  { %v8520_v43 = vpop.eup %8519  ;;  %8539 = vpow2.f32 %v6144_v40  ;;  %v10804_v15 = vmul.f32 %v8518_v6, %v8506_v62  ;;  %v3419_v40 = vrot.slane %v10742_v32, 1 }
 0x699   :  { %v8522_v51 = vpop.eup %8521  ;;  %8541 = vpow2.f32 %v6145_v46 }
 0x69a   :  { %v8524_v33 = vpop.eup %8523  ;;  %8543 = vpow2.f32 %v6146_v58  ;;  %v3427_v58 = vrot.slane %v10742_v32, 3 }
 0x69b   :  { %v8526_v3 = vpop.eup %8525  ;;  %8545 = vpow2.f32 %v6147_v34 }
 0x69c   :  { %v8528_v45 = vpop.eup %8527  ;;  %v10806_v31 = vmul.f32 %v8526_v3, %v8520_v43  ;;  %8547 = vpow2.f32 %v6148_v28  ;;  %v3483_v43 = vadd.f32 %v3419_v40, %v9833_v13 }
 0x69d   :  { %v8530_v5 = vpop.eup %8529  ;;  %8549 = vpow2.f32 %v6149_v50  ;;  %v10809_v62 = vmul.f32 %v8528_v45, %v8522_v51  ;;  %v3487_v51 = vadd.f32 %v3423_v26, %v9840_v1 }
 0x69e   :  { %v8532_v49 = vpop.eup %8531  ;;  %8551 = vpow2.f32 %v6150_v54  ;;  %v10812_v46 = vmul.f32 %v8530_v5, %v8524_v33  ;;  %v3491_v54 = vadd.f32 %v3427_v58, %v9849_v12 }
 0x69f   :  { %v8534_v23 = vpop.eup %8533  ;;  %v3564_v4 = vadd.f32 1.0, %v8532_v49  ;;  %8553 = vpow2.f32 %v6151_v7  ;;  %v6154_v40 = vmul.f32 -1.442695, %v3487_v51 }
 0x6a0   :  { %v8536_v16 = vpop.eup %8535  ;;  %v3565_v6 = vadd.f32 1.0, %v8534_v23  ;;  %8555 = vpow2.f32 %v6152_v61  ;;  %v6153_v61 = vmul.f32 -1.442695, %v3483_v43 }
 0x6a1   :  { %v8538_v34 = vpop.eup %8537  ;;  %v3566_v18 = vadd.f32 1.0, %v8536_v16  ;;  %8557 = vrcp.f32 %v3564_v4  ;;  %v6155_v4 = vmul.f32 -1.442695, %v3491_v54 }
 0x6a2   :  { %v8540_v47 = vpop.eup %8539  ;;  %v3567_v28 = vadd.f32 1.0, %v8538_v34  ;;  %8559 = vrcp.f32 %v3565_v6 }
 0x6a3   :  { %v8542_v50 = vpop.eup %8541  ;;  %v3568_v33 = vadd.f32 1.0, %v8540_v47  ;;  %8561 = vrcp.f32 %v3566_v18  ;;  %v3652_v47 = vrot.slane %v10584_v30, 7 }
 0x6a4   :  { %v8544_v32 = vpop.eup %8543  ;;  %v3569_v3 = vadd.f32 1.0, %v8542_v50  ;;  %8563 = vrcp.f32 %v3567_v28  ;;  %v3653_v50 = vrot.slane %v10588_v39, 7 }
 0x6a5   :  { %v8546_v7 = vpop.eup %8545  ;;  %v3570_v45 = vadd.f32 1.0, %v8544_v32  ;;  %8565 = vrcp.f32 %v3568_v33  ;;  %v3654_v33 = vrot.slane %v10593_v52, 7 }
 0x6a6   :  { %v8548_v5 = vpop.eup %8547  ;;  %v3571_v49 = vadd.f32 1.0, %v8546_v7  ;;  %8567 = vrcp.f32 %v3569_v3  ;;  %v3655_v7 = vrot.slane %v10597_v21, 7  ;;  %v3658_v21 = vrot.slane %v10608_v57, 7 }
 0x6a7   :  { %v8550_v23 = vpop.eup %8549  ;;  %8569 = vrcp.f32 %v3570_v45  ;;  %v3620_v16 = vadd.f32 1.0, %v8548_v5  ;;  %v3656_v5 = vrot.slane %v10600_v8, 7 }
 0x6a8   :  { %v8552_v26 = vpop.eup %8551  ;;  %8571 = vrcp.f32 %v3571_v49  ;;  %v3621_v58 = vadd.f32 1.0, %v8550_v23 }
 0x6a9   :  { %v8554_v6 = vpop.eup %8553  ;;  %8573 = vpow2.f32 %v6153_v61  ;;  %v3622_v18 = vadd.f32 1.0, %v8552_v26 }
 0x6aa   :  { %v8556_v34 = vpop.eup %8555  ;;  %8575 = vpow2.f32 %v6154_v40  ;;  %v3623_v3 = vadd.f32 1.0, %v8554_v6  ;;  %v3657_v40 = vrot.slane %v10604_v11, 7 }
 0x6ab   :  { %v8558_v28 = vpop.eup %8557  ;;  %8577 = vpow2.f32 %v6155_v4  ;;  %v3624_v43 = vadd.f32 1.0, %v8556_v34 }
 0x6ac   :  { %v8560_v51 = vpop.eup %8559  ;;  %8579 = vrcp.f32 %v3620_v16  ;;  %v3668_v54 = vmul.f32 %v8558_v28, %v3652_v47 }
 0x6ad   :  { %v8562_v32 = vpop.eup %8561  ;;  %8581 = vrcp.f32 %v3621_v58  ;;  %v3669_v45 = vmul.f32 %v8560_v51, %v3653_v50 }
 0x6ae   :  { %v8564_v61 = vpop.eup %8563  ;;  %8583 = vrcp.f32 %v3622_v18  ;;  %v3670_v30 = vmul.f32 %v8562_v32, %v3654_v33  ;;  %v10824_v49 = vadd.f32 %v10794_v55, %v3668_v54  ;;  %v3659_v55 = vrot.slane %v10612_v44, 7 }
 0x6af   :  { %v8566_v39 = vpop.eup %8565  ;;  %8585 = vrcp.f32 %v3624_v43  ;;  %v3671_v52 = vmul.f32 %v8564_v61, %v3655_v7  ;;  %v10828_v23 = vadd.f32 %v10796_v53, %v3669_v45 }
 0x6b0   :  { %v8568_v4 = vpop.eup %8567  ;;  %8587 = vtanh.f32 %v10736_v0  ;;  %v3672_v26 = vmul.f32 %v8566_v39, %v3656_v5  ;;  %v10833_v8 = vadd.f32 %v10800_v35, %v3670_v30 }
 0x6b1   :  { %v8570_v16 = vpop.eup %8569  ;;  %8589 = vrcp.f32 %v3623_v3  ;;  %v3673_v6 = vmul.f32 %v8568_v4, %v3657_v40  ;;  %v10837_v11 = vadd.f32 %v10804_v15, %v3671_v52 }
 0x6b2   :  { %v8572_v58 = vpop.eup %8571  ;;  %v3674_v53 = vmul.f32 %v8570_v16, %v3658_v21  ;;  %v10840_v34 = vadd.f32 %v10790_v41, %v3672_v26  ;;  %8591 = vtanh.f32 %v10824_v49 }
 0x6b3   :  { %v8574_v57 = vpop.eup %8573  ;;  %v3675_v18 = vmul.f32 %v8572_v58, %v3659_v55  ;;  %v10844_v35 = vadd.f32 %v10806_v31, %v3673_v6  ;;  %8593 = vtanh.f32 %v10828_v23 }
 0x6b4   :  { %v8576_v44 = vpop.eup %8575  ;;  %v3625_v47 = vadd.f32 1.0, %v8574_v57  ;;  %v10848_v28 = vadd.f32 %v10809_v62, %v3674_v53  ;;  %8595 = vtanh.f32 %v10833_v8 }
 0x6b5   :  { %v8578_v15 = vpop.eup %8577  ;;  %v3626_v43 = vadd.f32 1.0, %v8576_v44  ;;  %v10852_v41 = vadd.f32 %v10812_v46, %v3675_v18  ;;  %8597 = vtanh.f32 %v10837_v11 }
 0x6b6   :  { %v8580_v50 = vpop.eup %8579  ;;  %v3627_v51 = vadd.f32 1.0, %v8578_v15  ;;  %8599 = vrcp.f32 %v3625_v47 }
 0x6b7   :  { %v8582_v31 = vpop.eup %8581  ;;  %8601 = vrcp.f32 %v3626_v43 }
 0x6b8   :  { %v8584_v33 = vpop.eup %8583  ;;  %8603 = vrcp.f32 %v3627_v51 }
 0x6b9   :  { %v8586_v54 = vpop.eup %8585  ;;  %8605 = vtanh.f32 %v10840_v34 }
 0x6ba   :  { %v8588_v62 = vpop.eup %8587  ;;  %8607 = vtanh.f32 %v10844_v35 }
 0x6bb   :  { %v8590_v32 = vpop.eup %8589  ;;  %v3238_v3 = vmul.f32 %v8588_v62, %v10760_v48  ;;  %8609 = vtanh.f32 %v10848_v28 }
 0x6bc   :  { %v8592_v46 = vpop.eup %8591  ;;  %8611 = vtanh.f32 %v10852_v41 }
 0x6bd   :  { %v8594_v7 = vpop.eup %8593  ;;  %v3730_v45 = vrot.slane %v3238_v3, 4  ;;  %v3700_v61 = vmul.f32 %v8592_v46, %v8580_v50 }
 0x6be   :  { %v8596_v5 = vpop.eup %8595  ;;  %v3701_v30 = vmul.f32 %v8594_v7, %v8582_v31 }
 0x6bf   :  { %v8598_v39 = vpop.eup %8597  ;;  %v3734_v40 = vrot.slane %v3730_v45, 4  ;;  %v3702_v52 = vmul.f32 %v8596_v5, %v8584_v33  ;;  %v3904_v4 = vrot.slane %v3700_v61, 4 }
 0x6c0   :  { %v8600_v21 = vpop.eup %8599  ;;  %v3703_v26 = vmul.f32 %v8598_v39, %v8590_v32  ;;  %v3716_v16 = vrot.slane %v3701_v30, 7  ;;  %v3905_v55 = vrot.slane %v3701_v30, 3 }
 0x6c1   :  { %v8602_v6 = vpop.eup %8601  ;;  %3802 = vmatprep.mubr.f32.mxu0 %v3734_v40  ;;  %3873 = vmatprep.mubr.f32.mxu1 %v3734_v40  ;;  %v3718_v48 = vrot.slane %v3702_v52, 6  ;;  %v3907_v58 = vrot.slane %v3702_v52, 2 }
 0x6c2   :  { %v8604_v53 = vpop.eup %8603  ;;  %v3717_v57 = vsel %vm1081_vm6, %v3716_v16, %v3700_v61  ;;  %v3720_v18 = vrot.slane %v3703_v26, 5  ;;  %v3909_v44 = vrot.slane %v3703_v26, 1  ;;  %v3906_v47 = vsel %vm1069_vm2, %v3905_v55, %v3904_v4 }
 0x6c3   :  { %v8606_v15 = vpop.eup %8605  ;;  %v3719_v43 = vsel %vm1084_vm7, %v3718_v48, %v3717_v57  ;;  %v3908_v50 = vsel %vm1072_vm3, %v3907_v58, %v3906_v47  ;;  %v12430_v47 = vld [vmem:[#allocation20_spill] sm:$0xff] }
 0x6c4   :  { %v8608_v51 = vpop.eup %8607  ;;  %v3704_v31 = vmul.f32 %v8606_v15, %v8586_v54  ;;  %v3721_v33 = vsel %vm1087_vm8, %v3720_v18, %v3719_v43  ;;  %v3910_v62 = vsel %vm1075_vm4, %v3909_v44, %v3908_v50  ;;  %v12428_v18 = vld [vmem:[#allocation18_spill] sm:$0xff]  ;;  %v12429_v44 = vld [vmem:[#allocation19_spill] sm:$0xff]  ;;  %v12431_v15 = vld [vmem:[#allocation21_spill] sm:$0xff] }
 0x6c5   :  { %v8610_v32 = vpop.eup %8609  ;;  %v3705_v3 = vmul.f32 %v8608_v51, %v8600_v21  ;;  %v3731_v48 = vrot.slane %v3721_v33, 4  ;;  %v12432_v43 = vld [vmem:[#allocation22_spill] sm:$0xff]  ;;  %v12433_v50 = vld [vmem:[#allocation23_spill] sm:$0xff]  ;;  %v12434_v51 = vld [vmem:[#allocation24_spill] sm:$0xff] }
 0x6c6   :  { %v8612_v46 = vpop.eup %8611  ;;  %v3706_v7 = vmul.f32 %v8610_v32, %v8602_v6  ;;  %v3911_v45 = vsel %vm1078_vm5, %v3704_v31, %v3910_v62  ;;  %v3722_v5 = vrot.slane %v3704_v31, 4  ;;  %v12435_v31 = vld [vmem:[#allocation25_spill] sm:$0xff]  ;;  %v12436_v33 = vld [vmem:[#allocation26_spill] sm:$0xff]  ;;  %v12437_v62 = vld [vmem:[#allocation27_spill] sm:$0xff] }
 0x6c7   :  { %v3707_v61 = vmul.f32 %v8612_v46, %v8604_v53  ;;  %v3723_v30 = vrot.slane %v3705_v3, 3  ;;  %v3912_v39 = vrot.slane %v3705_v3, 7  ;;  %v12438_v32 = vld [vmem:[#allocation28_spill] sm:$0xff]  ;;  %v12439_v3 = vld [vmem:[#allocation29_spill] sm:$0xff]  ;;  %v12440_v46 = vld [vmem:[#allocation30_spill] sm:$0xff] }
 0x6c8   :  { %v3725_v40 = vrot.slane %v3706_v7, 2  ;;  %v3914_v52 = vrot.slane %v3706_v7, 6  ;;  %v12441_v7 = vld [vmem:[#allocation31_spill] sm:$0xff] }
 0x6c9   :  { %v3724_v4 = vsel %vm1069_vm2, %v3723_v30, %v3722_v5  ;;  %v3727_v26 = vrot.slane %v3707_v61, 1  ;;  %v3913_v54 = vsel %vm1081_vm6, %v3912_v39, %v3911_v45  ;;  %v3916_v16 = vrot.slane %v3707_v61, 5  ;;  %v12442_v45 = vld [vmem:[#allocation32_spill] sm:$0xff]  ;;  %v12443_v61 = vld [vmem:[#allocation33_spill] sm:$0xff]  ;;  %v12444_v5 = vld [vmem:[#allocation34_spill] sm:$0xff] }
 0x6ca   :  { %v3726_v55 = vsel %vm1072_vm3, %v3725_v40, %v3724_v4  ;;  %v3915_v21 = vsel %vm1084_vm7, %v3914_v52, %v3913_v54  ;;  %v12445_v30 = vld [vmem:[#allocation35_spill] sm:$0xff]  ;;  %v12446_v39 = vld [vmem:[#allocation36_spill] sm:$0xff]  ;;  %v12447_v40 = vld [vmem:[#allocation37_spill] sm:$0xff] }
 0x6cb   :  { %v3728_v6 = vsel %vm1075_vm4, %v3727_v26, %v3726_v55  ;;  %v3917_v58 = vsel %vm1087_vm8, %v3916_v16, %v3915_v21  ;;  %v12448_v52 = vld [vmem:[#allocation38_spill] sm:$0xff]  ;;  %v12449_v4 = vld [vmem:[#allocation39_spill] sm:$0xff]  ;;  %v12450_v26 = vld [vmem:[#allocation40_spill] sm:$0xff] }
 0x6cc   :  { %v3732_v53 = vrot.slane %v3728_v6, 4  ;;  %v12451_v54 = vld [vmem:[#allocation41_spill] sm:$0xff]  ;;  %v12452_v16 = vld [vmem:[#allocation42_spill] sm:$0xff]  ;;  %v12453_v55 = vld [vmem:[#allocation43_spill] sm:$0xff] }
 0x6cd   :  { %v12455_v21 = vld [vmem:[#allocation45_spill] sm:$0xff]  ;;  %v12456_v6 = vld [vmem:[#allocation46_spill] sm:$0xff] }
 0x6ce   :  { %v3733_v57 = vsel %vm177_vm0, %v3731_v48, %v3732_v53  ;;  %v12454_v48 = vld [vmem:[#allocation44_spill] sm:$0xff]  ;;  %vm5995_vm0 = vcmask 15360  }
 0x6cf   :  { %3803 = vmatmul.mubr.f32.vlgmr.msra.gmra.mrb[34].mxu0 %v3733_v57  ;;  %3874 = vmatmul.mubr.f32.vlgmr.msra.gmra.mrb[34].mxu1 %v3733_v57  ;;  %v12458_v53 = vld [vmem:[#allocation48_spill] sm:$0xff]  ;;  %v12459_v57 = vld [vmem:[#allocation49_spill] sm:$0xff] }
 0x6d0   :  { %7304 = vmatpush1.bf16.msra.mxu0 %v9247_v25  ;;  %7336 = vmatpush1.bf16.msra.mxu1 %v9250_v29 }
 0x6d1   :  { %7306 = vmatprep.subr.bf16.mxu0 %v9259_v36  ;;  %7338 = vmatprep.subr.bf16.mxu1 %v9263_v37 }
 0x6d2   :  { %3983 = vmatprep.mubr.f32.mxu0 %v11994_v9  ;;  %4054 = vmatprep.mubr.f32.mxu1 %v11994_v9 }
 0x6d4   :  { %7308 = vmatpush1.bf16.msra.mxu0 %v9265_v38  ;;  %7340 = vmatpush1.bf16.msra.mxu1 %v9269_v42 }
 0x6d5   :  { %7310 = vmatprep.subr.bf16.mxu0 %v12100_v60  ;;  %7342 = vmatprep.subr.bf16.mxu1 %v12101_v24 }
 0x6d8   :  { %7312 = vmatpush1.bf16.msra.mxu0 %v12102_v14  ;;  %7344 = vmatpush1.bf16.msra.mxu1 %v12103_v63 }
 0x6d9   :  { %7314 = vmatprep.subr.bf16.mxu0 %v12104_v56  ;;  %7346 = vmatprep.subr.bf16.mxu1 %v12209_v10 }
 0x6dc   :  { %7316 = vmatpush1.bf16.msra.mxu0 %v12318_v20  ;;  %7348 = vmatpush1.bf16.msra.mxu1 %v12428_v18 }
 0x6dd   :  { %7318 = vmatprep.subr.bf16.mxu0 %v12429_v44  ;;  %7350 = vmatprep.subr.bf16.mxu1 %v12430_v47 }
 0x6e0   :  { %7320 = vmatpush1.bf16.msra.mxu0 %v12431_v15  ;;  %7352 = vmatpush1.bf16.msra.mxu1 %v12432_v43  ;;  %v12522_v43 = vld [vmem:[#allocation106_spill] sm:$0xff] }
 0x6e1   :  { %7322 = vmatprep.subr.bf16.mxu0 %v12433_v50  ;;  %7354 = vmatprep.subr.bf16.mxu1 %v12434_v51 }
 0x6e4   :  { %7324 = vmatpush1.bf16.msra.mxu0 %v12435_v31  ;;  %7356 = vmatpush1.bf16.msra.mxu1 %v12436_v33  ;;  %v12521_v31 = vld [vmem:[#allocation105_spill] sm:$0xff] }
 0x6e5   :  { %7326 = vmatprep.subr.bf16.mxu0 %v12437_v62  ;;  %7358 = vmatprep.subr.bf16.mxu1 %v12438_v32  ;;  %v12520_v62 = vld [vmem:[#allocation103_spill] sm:$0xff] }
 0x6e8   :  { %7328 = vmatpush1.bf16.msra.mxu0 %v12439_v3  ;;  %7360 = vmatpush1.bf16.msra.mxu1 %v12440_v46  ;;  %v12519_v3 = vld [vmem:[#allocation102_spill] sm:$0xff] }
 0x6e9   :  { %7330 = vmatprep.subr.bf16.mxu0 %v12441_v7  ;;  %7362 = vmatprep.subr.bf16.mxu1 %v12442_v45 }
 0x6ec   :  { %7332 = vmatpush1.bf16.msra.mxu0 %v12443_v61  ;;  %7364 = vmatpush1.bf16.msra.mxu1 %v12444_v5  ;;  %v12514_v5 = vld [vmem:[#allocation127_spill] sm:$0xff] }
 0x6ed   :  { %7366 = vmatprep.subr.bf16.mxu0 %v12445_v30  ;;  %7430 = vmatprep.subr.bf16.mxu1 %v12446_v39  ;;  %v12512_v39 = vld [vmem:[#allocation125_spill] sm:$0xff] }
 0x6ef   :  { %3984 = vmatmul.mubr.f32.vlgmr.msra.gmra.mrb[36].mxu0 %v3917_v58  ;;  %4055 = vmatmul.mubr.f32.vlgmr.msra.gmra.mrb[36].mxu1 %v3917_v58  ;;  %v12457_v58 = vld [vmem:[#allocation47_spill] sm:$0xff] }
 0x6f0   :  { %7368 = vmatpush1.bf16.msra.mxu0 %v12447_v40  ;;  %7432 = vmatpush1.bf16.msra.mxu1 %v12448_v52  ;;  %v12511_v52 = vld [vmem:[#allocation124_spill] sm:$0xff] }
 0x6f1   :  { %7370 = vmatprep.subr.bf16.mxu0 %v12449_v4  ;;  %7434 = vmatprep.subr.bf16.mxu1 %v12450_v26  ;;  %v12460_v4 = vld [vmem:[#allocation50_spill] sm:$0xff]  ;;  %v12461_v26 = vld [vmem:[#allocation51_spill] sm:$0xff] }
 0x6f4   :  { %7372 = vmatpush1.bf16.msra.mxu0 %v12451_v54  ;;  %7436 = vmatpush1.bf16.msra.mxu1 %v12452_v16  ;;  %v12462_v54 = vld [vmem:[#allocation52_spill] sm:$0xff]  ;;  %v12463_v16 = vld [vmem:[#allocation53_spill] sm:$0xff] }
 0x6f5   :  { %7374 = vmatprep.subr.bf16.mxu0 %v12453_v55  ;;  %7438 = vmatprep.subr.bf16.mxu1 %v12454_v48  ;;  %v12464_v55 = vld [vmem:[#allocation54_spill] sm:$0xff]  ;;  %v12465_v48 = vld [vmem:[#allocation55_spill] sm:$0xff] }
 0x6f8   :  { %7376 = vmatpush1.bf16.msra.mxu0 %v12455_v21  ;;  %7440 = vmatpush1.bf16.msra.mxu1 %v12456_v6  ;;  %v12466_v21 = vld [vmem:[#allocation56_spill] sm:$0xff]  ;;  %v12467_v6 = vld [vmem:[#allocation57_spill] sm:$0xff] }
 0x6f9   :  { %7378 = vmatprep.subr.bf16.mxu0 %v12457_v58  ;;  %7442 = vmatprep.subr.bf16.mxu1 %v12458_v53  ;;  %v12468_v58 = vld [vmem:[#allocation58_spill] sm:$0xff]  ;;  %v12469_v53 = vld [vmem:[#allocation59_spill] sm:$0xff] }
 0x6fc   :  { %7380 = vmatpush1.bf16.msra.mxu0 %v12459_v57  ;;  %7444 = vmatpush1.bf16.msra.mxu1 %v12460_v4  ;;  %v12470_v57 = vld [vmem:[#allocation60_spill] sm:$0xff]  ;;  %v12471_v4 = vld [vmem:[#allocation61_spill] sm:$0xff] }
 0x6fd   :  { %7382 = vmatprep.subr.bf16.mxu0 %v12461_v26  ;;  %7446 = vmatprep.subr.bf16.mxu1 %v12462_v54  ;;  %v12472_v26 = vld [vmem:[#allocation62_spill] sm:$0xff]  ;;  %v12473_v54 = vld [vmem:[#allocation63_spill] sm:$0xff] }
 0x700   :  { %7384 = vmatpush1.bf16.msra.mxu0 %v12463_v16  ;;  %7448 = vmatpush1.bf16.msra.mxu1 %v12464_v55  ;;  %v12474_v16 = vld [vmem:[#allocation64_spill] sm:$0xff]  ;;  %v12475_v55 = vld [vmem:[#allocation65_spill] sm:$0xff] }
 0x701   :  { %7386 = vmatprep.subr.bf16.mxu0 %v12465_v48  ;;  %7450 = vmatprep.subr.bf16.mxu1 %v12466_v21  ;;  %v12476_v48 = vld [vmem:[#allocation66_spill] sm:$0xff]  ;;  %v12477_v21 = vld [vmem:[#allocation67_spill] sm:$0xff] }
 0x704   :  { %7388 = vmatpush1.bf16.msra.mxu0 %v12467_v6  ;;  %7452 = vmatpush1.bf16.msra.mxu1 %v12468_v58  ;;  %v12478_v6 = vld [vmem:[#allocation68_spill] sm:$0xff]  ;;  %v12479_v58 = vld [vmem:[#allocation69_spill] sm:$0xff] }
 0x705   :  { %7390 = vmatprep.subr.bf16.mxu0 %v12469_v53  ;;  %7454 = vmatprep.subr.bf16.mxu1 %v12470_v57  ;;  %v12480_v53 = vld [vmem:[#allocation70_spill] sm:$0xff]  ;;  %v12481_v57 = vld [vmem:[#allocation71_spill] sm:$0xff] }
 0x708   :  { %7392 = vmatpush1.bf16.msra.mxu0 %v12471_v4  ;;  %7456 = vmatpush1.bf16.msra.mxu1 %v12472_v26  ;;  %v12482_v4 = vld [vmem:[#allocation72_spill] sm:$0xff]  ;;  %v12483_v26 = vld [vmem:[#allocation73_spill] sm:$0xff] }
 0x709   :  { %7394 = vmatprep.subr.bf16.mxu0 %v12473_v54  ;;  %7458 = vmatprep.subr.bf16.mxu1 %v12474_v16  ;;  %v12484_v54 = vld [vmem:[#allocation74_spill] sm:$0xff]  ;;  %v12485_v16 = vld [vmem:[#allocation75_spill] sm:$0xff] }
 0x70c   :  { %7396 = vmatpush1.bf16.msra.mxu0 %v12475_v55  ;;  %7460 = vmatpush1.bf16.msra.mxu1 %v12476_v48  ;;  %v12486_v55 = vld [vmem:[#allocation76_spill] sm:$0xff]  ;;  %v12487_v48 = vld [vmem:[#allocation77_spill] sm:$0xff] }
 0x70d   :  { %7398 = vmatprep.subr.bf16.mxu0 %v12477_v21  ;;  %7462 = vmatprep.subr.bf16.mxu1 %v12478_v6  ;;  %v12488_v21 = vld [vmem:[#allocation78_spill] sm:$0xff]  ;;  %v12489_v6 = vld [vmem:[#allocation79_spill] sm:$0xff] }
 0x710   :  { %7400 = vmatpush1.bf16.msra.mxu0 %v12479_v58  ;;  %7464 = vmatpush1.bf16.msra.mxu1 %v12480_v53  ;;  %v12490_v58 = vld [vmem:[#allocation80_spill] sm:$0xff]  ;;  %v12491_v53 = vld [vmem:[#allocation81_spill] sm:$0xff] }
 0x711   :  { %7402 = vmatprep.subr.bf16.mxu0 %v12481_v57  ;;  %7466 = vmatprep.subr.bf16.mxu1 %v12482_v4  ;;  %v12492_v57 = vld [vmem:[#allocation82_spill] sm:$0xff]  ;;  %v12493_v4 = vld [vmem:[#allocation83_spill] sm:$0xff] }
 0x714   :  { %7404 = vmatpush1.bf16.msra.mxu0 %v12483_v26  ;;  %7468 = vmatpush1.bf16.msra.mxu1 %v12484_v54  ;;  %v12494_v26 = vld [vmem:[#allocation84_spill] sm:$0xff]  ;;  %v12495_v54 = vld [vmem:[#allocation85_spill] sm:$0xff] }
 0x715   :  { %7406 = vmatprep.subr.bf16.mxu0 %v12485_v16  ;;  %7470 = vmatprep.subr.bf16.mxu1 %v12486_v55  ;;  %v12496_v16 = vld [vmem:[#allocation86_spill] sm:$0xff]  ;;  %v12497_v55 = vld [vmem:[#allocation87_spill] sm:$0xff] }
 0x718   :  { %7408 = vmatpush1.bf16.msra.mxu0 %v12487_v48  ;;  %7472 = vmatpush1.bf16.msra.mxu1 %v12488_v21  ;;  %v12498_v48 = vld [vmem:[#allocation88_spill] sm:$0xff]  ;;  %v12499_v21 = vld [vmem:[#allocation89_spill] sm:$0xff] }
 0x719   :  { %7410 = vmatprep.subr.bf16.mxu0 %v12489_v6  ;;  %7474 = vmatprep.subr.bf16.mxu1 %v12490_v58  ;;  %v12500_v6 = vld [vmem:[#allocation90_spill] sm:$0xff]  ;;  %v12501_v58 = vld [vmem:[#allocation91_spill] sm:$0xff] }
 0x71c   :  { %7412 = vmatpush1.bf16.msra.mxu0 %v12491_v53  ;;  %7476 = vmatpush1.bf16.msra.mxu1 %v12492_v57  ;;  %v12502_v53 = vld [vmem:[#allocation92_spill] sm:$0xff]  ;;  %v12503_v57 = vld [vmem:[#allocation93_spill] sm:$0xff] }
 0x71d   :  { %7414 = vmatprep.subr.bf16.mxu0 %v12493_v4  ;;  %7478 = vmatprep.subr.bf16.mxu1 %v12494_v26  ;;  %v12504_v4 = vld [vmem:[#allocation94_spill] sm:$0xff]  ;;  %v12505_v26 = vld [vmem:[#allocation95_spill] sm:$0xff] }
 0x720   :  { %7416 = vmatpush1.bf16.msra.mxu0 %v12495_v54  ;;  %7480 = vmatpush1.bf16.msra.mxu1 %v12496_v16  ;;  %v12506_v54 = vld [vmem:[#allocation96_spill] sm:$0xff]  ;;  %v12507_v16 = vld [vmem:[#allocation97_spill] sm:$0xff] }
 0x721   :  { %7418 = vmatprep.subr.bf16.mxu0 %v12497_v55  ;;  %7482 = vmatprep.subr.bf16.mxu1 %v12498_v48  ;;  %v12508_v55 = vld [vmem:[#allocation98_spill] sm:$0xff]  ;;  %v12509_v48 = vld [vmem:[#allocation9_spill] sm:$0xff] }
 0x724   :  { %7420 = vmatpush1.bf16.msra.mxu0 %v12499_v21  ;;  %7484 = vmatpush1.bf16.msra.mxu1 %v12500_v6  ;;  %v12510_v21 = vld [vmem:[#allocation10_spill] sm:$0xff] }
 0x725   :  { %7422 = vmatprep.subr.bf16.mxu0 %v12501_v58  ;;  %7486 = vmatprep.subr.bf16.mxu1 %v12502_v53 }
 0x728   :  { %7424 = vmatpush1.bf16.msra.mxu0 %v12503_v57  ;;  %7488 = vmatpush1.bf16.msra.mxu1 %v12504_v4 }
 0x729   :  { %7426 = vmatprep.subr.bf16.mxu0 %v12505_v26  ;;  %7490 = vmatprep.subr.bf16.mxu1 %v12506_v54  ;;  %v12513_v54 = vld [vmem:[#allocation126_spill] sm:$0xff] }
 0x72c   :  { %7428 = vmatpush1.bf16.msra.mxu0 %v12507_v16  ;;  %7492 = vmatpush1.bf16.msra.mxu1 %v12508_v55 }
 0x72d   :  { %7494 = vmatprep.subr.bf16.mxu0 %v12509_v48  ;;  %7526 = vmatprep.subr.bf16.mxu1 %v12510_v21 }
 0x7a2   :  { %v3804_v6 = vpop.f32.mrb[34].mxu0  ;;  %v3875_v58 = vpop.f32.mrb[34].mxu1 }
 0x7a3   :  { %v3805_v53 = vadd.f32 %v3804_v6, %v12511_v52  ;;  %v3806_v40 = vpop.f32.mrb[35].mxu0  ;;  %v3877_v57 = vpop.f32.mrb[35].mxu1  ;;  %v3876_v55 = vadd.f32 %v3875_v58, %v12514_v5 }
 0x7a4   :  { %v3807_v4 = vadd.f32 %v3806_v40, %v12512_v39  ;;  %v3878_v16 = vadd.f32 %v3877_v57, %v12513_v54 }
 0x7a5   :  { %v6156_v30 = vmul.f32 -1.442695, %v3805_v53 }
 0x7a6   :  { %v6157_v26 = vmul.f32 -1.442695, %v3807_v4  ;;  %v6158_v61 = vmul.f32 -1.442695, %v3878_v16 }
 0x7a7   :  { %8613 = vpow2.f32 %v6156_v30 }
 0x7a8   :  { %8615 = vpow2.f32 %v6157_v26 }
 0x7a9   :  { %8617 = vtanh.f32 %v3876_v55 }
 0x7aa   :  { %8619 = vpow2.f32 %v6158_v61 }
 0x7b1   :  { %v8614_v48 = vpop.eup %8613 }
 0x7b2   :  { %v8616_v45 = vpop.eup %8615  ;;  %v3883_v21 = vadd.f32 1.0, %v8614_v48 }
 0x7b3   :  { %v3889_v7 = vadd.f32 1.0, %v8616_v45  ;;  %v8618_v6 = vpop.eup %8617 }
 0x7b4   :  { %8621 = vrcp.f32 %v3883_v21  ;;  %v8620_v52 = vpop.eup %8619 }
 0x7b5   :  { %8623 = vrcp.f32 %v3889_v7  ;;  %v3896_v57 = vadd.f32 1.0, %v8620_v52 }
 0x7b7   :  { %8625 = vrcp.f32 %v3896_v57 }
 0x7be   :  { %v8622_v40 = vpop.eup %8621 }
 0x7bf   :  { %v8624_v53 = vpop.eup %8623  ;;  %v3900_v4 = vmul.f32 %v8622_v40, %v8618_v6  ;;  %v12515_v6 = vld [vmem:[#allocation104_spill] sm:$0xff] }
 0x7c0   :  { %v3899_v30 = vmul.f32 %v8624_v53, %v10736_v0  ;;  %v12516_v0 = vld [vmem:[#allocation99_spill] sm:$0xff] }
 0x7c2   :  { %v10977_v26 = vadd.f32 %v3900_v4, %v3899_v30  ;;  %v3985_v58 = vpop.f32.mrb[36].mxu0  ;;  %v10979_v16 = vpop.f32.mrb[36].mxu1  ;;  %v12517_v4 = vld [vmem:[#allocation100_spill] sm:$0xff]  ;;  %v12518_v30 = vld [vmem:[#allocation101_spill] sm:$0xff] }
 0x7c3   :  { %v4065_v5 = vrot.slane %v3985_v58, 3  ;;  %v4069_v48 = vrot.slane %v3985_v58, 4  ;;  %v4073_v55 = vrot.slane %v3985_v58, 5  ;;  %v4077_v45 = vrot.slane %v3985_v58, 6  ;;  %v10981_v61 = vpop.f32.mrb[37].mxu0  ;;  %v10983_v7 = vpop.f32.mrb[37].mxu1 }
 0x7c4   :  { %v4081_v21 = vrot.slane %v3985_v58, 7  ;;  %v4085_v54 = vrot.slane %v3985_v58, 1  ;;  %v4089_v39 = vrot.slane %v3985_v58, 2  ;;  %v4145_v40 = vadd.f32 %v3985_v58, %v12515_v6  ;;  %v12531_v6 = vld [vmem:[#allocation114_spill] sm:$0xff] }
 0x7c5   :  { %v4125_v53 = vadd.f32 %v4065_v5, %v12516_v0  ;;  %v4129_v52 = vadd.f32 %v4069_v48, %v12517_v4  ;;  %v4133_v46 = vadd.f32 %v4073_v55, %v12518_v30  ;;  %v4137_v32 = vadd.f32 %v4077_v45, %v12519_v3  ;;  %v12532_v3 = vld [vmem:[#allocation115_spill] sm:$0xff] }
 0x7c6   :  { %v4141_v33 = vadd.f32 %v4081_v21, %v12520_v62  ;;  %v4149_v51 = vadd.f32 %v4085_v54, %v12521_v31  ;;  %v6164_v50 = vmul.f32 -1.442695, %v4145_v40  ;;  %v4153_v15 = vadd.f32 %v4089_v39, %v12522_v43 }
 0x7c7   :  { %v6159_v47 = vmul.f32 -1.442695, %v4125_v53  ;;  %v6160_v44 = vmul.f32 -1.442695, %v4129_v52  ;;  %v6161_v18 = vmul.f32 -1.442695, %v4133_v46  ;;  %v11002_v53 = vpop.eup %8625 }
 0x7c8   :  { %v6162_v58 = vmul.f32 -1.442695, %v4137_v32  ;;  %8627 = vpow2.f32 %v6164_v50  ;;  %v6163_v5 = vmul.f32 -1.442695, %v4141_v33  ;;  %v4067_v48 = vrot.slane %v10979_v16, 3  ;;  %v12523_v46 = vld [vmem:[#allocation108_spill] sm:$0xff] }
 0x7c9   :  { %8629 = vpow2.f32 %v6159_v47  ;;  %v4071_v55 = vrot.slane %v10979_v16, 4  ;;  %v6165_v57 = vmul.f32 -1.442695, %v4149_v51  ;;  %v4075_v45 = vrot.slane %v10979_v16, 5  ;;  %v12524_v47 = vld [vmem:[#allocation109_spill] sm:$0xff]  ;;  %v12525_v33 = vld [vmem:[#allocation110_spill] sm:$0xff] }
 0x7ca   :  { %8631 = vpow2.f32 %v6160_v44  ;;  %v6166_v54 = vmul.f32 -1.442695, %v4153_v15  ;;  %v4079_v21 = vrot.slane %v10979_v16, 6  ;;  %v4083_v39 = vrot.slane %v10979_v16, 7  ;;  %v12526_v44 = vld [vmem:[#allocation113_spill] sm:$0xff] }
 0x7cb   :  { %8633 = vpow2.f32 %v6161_v18  ;;  %v4127_v32 = vadd.f32 %v4067_v48, %v12523_v46  ;;  %v4131_v50 = vadd.f32 %v4071_v55, %v12524_v47  ;;  %v4135_v40 = vadd.f32 %v4075_v45, %v12525_v33  ;;  %v12527_v18 = vld [vmem:[#allocation111_spill] sm:$0xff] }
 0x7cc   :  { %8635 = vpow2.f32 %v6162_v58  ;;  %v4139_v51 = vadd.f32 %v4079_v21, %v12526_v44  ;;  %v4143_v15 = vadd.f32 %v4083_v39, %v12527_v18  ;;  %v4066_v55 = vrot.slane %v10981_v61, 3  ;;  %v12529_v33 = vld [vmem:[#allocation107_spill] sm:$0xff] }
 0x7cd   :  { %8637 = vpow2.f32 %v6163_v5  ;;  %v4070_v21 = vrot.slane %v10981_v61, 4  ;;  %v4082_v44 = vrot.slane %v10981_v61, 7 }
 0x7ce   :  { %8639 = vpow2.f32 %v6165_v57 }
 0x7cf   :  { %8641 = vpow2.f32 %v6166_v54  ;;  %v4087_v54 = vrot.slane %v10979_v16, 1  ;;  %v4130_v62 = vadd.f32 %v4070_v21, %v12531_v6  ;;  %v12536_v6 = vld [vmem:[#allocation120_spill] sm:$0xff] }
 0x7d0   :  { %8643 = vtanh.f32 %v4127_v32 }
 0x7d1   :  { %8645 = vtanh.f32 %v4131_v50  ;;  %v12528_v50 = vld [vmem:[#allocation118_spill] sm:$0xff] }
 0x7d2   :  { %v8628_v52 = vpop.eup %8627  ;;  %8647 = vtanh.f32 %v4135_v40  ;;  %v4147_v40 = vadd.f32 %v10979_v16, %v12528_v50  ;;  %v12530_v50 = vld [vmem:[#allocation119_spill] sm:$0xff] }
 0x7d3   :  { %v8630_v58 = vpop.eup %8629  ;;  %v4186_v43 = vadd.f32 1.0, %v8628_v52  ;;  %8649 = vtanh.f32 %v4139_v51  ;;  %v4074_v51 = vrot.slane %v10981_v61, 5  ;;  %v4151_v46 = vadd.f32 %v4087_v54, %v12530_v50  ;;  %v12535_v54 = vld [vmem:[#allocation117_spill] sm:$0xff] }
 0x7d4   :  { %v8632_v5 = vpop.eup %8631  ;;  %v4181_v48 = vadd.f32 1.0, %v8630_v58  ;;  %8651 = vtanh.f32 %v4143_v15  ;;  %v4091_v15 = vrot.slane %v10979_v16, 2  ;;  %v4086_v16 = vrot.slane %v10981_v61, 1 }
 0x7d5   :  { %v8634_v57 = vpop.eup %8633  ;;  %v4182_v45 = vadd.f32 1.0, %v8632_v5  ;;  %8653 = vrcp.f32 %v4186_v43  ;;  %v4078_v5 = vrot.slane %v10981_v61, 6  ;;  %v4134_v30 = vadd.f32 %v4074_v51, %v12532_v3 }
 0x7d6   :  { %v8636_v39 = vpop.eup %8635  ;;  %v4183_v32 = vadd.f32 1.0, %v8634_v57  ;;  %8655 = vrcp.f32 %v4181_v48  ;;  %v4126_v57 = vadd.f32 %v4066_v55, %v12529_v33  ;;  %v4090_v55 = vrot.slane %v10981_v61, 2  ;;  %v12534_v33 = vld [vmem:[#allocation116_spill] sm:$0xff] }
 0x7d7   :  { %v8638_v52 = vpop.eup %8637  ;;  %v4184_v58 = vadd.f32 1.0, %v8636_v39  ;;  %8657 = vrcp.f32 %v4182_v45  ;;  %v4142_v50 = vadd.f32 %v4082_v44, %v12535_v54  ;;  %v4146_v51 = vadd.f32 %v10981_v61, %v12536_v6 }
 0x7d8   :  { %v8640_v43 = vpop.eup %8639  ;;  %v4185_v18 = vadd.f32 1.0, %v8638_v52  ;;  %8659 = vrcp.f32 %v4183_v32  ;;  %v12533_v32 = vld [vmem:[#allocation122_spill] sm:$0xff]  ;;  %v6167_v21 = vmul.f32 -1.442695, %v4126_v57  ;;  %v6168_v3 = vmul.f32 -1.442695, %v4130_v62 }
 0x7d9   :  { %v8642_v48 = vpop.eup %8641  ;;  %v4187_v47 = vadd.f32 1.0, %v8640_v43  ;;  %8661 = vrcp.f32 %v4184_v58  ;;  %v4155_v4 = vadd.f32 %v4091_v15, %v12533_v32  ;;  %v4138_v43 = vadd.f32 %v4078_v5, %v12534_v33  ;;  %v12537_v32 = vld [vmem:[#allocation121_spill] sm:$0xff] }
 0x7da   :  { %v8644_v39 = vpop.eup %8643  ;;  %v4188_v45 = vadd.f32 1.0, %v8642_v48  ;;  %8663 = vrcp.f32 %v4185_v18  ;;  %v4068_v48 = vrot.slane %v10983_v7, 3  ;;  %v4150_v0 = vadd.f32 %v4086_v16, %v12537_v32 }
 0x7db   :  { %v8646_v52 = vpop.eup %8645  ;;  %8665 = vrcp.f32 %v4187_v47  ;;  %v4072_v47 = vrot.slane %v10983_v7, 4  ;;  %v6169_v5 = vmul.f32 -1.442695, %v4134_v30  ;;  %v4154_v44 = vadd.f32 %v4090_v55, %v12208_v59 }
 0x7dc   :  { %v8648_v58 = vpop.eup %8647  ;;  %8667 = vrcp.f32 %v4188_v45  ;;  %v4076_v45 = vrot.slane %v10983_v7, 5  ;;  %v6170_v57 = vmul.f32 -1.442695, %v4138_v43  ;;  %v6171_v61 = vmul.f32 -1.442695, %v4142_v50 }
 0x7dd   :  { %v8650_v18 = vpop.eup %8649  ;;  %8669 = vtanh.f32 %v4147_v40  ;;  %v4080_v40 = vrot.slane %v10983_v7, 6  ;;  %v4084_v62 = vrot.slane %v10983_v7, 7  ;;  %v4128_v6 = vadd.f32 %v4068_v48, %v12099_v2 }
 0x7de   :  { %v8652_v15 = vpop.eup %8651  ;;  %8671 = vtanh.f32 %v4151_v46  ;;  %v6172_v16 = vmul.f32 -1.442695, %v4146_v51  ;;  %v4132_v30 = vadd.f32 %v4072_v47, %v9734_v27  ;;  %v6173_v55 = vmul.f32 -1.442695, %v4150_v0 }
 0x7df   :  { %v8654_v33 = vpop.eup %8653  ;;  %8673 = vtanh.f32 %v4155_v4  ;;  %v4136_v43 = vadd.f32 %v4076_v45, %v9743_v17  ;;  %v6174_v50 = vmul.f32 -1.442695, %v4154_v44  ;;  %v4140_v31 = vadd.f32 %v4080_v40, %v9752_v22 }
 0x7e0   :  { %v8656_v54 = vpop.eup %8655  ;;  %8675 = vpow2.f32 %v6167_v21 }
 0x7e1   :  { %v8658_v46 = vpop.eup %8657  ;;  %8677 = vpow2.f32 %v6168_v3  ;;  %v11034_v32 = vmul.f32 %v8656_v54, %v8644_v39  ;;  %v4144_v39 = vadd.f32 %v4084_v62, %v9766_v19  ;;  %v6175_v54 = vmul.f32 -1.442695, %v4128_v6 }
 0x7e2   :  { %v8660_v4 = vpop.eup %8659  ;;  %8679 = vpow2.f32 %v6169_v5  ;;  %v11037_v59 = vmul.f32 %v8658_v46, %v8646_v52  ;;  %v6176_v52 = vmul.f32 -1.442695, %v4132_v30  ;;  %v6177_v45 = vmul.f32 -1.442695, %v4136_v43 }
 0x7e3   :  { %v8662_v21 = vpop.eup %8661  ;;  %8681 = vpow2.f32 %v6170_v57  ;;  %v11040_v48 = vmul.f32 %v8660_v4, %v8648_v58  ;;  %v6178_v57 = vmul.f32 -1.442695, %v4140_v31  ;;  %v4092_v4 = vrot.slane %v10983_v7, 2 }
 0x7e4   :  { %v8664_v3 = vpop.eup %8663  ;;  %v11042_v51 = vmul.f32 %v8662_v21, %v8650_v18  ;;  %8683 = vpow2.f32 %v6171_v61  ;;  %v6179_v18 = vmul.f32 -1.442695, %v4144_v39  ;;  %v4148_v21 = vadd.f32 %v10983_v7, %v9833_v13 }
 0x7e5   :  { %v8666_v47 = vpop.eup %8665  ;;  %v11045_v0 = vmul.f32 %v8664_v3, %v8652_v15  ;;  %8685 = vpow2.f32 %v6172_v16  ;;  %v4088_v15 = vrot.slane %v10983_v7, 1 }
 0x7e6   :  { %v8668_v5 = vpop.eup %8667  ;;  %8687 = vpow2.f32 %v6173_v55 }
 0x7e7   :  { %v8670_v44 = vpop.eup %8669  ;;  %8689 = vpow2.f32 %v6174_v50  ;;  %v4152_v39 = vadd.f32 %v4088_v15, %v9840_v1 }
 0x7e8   :  { %v8672_v58 = vpop.eup %8671  ;;  %v11047_v40 = vmul.f32 %v8670_v44, %v8654_v33  ;;  %8691 = vpow2.f32 %v6175_v54 }
 0x7e9   :  { %v8674_v61 = vpop.eup %8673  ;;  %8693 = vpow2.f32 %v6176_v52  ;;  %v11049_v62 = vmul.f32 %v8672_v58, %v8666_v47  ;;  %v4156_v52 = vadd.f32 %v4092_v4, %v9849_v12  ;;  %v6180_v58 = vmul.f32 -1.442695, %v4148_v21 }
 0x7ea   :  { %v8676_v6 = vpop.eup %8675  ;;  %8695 = vpow2.f32 %v6177_v45  ;;  %v11052_v46 = vmul.f32 %v8674_v61, %v8668_v5  ;;  %v6181_v7 = vmul.f32 -1.442695, %v4152_v39 }
 0x7eb   :  { %v8678_v16 = vpop.eup %8677  ;;  %v4229_v30 = vadd.f32 1.0, %v8676_v6  ;;  %8697 = vpow2.f32 %v6178_v57 }
 0x7ec   :  { %v8680_v31 = vpop.eup %8679  ;;  %v4230_v33 = vadd.f32 1.0, %v8678_v16  ;;  %8699 = vpow2.f32 %v6179_v18  ;;  %v6182_v16 = vmul.f32 -1.442695, %v4156_v52 }
 0x7ed   :  { %v8682_v55 = vpop.eup %8681  ;;  %v4231_v43 = vadd.f32 1.0, %v8680_v31  ;;  %8701 = vrcp.f32 %v4229_v30 }
 0x7ee   :  { %v8684_v50 = vpop.eup %8683  ;;  %v4232_v3 = vadd.f32 1.0, %v8682_v55  ;;  %8703 = vrcp.f32 %v4230_v33  ;;  %v4317_v55 = vrot.slane %v10824_v49, 7  ;;  %v4321_v49 = vrot.slane %v10840_v34, 7 }
 0x7ef   :  { %v8686_v54 = vpop.eup %8685  ;;  %v4233_v47 = vadd.f32 1.0, %v8684_v50  ;;  %8705 = vrcp.f32 %v4231_v43  ;;  %v4318_v50 = vrot.slane %v10828_v23, 7 }
 0x7f0   :  { %v8688_v5 = vpop.eup %8687  ;;  %v4234_v45 = vadd.f32 1.0, %v8686_v54  ;;  %8707 = vrcp.f32 %v4232_v3  ;;  %v4319_v54 = vrot.slane %v10833_v8, 7 }
 0x7f1   :  { %v8690_v44 = vpop.eup %8689  ;;  %v4235_v57 = vadd.f32 1.0, %v8688_v5  ;;  %8709 = vrcp.f32 %v4233_v47  ;;  %v4320_v5 = vrot.slane %v10837_v11, 7 }
 0x7f2   :  { %v8692_v18 = vpop.eup %8691  ;;  %v4236_v61 = vadd.f32 1.0, %v8690_v44  ;;  %8711 = vrcp.f32 %v4234_v45 }
 0x7f3   :  { %v8694_v6 = vpop.eup %8693  ;;  %8713 = vrcp.f32 %v4235_v57  ;;  %v4285_v39 = vadd.f32 1.0, %v8692_v18  ;;  %v4322_v18 = vrot.slane %v10844_v35, 7 }
 0x7f4   :  { %v8696_v15 = vpop.eup %8695  ;;  %8715 = vrcp.f32 %v4236_v61  ;;  %v4286_v30 = vadd.f32 1.0, %v8694_v6  ;;  %v4323_v6 = vrot.slane %v10848_v28, 7 }
 0x7f5   :  { %v8698_v31 = vpop.eup %8697  ;;  %8717 = vpow2.f32 %v6180_v58  ;;  %v4287_v45 = vadd.f32 1.0, %v8696_v15 }
 0x7f6   :  { %v8700_v4 = vpop.eup %8699  ;;  %8719 = vpow2.f32 %v6181_v7  ;;  %v4288_v33 = vadd.f32 1.0, %v8698_v31 }
 0x7f7   :  { %v8702_v43 = vpop.eup %8701  ;;  %8721 = vpow2.f32 %v6182_v16  ;;  %v4289_v21 = vadd.f32 1.0, %v8700_v4 }
 0x7f8   :  { %v8704_v3 = vpop.eup %8703  ;;  %8723 = vrcp.f32 %v4286_v30  ;;  %v4333_v47 = vmul.f32 %v8702_v43, %v4317_v55 }
 0x7f9   :  { %v8706_v52 = vpop.eup %8705  ;;  %8725 = vrcp.f32 %v4288_v33  ;;  %v4334_v44 = vmul.f32 %v8704_v3, %v4318_v50 }
 0x7fa   :  { %v8708_v57 = vpop.eup %8707  ;;  %8727 = vrcp.f32 %v4289_v21  ;;  %v4335_v58 = vmul.f32 %v8706_v52, %v4319_v54  ;;  %v11065_v61 = vadd.f32 %v11034_v32, %v4333_v47  ;;  %v4324_v32 = vrot.slane %v10852_v41, 7 }
 0x7fb   :  { %v8710_v23 = vpop.eup %8709  ;;  %8729 = vtanh.f32 %v10977_v26  ;;  %v4336_v8 = vmul.f32 %v8708_v57, %v4320_v5  ;;  %v11070_v7 = vadd.f32 %v11037_v59, %v4334_v44 }
 0x7fc   :  { %v8712_v11 = vpop.eup %8711  ;;  %8731 = vrcp.f32 %v4285_v39  ;;  %v4337_v16 = vmul.f32 %v8710_v23, %v4321_v49  ;;  %v11074_v34 = vadd.f32 %v11040_v48, %v4335_v58 }
 0x7fd   :  { %v8714_v15 = vpop.eup %8713  ;;  %8733 = vrcp.f32 %v4287_v45  ;;  %v4338_v30 = vmul.f32 %v8712_v11, %v4322_v18  ;;  %v11078_v35 = vadd.f32 %v11042_v51, %v4336_v8 }
 0x7fe   :  { %v8716_v31 = vpop.eup %8715  ;;  %v4339_v4 = vmul.f32 %v8714_v15, %v4323_v6  ;;  %v11081_v59 = vadd.f32 %v11045_v0, %v4337_v16  ;;  %8735 = vtanh.f32 %v11065_v61 }
 0x7ff   :  { %v8718_v28 = vpop.eup %8717  ;;  %v4340_v33 = vmul.f32 %v8716_v31, %v4324_v32  ;;  %v11085_v48 = vadd.f32 %v11047_v40, %v4338_v30  ;;  %8737 = vtanh.f32 %v11070_v7 }
 0x800   :  { %v8720_v41 = vpop.eup %8719  ;;  %v4290_v55 = vadd.f32 1.0, %v8718_v28  ;;  %v11089_v43 = vadd.f32 %v11049_v62, %v4339_v4  ;;  %8739 = vtanh.f32 %v11074_v34 }
 0x801   :  { %v8722_v51 = vpop.eup %8721  ;;  %v4291_v21 = vadd.f32 1.0, %v8720_v41  ;;  %v11093_v0 = vadd.f32 %v11052_v46, %v4340_v33  ;;  %8741 = vtanh.f32 %v11078_v35 }
 0x802   :  { %v8724_v50 = vpop.eup %8723  ;;  %v4292_v3 = vadd.f32 1.0, %v8722_v51  ;;  %8743 = vrcp.f32 %v4290_v55 }
 0x803   :  { %v8726_v40 = vpop.eup %8725  ;;  %8745 = vrcp.f32 %v4291_v21 }
 0x804   :  { %v8728_v39 = vpop.eup %8727  ;;  %8747 = vrcp.f32 %v4292_v3 }
 0x805   :  { %v8730_v54 = vpop.eup %8729  ;;  %8749 = vtanh.f32 %v11081_v59 }
 0x806   :  { %v8732_v62 = vpop.eup %8731  ;;  %v3903_v47 = vmul.f32 %v8730_v54, %v11002_v53  ;;  %8751 = vtanh.f32 %v11085_v48 }
 0x807   :  { %v8734_v52 = vpop.eup %8733  ;;  %8753 = vtanh.f32 %v11089_v43 }
 0x808   :  { %v8736_v46 = vpop.eup %8735  ;;  %v4395_v5 = vrot.slane %v3903_v47, 3  ;;  %8755 = vtanh.f32 %v11093_v0 }
 0x809   :  { %v8738_v45 = vpop.eup %8737  ;;  %v4365_v44 = vmul.f32 %v8736_v46, %v8732_v62 }
 0x80a   :  { %v8740_v57 = vpop.eup %8739  ;;  %v4400_v49 = vrot.slane %v4395_v5, 5  ;;  %v4366_v58 = vmul.f32 %v8738_v45, %v8724_v50 }
 0x80b   :  { %v8742_v23 = vpop.eup %8741  ;;  %v4367_v18 = vmul.f32 %v8740_v57, %v8734_v52  ;;  %v4570_v8 = vrot.slane %v4365_v44, 5 }
 0x80c   :  { %v8744_v11 = vpop.eup %8743  ;;  %4468 = vmatprep.mubr.f32.mxu0 %v4400_v49  ;;  %4539 = vmatprep.mubr.f32.mxu1 %v4400_v49  ;;  %v4368_v53 = vmul.f32 %v8742_v23, %v8726_v40  ;;  %v4381_v6 = vrot.slane %v4366_v58, 7  ;;  %v4571_v16 = vrot.slane %v4366_v58, 4 }
 0x80d   :  { %v8746_v15 = vpop.eup %8745  ;;  %v4383_v32 = vrot.slane %v4367_v18, 6  ;;  %v4573_v30 = vrot.slane %v4367_v18, 3 }
 0x80e   :  { %v8748_v31 = vpop.eup %8747  ;;  %v4382_v4 = vsel %vm1084_vm7, %v4381_v6, %v4365_v44  ;;  %v4572_v28 = vsel %vm1069_vm2, %v4571_v16, %v4570_v8  ;;  %v4575_v33 = vrot.slane %v4368_v53, 2  ;;  %v4385_v3 = vrot.slane %v4368_v53, 5 }
 0x80f   :  { %v8750_v41 = vpop.eup %8749  ;;  %v4384_v55 = vsel %vm1087_vm8, %v4383_v32, %v4382_v4  ;;  %v4574_v51 = vsel %vm1072_vm3, %v4573_v30, %v4572_v28  ;;  %v12538_v4 = vld [vmem:[#allocation18_spill] sm:$0xff]  ;;  %v12539_v28 = vld [vmem:[#allocation19_spill] sm:$0xff] }
 0x810   :  { %v8752_v21 = vpop.eup %8751  ;;  %v4369_v50 = vmul.f32 %v8750_v41, %v8728_v39  ;;  %v4576_v40 = vsel %vm1075_vm4, %v4575_v33, %v4574_v51  ;;  %v4397_v32 = vrot.slane %v4384_v55, 5  ;;  %v12540_v33 = vld [vmem:[#allocation20_spill] sm:$0xff]  ;;  %v12541_v41 = vld [vmem:[#allocation21_spill] sm:$0xff]  ;;  %v12542_v55 = vld [vmem:[#allocation22_spill] sm:$0xff] }
 0x811   :  { %v8754_v54 = vpop.eup %8753  ;;  %v4370_v62 = vmul.f32 %v8752_v21, %v8744_v11  ;;  %v12543_v51 = vld [vmem:[#allocation23_spill] sm:$0xff]  ;;  %v12544_v21 = vld [vmem:[#allocation24_spill] sm:$0xff] }
 0x812   :  { %v8756_v47 = vpop.eup %8755  ;;  %v4371_v52 = vmul.f32 %v8754_v54, %v8746_v15  ;;  %v4386_v46 = vrot.slane %v4369_v50, 4  ;;  %v4577_v5 = vrot.slane %v4369_v50, 1  ;;  %v12545_v50 = vld [vmem:[#allocation25_spill] sm:$0xff]  ;;  %v12548_v54 = vld [vmem:[#allocation28_spill] sm:$0xff] }
 0x813   :  { %v4372_v45 = vmul.f32 %v8756_v47, %v8748_v31  ;;  %v4388_v44 = vrot.slane %v4370_v62, 3  ;;  %v12550_v47 = vld [vmem:[#allocation30_spill] sm:$0xff] }
 0x814   :  { %v4387_v57 = vsel %vm1069_vm2, %v4386_v46, %v4385_v3  ;;  %v4390_v49 = vrot.slane %v4371_v52, 2  ;;  %v4578_v58 = vsel %vm1078_vm5, %v4577_v5, %v4576_v40  ;;  %v4580_v23 = vrot.slane %v4371_v52, 7  ;;  %v12546_v3 = vld [vmem:[#allocation26_spill] sm:$0xff]  ;;  %v12547_v40 = vld [vmem:[#allocation27_spill] sm:$0xff]  ;;  %v12552_v46 = vld [vmem:[#allocation32_spill] sm:$0xff] }
 0x815   :  { %v4389_v18 = vsel %vm1072_vm3, %v4388_v44, %v4387_v57  ;;  %v4392_v39 = vrot.slane %v4372_v45, 1  ;;  %v4579_v8 = vsel %vm1081_vm6, %v4370_v62, %v4578_v58  ;;  %v4582_v53 = vrot.slane %v4372_v45, 6  ;;  %v12549_v62 = vld [vmem:[#allocation29_spill] sm:$0xff]  ;;  %v12551_v52 = vld [vmem:[#allocation31_spill] sm:$0xff]  ;;  %v12554_v45 = vld [vmem:[#allocation34_spill] sm:$0xff] }
 0x816   :  { %v4391_v11 = vsel %vm1075_vm4, %v4390_v49, %v4389_v18  ;;  %v4581_v6 = vsel %vm1084_vm7, %v4580_v23, %v4579_v8  ;;  %v12553_v5 = vld [vmem:[#allocation33_spill] sm:$0xff]  ;;  %v12555_v44 = vld [vmem:[#allocation35_spill] sm:$0xff]  ;;  %v12556_v57 = vld [vmem:[#allocation36_spill] sm:$0xff] }
 0x817   :  { %v4393_v16 = vsel %vm1078_vm5, %v4392_v39, %v4391_v11  ;;  %v4583_v15 = vsel %vm1087_vm8, %v4582_v53, %v4581_v6  ;;  %v12557_v49 = vld [vmem:[#allocation37_spill] sm:$0xff]  ;;  %v12558_v58 = vld [vmem:[#allocation38_spill] sm:$0xff]  ;;  %v12559_v23 = vld [vmem:[#allocation39_spill] sm:$0xff] }
 0x818   :  { %v4398_v30 = vrot.slane %v4393_v16, 5  ;;  %v12560_v18 = vld [vmem:[#allocation40_spill] sm:$0xff]  ;;  %v12561_v39 = vld [vmem:[#allocation41_spill] sm:$0xff]  ;;  %v12562_v8 = vld [vmem:[#allocation42_spill] sm:$0xff] }
 0x819   :  { %v12563_v53 = vld [vmem:[#allocation43_spill] sm:$0xff]  ;;  %v12564_v11 = vld [vmem:[#allocation44_spill] sm:$0xff]  ;;  %v12565_v6 = vld [vmem:[#allocation45_spill] sm:$0xff] }
 0x81a   :  { %v4399_v31 = vsel %vm4396_vm12, %v4397_v32, %v4398_v30  ;;  %v12566_v16 = vld [vmem:[#allocation46_spill] sm:$0xff]  ;;  %v12568_v32 = vld [vmem:[#allocation48_spill] sm:$0xff]  ;;  %v12569_v30 = vld [vmem:[#allocation49_spill] sm:$0xff] }
 0x81b   :  { %4469 = vmatmul.mubr.f32.vlgmr.msra.gmra.mrb[38].mxu0 %v4399_v31  ;;  %4540 = vmatmul.mubr.f32.vlgmr.msra.gmra.mrb[38].mxu1 %v4399_v31  ;;  %v12570_v31 = vld [vmem:[#allocation50_spill] sm:$0xff] }
 0x81c   :  { %7496 = vmatpush1.bf16.msra.mxu0 %v9247_v25  ;;  %7528 = vmatpush1.bf16.msra.mxu1 %v9250_v29 }
 0x81d   :  { %7498 = vmatprep.subr.bf16.mxu0 %v9259_v36  ;;  %7530 = vmatprep.subr.bf16.mxu1 %v9263_v37 }
 0x81e   :  { %4649 = vmatprep.mubr.f32.mxu0 %v11994_v9  ;;  %4720 = vmatprep.mubr.f32.mxu1 %v11994_v9 }
 0x820   :  { %7500 = vmatpush1.bf16.msra.mxu0 %v9265_v38  ;;  %7532 = vmatpush1.bf16.msra.mxu1 %v9269_v42 }
 0x821   :  { %7502 = vmatprep.subr.bf16.mxu0 %v12100_v60  ;;  %7534 = vmatprep.subr.bf16.mxu1 %v12101_v24 }
 0x824   :  { %7504 = vmatpush1.bf16.msra.mxu0 %v12102_v14  ;;  %7536 = vmatpush1.bf16.msra.mxu1 %v12103_v63 }
 0x825   :  { %7506 = vmatprep.subr.bf16.mxu0 %v12104_v56  ;;  %7538 = vmatprep.subr.bf16.mxu1 %v12209_v10 }
 0x828   :  { %7508 = vmatpush1.bf16.msra.mxu0 %v12318_v20  ;;  %7540 = vmatpush1.bf16.msra.mxu1 %v12538_v4 }
 0x829   :  { %7510 = vmatprep.subr.bf16.mxu0 %v12539_v28  ;;  %7542 = vmatprep.subr.bf16.mxu1 %v12540_v33 }
 0x82c   :  { %7512 = vmatpush1.bf16.msra.mxu0 %v12541_v41  ;;  %7544 = vmatpush1.bf16.msra.mxu1 %v12542_v55 }
 0x82d   :  { %7514 = vmatprep.subr.bf16.mxu0 %v12543_v51  ;;  %7546 = vmatprep.subr.bf16.mxu1 %v12544_v21  ;;  %v12632_v51 = vld [vmem:[#allocation106_spill] sm:$0xff] }
 0x830   :  { %7516 = vmatpush1.bf16.msra.mxu0 %v12545_v50  ;;  %7548 = vmatpush1.bf16.msra.mxu1 %v12546_v3  ;;  %v12631_v3 = vld [vmem:[#allocation104_spill] sm:$0xff] }
 0x831   :  { %7518 = vmatprep.subr.bf16.mxu0 %v12547_v40  ;;  %7550 = vmatprep.subr.bf16.mxu1 %v12548_v54  ;;  %v12630_v54 = vld [vmem:[#allocation103_spill] sm:$0xff] }
 0x834   :  { %7520 = vmatpush1.bf16.msra.mxu0 %v12549_v62  ;;  %7552 = vmatpush1.bf16.msra.mxu1 %v12550_v47  ;;  %v12629_v47 = vld [vmem:[#allocation102_spill] sm:$0xff] }
 0x835   :  { %7522 = vmatprep.subr.bf16.mxu0 %v12551_v52  ;;  %7554 = vmatprep.subr.bf16.mxu1 %v12552_v46 }
 0x838   :  { %7524 = vmatpush1.bf16.msra.mxu0 %v12553_v5  ;;  %7556 = vmatpush1.bf16.msra.mxu1 %v12554_v45 }
 0x839   :  { %7558 = vmatprep.subr.bf16.mxu0 %v12555_v44  ;;  %7622 = vmatprep.subr.bf16.mxu1 %v12556_v57  ;;  %v12624_v44 = vld [vmem:[#allocation127_spill] sm:$0xff] }
 0x83b   :  { %4650 = vmatmul.mubr.f32.vlgmr.msra.gmra.mrb[40].mxu0 %v4583_v15  ;;  %4721 = vmatmul.mubr.f32.vlgmr.msra.gmra.mrb[40].mxu1 %v4583_v15  ;;  %v12567_v15 = vld [vmem:[#allocation47_spill] sm:$0xff] }
 0x83c   :  { %7560 = vmatpush1.bf16.msra.mxu0 %v12557_v49  ;;  %7624 = vmatpush1.bf16.msra.mxu1 %v12558_v58  ;;  %v12622_v49 = vld [vmem:[#allocation125_spill] sm:$0xff] }
 0x83d   :  { %7562 = vmatprep.subr.bf16.mxu0 %v12559_v23  ;;  %7626 = vmatprep.subr.bf16.mxu1 %v12560_v18  ;;  %v12571_v18 = vld [vmem:[#allocation51_spill] sm:$0xff]  ;;  %v12621_v23 = vld [vmem:[#allocation124_spill] sm:$0xff] }
 0x840   :  { %7564 = vmatpush1.bf16.msra.mxu0 %v12561_v39  ;;  %7628 = vmatpush1.bf16.msra.mxu1 %v12562_v8  ;;  %v12572_v39 = vld [vmem:[#allocation52_spill] sm:$0xff]  ;;  %v12573_v8 = vld [vmem:[#allocation53_spill] sm:$0xff] }
 0x841   :  { %7566 = vmatprep.subr.bf16.mxu0 %v12563_v53  ;;  %7630 = vmatprep.subr.bf16.mxu1 %v12564_v11  ;;  %v12574_v53 = vld [vmem:[#allocation54_spill] sm:$0xff]  ;;  %v12575_v11 = vld [vmem:[#allocation55_spill] sm:$0xff] }
 0x844   :  { %7568 = vmatpush1.bf16.msra.mxu0 %v12565_v6  ;;  %7632 = vmatpush1.bf16.msra.mxu1 %v12566_v16  ;;  %v12576_v6 = vld [vmem:[#allocation56_spill] sm:$0xff]  ;;  %v12577_v16 = vld [vmem:[#allocation57_spill] sm:$0xff] }
 0x845   :  { %7570 = vmatprep.subr.bf16.mxu0 %v12567_v15  ;;  %7634 = vmatprep.subr.bf16.mxu1 %v12568_v32  ;;  %v12578_v15 = vld [vmem:[#allocation58_spill] sm:$0xff]  ;;  %v12579_v32 = vld [vmem:[#allocation59_spill] sm:$0xff] }
 0x848   :  { %7572 = vmatpush1.bf16.msra.mxu0 %v12569_v30  ;;  %7636 = vmatpush1.bf16.msra.mxu1 %v12570_v31  ;;  %v12580_v30 = vld [vmem:[#allocation60_spill] sm:$0xff]  ;;  %v12581_v31 = vld [vmem:[#allocation61_spill] sm:$0xff] }
 0x849   :  { %7574 = vmatprep.subr.bf16.mxu0 %v12571_v18  ;;  %7638 = vmatprep.subr.bf16.mxu1 %v12572_v39  ;;  %v12582_v18 = vld [vmem:[#allocation62_spill] sm:$0xff]  ;;  %v12583_v39 = vld [vmem:[#allocation63_spill] sm:$0xff] }
 0x84c   :  { %7576 = vmatpush1.bf16.msra.mxu0 %v12573_v8  ;;  %7640 = vmatpush1.bf16.msra.mxu1 %v12574_v53  ;;  %v12584_v8 = vld [vmem:[#allocation64_spill] sm:$0xff]  ;;  %v12585_v53 = vld [vmem:[#allocation65_spill] sm:$0xff] }
 0x84d   :  { %7578 = vmatprep.subr.bf16.mxu0 %v12575_v11  ;;  %7642 = vmatprep.subr.bf16.mxu1 %v12576_v6  ;;  %v12586_v11 = vld [vmem:[#allocation66_spill] sm:$0xff]  ;;  %v12587_v6 = vld [vmem:[#allocation67_spill] sm:$0xff] }
 0x850   :  { %7580 = vmatpush1.bf16.msra.mxu0 %v12577_v16  ;;  %7644 = vmatpush1.bf16.msra.mxu1 %v12578_v15  ;;  %v12588_v16 = vld [vmem:[#allocation68_spill] sm:$0xff]  ;;  %v12589_v15 = vld [vmem:[#allocation69_spill] sm:$0xff] }
 0x851   :  { %7582 = vmatprep.subr.bf16.mxu0 %v12579_v32  ;;  %7646 = vmatprep.subr.bf16.mxu1 %v12580_v30  ;;  %v12590_v32 = vld [vmem:[#allocation70_spill] sm:$0xff]  ;;  %v12591_v30 = vld [vmem:[#allocation71_spill] sm:$0xff] }
 0x854   :  { %7584 = vmatpush1.bf16.msra.mxu0 %v12581_v31  ;;  %7648 = vmatpush1.bf16.msra.mxu1 %v12582_v18  ;;  %v12592_v31 = vld [vmem:[#allocation72_spill] sm:$0xff]  ;;  %v12593_v18 = vld [vmem:[#allocation73_spill] sm:$0xff] }
 0x855   :  { %7586 = vmatprep.subr.bf16.mxu0 %v12583_v39  ;;  %7650 = vmatprep.subr.bf16.mxu1 %v12584_v8  ;;  %v12594_v39 = vld [vmem:[#allocation74_spill] sm:$0xff]  ;;  %v12595_v8 = vld [vmem:[#allocation75_spill] sm:$0xff] }
 0x858   :  { %7588 = vmatpush1.bf16.msra.mxu0 %v12585_v53  ;;  %7652 = vmatpush1.bf16.msra.mxu1 %v12586_v11  ;;  %v12596_v53 = vld [vmem:[#allocation76_spill] sm:$0xff]  ;;  %v12597_v11 = vld [vmem:[#allocation77_spill] sm:$0xff] }
 0x859   :  { %7590 = vmatprep.subr.bf16.mxu0 %v12587_v6  ;;  %7654 = vmatprep.subr.bf16.mxu1 %v12588_v16  ;;  %v12598_v6 = vld [vmem:[#allocation78_spill] sm:$0xff]  ;;  %v12599_v16 = vld [vmem:[#allocation79_spill] sm:$0xff] }
 0x85c   :  { %7592 = vmatpush1.bf16.msra.mxu0 %v12589_v15  ;;  %7656 = vmatpush1.bf16.msra.mxu1 %v12590_v32  ;;  %v12600_v15 = vld [vmem:[#allocation80_spill] sm:$0xff]  ;;  %v12601_v32 = vld [vmem:[#allocation81_spill] sm:$0xff] }
 0x85d   :  { %7594 = vmatprep.subr.bf16.mxu0 %v12591_v30  ;;  %7658 = vmatprep.subr.bf16.mxu1 %v12592_v31  ;;  %v12602_v30 = vld [vmem:[#allocation82_spill] sm:$0xff]  ;;  %v12603_v31 = vld [vmem:[#allocation83_spill] sm:$0xff] }
 0x860   :  { %7596 = vmatpush1.bf16.msra.mxu0 %v12593_v18  ;;  %7660 = vmatpush1.bf16.msra.mxu1 %v12594_v39  ;;  %v12604_v18 = vld [vmem:[#allocation84_spill] sm:$0xff]  ;;  %v12605_v39 = vld [vmem:[#allocation85_spill] sm:$0xff] }
 0x861   :  { %7598 = vmatprep.subr.bf16.mxu0 %v12595_v8  ;;  %7662 = vmatprep.subr.bf16.mxu1 %v12596_v53  ;;  %v12606_v8 = vld [vmem:[#allocation86_spill] sm:$0xff]  ;;  %v12607_v53 = vld [vmem:[#allocation87_spill] sm:$0xff] }
 0x864   :  { %7600 = vmatpush1.bf16.msra.mxu0 %v12597_v11  ;;  %7664 = vmatpush1.bf16.msra.mxu1 %v12598_v6  ;;  %v12608_v11 = vld [vmem:[#allocation88_spill] sm:$0xff]  ;;  %v12609_v6 = vld [vmem:[#allocation89_spill] sm:$0xff] }
 0x865   :  { %7602 = vmatprep.subr.bf16.mxu0 %v12599_v16  ;;  %7666 = vmatprep.subr.bf16.mxu1 %v12600_v15  ;;  %v12610_v16 = vld [vmem:[#allocation90_spill] sm:$0xff]  ;;  %v12611_v15 = vld [vmem:[#allocation91_spill] sm:$0xff] }
 0x868   :  { %7604 = vmatpush1.bf16.msra.mxu0 %v12601_v32  ;;  %7668 = vmatpush1.bf16.msra.mxu1 %v12602_v30  ;;  %v12612_v32 = vld [vmem:[#allocation92_spill] sm:$0xff]  ;;  %v12613_v30 = vld [vmem:[#allocation93_spill] sm:$0xff] }
 0x869   :  { %7606 = vmatprep.subr.bf16.mxu0 %v12603_v31  ;;  %7670 = vmatprep.subr.bf16.mxu1 %v12604_v18  ;;  %v12614_v31 = vld [vmem:[#allocation94_spill] sm:$0xff]  ;;  %v12615_v18 = vld [vmem:[#allocation95_spill] sm:$0xff] }
 0x86c   :  { %7608 = vmatpush1.bf16.msra.mxu0 %v12605_v39  ;;  %7672 = vmatpush1.bf16.msra.mxu1 %v12606_v8  ;;  %v12616_v39 = vld [vmem:[#allocation96_spill] sm:$0xff]  ;;  %v12617_v8 = vld [vmem:[#allocation97_spill] sm:$0xff] }
 0x86d   :  { %7610 = vmatprep.subr.bf16.mxu0 %v12607_v53  ;;  %7674 = vmatprep.subr.bf16.mxu1 %v12608_v11  ;;  %v12618_v53 = vld [vmem:[#allocation98_spill] sm:$0xff]  ;;  %v12619_v11 = vld [vmem:[#allocation9_spill] sm:$0xff] }
 0x870   :  { %7612 = vmatpush1.bf16.msra.mxu0 %v12609_v6  ;;  %7676 = vmatpush1.bf16.msra.mxu1 %v12610_v16  ;;  %v12620_v6 = vld [vmem:[#allocation10_spill] sm:$0xff] }
 0x871   :  { %7614 = vmatprep.subr.bf16.mxu0 %v12611_v15  ;;  %7678 = vmatprep.subr.bf16.mxu1 %v12612_v32 }
 0x874   :  { %7616 = vmatpush1.bf16.msra.mxu0 %v12613_v30  ;;  %7680 = vmatpush1.bf16.msra.mxu1 %v12614_v31 }
 0x875   :  { %7618 = vmatprep.subr.bf16.mxu0 %v12615_v18  ;;  %7682 = vmatprep.subr.bf16.mxu1 %v12616_v39  ;;  %v12623_v39 = vld [vmem:[#allocation126_spill] sm:$0xff] }
 0x878   :  { %7620 = vmatpush1.bf16.msra.mxu0 %v12617_v8  ;;  %7684 = vmatpush1.bf16.msra.mxu1 %v12618_v53 }
 0x879   :  { %7686 = vmatprep.subr.bf16.mxu0 %v12619_v11  ;;  %7718 = vmatprep.subr.bf16.mxu1 %v12620_v6 }
 0x8ee   :  { %v4470_v16 = vpop.f32.mrb[38].mxu0  ;;  %v4541_v15 = vpop.f32.mrb[38].mxu1 }
 0x8ef   :  { %v4471_v32 = vadd.f32 %v4470_v16, %v12621_v23  ;;  %v4472_v58 = vpop.f32.mrb[39].mxu0  ;;  %v4543_v30 = vpop.f32.mrb[39].mxu1  ;;  %v4542_v53 = vadd.f32 %v4541_v15, %v12624_v44 }
 0x8f0   :  { %v4473_v31 = vadd.f32 %v4472_v58, %v12622_v49  ;;  %v4544_v8 = vadd.f32 %v4543_v30, %v12623_v39 }
 0x8f1   :  { %v6183_v57 = vmul.f32 -1.442695, %v4471_v32 }
 0x8f2   :  { %v6184_v18 = vmul.f32 -1.442695, %v4473_v31  ;;  %v6185_v45 = vmul.f32 -1.442695, %v4544_v8 }
 0x8f3   :  { %8757 = vpow2.f32 %v6183_v57 }
 0x8f4   :  { %8759 = vpow2.f32 %v6184_v18 }
 0x8f5   :  { %8761 = vtanh.f32 %v4542_v53 }
 0x8f6   :  { %8763 = vpow2.f32 %v6185_v45 }
 0x8fd   :  { %v8758_v11 = vpop.eup %8757 }
 0x8fe   :  { %v8760_v5 = vpop.eup %8759  ;;  %v4549_v6 = vadd.f32 1.0, %v8758_v11 }
 0x8ff   :  { %v4555_v46 = vadd.f32 1.0, %v8760_v5  ;;  %v8762_v16 = vpop.eup %8761 }
 0x900   :  { %8765 = vrcp.f32 %v4549_v6  ;;  %v8764_v23 = vpop.eup %8763 }
 0x901   :  { %8767 = vrcp.f32 %v4555_v46  ;;  %v4562_v30 = vadd.f32 1.0, %v8764_v23 }
 0x903   :  { %8769 = vrcp.f32 %v4562_v30 }
 0x90a   :  { %v8766_v58 = vpop.eup %8765 }
 0x90b   :  { %v8768_v32 = vpop.eup %8767  ;;  %v4566_v31 = vmul.f32 %v8766_v58, %v8762_v16  ;;  %v12625_v16 = vld [vmem:[#allocation105_spill] sm:$0xff] }
 0x90c   :  { %v4565_v57 = vmul.f32 %v8768_v32, %v10977_v26  ;;  %v12626_v26 = vld [vmem:[#allocation99_spill] sm:$0xff] }
 0x90e   :  { %v11217_v18 = vadd.f32 %v4566_v31, %v4565_v57  ;;  %v4651_v15 = vpop.f32.mrb[40].mxu0  ;;  %v11219_v8 = vpop.f32.mrb[40].mxu1  ;;  %v12627_v31 = vld [vmem:[#allocation100_spill] sm:$0xff]  ;;  %v12628_v57 = vld [vmem:[#allocation101_spill] sm:$0xff] }
 0x90f   :  { %v4731_v39 = vrot.slane %v4651_v15, 2  ;;  %v4735_v11 = vrot.slane %v4651_v15, 3  ;;  %v4739_v53 = vrot.slane %v4651_v15, 4  ;;  %v4743_v5 = vrot.slane %v4651_v15, 5  ;;  %v11221_v45 = vpop.f32.mrb[41].mxu0  ;;  %v11223_v46 = vpop.f32.mrb[41].mxu1 }
 0x910   :  { %v4747_v6 = vrot.slane %v4651_v15, 6  ;;  %v4751_v44 = vrot.slane %v4651_v15, 7  ;;  %v4755_v49 = vrot.slane %v4651_v15, 1  ;;  %v4815_v58 = vadd.f32 %v4651_v15, %v12625_v16 }
 0x911   :  { %v4791_v32 = vadd.f32 %v4731_v39, %v12626_v26  ;;  %v4795_v23 = vadd.f32 %v4735_v11, %v12627_v31  ;;  %v4799_v52 = vadd.f32 %v4739_v53, %v12628_v57  ;;  %v4803_v62 = vadd.f32 %v4743_v5, %v12629_v47  ;;  %v12642_v47 = vld [vmem:[#allocation115_spill] sm:$0xff]  ;;  %v12643_v57 = vld [vmem:[#allocation122_spill] sm:$0xff]  ;;  %v12645_v26 = vld [vmem:[#allocation117_spill] sm:$0xff] }
 0x912   :  { %v4807_v40 = vadd.f32 %v4747_v6, %v12630_v54  ;;  %v4811_v50 = vadd.f32 %v4751_v44, %v12631_v3  ;;  %v6192_v21 = vmul.f32 -1.442695, %v4815_v58  ;;  %v4819_v55 = vadd.f32 %v4755_v49, %v12632_v51  ;;  %v12640_v3 = vld [vmem:[#allocation114_spill] sm:$0xff] }
 0x913   :  { %v6186_v41 = vmul.f32 -1.442695, %v4791_v32  ;;  %v6187_v33 = vmul.f32 -1.442695, %v4795_v23  ;;  %v6188_v28 = vmul.f32 -1.442695, %v4799_v52  ;;  %v11242_v32 = vpop.eup %8769 }
 0x914   :  { %v6189_v15 = vmul.f32 -1.442695, %v4803_v62  ;;  %8771 = vpow2.f32 %v6192_v21  ;;  %v6190_v39 = vmul.f32 -1.442695, %v4807_v40  ;;  %v4733_v11 = vrot.slane %v11219_v8, 2  ;;  %v12633_v52 = vld [vmem:[#allocation108_spill] sm:$0xff] }
 0x915   :  { %8773 = vpow2.f32 %v6186_v41  ;;  %v4737_v53 = vrot.slane %v11219_v8, 3  ;;  %v6191_v30 = vmul.f32 -1.442695, %v4811_v50  ;;  %v4741_v5 = vrot.slane %v11219_v8, 4  ;;  %v12634_v41 = vld [vmem:[#allocation109_spill] sm:$0xff]  ;;  %v12635_v40 = vld [vmem:[#allocation110_spill] sm:$0xff] }
 0x916   :  { %8775 = vpow2.f32 %v6187_v33  ;;  %v6193_v44 = vmul.f32 -1.442695, %v4819_v55  ;;  %v4745_v6 = vrot.slane %v11219_v8, 5  ;;  %v4749_v49 = vrot.slane %v11219_v8, 6  ;;  %v12636_v33 = vld [vmem:[#allocation113_spill] sm:$0xff] }
 0x917   :  { %8777 = vpow2.f32 %v6188_v28  ;;  %v4793_v62 = vadd.f32 %v4733_v11, %v12633_v52  ;;  %v4797_v21 = vadd.f32 %v4737_v53, %v12634_v41  ;;  %v4801_v58 = vadd.f32 %v4741_v5, %v12635_v40  ;;  %v12637_v28 = vld [vmem:[#allocation111_spill] sm:$0xff] }
 0x918   :  { %8779 = vpow2.f32 %v6189_v15  ;;  %v4805_v50 = vadd.f32 %v4745_v6, %v12636_v33  ;;  %v4809_v55 = vadd.f32 %v4749_v49, %v12637_v28  ;;  %v4736_v6 = vrot.slane %v11221_v45, 3 }
 0x919   :  { %8781 = vpow2.f32 %v6190_v39  ;;  %v4753_v39 = vrot.slane %v11219_v8, 7  ;;  %v4752_v52 = vrot.slane %v11221_v45, 7 }
 0x91a   :  { %8783 = vpow2.f32 %v6191_v30  ;;  %v4732_v30 = vrot.slane %v11221_v45, 2  ;;  %v4796_v54 = vadd.f32 %v4736_v6, %v12640_v3 }
 0x91b   :  { %8785 = vpow2.f32 %v6193_v44 }
 0x91c   :  { %8787 = vtanh.f32 %v4793_v62 }
 0x91d   :  { %8789 = vtanh.f32 %v4797_v21  ;;  %v4757_v21 = vrot.slane %v11219_v8, 1 }
 0x91e   :  { %v8772_v23 = vpop.eup %8771  ;;  %8791 = vtanh.f32 %v4801_v58  ;;  %v4740_v58 = vrot.slane %v11221_v45, 4 }
 0x91f   :  { %v8774_v15 = vpop.eup %8773  ;;  %v4853_v16 = vadd.f32 1.0, %v8772_v23  ;;  %8793 = vtanh.f32 %v4805_v50  ;;  %v12638_v50 = vld [vmem:[#allocation118_spill] sm:$0xff]  ;;  %v4821_v31 = vadd.f32 %v4757_v21, %v12643_v57  ;;  %v12647_v21 = vld [vmem:[#allocation121_spill] sm:$0xff] }
 0x920   :  { %v8776_v11 = vpop.eup %8775  ;;  %v4847_v53 = vadd.f32 1.0, %v8774_v15  ;;  %8795 = vtanh.f32 %v4809_v55  ;;  %v4813_v15 = vadd.f32 %v4753_v39, %v12638_v50  ;;  %v4744_v55 = vrot.slane %v11221_v45, 5  ;;  %v12641_v39 = vld [vmem:[#allocation119_spill] sm:$0xff] }
 0x921   :  { %v8778_v5 = vpop.eup %8777  ;;  %v4848_v44 = vadd.f32 1.0, %v8776_v11  ;;  %8797 = vrcp.f32 %v4853_v16  ;;  %v4748_v16 = vrot.slane %v11221_v45, 6  ;;  %v12639_v11 = vld [vmem:[#allocation107_spill] sm:$0xff]  ;;  %v4817_v50 = vadd.f32 %v11219_v8, %v12641_v39  ;;  %v12646_v8 = vld [vmem:[#allocation120_spill] sm:$0xff] }
 0x922   :  { %v8780_v49 = vpop.eup %8779  ;;  %v4849_v62 = vadd.f32 1.0, %v8778_v5  ;;  %8799 = vrcp.f32 %v4847_v53  ;;  %v4792_v41 = vadd.f32 %v4732_v30, %v12639_v11  ;;  %v4756_v30 = vrot.slane %v11221_v45, 1 }
 0x923   :  { %v8782_v23 = vpop.eup %8781  ;;  %v4850_v28 = vadd.f32 1.0, %v8780_v49  ;;  %8801 = vrcp.f32 %v4848_v44  ;;  %v4808_v6 = vadd.f32 %v4748_v16, %v12645_v26  ;;  %v4812_v39 = vadd.f32 %v4752_v52, %v12646_v8 }
 0x924   :  { %v8784_v33 = vpop.eup %8783  ;;  %v4851_v40 = vadd.f32 1.0, %v8782_v23  ;;  %8803 = vrcp.f32 %v4849_v62  ;;  %v4800_v23 = vadd.f32 %v4740_v58, %v12642_v47  ;;  %v6194_v3 = vmul.f32 -1.442695, %v4792_v41  ;;  %v12648_v41 = vld [vmem:[#allocation123_spill] sm:$0xff] }
 0x925   :  { %v8786_v5 = vpop.eup %8785  ;;  %v4852_v53 = vadd.f32 1.0, %v8784_v33  ;;  %8805 = vrcp.f32 %v4850_v28  ;;  %v12644_v33 = vld [vmem:[#allocation116_spill] sm:$0xff]  ;;  %v6195_v58 = vmul.f32 -1.442695, %v4796_v54  ;;  %v4816_v57 = vadd.f32 %v11221_v45, %v12647_v21 }
 0x926   :  { %v8788_v49 = vpop.eup %8787  ;;  %v4854_v44 = vadd.f32 1.0, %v8786_v5  ;;  %8807 = vrcp.f32 %v4851_v40  ;;  %v4804_v28 = vadd.f32 %v4744_v55, %v12644_v33  ;;  %v4734_v40 = vrot.slane %v11223_v46, 2 }
 0x927   :  { %v8790_v62 = vpop.eup %8789  ;;  %8809 = vrcp.f32 %v4852_v53  ;;  %v4738_v53 = vrot.slane %v11223_v46, 3  ;;  %v6196_v55 = vmul.f32 -1.442695, %v4800_v23  ;;  %v4820_v16 = vadd.f32 %v4756_v30, %v12648_v41 }
 0x928   :  { %v8792_v11 = vpop.eup %8791  ;;  %8811 = vrcp.f32 %v4854_v44  ;;  %v4742_v44 = vrot.slane %v11223_v46, 4  ;;  %v6197_v26 = vmul.f32 -1.442695, %v4804_v28  ;;  %v6198_v54 = vmul.f32 -1.442695, %v4808_v6 }
 0x929   :  { %v8794_v5 = vpop.eup %8793  ;;  %8813 = vtanh.f32 %v4813_v15  ;;  %v4746_v15 = vrot.slane %v11223_v46, 5  ;;  %v4750_v52 = vrot.slane %v11223_v46, 6  ;;  %v6199_v45 = vmul.f32 -1.442695, %v4812_v39 }
 0x92a   :  { %v8796_v47 = vpop.eup %8795  ;;  %8815 = vtanh.f32 %v4817_v50  ;;  %v4794_v50 = vadd.f32 %v4734_v40, %v12099_v2  ;;  %v4798_v23 = vadd.f32 %v4738_v53, %v9734_v27  ;;  %v6200_v30 = vmul.f32 -1.442695, %v4816_v57 }
 0x92b   :  { %v8798_v33 = vpop.eup %8797  ;;  %8817 = vtanh.f32 %v4821_v31  ;;  %v4802_v28 = vadd.f32 %v4742_v44, %v9743_v17  ;;  %v6201_v4 = vmul.f32 -1.442695, %v4820_v16  ;;  %v4806_v40 = vadd.f32 %v4746_v15, %v9752_v22 }
 0x92c   :  { %v8800_v51 = vpop.eup %8799  ;;  %8819 = vpow2.f32 %v6194_v3 }
 0x92d   :  { %v8802_v8 = vpop.eup %8801  ;;  %8821 = vpow2.f32 %v6195_v58  ;;  %v11274_v21 = vmul.f32 %v8800_v51, %v8788_v49  ;;  %v4810_v51 = vadd.f32 %v4750_v52, %v9766_v19  ;;  %v6202_v49 = vmul.f32 -1.442695, %v4794_v50 }
 0x92e   :  { %v8804_v31 = vpop.eup %8803  ;;  %8823 = vpow2.f32 %v6196_v55  ;;  %v11277_v41 = vmul.f32 %v8802_v8, %v8790_v62  ;;  %v6203_v62 = vmul.f32 -1.442695, %v4798_v23  ;;  %v4754_v52 = vrot.slane %v11223_v46, 7 }
 0x92f   :  { %v8806_v3 = vpop.eup %8805  ;;  %v11279_v6 = vmul.f32 %v8804_v31, %v8792_v11  ;;  %8825 = vpow2.f32 %v6197_v26  ;;  %v6204_v11 = vmul.f32 -1.442695, %v4802_v28  ;;  %v6205_v26 = vmul.f32 -1.442695, %v4806_v40 }
 0x930   :  { %v8808_v58 = vpop.eup %8807  ;;  %v11282_v39 = vmul.f32 %v8806_v3, %v8794_v5  ;;  %8827 = vpow2.f32 %v6198_v54  ;;  %v6206_v5 = vmul.f32 -1.442695, %v4810_v51  ;;  %v4818_v51 = vadd.f32 %v11223_v46, %v9840_v1 }
 0x931   :  { %v8810_v53 = vpop.eup %8809  ;;  %v11285_v57 = vmul.f32 %v8808_v58, %v8796_v47  ;;  %8829 = vpow2.f32 %v6199_v45 }
 0x932   :  { %v8812_v8 = vpop.eup %8811  ;;  %8831 = vpow2.f32 %v6200_v30 }
 0x933   :  { %v8814_v55 = vpop.eup %8813  ;;  %8833 = vpow2.f32 %v6201_v4  ;;  %v4758_v4 = vrot.slane %v11223_v46, 1 }
 0x934   :  { %v8816_v44 = vpop.eup %8815  ;;  %v11287_v16 = vmul.f32 %v8814_v55, %v8810_v53  ;;  %8835 = vpow2.f32 %v6202_v49 }
 0x935   :  { %v8818_v15 = vpop.eup %8817  ;;  %v11289_v54 = vmul.f32 %v8816_v44, %v8798_v33  ;;  %8837 = vpow2.f32 %v6203_v62  ;;  %v4814_v33 = vadd.f32 %v4754_v52, %v9833_v13  ;;  %v4822_v62 = vadd.f32 %v4758_v4, %v9849_v12 }
 0x936   :  { %v8820_v47 = vpop.eup %8819  ;;  %8839 = vpow2.f32 %v6204_v11  ;;  %v11292_v50 = vmul.f32 %v8818_v15, %v8812_v8  ;;  %v6208_v52 = vmul.f32 -1.442695, %v4818_v51  ;;  %v4985_v51 = vrot.slane %v11074_v34, 7 }
 0x937   :  { %v8822_v45 = vpop.eup %8821  ;;  %v4895_v23 = vadd.f32 1.0, %v8820_v47  ;;  %8841 = vpow2.f32 %v6205_v26  ;;  %v6207_v44 = vmul.f32 -1.442695, %v4814_v33  ;;  %v4988_v34 = vrot.slane %v11085_v48, 7 }
 0x938   :  { %v8824_v31 = vpop.eup %8823  ;;  %v4896_v30 = vadd.f32 1.0, %v8822_v45  ;;  %8843 = vpow2.f32 %v6206_v5  ;;  %v6209_v45 = vmul.f32 -1.442695, %v4822_v62 }
 0x939   :  { %v8826_v28 = vpop.eup %8825  ;;  %v4897_v3 = vadd.f32 1.0, %v8824_v31  ;;  %8845 = vrcp.f32 %v4895_v23 }
 0x93a   :  { %v8828_v40 = vpop.eup %8827  ;;  %v4898_v58 = vadd.f32 1.0, %v8826_v28  ;;  %8847 = vrcp.f32 %v4896_v30  ;;  %v4983_v28 = vrot.slane %v11065_v61, 7  ;;  %v4987_v61 = vrot.slane %v11081_v59, 7 }
 0x93b   :  { %v8830_v49 = vpop.eup %8829  ;;  %v4899_v53 = vadd.f32 1.0, %v8828_v40  ;;  %8849 = vrcp.f32 %v4897_v3  ;;  %v4984_v40 = vrot.slane %v11070_v7, 7 }
 0x93c   :  { %v8832_v8 = vpop.eup %8831  ;;  %v4900_v11 = vadd.f32 1.0, %v8830_v49  ;;  %8851 = vrcp.f32 %v4898_v58 }
 0x93d   :  { %v8834_v55 = vpop.eup %8833  ;;  %v4901_v26 = vadd.f32 1.0, %v8832_v8  ;;  %8853 = vrcp.f32 %v4899_v53  ;;  %v4986_v8 = vrot.slane %v11078_v35, 7 }
 0x93e   :  { %v8836_v5 = vpop.eup %8835  ;;  %v4902_v15 = vadd.f32 1.0, %v8834_v55  ;;  %8855 = vrcp.f32 %v4900_v11 }
 0x93f   :  { %v8838_v47 = vpop.eup %8837  ;;  %8857 = vrcp.f32 %v4901_v26  ;;  %v4951_v49 = vadd.f32 1.0, %v8836_v5 }
 0x940   :  { %v8840_v46 = vpop.eup %8839  ;;  %8859 = vrcp.f32 %v4902_v15  ;;  %v4952_v11 = vadd.f32 1.0, %v8838_v47  ;;  %v4989_v47 = vrot.slane %v11089_v43, 7 }
 0x941   :  { %v8842_v23 = vpop.eup %8841  ;;  %8861 = vpow2.f32 %v6207_v44  ;;  %v4953_v31 = vadd.f32 1.0, %v8840_v46 }
 0x942   :  { %v8844_v4 = vpop.eup %8843  ;;  %8863 = vpow2.f32 %v6208_v52  ;;  %v4954_v30 = vadd.f32 1.0, %v8842_v23 }
 0x943   :  { %v8846_v3 = vpop.eup %8845  ;;  %8865 = vpow2.f32 %v6209_v45  ;;  %v4955_v33 = vadd.f32 1.0, %v8844_v4 }
 0x944   :  { %v8848_v58 = vpop.eup %8847  ;;  %8867 = vrcp.f32 %v4953_v31  ;;  %v4999_v53 = vmul.f32 %v8846_v3, %v4983_v28 }
 0x945   :  { %v8850_v62 = vpop.eup %8849  ;;  %8869 = vrcp.f32 %v4954_v30  ;;  %v5000_v55 = vmul.f32 %v8848_v58, %v4984_v40 }
 0x946   :  { %v8852_v26 = vpop.eup %8851  ;;  %v5001_v44 = vmul.f32 %v8850_v62, %v4985_v51  ;;  %8871 = vrcp.f32 %v4955_v33  ;;  %v11305_v15 = vadd.f32 %v11274_v21, %v4999_v53  ;;  %v4990_v21 = vrot.slane %v11093_v0, 7 }
 0x947   :  { %v8854_v7 = vpop.eup %8853  ;;  %v5002_v52 = vmul.f32 %v8852_v26, %v4986_v8  ;;  %8873 = vtanh.f32 %v11217_v18  ;;  %v11310_v5 = vadd.f32 %v11277_v41, %v5000_v55 }
 0x948   :  { %v8856_v35 = vpop.eup %8855  ;;  %8875 = vrcp.f32 %v4951_v49  ;;  %v5003_v45 = vmul.f32 %v8854_v7, %v4987_v61  ;;  %v11314_v59 = vadd.f32 %v11279_v6, %v5001_v44 }
 0x949   :  { %v8858_v46 = vpop.eup %8857  ;;  %8877 = vrcp.f32 %v4952_v11  ;;  %v5004_v23 = vmul.f32 %v8856_v35, %v4988_v34  ;;  %v11318_v48 = vadd.f32 %v11282_v39, %v5002_v52 }
 0x94a   :  { %v8860_v31 = vpop.eup %8859  ;;  %v5005_v4 = vmul.f32 %v8858_v46, %v4989_v47  ;;  %v11321_v41 = vadd.f32 %v11285_v57, %v5003_v45  ;;  %8879 = vtanh.f32 %v11305_v15 }
 0x94b   :  { %v8862_v43 = vpop.eup %8861  ;;  %v5006_v30 = vmul.f32 %v8860_v31, %v4990_v21  ;;  %v11325_v6 = vadd.f32 %v11287_v16, %v5004_v23  ;;  %8881 = vtanh.f32 %v11310_v5 }
 0x94c   :  { %v8864_v0 = vpop.eup %8863  ;;  %v4956_v28 = vadd.f32 1.0, %v8862_v43  ;;  %v11329_v3 = vadd.f32 %v11289_v54, %v5005_v4  ;;  %8883 = vtanh.f32 %v11314_v59 }
 0x94d   :  { %v8866_v39 = vpop.eup %8865  ;;  %v4957_v33 = vadd.f32 1.0, %v8864_v0  ;;  %v11333_v57 = vadd.f32 %v11292_v50, %v5006_v30  ;;  %8885 = vtanh.f32 %v11318_v48 }
 0x94e   :  { %v8868_v40 = vpop.eup %8867  ;;  %v4958_v58 = vadd.f32 1.0, %v8866_v39  ;;  %8887 = vrcp.f32 %v4956_v28 }
 0x94f   :  { %v8870_v16 = vpop.eup %8869  ;;  %8889 = vrcp.f32 %v4957_v33 }
 0x950   :  { %v8872_v51 = vpop.eup %8871  ;;  %8891 = vrcp.f32 %v4958_v58 }
 0x951   :  { %v8874_v49 = vpop.eup %8873  ;;  %8893 = vtanh.f32 %v11321_v41 }
 0x952   :  { %v8876_v54 = vpop.eup %8875  ;;  %v4569_v53 = vmul.f32 %v8874_v49, %v11242_v32  ;;  %8895 = vtanh.f32 %v11325_v6 }
 0x953   :  { %v8878_v62 = vpop.eup %8877  ;;  %8897 = vtanh.f32 %v11329_v3 }
 0x954   :  { %v8880_v50 = vpop.eup %8879  ;;  %v5061_v8 = vrot.slane %v4569_v53, 2  ;;  %8899 = vtanh.f32 %v11333_v57 }
 0x955   :  { %v8882_v11 = vpop.eup %8881  ;;  %v5031_v55 = vmul.f32 %v8880_v50, %v8876_v54 }
 0x956   :  { %v8884_v26 = vpop.eup %8883  ;;  %v5066_v61 = vrot.slane %v5061_v8, 6  ;;  %v5032_v44 = vmul.f32 %v8882_v11, %v8878_v62 }
 0x957   :  { %v8886_v7 = vpop.eup %8885  ;;  %v5033_v34 = vmul.f32 %v8884_v26, %v8868_v40  ;;  %v5236_v52 = vrot.slane %v5031_v55, 6 }
 0x958   :  { %v8888_v35 = vpop.eup %8887  ;;  %5134 = vmatprep.mubr.f32.mxu0 %v5066_v61  ;;  %5205 = vmatprep.mubr.f32.mxu1 %v5066_v61  ;;  %v5034_v32 = vmul.f32 %v8886_v7, %v8870_v16  ;;  %v5047_v47 = vrot.slane %v5032_v44, 7  ;;  %v5237_v45 = vrot.slane %v5032_v44, 5 }
 0x959   :  { %v8890_v46 = vpop.eup %8889  ;;  %v5049_v21 = vrot.slane %v5033_v34, 6  ;;  %v5239_v23 = vrot.slane %v5033_v34, 4 }
 0x95a   :  { %v8892_v31 = vpop.eup %8891  ;;  %v5048_v4 = vsel %vm1087_vm8, %v5047_v47, %v5031_v55  ;;  %v5050_v43 = vrot.slane %v5034_v32, 5  ;;  %v5238_v30 = vsel %vm1069_vm2, %v5237_v45, %v5236_v52  ;;  %v5241_v0 = vrot.slane %v5034_v32, 3 }
 0x95b   :  { %v8894_v28 = vpop.eup %8893  ;;  %v5240_v39 = vsel %vm1072_vm3, %v5239_v23, %v5238_v30  ;;  %v12664_v30 = vld [vmem:[#allocation33_spill] sm:$0xff] }
 0x95c   :  { %v8896_v33 = vpop.eup %8895  ;;  %v5035_v40 = vmul.f32 %v8894_v28, %v8872_v51  ;;  %v5051_v58 = vsel %vm1069_vm2, %v5050_v43, %v5049_v21  ;;  %v5242_v16 = vsel %vm1075_vm4, %v5241_v0, %v5240_v39  ;;  %v5063_v21 = vrot.slane %v5048_v4, 6  ;;  %v12662_v4 = vld [vmem:[#allocation31_spill] sm:$0xff]  ;;  %v12663_v43 = vld [vmem:[#allocation32_spill] sm:$0xff]  ;;  %v12665_v0 = vld [vmem:[#allocation34_spill] sm:$0xff] }
 0x95d   :  { %v8898_v49 = vpop.eup %8897  ;;  %v5036_v54 = vmul.f32 %v8896_v33, %v8888_v35  ;;  %v12666_v28 = vld [vmem:[#allocation35_spill] sm:$0xff]  ;;  %v12667_v39 = vld [vmem:[#allocation36_spill] sm:$0xff]  ;;  %v12668_v33 = vld [vmem:[#allocation37_spill] sm:$0xff] }
 0x95e   :  { %v8900_v53 = vpop.eup %8899  ;;  %v5037_v62 = vmul.f32 %v8898_v49, %v8890_v46  ;;  %v5052_v50 = vrot.slane %v5035_v40, 4  ;;  %v5243_v8 = vrot.slane %v5035_v40, 2  ;;  %v12669_v40 = vld [vmem:[#allocation38_spill] sm:$0xff]  ;;  %v12672_v49 = vld [vmem:[#allocation41_spill] sm:$0xff] }
 0x95f   :  { %v5038_v11 = vmul.f32 %v8900_v53, %v8892_v31  ;;  %v5054_v55 = vrot.slane %v5036_v54, 3  ;;  %v5245_v26 = vrot.slane %v5036_v54, 1  ;;  %v12673_v54 = vld [vmem:[#allocation42_spill] sm:$0xff]  ;;  %v12674_v53 = vld [vmem:[#allocation43_spill] sm:$0xff] }
 0x960   :  { %v5053_v61 = vsel %vm1072_vm3, %v5052_v50, %v5051_v58  ;;  %v5056_v44 = vrot.slane %v5037_v62, 2  ;;  %v5244_v7 = vsel %vm1078_vm5, %v5243_v8, %v5242_v16  ;;  %v12670_v58 = vld [vmem:[#allocation39_spill] sm:$0xff]  ;;  %v12671_v16 = vld [vmem:[#allocation40_spill] sm:$0xff]  ;;  %v12676_v50 = vld [vmem:[#allocation45_spill] sm:$0xff] }
 0x961   :  { %v5055_v51 = vsel %vm1075_vm4, %v5054_v55, %v5053_v61  ;;  %v5058_v34 = vrot.slane %v5038_v11, 1  ;;  %v5246_v52 = vsel %vm1081_vm6, %v5245_v26, %v5244_v7  ;;  %v5248_v32 = vrot.slane %v5038_v11, 7  ;;  %v12677_v8 = vld [vmem:[#allocation46_spill] sm:$0xff]  ;;  %v12678_v11 = vld [vmem:[#allocation47_spill] sm:$0xff]  ;;  %v12679_v55 = vld [vmem:[#allocation48_spill] sm:$0xff] }
 0x962   :  { %v5057_v35 = vsel %vm1078_vm5, %v5056_v44, %v5055_v51  ;;  %v5247_v47 = vsel %vm1084_vm7, %v5037_v62, %v5246_v52  ;;  %v12675_v62 = vld [vmem:[#allocation44_spill] sm:$0xff]  ;;  %v12680_v26 = vld [vmem:[#allocation49_spill] sm:$0xff]  ;;  %v12681_v61 = vld [vmem:[#allocation50_spill] sm:$0xff] }
 0x963   :  { %v5059_v45 = vsel %vm1081_vm6, %v5058_v34, %v5057_v35  ;;  %v5249_v46 = vsel %vm1087_vm8, %v5248_v32, %v5247_v47  ;;  %v12682_v44 = vld [vmem:[#allocation51_spill] sm:$0xff]  ;;  %v12683_v7 = vld [vmem:[#allocation52_spill] sm:$0xff]  ;;  %v12684_v51 = vld [vmem:[#allocation53_spill] sm:$0xff] }
 0x964   :  { %v5064_v23 = vrot.slane %v5059_v45, 6  ;;  %v12685_v34 = vld [vmem:[#allocation54_spill] sm:$0xff]  ;;  %v12686_v52 = vld [vmem:[#allocation55_spill] sm:$0xff]  ;;  %v12687_v32 = vld [vmem:[#allocation56_spill] sm:$0xff] }
 0x965   :  { %v12688_v35 = vld [vmem:[#allocation57_spill] sm:$0xff]  ;;  %v12689_v47 = vld [vmem:[#allocation58_spill] sm:$0xff]  ;;  %v12690_v45 = vld [vmem:[#allocation59_spill] sm:$0xff] }
 0x966   :  { %v5065_v31 = vsel %vm5062_vm13, %v5063_v21, %v5064_v23  ;;  %v12692_v21 = vld [vmem:[#allocation61_spill] sm:$0xff]  ;;  %v12693_v23 = vld [vmem:[#allocation62_spill] sm:$0xff] }
 0x967   :  { %5135 = vmatmul.mubr.f32.vlgmr.msra.gmra.mrb[42].mxu0 %v5065_v31  ;;  %5206 = vmatmul.mubr.f32.vlgmr.msra.gmra.mrb[42].mxu1 %v5065_v31  ;;  %v12694_v31 = vld [vmem:[#allocation63_spill] sm:$0xff] }
 0x968   :  { %7688 = vmatpush1.bf16.msra.mxu0 %v9247_v25  ;;  %7720 = vmatpush1.bf16.msra.mxu1 %v9250_v29  ;;  %v12649_v25 = vld [vmem:[#allocation18_spill] sm:$0xff]  ;;  %v12650_v29 = vld [vmem:[#allocation19_spill] sm:$0xff] }
 0x969   :  { %7690 = vmatprep.subr.bf16.mxu0 %v9259_v36  ;;  %7722 = vmatprep.subr.bf16.mxu1 %v9263_v37  ;;  %v12651_v36 = vld [vmem:[#allocation20_spill] sm:$0xff]  ;;  %v12652_v37 = vld [vmem:[#allocation21_spill] sm:$0xff] }
 0x96a   :  { %5315 = vmatprep.mubr.f32.mxu0 %v11994_v9  ;;  %5386 = vmatprep.mubr.f32.mxu1 %v11994_v9 }
 0x96c   :  { %7692 = vmatpush1.bf16.msra.mxu0 %v9265_v38  ;;  %7724 = vmatpush1.bf16.msra.mxu1 %v9269_v42  ;;  %v12653_v38 = vld [vmem:[#allocation22_spill] sm:$0xff]  ;;  %v12654_v42 = vld [vmem:[#allocation23_spill] sm:$0xff] }
 0x96d   :  { %7694 = vmatprep.subr.bf16.mxu0 %v12100_v60  ;;  %7726 = vmatprep.subr.bf16.mxu1 %v12101_v24  ;;  %v12655_v60 = vld [vmem:[#allocation24_spill] sm:$0xff]  ;;  %v12656_v24 = vld [vmem:[#allocation25_spill] sm:$0xff] }
 0x970   :  { %7696 = vmatpush1.bf16.msra.mxu0 %v12102_v14  ;;  %7728 = vmatpush1.bf16.msra.mxu1 %v12103_v63  ;;  %v12657_v14 = vld [vmem:[#allocation26_spill] sm:$0xff]  ;;  %v12658_v63 = vld [vmem:[#allocation27_spill] sm:$0xff] }
 0x971   :  { %7698 = vmatprep.subr.bf16.mxu0 %v12104_v56  ;;  %7730 = vmatprep.subr.bf16.mxu1 %v12209_v10  ;;  %v12659_v56 = vld [vmem:[#allocation28_spill] sm:$0xff]  ;;  %v12660_v10 = vld [vmem:[#allocation29_spill] sm:$0xff] }
 0x974   :  { %7700 = vmatpush1.bf16.msra.mxu0 %v12318_v20  ;;  %7732 = vmatpush1.bf16.msra.mxu1 %v12649_v25  ;;  %v12661_v20 = vld [vmem:[#allocation30_spill] sm:$0xff]  ;;  %v12695_v25 = vld [vmem:[#allocation64_spill] sm:$0xff] }
 0x975   :  { %7702 = vmatprep.subr.bf16.mxu0 %v12650_v29  ;;  %7734 = vmatprep.subr.bf16.mxu1 %v12651_v36  ;;  %v12696_v29 = vld [vmem:[#allocation65_spill] sm:$0xff]  ;;  %v12697_v36 = vld [vmem:[#allocation66_spill] sm:$0xff] }
 0x978   :  { %7704 = vmatpush1.bf16.msra.mxu0 %v12652_v37  ;;  %7736 = vmatpush1.bf16.msra.mxu1 %v12653_v38  ;;  %v12698_v37 = vld [vmem:[#allocation67_spill] sm:$0xff]  ;;  %v12699_v38 = vld [vmem:[#allocation68_spill] sm:$0xff] }
 0x979   :  { %7706 = vmatprep.subr.bf16.mxu0 %v12654_v42  ;;  %7738 = vmatprep.subr.bf16.mxu1 %v12655_v60  ;;  %v12700_v42 = vld [vmem:[#allocation69_spill] sm:$0xff]  ;;  %v12701_v60 = vld [vmem:[#allocation70_spill] sm:$0xff] }
 0x97c   :  { %7708 = vmatpush1.bf16.msra.mxu0 %v12656_v24  ;;  %7740 = vmatpush1.bf16.msra.mxu1 %v12657_v14  ;;  %v12702_v24 = vld [vmem:[#allocation71_spill] sm:$0xff]  ;;  %v12703_v14 = vld [vmem:[#allocation72_spill] sm:$0xff] }
 0x97d   :  { %7710 = vmatprep.subr.bf16.mxu0 %v12658_v63  ;;  %7742 = vmatprep.subr.bf16.mxu1 %v12659_v56  ;;  %v12704_v63 = vld [vmem:[#allocation73_spill] sm:$0xff]  ;;  %v12705_v56 = vld [vmem:[#allocation74_spill] sm:$0xff] }
 0x980   :  { %7712 = vmatpush1.bf16.msra.mxu0 %v12660_v10  ;;  %7744 = vmatpush1.bf16.msra.mxu1 %v12661_v20  ;;  %v12706_v10 = vld [vmem:[#allocation75_spill] sm:$0xff]  ;;  %v12707_v20 = vld [vmem:[#allocation76_spill] sm:$0xff] }
 0x981   :  { %7714 = vmatprep.subr.bf16.mxu0 %v12662_v4  ;;  %7746 = vmatprep.subr.bf16.mxu1 %v12663_v43  ;;  %v12708_v4 = vld [vmem:[#allocation77_spill] sm:$0xff]  ;;  %v12709_v43 = vld [vmem:[#allocation78_spill] sm:$0xff] }
 0x984   :  { %7716 = vmatpush1.bf16.msra.mxu0 %v12664_v30  ;;  %7748 = vmatpush1.bf16.msra.mxu1 %v12665_v0  ;;  %v12710_v30 = vld [vmem:[#allocation79_spill] sm:$0xff]  ;;  %v12711_v0 = vld [vmem:[#allocation80_spill] sm:$0xff] }
 0x985   :  { %7750 = vmatprep.subr.bf16.mxu0 %v12666_v28  ;;  %7814 = vmatprep.subr.bf16.mxu1 %v12667_v39  ;;  %v12712_v28 = vld [vmem:[#allocation81_spill] sm:$0xff]  ;;  %v12713_v39 = vld [vmem:[#allocation82_spill] sm:$0xff] }
 0x987   :  { %5316 = vmatmul.mubr.f32.vlgmr.msra.gmra.mrb[44].mxu0 %v5249_v46  ;;  %5387 = vmatmul.mubr.f32.vlgmr.msra.gmra.mrb[44].mxu1 %v5249_v46  ;;  %v12691_v46 = vld [vmem:[#allocation60_spill] sm:$0xff] }
 0x988   :  { %7752 = vmatpush1.bf16.msra.mxu0 %v12668_v33  ;;  %7816 = vmatpush1.bf16.msra.mxu1 %v12669_v40  ;;  %v12714_v33 = vld [vmem:[#allocation83_spill] sm:$0xff]  ;;  %v12715_v40 = vld [vmem:[#allocation84_spill] sm:$0xff] }
 0x989   :  { %7754 = vmatprep.subr.bf16.mxu0 %v12670_v58  ;;  %7818 = vmatprep.subr.bf16.mxu1 %v12671_v16  ;;  %v12716_v58 = vld [vmem:[#allocation85_spill] sm:$0xff]  ;;  %v12717_v16 = vld [vmem:[#allocation86_spill] sm:$0xff] }
 0x98c   :  { %7756 = vmatpush1.bf16.msra.mxu0 %v12672_v49  ;;  %7820 = vmatpush1.bf16.msra.mxu1 %v12673_v54  ;;  %v12718_v49 = vld [vmem:[#allocation87_spill] sm:$0xff]  ;;  %v12719_v54 = vld [vmem:[#allocation88_spill] sm:$0xff] }
 0x98d   :  { %7758 = vmatprep.subr.bf16.mxu0 %v12674_v53  ;;  %7822 = vmatprep.subr.bf16.mxu1 %v12675_v62  ;;  %v12720_v53 = vld [vmem:[#allocation89_spill] sm:$0xff]  ;;  %v12721_v62 = vld [vmem:[#allocation90_spill] sm:$0xff] }
 0x990   :  { %7760 = vmatpush1.bf16.msra.mxu0 %v12676_v50  ;;  %7824 = vmatpush1.bf16.msra.mxu1 %v12677_v8  ;;  %v12722_v50 = vld [vmem:[#allocation91_spill] sm:$0xff]  ;;  %v12723_v8 = vld [vmem:[#allocation92_spill] sm:$0xff] }
 0x991   :  { %7762 = vmatprep.subr.bf16.mxu0 %v12678_v11  ;;  %7826 = vmatprep.subr.bf16.mxu1 %v12679_v55  ;;  %v12724_v11 = vld [vmem:[#allocation93_spill] sm:$0xff]  ;;  %v12725_v55 = vld [vmem:[#allocation94_spill] sm:$0xff] }
 0x994   :  { %7764 = vmatpush1.bf16.msra.mxu0 %v12680_v26  ;;  %7828 = vmatpush1.bf16.msra.mxu1 %v12681_v61  ;;  %v12726_v26 = vld [vmem:[#allocation95_spill] sm:$0xff]  ;;  %v12727_v61 = vld [vmem:[#allocation96_spill] sm:$0xff] }
 0x995   :  { %7766 = vmatprep.subr.bf16.mxu0 %v12682_v44  ;;  %7830 = vmatprep.subr.bf16.mxu1 %v12683_v7  ;;  %v12728_v44 = vld [vmem:[#allocation97_spill] sm:$0xff]  ;;  %v12729_v7 = vld [vmem:[#allocation98_spill] sm:$0xff] }
 0x998   :  { %7768 = vmatpush1.bf16.msra.mxu0 %v12684_v51  ;;  %7832 = vmatpush1.bf16.msra.mxu1 %v12685_v34 }
 0x999   :  { %7770 = vmatprep.subr.bf16.mxu0 %v12686_v52  ;;  %7834 = vmatprep.subr.bf16.mxu1 %v12687_v32  ;;  %v12730_v52 = vld [vmem:[#allocation124_spill] sm:$0xff] }
 0x99c   :  { %7772 = vmatpush1.bf16.msra.mxu0 %v12688_v35  ;;  %7836 = vmatpush1.bf16.msra.mxu1 %v12689_v47 }
 0x99d   :  { %7774 = vmatprep.subr.bf16.mxu0 %v12690_v45  ;;  %7838 = vmatprep.subr.bf16.mxu1 %v12691_v46  ;;  %v12731_v45 = vld [vmem:[#allocation125_spill] sm:$0xff] }
 0x9a0   :  { %7776 = vmatpush1.bf16.msra.mxu0 %v12692_v21  ;;  %7840 = vmatpush1.bf16.msra.mxu1 %v12693_v23 }
 0x9a1   :  { %7778 = vmatprep.subr.bf16.mxu0 %v12694_v31  ;;  %7842 = vmatprep.subr.bf16.mxu1 %v12695_v25  ;;  %v12732_v31 = vld [vmem:[#allocation127_spill] sm:$0xff] }
 0x9a4   :  { %7780 = vmatpush1.bf16.msra.mxu0 %v12696_v29  ;;  %7844 = vmatpush1.bf16.msra.mxu1 %v12697_v36 }
 0x9a5   :  { %7782 = vmatprep.subr.bf16.mxu0 %v12698_v37  ;;  %7846 = vmatprep.subr.bf16.mxu1 %v12699_v38 }
 0x9a8   :  { %7784 = vmatpush1.bf16.msra.mxu0 %v12700_v42  ;;  %7848 = vmatpush1.bf16.msra.mxu1 %v12701_v60 }
 0x9a9   :  { %7786 = vmatprep.subr.bf16.mxu0 %v12702_v24  ;;  %7850 = vmatprep.subr.bf16.mxu1 %v12703_v14  ;;  %v12733_v24 = vld [vmem:[#allocation126_spill] sm:$0xff] }
 0x9ac   :  { %7788 = vmatpush1.bf16.msra.mxu0 %v12704_v63  ;;  %7852 = vmatpush1.bf16.msra.mxu1 %v12705_v56 }
 0x9ad   :  { %7790 = vmatprep.subr.bf16.mxu0 %v12706_v10  ;;  %7854 = vmatprep.subr.bf16.mxu1 %v12707_v20 }
 0x9b0   :  { %7792 = vmatpush1.bf16.msra.mxu0 %v12708_v4  ;;  %7856 = vmatpush1.bf16.msra.mxu1 %v12709_v43 }
 0x9b1   :  { %7794 = vmatprep.subr.bf16.mxu0 %v12710_v30  ;;  %7858 = vmatprep.subr.bf16.mxu1 %v12711_v0 }
 0x9b4   :  { %7796 = vmatpush1.bf16.msra.mxu0 %v12712_v28  ;;  %7860 = vmatpush1.bf16.msra.mxu1 %v12713_v39 }
 0x9b5   :  { %7798 = vmatprep.subr.bf16.mxu0 %v12714_v33  ;;  %7862 = vmatprep.subr.bf16.mxu1 %v12715_v40 }
 0x9b8   :  { %7800 = vmatpush1.bf16.msra.mxu0 %v12716_v58  ;;  %7864 = vmatpush1.bf16.msra.mxu1 %v12717_v16 }
 0x9b9   :  { %7802 = vmatprep.subr.bf16.mxu0 %v12718_v49  ;;  %7866 = vmatprep.subr.bf16.mxu1 %v12719_v54 }
 0x9bc   :  { %7804 = vmatpush1.bf16.msra.mxu0 %v12720_v53  ;;  %7868 = vmatpush1.bf16.msra.mxu1 %v12721_v62  ;;  %v12734_v53 = vld [vmem:[#allocation106_spill] sm:$0xff] }
 0x9bd   :  { %7806 = vmatprep.subr.bf16.mxu0 %v12722_v50  ;;  %7870 = vmatprep.subr.bf16.mxu1 %v12723_v8  ;;  %v12736_v8 = vld [vmem:[#allocation100_spill] sm:$0xff] }
 0x9c0   :  { %7808 = vmatpush1.bf16.msra.mxu0 %v12724_v11  ;;  %7872 = vmatpush1.bf16.msra.mxu1 %v12725_v55  ;;  %v12737_v55 = vld [vmem:[#allocation101_spill] sm:$0xff] }
 0x9c1   :  { %7810 = vmatprep.subr.bf16.mxu0 %v12726_v26  ;;  %7874 = vmatprep.subr.bf16.mxu1 %v12727_v61  ;;  %v12738_v61 = vld [vmem:[#allocation102_spill] sm:$0xff] }
 0x9c4   :  { %7812 = vmatpush1.bf16.msra.mxu0 %v12728_v44  ;;  %7876 = vmatpush1.bf16.msra.mxu1 %v12729_v7  ;;  %v12739_v7 = vld [vmem:[#allocation103_spill] sm:$0xff] }
 0xa3a   :  { %v5136_v51 = vpop.f32.mrb[42].mxu0  ;;  %v5207_v34 = vpop.f32.mrb[42].mxu1 }
 0xa3b   :  { %v5137_v32 = vadd.f32 %v5136_v51, %v12730_v52  ;;  %v5138_v35 = vpop.f32.mrb[43].mxu0  ;;  %v5209_v47 = vpop.f32.mrb[43].mxu1  ;;  %v5208_v25 = vadd.f32 %v5207_v34, %v12732_v31  ;;  %v12740_v34 = vld [vmem:[#allocation104_spill] sm:$0xff] }
 0xa3c   :  { %v5139_v46 = vadd.f32 %v5138_v35, %v12731_v45  ;;  %v5210_v14 = vadd.f32 %v5209_v47, %v12733_v24  ;;  %v12741_v47 = vld [vmem:[#allocation105_spill] sm:$0xff] }
 0xa3d   :  { %v6210_v21 = vmul.f32 -1.442695, %v5137_v32 }
 0xa3e   :  { %v6211_v23 = vmul.f32 -1.442695, %v5139_v46  ;;  %v6212_v4 = vmul.f32 -1.442695, %v5210_v14 }
 0xa3f   :  { %8901 = vpow2.f32 %v6210_v21 }
 0xa40   :  { %8903 = vpow2.f32 %v6211_v23 }
 0xa41   :  { %8905 = vtanh.f32 %v5208_v25 }
 0xa49   :  { %v8902_v29 = vpop.eup %8901 }
 0xa4a   :  { %v8904_v36 = vpop.eup %8903  ;;  %v5215_v37 = vadd.f32 1.0, %v8902_v29 }
 0xa4b   :  { %v5221_v38 = vadd.f32 1.0, %v8904_v36  ;;  %v8906_v42 = vpop.eup %8905 }
 0xa4c   :  { %8907 = vrcp.f32 %v5215_v37 }
 0xa4d   :  { %8909 = vrcp.f32 %v5221_v38 }
 0xa4e   :  { %8911 = vpow2.f32 %v6212_v4 }
 0xa56   :  { %v8908_v60 = vpop.eup %8907 }
 0xa57   :  { %v8910_v63 = vpop.eup %8909  ;;  %v5232_v56 = vmul.f32 %v8908_v60, %v8906_v42 }
 0xa58   :  { %v5231_v10 = vmul.f32 %v8910_v63, %v11217_v18  ;;  %v12735_v18 = vld [vmem:[#allocation99_spill] sm:$0xff] }
 0xa5a   :  { %v11455_v20 = vadd.f32 %v5232_v56, %v5231_v10  ;;  %v5317_v43 = vpop.f32.mrb[44].mxu0  ;;  %v11457_v30 = vpop.f32.mrb[44].mxu1  ;;  %v12742_v10 = vld [vmem:[#allocation108_spill] sm:$0xff] }
 0xa5b   :  { %v5397_v0 = vrot.slane %v5317_v43, 1  ;;  %v5401_v28 = vrot.slane %v5317_v43, 2  ;;  %v5405_v39 = vrot.slane %v5317_v43, 3  ;;  %v5409_v33 = vrot.slane %v5317_v43, 4  ;;  %v11459_v40 = vpop.f32.mrb[45].mxu0  ;;  %v11461_v58 = vpop.f32.mrb[45].mxu1 }
 0xa5c   :  { %v5413_v16 = vrot.slane %v5317_v43, 5  ;;  %v5417_v49 = vrot.slane %v5317_v43, 6  ;;  %v5421_v54 = vrot.slane %v5317_v43, 7  ;;  %v5485_v62 = vadd.f32 %v5317_v43, %v12734_v53  ;;  %v12743_v43 = vld [vmem:[#allocation109_spill] sm:$0xff] }
 0xa5d   :  { %v5457_v50 = vadd.f32 %v5397_v0, %v12735_v18  ;;  %v5461_v11 = vadd.f32 %v5401_v28, %v12736_v8  ;;  %v5465_v26 = vadd.f32 %v5405_v39, %v12737_v55  ;;  %v5469_v44 = vadd.f32 %v5409_v33, %v12738_v61  ;;  %v12744_v28 = vld [vmem:[#allocation110_spill] sm:$0xff]  ;;  %v12745_v33 = vld [vmem:[#allocation113_spill] sm:$0xff] }
 0xa5e   :  { %v5473_v51 = vadd.f32 %v5413_v16, %v12739_v7  ;;  %v5477_v32 = vadd.f32 %v5417_v49, %v12740_v34  ;;  %v6220_v35 = vmul.f32 -1.442695, %v5485_v62  ;;  %v5481_v46 = vadd.f32 %v5421_v54, %v12741_v47  ;;  %v11480_v49 = vpop.eup %8911  ;;  %v12746_v54 = vld [vmem:[#allocation111_spill] sm:$0xff] }
 0xa5f   :  { %v6213_v21 = vmul.f32 -1.442695, %v5457_v50  ;;  %v6214_v23 = vmul.f32 -1.442695, %v5461_v11  ;;  %v6215_v25 = vmul.f32 -1.442695, %v5465_v26 }
 0xa60   :  { %v6216_v29 = vmul.f32 -1.442695, %v5469_v44  ;;  %8913 = vpow2.f32 %v6220_v35  ;;  %v6217_v36 = vmul.f32 -1.442695, %v5473_v51  ;;  %v5399_v37 = vrot.slane %v11457_v30, 1  ;;  %v12747_v35 = vld [vmem:[#allocation118_spill] sm:$0xff] }
 0xa61   :  { %8915 = vpow2.f32 %v6213_v21  ;;  %v5403_v38 = vrot.slane %v11457_v30, 2  ;;  %v6218_v42 = vmul.f32 -1.442695, %v5477_v32  ;;  %v5407_v60 = vrot.slane %v11457_v30, 3 }
 0xa62   :  { %8917 = vpow2.f32 %v6214_v23  ;;  %v6219_v14 = vmul.f32 -1.442695, %v5481_v46  ;;  %v5411_v63 = vrot.slane %v11457_v30, 4  ;;  %v5415_v56 = vrot.slane %v11457_v30, 5 }
 0xa63   :  { %8919 = vpow2.f32 %v6215_v25  ;;  %v5459_v4 = vadd.f32 %v5399_v37, %v12742_v10  ;;  %v5463_v0 = vadd.f32 %v5403_v38, %v12743_v43  ;;  %v5467_v39 = vadd.f32 %v5407_v60, %v12744_v28  ;;  %v12748_v25 = vld [vmem:[#allocation119_spill] sm:$0xff] }
 0xa64   :  { %8921 = vpow2.f32 %v6216_v29  ;;  %v5471_v16 = vadd.f32 %v5411_v63, %v12745_v33  ;;  %v5475_v53 = vadd.f32 %v5415_v56, %v12746_v54  ;;  %v5419_v18 = vrot.slane %v11457_v30, 6  ;;  %v12749_v60 = vld [vmem:[#allocation107_spill] sm:$0xff] }
 0xa65   :  { %8923 = vpow2.f32 %v6217_v36  ;;  %v5423_v11 = vrot.slane %v11457_v30, 7  ;;  %v5398_v61 = vrot.slane %v11459_v40, 1  ;;  %v5402_v51 = vrot.slane %v11459_v40, 2  ;;  %v12751_v33 = vld [vmem:[#allocation115_spill] sm:$0xff] }
 0xa66   :  { %8925 = vpow2.f32 %v6218_v42  ;;  %v5479_v47 = vadd.f32 %v5419_v18, %v12747_v35  ;;  %v5406_v46 = vrot.slane %v11459_v40, 3  ;;  %v5410_v36 = vrot.slane %v11459_v40, 4  ;;  %v12753_v18 = vld [vmem:[#allocation116_spill] sm:$0xff] }
 0xa67   :  { %8927 = vpow2.f32 %v6219_v14  ;;  %v5483_v29 = vadd.f32 %v5423_v11, %v12748_v25  ;;  %v5414_v42 = vrot.slane %v11459_v40, 5  ;;  %v5458_v14 = vadd.f32 %v5398_v61, %v12749_v60  ;;  %v12754_v11 = vld [vmem:[#allocation117_spill] sm:$0xff] }
 0xa68   :  { %8929 = vtanh.f32 %v5459_v4  ;;  %v5418_v10 = vrot.slane %v11459_v40, 6  ;;  %v12750_v4 = vld [vmem:[#allocation114_spill] sm:$0xff]  ;;  %v5404_v61 = vrot.slane %v11461_v58, 2 }
 0xa69   :  { %8931 = vtanh.f32 %v5463_v0  ;;  %v5462_v43 = vadd.f32 %v5402_v51, %v12750_v4 }
 0xa6a   :  { %v8914_v62 = vpop.eup %8913  ;;  %8933 = vtanh.f32 %v5467_v39  ;;  %v5422_v39 = vrot.slane %v11459_v40, 7 }
 0xa6b   :  { %v8916_v50 = vpop.eup %8915  ;;  %v5520_v8 = vadd.f32 1.0, %v8914_v62  ;;  %8935 = vtanh.f32 %v5471_v16  ;;  %v5466_v16 = vadd.f32 %v5406_v46, %v12751_v33  ;;  %v12756_v46 = vld [vmem:[#allocation121_spill] sm:$0xff] }
 0xa6c   :  { %v8918_v55 = vpop.eup %8917  ;;  %v5513_v26 = vadd.f32 1.0, %v8916_v50  ;;  %8937 = vtanh.f32 %v5475_v53  ;;  %v12752_v53 = vld [vmem:[#allocation122_spill] sm:$0xff]  ;;  %v5470_v50 = vadd.f32 %v5410_v36, %v12753_v18  ;;  %v12757_v36 = vld [vmem:[#allocation123_spill] sm:$0xff] }
 0xa6d   :  { %v8920_v44 = vpop.eup %8919  ;;  %v5514_v7 = vadd.f32 1.0, %v8918_v55  ;;  %8939 = vrcp.f32 %v5520_v8  ;;  %v5487_v62 = vadd.f32 %v11457_v30, %v12752_v53  ;;  %v5474_v55 = vadd.f32 %v5414_v42, %v12754_v11 }
 0xa6e   :  { %v8922_v34 = vpop.eup %8921  ;;  %v5515_v32 = vadd.f32 1.0, %v8920_v44  ;;  %8941 = vrcp.f32 %v5513_v26  ;;  %v6221_v26 = vmul.f32 -1.442695, %v5458_v14  ;;  %v5482_v30 = vadd.f32 %v5422_v39, %v12756_v46 }
 0xa6f   :  { %v8924_v21 = vpop.eup %8923  ;;  %v5516_v23 = vadd.f32 1.0, %v8922_v34  ;;  %8943 = vrcp.f32 %v5514_v7  ;;  %v12755_v7 = vld [vmem:[#allocation120_spill] sm:$0xff]  ;;  %v6222_v34 = vmul.f32 -1.442695, %v5462_v43  ;;  %v6225_v60 = vmul.f32 -1.442695, %v5474_v55 }
 0xa70   :  { %v8926_v37 = vpop.eup %8925  ;;  %v5517_v38 = vadd.f32 1.0, %v8924_v21  ;;  %8945 = vrcp.f32 %v5515_v32  ;;  %v5478_v51 = vadd.f32 %v5418_v10, %v12755_v7  ;;  %v5408_v32 = vrot.slane %v11461_v58, 3 }
 0xa71   :  { %v8928_v63 = vpop.eup %8927  ;;  %v5518_v56 = vadd.f32 1.0, %v8926_v37  ;;  %8947 = vrcp.f32 %v5516_v23  ;;  %v6223_v21 = vmul.f32 -1.442695, %v5466_v16  ;;  %v5412_v23 = vrot.slane %v11461_v58, 4 }
 0xa72   :  { %v8930_v0 = vpop.eup %8929  ;;  %v5519_v28 = vadd.f32 1.0, %v8928_v63  ;;  %8949 = vrcp.f32 %v5517_v38  ;;  %v5486_v37 = vadd.f32 %v11459_v40, %v12757_v36  ;;  %v6224_v38 = vmul.f32 -1.442695, %v5470_v50 }
 0xa73   :  { %v8932_v54 = vpop.eup %8931  ;;  %8951 = vrcp.f32 %v5518_v56  ;;  %v5420_v14 = vrot.slane %v11461_v58, 6  ;;  %v6226_v56 = vmul.f32 -1.442695, %v5478_v51  ;;  %v5468_v10 = vadd.f32 %v5408_v32, %v9743_v17 }
 0xa74   :  { %v8934_v8 = vpop.eup %8933  ;;  %8953 = vrcp.f32 %v5519_v28  ;;  %v6227_v40 = vmul.f32 -1.442695, %v5482_v30  ;;  %v5472_v39 = vadd.f32 %v5412_v23, %v9752_v22  ;;  %v6228_v53 = vmul.f32 -1.442695, %v5486_v37 }
 0xa75   :  { %v8936_v44 = vpop.eup %8935  ;;  %8955 = vtanh.f32 %v5479_v47  ;;  %v5416_v47 = vrot.slane %v11461_v58, 5  ;;  %v5480_v17 = vadd.f32 %v5420_v14, %v9833_v13  ;;  %v6231_v11 = vmul.f32 -1.442695, %v5468_v10 }
 0xa76   :  { %v8938_v35 = vpop.eup %8937  ;;  %8957 = vtanh.f32 %v5483_v29  ;;  %v5464_v29 = vadd.f32 %v5404_v61, %v9734_v27  ;;  %v5424_v13 = vrot.slane %v11461_v58, 7  ;;  %v5400_v10 = vrot.slane %v11461_v58, 1 }
 0xa77   :  { %v8940_v25 = vpop.eup %8939  ;;  %8959 = vtanh.f32 %v5487_v62  ;;  %v5476_v27 = vadd.f32 %v5416_v47, %v9766_v19  ;;  %v6234_v19 = vmul.f32 -1.442695, %v5480_v17 }
 0xa78   :  { %v8942_v42 = vpop.eup %8941  ;;  %8961 = vpow2.f32 %v6221_v26  ;;  %v5484_v37 = vadd.f32 %v5424_v13, %v9840_v1  ;;  %v5460_v17 = vadd.f32 %v5400_v10, %v12099_v2 }
 0xa79   :  { %v8944_v63 = vpop.eup %8943  ;;  %8963 = vpow2.f32 %v6222_v34  ;;  %v11512_v4 = vmul.f32 %v8942_v42, %v8930_v0  ;;  %v6230_v0 = vmul.f32 -1.442695, %v5464_v29  ;;  %v6233_v26 = vmul.f32 -1.442695, %v5476_v27 }
 0xa7a   :  { %v8946_v43 = vpop.eup %8945  ;;  %v11514_v28 = vmul.f32 %v8944_v63, %v8932_v54  ;;  %8965 = vpow2.f32 %v6223_v21  ;;  %v5488_v42 = vadd.f32 %v11461_v58, %v9849_v12  ;;  %v6229_v13 = vmul.f32 -1.442695, %v5460_v17 }
 0xa7b   :  { %v8948_v33 = vpop.eup %8947  ;;  %v11517_v16 = vmul.f32 %v8946_v43, %v8934_v8  ;;  %8967 = vpow2.f32 %v6224_v38  ;;  %v6232_v8 = vmul.f32 -1.442695, %v5472_v39  ;;  %v6235_v43 = vmul.f32 -1.442695, %v5484_v37 }
 0xa7c   :  { %v8950_v62 = vpop.eup %8949  ;;  %v11520_v18 = vmul.f32 %v8948_v33, %v8936_v44  ;;  %8969 = vpow2.f32 %v6225_v60  ;;  %v6236_v39 = vmul.f32 -1.442695, %v5488_v42 }
 0xa7d   :  { %v8952_v54 = vpop.eup %8951  ;;  %v11523_v50 = vmul.f32 %v8950_v62, %v8938_v35  ;;  %8971 = vpow2.f32 %v6226_v56 }
 0xa7e   :  { %v8954_v22 = vpop.eup %8953  ;;  %8973 = vpow2.f32 %v6227_v40 }
 0xa7f   :  { %v8956_v55 = vpop.eup %8955  ;;  %8975 = vpow2.f32 %v6228_v53  ;;  %v5228_v53 = vadd.f32 1.0, %v11480_v49 }
 0xa80   :  { %v8958_v61 = vpop.eup %8957  ;;  %8977 = vpow2.f32 %v6230_v0  ;;  %v11525_v44 = vmul.f32 %v8956_v55, %v8952_v54 }
 0xa81   :  { %v8960_v7 = vpop.eup %8959  ;;  %8979 = vpow2.f32 %v6231_v11  ;;  %v11528_v51 = vmul.f32 %v8958_v61, %v8954_v22  ;;  %v5649_v11 = vrot.slane %v11305_v15, 7  ;;  %v5652_v61 = vrot.slane %v11318_v48, 7 }
 0xa82   :  { %v8962_v34 = vpop.eup %8961  ;;  %8981 = vpow2.f32 %v6232_v8  ;;  %v11530_v32 = vmul.f32 %v8960_v7, %v8940_v25  ;;  %v5650_v8 = vrot.slane %v11310_v5, 7 }
 0xa83   :  { %v8964_v35 = vpop.eup %8963  ;;  %v5561_v46 = vadd.f32 1.0, %v8962_v34  ;;  %8983 = vpow2.f32 %v6233_v26  ;;  %v5651_v26 = vrot.slane %v11314_v59, 7  ;;  %v5653_v34 = vrot.slane %v11321_v41, 7 }
 0xa84   :  { %v8966_v30 = vpop.eup %8965  ;;  %v5562_v21 = vadd.f32 1.0, %v8964_v35  ;;  %8985 = vpow2.f32 %v6234_v19  ;;  %v5654_v59 = vrot.slane %v11325_v6, 7 }
 0xa85   :  { %v8968_v23 = vpop.eup %8967  ;;  %v5563_v36 = vadd.f32 1.0, %v8966_v30  ;;  %8987 = vrcp.f32 %v5561_v46 }
 0xa86   :  { %v8970_v38 = vpop.eup %8969  ;;  %v5564_v47 = vadd.f32 1.0, %v8968_v23  ;;  %8989 = vrcp.f32 %v5562_v21 }
 0xa87   :  { %v8972_v60 = vpop.eup %8971  ;;  %v5565_v25 = vadd.f32 1.0, %v8970_v38  ;;  %8991 = vrcp.f32 %v5563_v36  ;;  %v5655_v36 = vrot.slane %v11329_v3, 7 }
 0xa88   :  { %v8974_v14 = vpop.eup %8973  ;;  %v5566_v29 = vadd.f32 1.0, %v8972_v60  ;;  %8993 = vrcp.f32 %v5564_v47  ;;  %v5656_v47 = vrot.slane %v11333_v57, 7 }
 0xa89   :  { %v8976_v63 = vpop.eup %8975  ;;  %v5567_v56 = vadd.f32 1.0, %v8974_v14  ;;  %8995 = vrcp.f32 %v5565_v25 }
 0xa8a   :  { %v8978_v40 = vpop.eup %8977  ;;  %v5568_v1 = vadd.f32 1.0, %v8976_v63  ;;  %8997 = vrcp.f32 %v5566_v29 }
 0xa8b   :  { %v8980_v33 = vpop.eup %8979  ;;  %8999 = vrcp.f32 %v5567_v56  ;;  %v5618_v27 = vadd.f32 1.0, %v8978_v40 }
 0xa8c   :  { %v8982_v12 = vpop.eup %8981  ;;  %9001 = vrcp.f32 %v5568_v1  ;;  %v5619_v0 = vadd.f32 1.0, %v8980_v33 }
 0xa8d   :  { %v8984_v62 = vpop.eup %8983  ;;  %9003 = vpow2.f32 %v6235_v43  ;;  %v5620_v58 = vadd.f32 1.0, %v8982_v12 }
 0xa8e   :  { %v8986_v54 = vpop.eup %8985  ;;  %9005 = vpow2.f32 %v6236_v39  ;;  %v5621_v55 = vadd.f32 1.0, %v8984_v62 }
 0xa8f   :  { %v8988_v22 = vpop.eup %8987  ;;  %9007 = vrcp.f32 %v5228_v53  ;;  %v5622_v46 = vadd.f32 1.0, %v8986_v54 }
 0xa90   :  { %v8990_v49 = vpop.eup %8989  ;;  %9009 = vrcp.f32 %v5618_v27  ;;  %v5665_v19 = vmul.f32 %v8988_v22, %v5649_v11 }
 0xa91   :  { %v8992_v2 = vpop.eup %8991  ;;  %v5666_v7 = vmul.f32 %v8990_v49, %v5650_v8  ;;  %9011 = vrcp.f32 %v5619_v0 }
 0xa92   :  { %v8994_v35 = vpop.eup %8993  ;;  %v5667_v15 = vmul.f32 %v8992_v2, %v5651_v26  ;;  %9013 = vrcp.f32 %v5620_v58  ;;  %v5681_v5 = vadd.f32 %v11512_v4, %v5665_v19 }
 0xa93   :  { %v8996_v30 = vpop.eup %8995  ;;  %9015 = vrcp.f32 %v5621_v55  ;;  %v5668_v21 = vmul.f32 %v8994_v35, %v5652_v61  ;;  %v5682_v48 = vadd.f32 %v11514_v28, %v5666_v7 }
 0xa94   :  { %v8998_v23 = vpop.eup %8997  ;;  %9017 = vtanh.f32 %v11455_v20  ;;  %v5669_v37 = vmul.f32 %v8996_v30, %v5653_v34  ;;  %v5683_v41 = vadd.f32 %v11517_v16, %v5667_v15 }
 0xa95   :  { %v9000_v38 = vpop.eup %8999  ;;  %9019 = vpow2.f32 %v6229_v13  ;;  %v5670_v4 = vmul.f32 %v8998_v23, %v5654_v59  ;;  %v5684_v42 = vadd.f32 %v11520_v18, %v5668_v21 }
 0xa96   :  { %v9002_v60 = vpop.eup %9001  ;;  %9021 = vrcp.f32 %v5622_v46  ;;  %v5671_v6 = vmul.f32 %v9000_v38, %v5655_v36  ;;  %v5685_v28 = vadd.f32 %v11523_v50, %v5669_v37 }
 0xa97   :  { %v9004_v25 = vpop.eup %9003  ;;  %v5672_v14 = vmul.f32 %v9002_v60, %v5656_v47  ;;  %v5686_v29 = vadd.f32 %v11525_v44, %v5670_v4  ;;  %9023 = vtanh.f32 %v5682_v48  ;;  %v5902_v60 = vld [vmem:[%s11627_s6] sm:$0xff] }
 0xa98   :  { %v9006_v3 = vpop.eup %9005  ;;  %v5623_v63 = vadd.f32 1.0, %v9004_v25  ;;  %v5687_v16 = vadd.f32 %v11528_v51, %v5671_v6  ;;  %9025 = vtanh.f32 %v5683_v41  ;;  %v5903_v6 = vld [vmem:[%s11627_s6 + $0x8] sm:$0xff]  ;;  %v9137_v25 = vmov 0.0|0.0  }
 0xa99   :  { %v9008_v56 = vpop.eup %9007  ;;  %v5624_v57 = vadd.f32 1.0, %v9006_v3  ;;  %v5688_v10 = vadd.f32 %v11530_v32, %v5672_v14  ;;  %9027 = vtanh.f32 %v5684_v42  ;;  %7877 = vmatprep.subr.bf16.mxu0 %v9137_v25  ;;  %v7878_v14 = vpack.c.bf16 %v5903_v6, %v5902_v60 }
 0xa9a   :  { %v9010_v18 = vpop.eup %9009  ;;  %9029 = vrcp.f32 %v5623_v63  ;;  %v5906_v63 = vld [vmem:[%s11627_s6 + $0x20] sm:$0xff] }
 0xa9b   :  { %v9012_v43 = vpop.eup %9011  ;;  %9031 = vrcp.f32 %v5624_v57  ;;  %v5908_v57 = vld [vmem:[%s11627_s6 + $0x30] sm:$0xff] }
 0xa9c   :  { %v9014_v50 = vpop.eup %9013  ;;  %9033 = vtanh.f32 %v5685_v28  ;;  %v5904_v28 = vld [vmem:[%s11627_s6 + $0x10] sm:$0xff] }
 0xa9d   :  { %v9016_v40 = vpop.eup %9015  ;;  %9035 = vtanh.f32 %v5686_v29  ;;  %v5905_v29 = vld [vmem:[%s11627_s6 + $0x18] sm:$0xff] }
 0xa9e   :  { %v9018_v44 = vpop.eup %9017  ;;  %9037 = vtanh.f32 %v5687_v16  ;;  %v7881_v3 = vpack.c.bf16 %v5905_v29, %v5904_v28  ;;  %v5907_v16 = vld [vmem:[%s11627_s6 + $0x28] sm:$0xff] }
 0xa9f   :  { %v9020_v1 = vpop.eup %9019  ;;  %v5235_v39 = vmul.f32 %v9018_v44, %v9008_v56  ;;  %9039 = vtanh.f32 %v5688_v10  ;;  %v7884_v56 = vpack.c.bf16 %v5907_v16, %v5906_v63  ;;  %v5913_v44 = vld [vmem:[%s11627_s6 + $0x58] sm:$0xff] }
 0xaa0   :  { %v9022_v51 = vpop.eup %9021  ;;  %v5617_v33 = vadd.f32 1.0, %v9020_v1  ;;  %9041 = vtanh.f32 %v5681_v5 }
 0xaa1   :  { %v9024_v53 = vpop.eup %9023  ;;  %v5727_v12 = vrot.slane %v5235_v39, 1  ;;  %v5914_v39 = vld [vmem:[%s11627_s6 + $0x60] sm:$0xff] }
 0xaa2   :  { %v9026_v32 = vpop.eup %9025  ;;  %9043 = vrcp.f32 %v5617_v33  ;;  %v5698_v27 = vmul.f32 %v9024_v53, %v9010_v18  ;;  %v5910_v18 = vld [vmem:[%s11627_s6 + $0x40] sm:$0xff]  ;;  %v5916_v53 = vld [vmem:[%s11627_s6 + $0x70] sm:$0xff] }
 0xaa3   :  { %v9028_v62 = vpop.eup %9027  ;;  %v5732_v17 = vrot.slane %v5727_v12, 7  ;;  %v5699_v0 = vmul.f32 %v9026_v32, %v9012_v43  ;;  %v5911_v43 = vld [vmem:[%s11627_s6 + $0x48] sm:$0xff]  ;;  %v5917_v12 = vld [vmem:[%s11627_s6 + $0x78] sm:$0xff] }
 0xaa4   :  { %v9030_v54 = vpop.eup %9029  ;;  %v5700_v58 = vmul.f32 %v9028_v62, %v9014_v50  ;;  %v5713_v11 = vrot.slane %v5698_v27, 7  ;;  %v7890_v50 = vpack.c.bf16 %v5911_v43, %v5910_v18  ;;  %v7899_v32 = vpack.c.bf16 %v5917_v12, %v5916_v53 }
 0xaa5   :  { %v9032_v22 = vpop.eup %9031  ;;  %5800 = vmatprep.mubr.f32.mxu0 %v5732_v17  ;;  %5871 = vmatprep.mubr.f32.mxu1 %v5732_v17  ;;  %v5714_v8 = vrot.slane %v5699_v0, 6 }
 0xaa6   :  { %v9034_v55 = vpop.eup %9033  ;;  %v5716_v49 = vrot.slane %v5700_v58, 5 }
 0xaa7   :  { %v9036_v26 = vpop.eup %9035  ;;  %v5701_v61 = vmul.f32 %v9034_v55, %v9016_v40  ;;  %v5715_v19 = vsel %vm1069_vm2, %v5714_v8, %v5713_v11  ;;  %v5912_v40 = vld [vmem:[%s11627_s6 + $0x50] sm:$0xff] }
 0xaa8   :  { %v9038_v2 = vpop.eup %9037  ;;  %v5702_v7 = vmul.f32 %v9036_v26, %v9022_v51  ;;  %v5717_v13 = vsel %vm1072_vm3, %v5716_v49, %v5715_v19  ;;  %v7893_v1 = vpack.c.bf16 %v5913_v44, %v5912_v40  ;;  %v5915_v51 = vld [vmem:[%s11627_s6 + $0x68] sm:$0xff] }
 0xaa9   :  { %v9040_v34 = vpop.eup %9039  ;;  %v5703_v35 = vmul.f32 %v9038_v2, %v9030_v54  ;;  %v5718_v15 = vrot.slane %v5701_v61, 4  ;;  %v7896_v33 = vpack.c.bf16 %v5915_v51, %v5914_v39 }
 0xaaa   :  { %v9042_v46 = vpop.eup %9041  ;;  %v5704_v5 = vmul.f32 %v9040_v34, %v9032_v22  ;;  %v5720_v30 = vrot.slane %v5702_v7, 3 }
 0xaab   :  { %v5719_v59 = vsel %vm1075_vm4, %v5718_v15, %v5717_v13  ;;  %v5722_v21 = vrot.slane %v5703_v35, 2 }
 0xaac   :  { %v9044_v48 = vpop.eup %9043  ;;  %v5721_v23 = vsel %vm1078_vm5, %v5720_v30, %v5719_v59  ;;  %v5724_v36 = vrot.slane %v5704_v5, 1  ;;  %v6240_v30 = vld [vmem:[%s11628_s7] ss:$0 sm:$0xff] }
 0xaad   :  { %v5697_v37 = vmul.f32 %v9044_v48, %v9042_v46  ;;  %v5723_v41 = vsel %vm1081_vm6, %v5722_v21, %v5721_v23 }
 0xaae   :  { %v5725_v38 = vsel %vm1084_vm7, %v5724_v36, %v5723_v41 }
 0xaaf   :  { %v5729_v47 = vrot.slane %v5697_v37, 7  ;;  %v5730_v4 = vrot.slane %v5725_v38, 7 }
 0xab1   :  { %v5731_v42 = vsel %vm5728_vm14, %v5729_v47, %v5730_v4 }
 0xab2   :  { %5801 = vmatmul.mubr.f32.vlgmr.msra.gmra.mrb[46].mxu0 %v5731_v42  ;;  %5872 = vmatmul.mubr.f32.vlgmr.msra.gmra.mrb[46].mxu1 %v5731_v42 }
 0xab3   :  { %6290 = vmatprep.mubr.msk.f32.mxu0 %vm9138_vm15, %v11994_v9  ;;  %7879 = vmatpush3.bf16.msra.mxu0 %v7878_v14  ;;  %v5909_v9 = vld [vmem:[%s11627_s6 + $0x38] sm:$0xff] }
 0xab4   :  { %7880 = vmatprep.subr.bf16.mxu0 %v9137_v25  ;;  %v7887_v10 = vpack.c.bf16 %v5909_v9, %v5908_v57 }
 0xab7   :  { %7882 = vmatpush3.bf16.msra.mxu0 %v7881_v3 }
 0xab8   :  { %7883 = vmatprep.subr.bf16.mxu0 %v9137_v25 }
 0xabb   :  { %7885 = vmatpush3.bf16.msra.mxu0 %v7884_v56 }
 0xabc   :  { %7886 = vmatprep.subr.bf16.mxu0 %v9137_v25 }
 0xabf   :  { %7888 = vmatpush3.bf16.msra.mxu0 %v7887_v10 }
 0xac0   :  { %7889 = vmatprep.subr.bf16.mxu0 %v9137_v25 }
 0xac3   :  { %7891 = vmatpush3.bf16.msra.mxu0 %v7890_v50 }
 0xac4   :  { %7892 = vmatprep.subr.bf16.mxu0 %v9137_v25 }
 0xac7   :  { %7894 = vmatpush3.bf16.msra.mxu0 %v7893_v1 }
 0xac8   :  { %7895 = vmatprep.subr.bf16.mxu0 %v9137_v25 }
 0xacb   :  { %7897 = vmatpush3.bf16.msra.mxu0 %v7896_v33 }
 0xacc   :  { %7898 = vmatprep.subr.bf16.mxu0 %v9137_v25 }
 0xacf   :  { %7900 = vmatpush3.bf16.msra.mxu0 %v7899_v32 }
 0xb85   :  { %v5802_v27 = vpop.f32.mrb[46].mxu0  ;;  %v5873_v62 = vpop.f32.mrb[46].mxu1 }
 0xb86   :  { %v5803_v17 = vadd.f32 %v5802_v27, %v12730_v52  ;;  %v5804_v0 = vpop.f32.mrb[47].mxu0  ;;  %v5875_v54 = vpop.f32.mrb[47].mxu1  ;;  %v5874_v49 = vadd.f32 %v5873_v62, %v12732_v31 }
 0xb87   :  { %v5805_v58 = vadd.f32 %v5804_v0, %v12731_v45  ;;  %v5876_v8 = vadd.f32 %v5875_v54, %v12733_v24 }
 0xb88   :  { %v6237_v11 = vmul.f32 -1.442695, %v5803_v17 }
 0xb89   :  { %v6238_v22 = vmul.f32 -1.442695, %v5805_v58  ;;  %v6239_v55 = vmul.f32 -1.442695, %v5876_v8 }
 0xb8a   :  { %9045 = vpow2.f32 %v6237_v11 }
 0xb8b   :  { %9047 = vpow2.f32 %v6238_v22 }
 0xb8c   :  { %9049 = vpow2.f32 %v6239_v55 }
 0xb8d   :  { %9051 = vtanh.f32 %v5874_v49 }
 0xb94   :  { %v9046_v26 = vpop.eup %9045 }
 0xb95   :  { %v9048_v61 = vpop.eup %9047  ;;  %v5881_v19 = vadd.f32 1.0, %v9046_v26 }
 0xb96   :  { %v5887_v2 = vadd.f32 1.0, %v9048_v61  ;;  %v9050_v52 = vpop.eup %9049 }
 0xb97   :  { %9053 = vrcp.f32 %v5881_v19  ;;  %v9052_v7 = vpop.eup %9051  ;;  %v5894_v35 = vadd.f32 1.0, %v9050_v52 }
 0xb98   :  { %9055 = vrcp.f32 %v5887_v2 }
 0xb99   :  { %9057 = vrcp.f32 %v5894_v35 }
 0xba1   :  { %v9054_v45 = vpop.eup %9053 }
 0xba2   :  { %v9056_v13 = vpop.eup %9055  ;;  %v5898_v34 = vmul.f32 %v9054_v45, %v9052_v7 }
 0xba3   :  { %v5897_v15 = vmul.f32 %v9056_v13, %v11455_v20  ;;  %v9058_v31 = vpop.eup %9057 }
 0xba5   :  { %v5899_v24 = vadd.f32 %v5898_v34, %v5897_v15 }
 0xba7   :  { %9059 = vtanh.f32 %v5899_v24 }
 0xbb1   :  { %v9060_v46 = vpop.eup %9059 }
 0xbb2   :  { %v5901_v5 = vmul.f32 %v9060_v46, %v9058_v31 }
 0xbb4   :  { %6291 = vmatmul.mubr.f32.vlgmr.msra.gmra.mrb[48].mxu0 %v5901_v5 }
 0xc87   :  { %v5991_v59 = vpop.f32.mrb[48].mxu0 }
 0xc88   :  { %v5992_v21 = vadd.f32 %v6240_v30, %v5991_v59  ;;  %v6292_v48 = vpop.f32.mrb[49].mxu0 }
 0xc8a   :  { %5996 = vst.msk [vmem:[%s11629_s8] sm:$0xff] %vm5995_vm0, %v5992_v21 }
 0xc8b   :  { %6001 = vsyncpa [#allocation3], 1 }
 0xc8c   :  { %6002 = vsyncpa [#allocation5], 1 }

</bundles_post_ra>
